<compile_context>
chip_gen: v7x
topology: tpu7x:2x2x1
jax: 0.10.0
libtpu: 0.0.40
codegen_flags: <defaults>
</compile_context>

<pallas_src>
import jax
import jax.numpy as jnp
from jax.experimental import pallas as pl
from jax.experimental.pallas import tpu as pltpu

FEATURE_CH = 512
INPUT_CH = 67
PAD_IN = 128                 # INPUT_CH zero-padded to a lane-dense 128
MLP_CH = 1024
EDGE_NUM = 1
SEQ = EDGE_NUM + 1           # Conv1d spatial length (edge_num + 1)
OUT_CH = EDGE_NUM + 1        # actor head
BLOCK_NUM = 3


# ---------------------------------------------------------------------------
# Fused Pallas kernel (single invocation, everything resident in VMEM)
# ---------------------------------------------------------------------------
def _fused_kernel(x_ref,
                  cw1, cb1, cw2, cb2, cw3, cb3,
                  mw1, mb1, mw2, mb2, mw3, mb3, mw4, mb4,
                  o_ref):
    f32, bf16 = jnp.float32, jnp.bfloat16

    # ---- conv stage: Conv1d(k=1) == per-position channel matmul.
    # x rows are ordered l*B + b (channels last, zero-padded to PAD_IN).
    h = jnp.dot(x_ref[...].astype(bf16), cw1[...], preferred_element_type=f32)
    h = jnp.maximum(h + cb1[...], 0.0)
    h = jnp.dot(h.astype(bf16), cw2[...], preferred_element_type=f32)
    h = jnp.maximum(h + cb2[...], 0.0)
    h = jnp.dot(h.astype(bf16), cw3[...], preferred_element_type=f32)
    h = jnp.maximum(h + cb3[...], 0.0)           # (SEQ*B, FEATURE_CH), f32
    hb = h.astype(bf16)
    batch = hb.shape[0] // SEQ

    # ---- first MLP layer: PyTorch's view(B, -1) flatten (feature = c*SEQ + l)
    # is folded into mw1's row order, so no activation transpose is needed:
    #   flat_pt @ W1  ==  sum_l  h[l*B:(l+1)*B, :] @ mw1[l]
    z = mb1[...]
    for l in range(SEQ):     # static unroll (SEQ == 2)
        z = z + jnp.dot(hb[l * batch:(l + 1) * batch, :], mw1[l],
                        preferred_element_type=f32)
    z = jnp.maximum(z, 0.0)

    # ---- remaining MLP blocks + output head.
    z = jnp.dot(z.astype(bf16), mw2[...], preferred_element_type=f32) + mb2[...]
    z = jnp.maximum(z, 0.0)
    z = jnp.dot(z.astype(bf16), mw3[...], preferred_element_type=f32) + mb3[...]
    z = jnp.maximum(z, 0.0)
    o_ref[...] = jnp.dot(z.astype(bf16), mw4[...],
                         preferred_element_type=f32) + mb4[...]


def _fused_forward(x2d, flat_params):
    batch = x2d.shape[0] // SEQ
    n_in = 1 + len(flat_params)
    vmem = pl.BlockSpec(memory_space=pltpu.MemorySpace.VMEM)
    return pl.pallas_call(
        _fused_kernel,
        out_shape=jax.ShapeDtypeStruct((batch, OUT_CH), jnp.float32),
        in_specs=[vmem] * n_in,
        out_specs=vmem,
        compiler_params=pltpu.CompilerParams(vmem_limit_bytes=32 * 1024 * 1024),
    )(x2d, *flat_params)


# ---------------------------------------------------------------------------
# Deterministic parameter initialization (synthetic; shapes follow __init__).
# Weights stored (in, out), i.e. transposed vs. PyTorch Conv1d/Linear layout.
# ---------------------------------------------------------------------------
def init_params(key):
    def _layer(k, fan_in, fan_out):
        kw, kb = jax.random.split(k)
        scale = 1.0 / jnp.sqrt(jnp.float32(fan_in))
        w = jax.random.uniform(kw, (fan_in, fan_out), jnp.float32, -scale, scale)
        b = jax.random.uniform(kb, (1, fan_out), jnp.float32, -scale, scale)
        return w, b

    keys = jax.random.split(key, 7)
    conv = []
    for k, (fi, fo) in zip(keys[:3], [(INPUT_CH, FEATURE_CH),
                                      (FEATURE_CH, FEATURE_CH),
                                      (FEATURE_CH, FEATURE_CH)]):
        conv.extend(_layer(k, fi, fo))

    mlp_in = SEQ * FEATURE_CH
    mlp = []
    for k, (fi, fo) in zip(keys[3:], [(mlp_in, MLP_CH),
                                      (MLP_CH, MLP_CH),
                                      (MLP_CH, MLP_CH),
                                      (MLP_CH, OUT_CH)]):
        mlp.extend(_layer(k, fi, fo))

    return {"conv": tuple(conv), "mlp": tuple(mlp)}


def prepare_params(params):
    """One-time host-side layout/precision plumbing for the fused kernel."""
    cw1, cb1, cw2, cb2, cw3, cb3 = params["conv"]
    mw1, mb1, mw2, mb2, mw3, mb3, mw4, mb4 = params["mlp"]
    bf16 = jnp.bfloat16
    # Pad first conv weight rows 67 -> 128 (matches zero-padded input columns).
    cw1p = jnp.zeros((PAD_IN, FEATURE_CH), jnp.float32).at[:INPUT_CH].set(cw1)
    # Fold PyTorch's (B, C, L).view(B, -1) flatten into mw1's row order:
    # mw1 row index = c*SEQ + l; regroup into SEQ blocks of FEATURE_CH rows.
    mw1p = mw1.reshape(FEATURE_CH, SEQ, MLP_CH).transpose(1, 0, 2)
    return (cw1p.astype(bf16), cb1, cw2.astype(bf16), cb2, cw3.astype(bf16), cb3,
            mw1p.astype(bf16), mb1, mw2.astype(bf16), mb2,
            mw3.astype(bf16), mb3, mw4.astype(bf16), mb4)


# ---------------------------------------------------------------------------
# Forward pass (mec_net.forward: returns (logits, state))
# ---------------------------------------------------------------------------
def mec_net_forward(obs, prepared_params):
    state = obs.astype(jnp.float32)                 # torch.tensor(state).float()
    B = state.shape[0]
    # (B, C, L) -> rows ordered l*B + b, channels last; zero-pad channels.
    x2d = jnp.transpose(state, (2, 0, 1)).reshape(SEQ * B, INPUT_CH)
    x2d = jnp.pad(x2d, ((0, 0), (0, PAD_IN - INPUT_CH)))
    logits = _fused_forward(x2d, prepared_params)   # (B, OUT_CH)
    return logits, state


# ---------------------------------------------------------------------------
# Pure-JAX f32 reference (follows the PyTorch data layout literally).
# ---------------------------------------------------------------------------
def reference_forward(obs, params):
    hi = jax.lax.Precision.HIGHEST
    state = obs.astype(jnp.float32)
    B = state.shape[0]
    cw1, cb1, cw2, cb2, cw3, cb3 = params["conv"]
    mw1, mb1, mw2, mb2, mw3, mb3, mw4, mb4 = params["mlp"]
    x = jnp.transpose(state, (0, 2, 1)).reshape(B * SEQ, INPUT_CH)   # (b*L+l, C)
    h = jax.nn.relu(jnp.dot(x, cw1, precision=hi) + cb1)
    h = jax.nn.relu(jnp.dot(h, cw2, precision=hi) + cb2)
    h = jax.nn.relu(jnp.dot(h, cw3, precision=hi) + cb3)
    # PyTorch x.view(B, -1) on (B, FEATURE_CH, L): feature index = c*L + l
    flat = jnp.transpose(h.reshape(B, SEQ, FEATURE_CH), (0, 2, 1)).reshape(
        B, SEQ * FEATURE_CH)
    z = jax.nn.relu(jnp.dot(flat, mw1, precision=hi) + mb1)
    z = jax.nn.relu(jnp.dot(z, mw2, precision=hi) + mb2)
    z = jax.nn.relu(jnp.dot(z, mw3, precision=hi) + mb3)
    return jnp.dot(z, mw4, precision=hi) + mb4, state


if __name__ == "__main__":
    key = jax.random.PRNGKey(0)
    k_obs, k_par = jax.random.split(key)
    B = 4
    obs = jax.random.normal(k_obs, (B, INPUT_CH, SEQ), dtype=jnp.float32)
    params = init_params(k_par)
    prepared = prepare_params(params)

    logits, state = jax.jit(mec_net_forward)(obs, prepared)
    jax.block_until_ready((logits, state))
    assert logits.shape == (B, OUT_CH) and state.shape == (B, INPUT_CH, SEQ)

    # Loose check vs f32 reference (kernel uses bf16 weights/activations).
    ref_logits, _ = reference_forward(obs, params)
    assert bool(jnp.allclose(logits, ref_logits, atol=1e-1, rtol=1e-1))

    print("KERNEL_OK")
</pallas_src>

<mosaic_0001>
module attributes {stable_mosaic.version = 11 : i64} {
  func.func @_fused_kernel(%arg0: memref<8x128xf32, #tpu.memory_space<vmem>>, %arg1: memref<128x512xbf16, #tpu.memory_space<vmem>>, %arg2: memref<1x512xf32, #tpu.memory_space<vmem>>, %arg3: memref<512x512xbf16, #tpu.memory_space<vmem>>, %arg4: memref<1x512xf32, #tpu.memory_space<vmem>>, %arg5: memref<512x512xbf16, #tpu.memory_space<vmem>>, %arg6: memref<1x512xf32, #tpu.memory_space<vmem>>, %arg7: memref<2x512x1024xbf16, #tpu.memory_space<vmem>>, %arg8: memref<1x1024xf32, #tpu.memory_space<vmem>>, %arg9: memref<1024x1024xbf16, #tpu.memory_space<vmem>>, %arg10: memref<1x1024xf32, #tpu.memory_space<vmem>>, %arg11: memref<1024x1024xbf16, #tpu.memory_space<vmem>>, %arg12: memref<1x1024xf32, #tpu.memory_space<vmem>>, %arg13: memref<1024x2xbf16, #tpu.memory_space<vmem>>, %arg14: memref<1x2xf32, #tpu.memory_space<vmem>>, %arg15: memref<4x2xf32, #tpu.memory_space<vmem>>) attributes {dimension_semantics = [], scalar_prefetch = 0 : i64, scratch_operands = 0 : i64, tpu.core_type = #tpu.core_type<tc>} {
    %c0 = arith.constant 0 : index
    %c0_0 = arith.constant 0 : index
    %0 = vector.load %arg0[%c0, %c0_0] : memref<8x128xf32, #tpu.memory_space<vmem>>, vector<8x128xf32>
    %1 = arith.truncf %0 : vector<8x128xf32> to vector<8x128xbf16>
    %c0_1 = arith.constant 0 : index
    %c0_2 = arith.constant 0 : index
    %2 = vector.load %arg1[%c0_1, %c0_2] : memref<128x512xbf16, #tpu.memory_space<vmem>>, vector<128x512xbf16>
    %cst = arith.constant dense<0.000000e+00> : vector<8x512xf32>
    %3 = tpu.matmul %1, %2, %cst {dimension_numbers = #tpu.dot_dimension_numbers<[1], [0], [0], [1], [0, 0, 1, 1], [], []>} : vector<8x128xbf16>, vector<128x512xbf16>, vector<8x512xf32> -> vector<8x512xf32>
    %c0_3 = arith.constant 0 : index
    %c0_4 = arith.constant 0 : index
    %4 = vector.load %arg2[%c0_3, %c0_4] : memref<1x512xf32, #tpu.memory_space<vmem>>, vector<1x512xf32>
    %5 = vector.broadcast %4 : vector<1x512xf32> to vector<8x512xf32>
    %6 = arith.addf %3, %5 : vector<8x512xf32>
    %cst_5 = arith.constant 0.000000e+00 : f32
    %7 = vector.broadcast %cst_5 : f32 to vector<8x512xf32>
    %8 = arith.maximumf %6, %7 : vector<8x512xf32>
    %9 = arith.truncf %8 : vector<8x512xf32> to vector<8x512xbf16>
    %c0_6 = arith.constant 0 : index
    %c0_7 = arith.constant 0 : index
    %10 = vector.load %arg3[%c0_6, %c0_7] : memref<512x512xbf16, #tpu.memory_space<vmem>>, vector<512x512xbf16>
    %cst_8 = arith.constant dense<0.000000e+00> : vector<8x512xf32>
    %11 = tpu.matmul %9, %10, %cst_8 {dimension_numbers = #tpu.dot_dimension_numbers<[1], [0], [0], [1], [0, 0, 1, 1], [], []>} : vector<8x512xbf16>, vector<512x512xbf16>, vector<8x512xf32> -> vector<8x512xf32>
    %c0_9 = arith.constant 0 : index
    %c0_10 = arith.constant 0 : index
    %12 = vector.load %arg4[%c0_9, %c0_10] : memref<1x512xf32, #tpu.memory_space<vmem>>, vector<1x512xf32>
    %13 = vector.broadcast %12 : vector<1x512xf32> to vector<8x512xf32>
    %14 = arith.addf %11, %13 : vector<8x512xf32>
    %cst_11 = arith.constant 0.000000e+00 : f32
    %15 = vector.broadcast %cst_11 : f32 to vector<8x512xf32>
    %16 = arith.maximumf %14, %15 : vector<8x512xf32>
    %17 = arith.truncf %16 : vector<8x512xf32> to vector<8x512xbf16>
    %c0_12 = arith.constant 0 : index
    %c0_13 = arith.constant 0 : index
    %18 = vector.load %arg5[%c0_12, %c0_13] : memref<512x512xbf16, #tpu.memory_space<vmem>>, vector<512x512xbf16>
    %cst_14 = arith.constant dense<0.000000e+00> : vector<8x512xf32>
    %19 = tpu.matmul %17, %18, %cst_14 {dimension_numbers = #tpu.dot_dimension_numbers<[1], [0], [0], [1], [0, 0, 1, 1], [], []>} : vector<8x512xbf16>, vector<512x512xbf16>, vector<8x512xf32> -> vector<8x512xf32>
    %c0_15 = arith.constant 0 : index
    %c0_16 = arith.constant 0 : index
    %20 = vector.load %arg6[%c0_15, %c0_16] : memref<1x512xf32, #tpu.memory_space<vmem>>, vector<1x512xf32>
    %21 = vector.broadcast %20 : vector<1x512xf32> to vector<8x512xf32>
    %22 = arith.addf %19, %21 : vector<8x512xf32>
    %cst_17 = arith.constant 0.000000e+00 : f32
    %23 = vector.broadcast %cst_17 : f32 to vector<8x512xf32>
    %24 = arith.maximumf %22, %23 : vector<8x512xf32>
    %25 = arith.truncf %24 : vector<8x512xf32> to vector<8x512xbf16>
    %c0_18 = arith.constant 0 : index
    %c0_19 = arith.constant 0 : index
    %26 = vector.load %arg8[%c0_18, %c0_19] : memref<1x1024xf32, #tpu.memory_space<vmem>>, vector<1x1024xf32>
    %27 = vector.extract_strided_slice %25 {offsets = [0, 0], sizes = [4, 512], strides = [1, 1]} : vector<8x512xbf16> to vector<4x512xbf16>
    %c0_20 = arith.constant 0 : index
    %c0_21 = arith.constant 0 : index
    %c0_22 = arith.constant 0 : index
    %28 = vector.load %arg7[%c0_20, %c0_21, %c0_22] : memref<2x512x1024xbf16, #tpu.memory_space<vmem>>, vector<1x512x1024xbf16>
    %29 = vector.shape_cast %28 : vector<1x512x1024xbf16> to vector<512x1024xbf16>
    %cst_23 = arith.constant dense<0.000000e+00> : vector<4x1024xf32>
    %30 = tpu.matmul %27, %29, %cst_23 {dimension_numbers = #tpu.dot_dimension_numbers<[1], [0], [0], [1], [0, 0, 1, 1], [], []>} : vector<4x512xbf16>, vector<512x1024xbf16>, vector<4x1024xf32> -> vector<4x1024xf32>
    %31 = vector.broadcast %26 : vector<1x1024xf32> to vector<4x1024xf32>
    %32 = arith.addf %31, %30 : vector<4x1024xf32>
    %33 = vector.extract_strided_slice %25 {offsets = [4, 0], sizes = [4, 512], strides = [1, 1]} : vector<8x512xbf16> to vector<4x512xbf16>
    %c1 = arith.constant 1 : index
    %c0_24 = arith.constant 0 : index
    %c0_25 = arith.constant 0 : index
    %34 = vector.load %arg7[%c1, %c0_24, %c0_25] : memref<2x512x1024xbf16, #tpu.memory_space<vmem>>, vector<1x512x1024xbf16>
    %35 = vector.shape_cast %34 : vector<1x512x1024xbf16> to vector<512x1024xbf16>
    %cst_26 = arith.constant dense<0.000000e+00> : vector<4x1024xf32>
    %36 = tpu.matmul %33, %35, %cst_26 {dimension_numbers = #tpu.dot_dimension_numbers<[1], [0], [0], [1], [0, 0, 1, 1], [], []>} : vector<4x512xbf16>, vector<512x1024xbf16>, vector<4x1024xf32> -> vector<4x1024xf32>
    %37 = arith.addf %32, %36 : vector<4x1024xf32>
    %cst_27 = arith.constant 0.000000e+00 : f32
    %38 = vector.broadcast %cst_27 : f32 to vector<4x1024xf32>
    %39 = arith.maximumf %37, %38 : vector<4x1024xf32>
    %40 = arith.truncf %39 : vector<4x1024xf32> to vector<4x1024xbf16>
    %c0_28 = arith.constant 0 : index
    %c0_29 = arith.constant 0 : index
    %41 = vector.load %arg9[%c0_28, %c0_29] : memref<1024x1024xbf16, #tpu.memory_space<vmem>>, vector<1024x1024xbf16>
    %cst_30 = arith.constant dense<0.000000e+00> : vector<4x1024xf32>
    %42 = tpu.matmul %40, %41, %cst_30 {dimension_numbers = #tpu.dot_dimension_numbers<[1], [0], [0], [1], [0, 0, 1, 1], [], []>} : vector<4x1024xbf16>, vector<1024x1024xbf16>, vector<4x1024xf32> -> vector<4x1024xf32>
    %c0_31 = arith.constant 0 : index
    %c0_32 = arith.constant 0 : index
    %43 = vector.load %arg10[%c0_31, %c0_32] : memref<1x1024xf32, #tpu.memory_space<vmem>>, vector<1x1024xf32>
    %44 = vector.broadcast %43 : vector<1x1024xf32> to vector<4x1024xf32>
    %45 = arith.addf %42, %44 : vector<4x1024xf32>
    %cst_33 = arith.constant 0.000000e+00 : f32
    %46 = vector.broadcast %cst_33 : f32 to vector<4x1024xf32>
    %47 = arith.maximumf %45, %46 : vector<4x1024xf32>
    %48 = arith.truncf %47 : vector<4x1024xf32> to vector<4x1024xbf16>
    %c0_34 = arith.constant 0 : index
    %c0_35 = arith.constant 0 : index
    %49 = vector.load %arg11[%c0_34, %c0_35] : memref<1024x1024xbf16, #tpu.memory_space<vmem>>, vector<1024x1024xbf16>
    %cst_36 = arith.constant dense<0.000000e+00> : vector<4x1024xf32>
    %50 = tpu.matmul %48, %49, %cst_36 {dimension_numbers = #tpu.dot_dimension_numbers<[1], [0], [0], [1], [0, 0, 1, 1], [], []>} : vector<4x1024xbf16>, vector<1024x1024xbf16>, vector<4x1024xf32> -> vector<4x1024xf32>
    %c0_37 = arith.constant 0 : index
    %c0_38 = arith.constant 0 : index
    %51 = vector.load %arg12[%c0_37, %c0_38] : memref<1x1024xf32, #tpu.memory_space<vmem>>, vector<1x1024xf32>
    %52 = vector.broadcast %51 : vector<1x1024xf32> to vector<4x1024xf32>
    %53 = arith.addf %50, %52 : vector<4x1024xf32>
    %cst_39 = arith.constant 0.000000e+00 : f32
    %54 = vector.broadcast %cst_39 : f32 to vector<4x1024xf32>
    %55 = arith.maximumf %53, %54 : vector<4x1024xf32>
    %56 = arith.truncf %55 : vector<4x1024xf32> to vector<4x1024xbf16>
    %c0_40 = arith.constant 0 : index
    %c0_41 = arith.constant 0 : index
    %57 = vector.load %arg13[%c0_40, %c0_41] : memref<1024x2xbf16, #tpu.memory_space<vmem>>, vector<1024x2xbf16>
    %cst_42 = arith.constant dense<0.000000e+00> : vector<4x2xf32>
    %58 = tpu.matmul %56, %57, %cst_42 {dimension_numbers = #tpu.dot_dimension_numbers<[1], [0], [0], [1], [0, 0, 1, 1], [], []>} : vector<4x1024xbf16>, vector<1024x2xbf16>, vector<4x2xf32> -> vector<4x2xf32>
    %c0_43 = arith.constant 0 : index
    %c0_44 = arith.constant 0 : index
    %59 = vector.load %arg14[%c0_43, %c0_44] : memref<1x2xf32, #tpu.memory_space<vmem>>, vector<1x2xf32>
    %60 = vector.broadcast %59 : vector<1x2xf32> to vector<4x2xf32>
    %61 = arith.addf %58, %60 : vector<4x2xf32>
    %c0_45 = arith.constant 0 : index
    %c0_46 = arith.constant 0 : index
    %62 = vector.load %arg15[%c0_45, %c0_46] : memref<4x2xf32, #tpu.memory_space<vmem>>, vector<4x2xf32>
    tpu.vector_store %arg15[%c0_45, %c0_46], %61 {strides = array<i32>} : memref<4x2xf32, #tpu.memory_space<vmem>>, vector<4x2xf32>,
    return
  }
}

</mosaic_0001>

<bundles_post_ra>
// kernel: mec_net_forward.1
= control target key start
LH: loop header
LB: loop body
LE: loop exit
PB: predicated region body
PF: predicated region fallthrough
CT: control target
= control target key end

     0   :  { %20 = vsyncpa [#allocation3], 0  ;;  %s18285_s0 = inlined_call_operand.vmem [shape: f32[8,128], index: 0, kind: input, shape index: {}]   ;;  %s18286_s1 = inlined_call_operand.hbm [shape: bf16[128,512], index: 1, kind: input, shape index: {}]   ;;  %s18287_s2 = inlined_call_operand.hbm [shape: f32[1,512], index: 2, kind: input, shape index: {}]   ;;  %s18288_s3 = inlined_call_operand.hbm [shape: bf16[512,512], index: 3, kind: input, shape index: {}]   ;;  %s18289_s4 = inlined_call_operand.hbm [shape: f32[1,512], index: 4, kind: input, shape index: {}]   ;;  %s18290_s5 = inlined_call_operand.hbm [shape: bf16[512,512], index: 5, kind: input, shape index: {}]   ;;  %s18291_s6 = inlined_call_operand.hbm [shape: f32[1,512], index: 6, kind: input, shape index: {}]   ;;  %s18292_s7 = inlined_call_operand.hbm [shape: bf16[2,512,1024], index: 7, kind: input, shape index: {}]   ;;  %s18293_s8 = inlined_call_operand.hbm [shape: f32[1,1024], index: 8, kind: input, shape index: {}]   ;;  %s18294_s9 = inlined_call_operand.hbm [shape: bf16[1024,1024], index: 9, kind: input, shape index: {}]   ;;  %s18295_s10 = inlined_call_operand.hbm [shape: f32[1,1024], index: 10, kind: input, shape index: {}]   ;;  %s18296_s11 = inlined_call_operand.hbm [shape: bf16[1024,1024], index: 11, kind: input, shape index: {}]   ;;  %s18297_s12 = inlined_call_operand.hbm [shape: f32[1,1024], index: 12, kind: input, shape index: {}]   ;;  %s18298_s13 = inlined_call_operand.vmem [shape: bf16[1024,2], index: 13, kind: input, shape index: {}]   ;;  %s18299_s14 = inlined_call_operand.hbm [shape: f32[1,2], index: 14, kind: input, shape index: {}]   ;;  %s18300_s15 = inlined_call_operand.vmem [shape: f32[4,2], index: 15, kind: output, shape index: {}]  }
   0x1   :  { %21 = vsyncpa [#allocation5], 0 }
   0x2   :  { %22 = vsyncpa [#allocation8], 0 }
   0x3   :  { %23 = vsyncpa [#allocation11], 0 }
   0x4   :  { %24 = vsyncpa [#allocation14], 0 }
   0x5   :  { %25 = vsyncpa [#allocation17], 0 }
   0x6   :  { %26 = vsyncpa [#allocation20], 0  ;;  %s17507_s18 = smov [#allocation4]   ;;  %s17508_s20 = smov [#allocation7]  }
   0x7   :  { %s47_s19 = sshll.u32 %s17507_s18, 4  ;;  %s69_s21 = sshll.u32 %s17508_s20, 4  ;;  %s48_s19 = int_to_ptr.vmem [resolvable:$true] %s47_s19  ;;  %s70_s21 = int_to_ptr.vmem [resolvable:$true] %s69_s21 }
   0x8   :  { %s17207_s24 = scalar_lea.hbm %s18287_s2, 64 }
   0x9   :  { %p17208_p0 = scmp.ne.s32.totalorder %s18287_s2, %s17207_s24  ;;  %p17211_p1 = scmp.lt.u32.totalorder %s17207_s24, %s18287_s2 }
   0xb   :  { %p17213_p2 = pnand %p17211_p1, %p17208_p0 }
   0xd   :  { %17216 = shalt.err (!%p17213_p2)
}
   0xe   :  { %s17217_s29 = scalar_lea.vmem %s48_s19, 64  ;;  %p17222_p4 = scmp.lt.s32.totalorder %s48_s19, %s48_s19 }
   0xf   :  { %p17218_p3 = scmp.ne.s32.totalorder %s48_s19, %s17217_s29  ;;  %p17223_p5 = scmp.lt.s32.totalorder %s17217_s29, %s17217_s29 }
  0x11   :  { %p17224_p6 = por %p17223_p5, %p17222_p4 }
  0x13   :  { %p17225_p7 = pnand %p17224_p6, %p17218_p3 }
  0x15   :  { %17228 = shalt.err (!%p17225_p7)
}
  0x16   :  { %50 = dma.hbm_to_vmem [thread:$0]  %s18287_s2, 64, %s48_s19, [#allocation5]  }
  0x17   :  { %s17229_s20 = scalar_lea.hbm %s18289_s4, 64 }
  0x18   :  { %p17230_p8 = scmp.ne.s32.totalorder %s18289_s4, %s17229_s20  ;;  %p17233_p9 = scmp.lt.u32.totalorder %s17229_s20, %s18289_s4 }
  0x1a   :  { %p17235_p10 = pnand %p17233_p9, %p17230_p8 }
  0x1c   :  { %17238 = shalt.err (!%p17235_p10)
}
  0x1d   :  { %s17239_s26 = scalar_lea.vmem %s70_s21, 64  ;;  %p17244_p12 = scmp.lt.s32.totalorder %s70_s21, %s70_s21 }
  0x1e   :  { %p17240_p11 = scmp.ne.s32.totalorder %s70_s21, %s17239_s26  ;;  %p17245_p13 = scmp.lt.s32.totalorder %s17239_s26, %s17239_s26 }
  0x20   :  { %p17246_p0 = por %p17245_p13, %p17244_p12 }
  0x22   :  { %p17247_p1 = pnand %p17246_p0, %p17240_p11 }
  0x24   :  { %17250 = shalt.err (!%p17247_p1)
}
  0x25   :  { %72 = dma.hbm_to_vmem [thread:$0]  %s18289_s4, 64, %s70_s21, [#allocation8]  }
  0x26   :  { %s17509_s27 = smov [#allocation10]   ;;  %s17510_s29 = smov [#allocation13]  }
  0x27   :  { %s91_s28 = sshll.u32 %s17509_s27, 4  ;;  %s113_s30 = sshll.u32 %s17510_s29, 4  ;;  %s92_s28 = int_to_ptr.vmem [resolvable:$true] %s91_s28  ;;  %s114_s30 = int_to_ptr.vmem [resolvable:$true] %s113_s30 }
  0x28   :  { %s17251_s18 = scalar_lea.hbm %s18291_s6, 64 }
  0x29   :  { %p17252_p2 = scmp.ne.s32.totalorder %s18291_s6, %s17251_s18  ;;  %p17255_p3 = scmp.lt.u32.totalorder %s17251_s18, %s18291_s6 }
  0x2b   :  { %p17257_p4 = pnand %p17255_p3, %p17252_p2 }
  0x2d   :  { %17260 = shalt.err (!%p17257_p4)
}
  0x2e   :  { %s17261_s4 = scalar_lea.vmem %s92_s28, 64  ;;  %p17266_p6 = scmp.lt.s32.totalorder %s92_s28, %s92_s28 }
  0x2f   :  { %p17262_p5 = scmp.ne.s32.totalorder %s92_s28, %s17261_s4  ;;  %p17267_p7 = scmp.lt.s32.totalorder %s17261_s4, %s17261_s4 }
  0x31   :  { %p17268_p8 = por %p17267_p7, %p17266_p6 }
  0x33   :  { %p17269_p9 = pnand %p17268_p8, %p17262_p5 }
  0x35   :  { %17272 = shalt.err (!%p17269_p9)
}
  0x36   :  { %94 = dma.hbm_to_vmem [thread:$0]  %s18291_s6, 64, %s92_s28, [#allocation11]  }
  0x37   :  { %s17273_s19 = scalar_lea.hbm %s18293_s8, 128 }
  0x38   :  { %p17274_p10 = scmp.ne.s32.totalorder %s18293_s8, %s17273_s19  ;;  %p17277_p11 = scmp.lt.u32.totalorder %s17273_s19, %s18293_s8 }
  0x3a   :  { %p17279_p12 = pnand %p17277_p11, %p17274_p10 }
  0x3c   :  { %17282 = shalt.err (!%p17279_p12)
}
  0x3d   :  { %s17283_s18 = scalar_lea.vmem %s114_s30, 128  ;;  %p17288_p0 = scmp.lt.s32.totalorder %s114_s30, %s114_s30 }
  0x3e   :  { %p17284_p13 = scmp.ne.s32.totalorder %s114_s30, %s17283_s18  ;;  %p17289_p1 = scmp.lt.s32.totalorder %s17283_s18, %s17283_s18 }
  0x40   :  { %p17290_p2 = por %p17289_p1, %p17288_p0 }
  0x42   :  { %p17291_p3 = pnand %p17290_p2, %p17284_p13 }
  0x44   :  { %17294 = shalt.err (!%p17291_p3)
}
  0x45   :  { %116 = dma.hbm_to_vmem [thread:$0]  %s18293_s8, 128, %s114_s30, [#allocation14]  }
  0x46   :  { %s17511_s20 = smov [#allocation16]   ;;  %s17512_s23 = smov [#allocation19]  }
  0x47   :  { %s135_s22 = sshll.u32 %s17511_s20, 4  ;;  %s157_s24 = sshll.u32 %s17512_s23, 4  ;;  %s136_s22 = int_to_ptr.vmem [resolvable:$true] %s135_s22  ;;  %s158_s24 = int_to_ptr.vmem [resolvable:$true] %s157_s24 }
  0x48   :  { %s17295_s25 = scalar_lea.hbm %s18295_s10, 128 }
  0x49   :  { %p17296_p4 = scmp.ne.s32.totalorder %s18295_s10, %s17295_s25  ;;  %p17299_p5 = scmp.lt.u32.totalorder %s17295_s25, %s18295_s10 }
  0x4b   :  { %p17301_p6 = pnand %p17299_p5, %p17296_p4 }
  0x4d   :  { %17304 = shalt.err (!%p17301_p6)
}
  0x4e   :  { %s17305_s8 = scalar_lea.vmem %s136_s22, 128  ;;  %p17310_p8 = scmp.lt.s32.totalorder %s136_s22, %s136_s22 }
  0x4f   :  { %p17306_p7 = scmp.ne.s32.totalorder %s136_s22, %s17305_s8  ;;  %p17311_p9 = scmp.lt.s32.totalorder %s17305_s8, %s17305_s8 }
  0x51   :  { %p17312_p10 = por %p17311_p9, %p17310_p8 }
  0x53   :  { %p17313_p11 = pnand %p17312_p10, %p17306_p7 }
  0x55   :  { %17316 = shalt.err (!%p17313_p11)
}
  0x56   :  { %138 = dma.hbm_to_vmem [thread:$0]  %s18295_s10, 128, %s136_s22, [#allocation17]  }
  0x57   :  { %s17317_s18 = scalar_lea.hbm %s18297_s12, 128 }
  0x58   :  { %p17318_p12 = scmp.ne.s32.totalorder %s18297_s12, %s17317_s18  ;;  %p17321_p13 = scmp.lt.u32.totalorder %s17317_s18, %s18297_s12 }
  0x5a   :  { %p17323_p0 = pnand %p17321_p13, %p17318_p12 }
  0x5c   :  { %17326 = shalt.err (!%p17323_p0)
}
  0x5d   :  { %s17327_s4 = scalar_lea.vmem %s158_s24, 128  ;;  %p17332_p2 = scmp.lt.s32.totalorder %s158_s24, %s158_s24 }
  0x5e   :  { %p17328_p1 = scmp.ne.s32.totalorder %s158_s24, %s17327_s4  ;;  %p17333_p3 = scmp.lt.s32.totalorder %s17327_s4, %s17327_s4 }
  0x60   :  { %p17334_p4 = por %p17333_p3, %p17332_p2 }
  0x62   :  { %p17335_p5 = pnand %p17334_p4, %p17328_p1 }
  0x64   :  { %17338 = shalt.err (!%p17335_p5)
}
  0x65   :  { %160 = dma.hbm_to_vmem [thread:$0]  %s18297_s12, 128, %s158_s24, [#allocation20]  }
  0x66   :  { %s17513_s21 = smov [#allocation2]   ;;  %s17339_s19 = scalar_lea.hbm %s18286_s1, 4096 }
  0x67   :  { %s34_s25 = sshll.u32 %s17513_s21, 4  ;;  %p17340_p6 = scmp.ne.s32.totalorder %s18286_s1, %s17339_s19  ;;  %s35_s25 = int_to_ptr.vmem [resolvable:$true] %s34_s25 }
  0x68   :  { %p17343_p7 = scmp.lt.u32.totalorder %s17339_s19, %s18286_s1 }
  0x6a   :  { %p17345_p8 = pnand %p17343_p7, %p17340_p6 }
  0x6c   :  { %17348 = shalt.err (!%p17345_p8)
}
  0x6d   :  { %s17349_s16 = scalar_lea.vmem %s35_s25, 4096  ;;  %p17354_p10 = scmp.lt.s32.totalorder %s35_s25, %s35_s25 }
  0x6e   :  { %p17350_p9 = scmp.ne.s32.totalorder %s35_s25, %s17349_s16  ;;  %p17355_p11 = scmp.lt.s32.totalorder %s17349_s16, %s17349_s16 }
  0x70   :  { %p17356_p12 = por %p17355_p11, %p17354_p10 }
  0x72   :  { %p17357_p13 = pnand %p17356_p12, %p17350_p9 }
  0x74   :  { %17360 = shalt.err (!%p17357_p13)
}
  0x75   :  { %s17514_s12 = smov 256   ;;  %s17515_s24 = smov 16  }
  0x76   :  { %40 = dma.hbm_to_vmem [thread:$0]  %s18286_s1, 4096, %s35_s25, [#allocation3], %s17514_s12, %s17514_s12, %s17515_s24  }
  0x77   :  { %s17516_s6 = smov [#allocation6]   ;;  %s17517_s20 = smov [#allocation9]  }
  0x78   :  { %s56_s28 = sshll.u32 %s17516_s6, 4  ;;  %s78_s23 = sshll.u32 %s17517_s20, 4  ;;  %s57_s28 = int_to_ptr.vmem [resolvable:$true] %s56_s28  ;;  %s79_s23 = int_to_ptr.vmem [resolvable:$true] %s78_s23 }
  0x79   :  { %s17361_s22 = scalar_lea.hbm %s18288_s3, 16384 }
  0x7a   :  { %p17362_p0 = scmp.ne.s32.totalorder %s18288_s3, %s17361_s22  ;;  %p17365_p1 = scmp.lt.u32.totalorder %s17361_s22, %s18288_s3 }
  0x7c   :  { %p17367_p2 = pnand %p17365_p1, %p17362_p0 }
  0x7e   :  { %17370 = shalt.err (!%p17367_p2)
}
  0x7f   :  { %s17371_s1 = scalar_lea.vmem %s57_s28, 16384  ;;  %p17376_p4 = scmp.lt.s32.totalorder %s57_s28, %s57_s28 }
  0x80   :  { %p17372_p3 = scmp.ne.s32.totalorder %s57_s28, %s17371_s1  ;;  %p17377_p5 = scmp.lt.s32.totalorder %s17371_s1, %s17371_s1 }
  0x82   :  { %p17378_p6 = por %p17377_p5, %p17376_p4 }
  0x84   :  { %p17379_p7 = pnand %p17378_p6, %p17372_p3 }
  0x86   :  { %17382 = shalt.err (!%p17379_p7)
}
  0x87   :  { %62 = dma.hbm_to_vmem [thread:$0]  %s18288_s3, 16384, %s57_s28, [#allocation5], %s17514_s12, %s17514_s12, %s17515_s24  }
  0x88   :  { %s17383_s29 = scalar_lea.hbm %s18290_s5, 16384 }
  0x89   :  { %p17384_p8 = scmp.ne.s32.totalorder %s18290_s5, %s17383_s29  ;;  %p17387_p9 = scmp.lt.u32.totalorder %s17383_s29, %s18290_s5 }
  0x8b   :  { %p17389_p10 = pnand %p17387_p9, %p17384_p8 }
  0x8d   :  { %17392 = shalt.err (!%p17389_p10)
}
  0x8e   :  { %s17393_s20 = scalar_lea.vmem %s79_s23, 16384  ;;  %p17398_p12 = scmp.lt.s32.totalorder %s79_s23, %s79_s23 }
  0x8f   :  { %p17394_p11 = scmp.ne.s32.totalorder %s79_s23, %s17393_s20  ;;  %p17399_p13 = scmp.lt.s32.totalorder %s17393_s20, %s17393_s20 }
  0x91   :  { %p17400_p0 = por %p17399_p13, %p17398_p12 }
  0x93   :  { %p17401_p1 = pnand %p17400_p0, %p17394_p11 }
  0x95   :  { %17404 = shalt.err (!%p17401_p1)
}
  0x96   :  { %84 = dma.hbm_to_vmem [thread:$0]  %s18290_s5, 16384, %s79_s23, [#allocation8], %s17514_s12, %s17514_s12, %s17515_s24  }
  0x97   :  { %s17518_s4 = smov [#allocation12]   ;;  %s17405_s26 = scalar_lea.hbm %s18292_s7, 65536 }
  0x98   :  { %s100_s10 = sshll.u32 %s17518_s4, 4  ;;  %p17406_p2 = scmp.ne.s32.totalorder %s18292_s7, %s17405_s26  ;;  %s101_s10 = int_to_ptr.vmem [resolvable:$true] %s100_s10 }
  0x99   :  { %p17409_p3 = scmp.lt.u32.totalorder %s17405_s26, %s18292_s7 }
  0x9b   :  { %p17411_p4 = pnand %p17409_p3, %p17406_p2 }
  0x9d   :  { %17414 = shalt.err (!%p17411_p4)
}
  0x9e   :  { %s17415_s27 = scalar_lea.vmem %s101_s10, 65536  ;;  %p17420_p6 = scmp.lt.s32.totalorder %s101_s10, %s101_s10 }
  0x9f   :  { %p17416_p5 = scmp.ne.s32.totalorder %s101_s10, %s17415_s27  ;;  %p17421_p7 = scmp.lt.s32.totalorder %s17415_s27, %s17415_s27 }
  0xa1   :  { %p17422_p8 = por %p17421_p7, %p17420_p6 }
  0xa3   :  { %p17423_p9 = pnand %p17422_p8, %p17416_p5 }
  0xa5   :  { %17426 = shalt.err (!%p17423_p9)
}
  0xa6   :  { %s17519_s5 = smov 512   ;;  %s17520_s12 = smov 32  }
  0xa7   :  { %106 = dma.hbm_to_vmem [thread:$0]  %s18292_s7, 65536, %s101_s10, [#allocation11], %s17519_s5, %s17519_s5, %s17520_s12  }
  0xa8   :  { %s17521_s8 = smov [#allocation15]   ;;  %s17522_s29 = smov [#allocation18]  }
  0xa9   :  { %s122_s30 = sshll.u32 %s17521_s8, 4  ;;  %s144_s16 = sshll.u32 %s17522_s29, 4  ;;  %s123_s30 = int_to_ptr.vmem [resolvable:$true] %s122_s30  ;;  %s17737_s16 = int_to_ptr.vmem [resolvable:$true] %s144_s16 }
  0xaa   :  { %s17427_s6 = scalar_lea.hbm %s18294_s9, 65536 }
  0xab   :  { %p17428_p10 = scmp.ne.s32.totalorder %s18294_s9, %s17427_s6  ;;  %p17431_p11 = scmp.lt.u32.totalorder %s17427_s6, %s18294_s9 }
  0xad   :  { %p17433_p12 = pnand %p17431_p11, %p17428_p10 }
  0xaf   :  { %17436 = shalt.err (!%p17433_p12)
}
  0xb0   :  { %s17437_s7 = scalar_lea.vmem %s123_s30, 65536  ;;  %p17442_p0 = scmp.lt.s32.totalorder %s123_s30, %s123_s30 }
  0xb1   :  { %p17438_p13 = scmp.ne.s32.totalorder %s123_s30, %s17437_s7  ;;  %p17443_p1 = scmp.lt.s32.totalorder %s17437_s7, %s17437_s7 }
  0xb3   :  { %p17444_p2 = por %p17443_p1, %p17442_p0 }
  0xb5   :  { %p17445_p3 = pnand %p17444_p2, %p17438_p13 }
  0xb7   :  { %17448 = shalt.err (!%p17445_p3)
}
  0xb8   :  { %128 = dma.hbm_to_vmem [thread:$0]  %s18294_s9, 65536, %s123_s30, [#allocation14], %s17519_s5, %s17519_s5, %s17520_s12  }
  0xb9   :  { %s17449_s2 = scalar_lea.hbm %s18296_s11, 65536 }
  0xba   :  { %p17450_p4 = scmp.ne.s32.totalorder %s18296_s11, %s17449_s2  ;;  %p17453_p5 = scmp.lt.u32.totalorder %s17449_s2, %s18296_s11 }
  0xbc   :  { %p17455_p6 = pnand %p17453_p5, %p17450_p4 }
  0xbe   :  { %17458 = shalt.err (!%p17455_p6)
}
  0xbf   :  { %s17459_s24 = scalar_lea.vmem %s17737_s16, 65536  ;;  %p17464_p8 = scmp.lt.s32.totalorder %s17737_s16, %s17737_s16 }
  0xc0   :  { %p17460_p7 = scmp.ne.s32.totalorder %s17737_s16, %s17459_s24  ;;  %p17465_p9 = scmp.lt.s32.totalorder %s17459_s24, %s17459_s24 }
  0xc2   :  { %p17466_p10 = por %p17465_p9, %p17464_p8 }
  0xc4   :  { %p17467_p11 = pnand %p17466_p10, %p17460_p7 }
  0xc6   :  { %17470 = shalt.err (!%p17467_p11)
}
  0xc7   :  { %150 = dma.hbm_to_vmem [thread:$0]  %s18296_s11, 65536, %s17737_s16, [#allocation17], %s17519_s5, %s17519_s5, %s17520_s12  }
  0xc8   :  { %s17523_s8 = smov [#allocation21]   ;;  %s17471_s18 = scalar_lea.hbm %s18299_s14, 16 }
  0xc9   :  { %s169_s30 = sshll.u32 %s17523_s8, 4  ;;  %p17472_p12 = scmp.ne.s32.totalorder %s18299_s14, %s17471_s18  ;;  %s170_s30 = int_to_ptr.vmem [resolvable:$true] %s169_s30 }
  0xca   :  { %p17475_p13 = scmp.lt.u32.totalorder %s17471_s18, %s18299_s14 }
  0xcc   :  { %p17477_p0 = pnand %p17475_p13, %p17472_p12 }
  0xce   :  { %17480 = shalt.err (!%p17477_p0)
}
  0xcf   :  { %s17481_s4 = scalar_lea.vmem %s170_s30, 16  ;;  %s17485_s11 = scalar_lea.vmem %s170_s30, 32 }
  0xd0   :  { %p17482_p1 = scmp.ne.s32.totalorder %s170_s30, %s17481_s4  ;;  %p17486_p2 = scmp.lt.s32.totalorder %s170_s30, %s170_s30 }
  0xd1   :  { %p17487_p3 = scmp.lt.s32.totalorder %s17485_s11, %s17481_s4 }
  0xd3   :  { %p17488_p4 = por %p17487_p3, %p17486_p2 }
  0xd5   :  { %p17489_p5 = pnand %p17488_p4, %p17482_p1 }
  0xd7   :  { %17492 = shalt.err (!%p17489_p5)
}
  0xd8   :  { %172 = dma.hbm_to_vmem [thread:$0]  %s18299_s14, 16, %s170_s30, [#allocation20]  }
  0xd9   :  { %17493 = dma.done.wait [#allocation3], 4096  }
  0xda   :  { %17494 = vsyncadd [#allocation3], 4294963200 }
  0xdb   :  { %17495 = dma.done.wait [#allocation5], 16448  }
  0xdc   :  { %17496 = vsyncadd [#allocation5], 4294950848 }
  0xdd   :  { %17497 = dma.done.wait [#allocation8], 16448  }
  0xde   :  { %17498 = vsyncadd [#allocation8], 4294950848 }
  0xdf   :  { %17499 = dma.done.wait [#allocation11], 65600  }
  0xe0   :  { %17500 = vsyncadd [#allocation11], 4294901696 }
  0xe1   :  { %17501 = dma.done.wait [#allocation14], 65664  }
  0xe2   :  { %17502 = vsyncadd [#allocation14], 4294901632 }
  0xe3   :  { %17503 = dma.done.wait [#allocation17], 65664  }
  0xe4   :  { %17504 = vsyncadd [#allocation17], 4294901632 }
  0xe5   :  { %17505 = dma.done.wait [#allocation20], 144  }
  0xe6   :  { %17506 = vsyncadd [#allocation20], 4294967152  ;;  %v17524_v0 = vmov 0   ;;  %v16709_v1 = vld [vmem:[#allocation2 + $0x4] ss:$16 sps:$4 sm:$0xff]   ;;  %vm14509_vm0 = vcmask 11264  }
  0xe7   :  { %461 = vmatprep.mubr.bf16.mxu0 %v17524_v0  ;;  %502 = vmatprep.mubr.bf16.mxu1 %v17524_v0  ;;  %v16711_v2 = vld [vmem:[#allocation2] ss:$16 sps:$4 sm:$0xff]   ;;  %v16712_v3 = vld [vmem:[#allocation2 + $0x24] ss:$16 sps:$4 sm:$0xff]   ;;  %v16733_v10 = vld [vmem:[#allocation2 + $0xc] ss:$16 sps:$4 sm:$0xff]  }
  0xe8   :  { %429 = vmatprep.subr.bf16.mxu0 %v16709_v1  ;;  %v16714_v4 = vld [vmem:[#allocation2 + $0x20] ss:$16 sps:$4 sm:$0xff]   ;;  %v16715_v5 = vld [vmem:[#allocation2 + $0x44] ss:$16 sps:$4 sm:$0xff]   ;;  %v16735_v11 = vld [vmem:[#allocation2 + $0x8] ss:$16 sps:$4 sm:$0xff]   ;;  %470 = vmatprep.subr.bf16.mxu1 %v16733_v10 }
  0xe9   :  { %430 = vmatpush1.bf16.msra.mxu0 %v16711_v2  ;;  %v16717_v6 = vld [vmem:[#allocation2 + $0x40] ss:$16 sps:$4 sm:$0xff]   ;;  %v16718_v7 = vld [vmem:[#allocation2 + $0x64] ss:$16 sps:$4 sm:$0xff]   ;;  %v16736_v12 = vld [vmem:[#allocation2 + $0x2c] ss:$16 sps:$4 sm:$0xff]   ;;  %471 = vmatpush1.bf16.msra.mxu1 %v16735_v11 }
  0xea   :  { %431 = vmatprep.subr.bf16.mxu0 %v16712_v3  ;;  %v16720_v8 = vld [vmem:[#allocation2 + $0x60] ss:$16 sps:$4 sm:$0xff]   ;;  %v16721_v9 = vld [vmem:[#allocation2 + $0x84] ss:$16 sps:$4 sm:$0xff]   ;;  %v16738_v14 = vld [vmem:[#allocation2 + $0x28] ss:$16 sps:$4 sm:$0xff]   ;;  %472 = vmatprep.subr.bf16.mxu1 %v16736_v12 }
  0xeb   :  { %v16723_v13 = vld [vmem:[#allocation2 + $0x80] ss:$16 sps:$4 sm:$0xff]   ;;  %v16739_v15 = vld [vmem:[#allocation2 + $0x4c] ss:$16 sps:$4 sm:$0xff]   ;;  %v16724_v16 = vld [vmem:[#allocation2 + $0xa4] ss:$16 sps:$4 sm:$0xff]  }
  0xec   :  { %v16726_v17 = vld [vmem:[#allocation2 + $0xa0] ss:$16 sps:$4 sm:$0xff]   ;;  %v16741_v18 = vld [vmem:[#allocation2 + $0x48] ss:$16 sps:$4 sm:$0xff]   ;;  %v16742_v19 = vld [vmem:[#allocation2 + $0x6c] ss:$16 sps:$4 sm:$0xff]  }
  0xed   :  { %432 = vmatpush1.bf16.msra.mxu0 %v16714_v4  ;;  %473 = vmatpush1.bf16.msra.mxu1 %v16738_v14  ;;  %v16727_v20 = vld [vmem:[#allocation2 + $0xc4] ss:$16 sps:$4 sm:$0xff]   ;;  %v16729_v21 = vld [vmem:[#allocation2 + $0xc0] ss:$16 sps:$4 sm:$0xff]   ;;  %v16744_v22 = vld [vmem:[#allocation2 + $0x68] ss:$16 sps:$4 sm:$0xff]  }
  0xee   :  { %433 = vmatprep.subr.bf16.mxu0 %v16715_v5  ;;  %474 = vmatprep.subr.bf16.mxu1 %v16739_v15  ;;  %v16745_v23 = vld [vmem:[#allocation2 + $0x8c] ss:$16 sps:$4 sm:$0xff]   ;;  %v16730_v24 = vld [vmem:[#allocation2 + $0xe4] ss:$16 sps:$4 sm:$0xff]   ;;  %v16732_v25 = vld [vmem:[#allocation2 + $0xe0] ss:$16 sps:$4 sm:$0xff]  }
  0xef   :  { %v213_v26 = vld [vmem:[%s18285_s0] sm:$0xff]  ;;  %v16747_v27 = vld [vmem:[#allocation2 + $0x88] ss:$16 sps:$4 sm:$0xff]   ;;  %v16748_v28 = vld [vmem:[#allocation2 + $0xac] ss:$16 sps:$4 sm:$0xff]  }
  0xf0   :  { %v16759_v29 = vld [vmem:[#allocation6 + $0x4] ss:$16 sps:$4 sm:$0xff]   ;;  %v214_v30 = vpack.c.bf16 %v213_v26, %v213_v26  ;;  %v16751_v32 = vld [vmem:[#allocation2 + $0xcc] ss:$16 sps:$4 sm:$0xff]   ;;  %v16757_v33 = vld [vmem:[#allocation6] ss:$16 sps:$4 sm:$0xff]  }
  0xf1   :  { %434 = vmatpush1.bf16.msra.mxu0 %v16717_v6  ;;  %475 = vmatpush1.bf16.msra.mxu1 %v16741_v18  ;;  %v16750_v31 = vld [vmem:[#allocation2 + $0xa8] ss:$16 sps:$4 sm:$0xff]   ;;  %v16754_v36 = vld [vmem:[#allocation2 + $0xec] ss:$16 sps:$4 sm:$0xff]   ;;  %v16763_v37 = vld [vmem:[#allocation6 + $0x20] ss:$16 sps:$4 sm:$0xff]  }
  0xf2   :  { %435 = vmatprep.subr.bf16.mxu0 %v16718_v7  ;;  %476 = vmatprep.subr.bf16.mxu1 %v16742_v19  ;;  %v16765_v34 = vld [vmem:[#allocation6 + $0x24] ss:$16 sps:$4 sm:$0xff]   ;;  %v16762_v40 = vld [vmem:[#allocation6 + $0xc] ss:$16 sps:$4 sm:$0xff]   ;;  %v16769_v41 = vld [vmem:[#allocation6 + $0x40] ss:$16 sps:$4 sm:$0xff]  }
  0xf3   :  { %v16753_v35 = vld [vmem:[#allocation2 + $0xc8] ss:$16 sps:$4 sm:$0xff]   ;;  %v16760_v43 = vld [vmem:[#allocation6 + $0x8] ss:$16 sps:$4 sm:$0xff]   ;;  %v16768_v44 = vld [vmem:[#allocation6 + $0x2c] ss:$16 sps:$4 sm:$0xff]  }
  0xf4   :  { %v16771_v38 = vld [vmem:[#allocation6 + $0x44] ss:$16 sps:$4 sm:$0xff]   ;;  %v16775_v45 = vld [vmem:[#allocation6 + $0x60] ss:$16 sps:$4 sm:$0xff]   ;;  %v16766_v47 = vld [vmem:[#allocation6 + $0x28] ss:$16 sps:$4 sm:$0xff]  }
  0xf5   :  { %436 = vmatpush1.bf16.msra.mxu0 %v16720_v8  ;;  %477 = vmatpush1.bf16.msra.mxu1 %v16744_v22  ;;  %v16756_v39 = vld [vmem:[#allocation2 + $0xe8] ss:$16 sps:$4 sm:$0xff]   ;;  %v16774_v48 = vld [vmem:[#allocation6 + $0x4c] ss:$16 sps:$4 sm:$0xff]   ;;  %v16781_v49 = vld [vmem:[#allocation6 + $0x80] ss:$16 sps:$4 sm:$0xff]  }
  0xf6   :  { %437 = vmatprep.subr.bf16.mxu0 %v16721_v9  ;;  %478 = vmatprep.subr.bf16.mxu1 %v16745_v23  ;;  %v16777_v42 = vld [vmem:[#allocation6 + $0x64] ss:$16 sps:$4 sm:$0xff]   ;;  %v16772_v51 = vld [vmem:[#allocation6 + $0x48] ss:$16 sps:$4 sm:$0xff]   ;;  %v16780_v52 = vld [vmem:[#allocation6 + $0x6c] ss:$16 sps:$4 sm:$0xff]  }
  0xf7   :  { %v16783_v46 = vld [vmem:[#allocation6 + $0x84] ss:$16 sps:$4 sm:$0xff]   ;;  %v16787_v53 = vld [vmem:[#allocation6 + $0xa0] ss:$16 sps:$4 sm:$0xff]   ;;  %v16778_v55 = vld [vmem:[#allocation6 + $0x68] ss:$16 sps:$4 sm:$0xff]  }
  0xf8   :  { %v16789_v50 = vld [vmem:[#allocation6 + $0xa4] ss:$16 sps:$4 sm:$0xff]   ;;  %v16786_v56 = vld [vmem:[#allocation6 + $0x8c] ss:$16 sps:$4 sm:$0xff]   ;;  %v16793_v57 = vld [vmem:[#allocation6 + $0xc0] ss:$16 sps:$4 sm:$0xff]  }
  0xf9   :  { %438 = vmatpush1.bf16.msra.mxu0 %v16723_v13  ;;  %479 = vmatpush1.bf16.msra.mxu1 %v16747_v27  ;;  %v16795_v54 = vld [vmem:[#allocation6 + $0xc4] ss:$16 sps:$4 sm:$0xff]   ;;  %v16784_v59 = vld [vmem:[#allocation6 + $0x88] ss:$16 sps:$4 sm:$0xff]   ;;  %v16792_v60 = vld [vmem:[#allocation6 + $0xac] ss:$16 sps:$4 sm:$0xff]  }
  0xfa   :  { %439 = vmatprep.subr.bf16.mxu0 %v16724_v16  ;;  %480 = vmatprep.subr.bf16.mxu1 %v16748_v28  ;;  %v16801_v58 = vld [vmem:[#allocation6 + $0xe4] ss:$16 sps:$4 sm:$0xff]   ;;  %v16799_v61 = vld [vmem:[#allocation6 + $0xe0] ss:$16 sps:$4 sm:$0xff]   ;;  %v16790_v63 = vld [vmem:[#allocation6 + $0xa8] ss:$16 sps:$4 sm:$0xff]  }
  0xfb   :  { %v16807_v62 = vld [vmem:[#allocation6 + $0x104] ss:$16 sps:$4 sm:$0xff]   ;;  %v16798_v0 = vld [vmem:[#allocation6 + $0xcc] ss:$16 sps:$4 sm:$0xff]   ;;  %v16805_v1 = vld [vmem:[#allocation6 + $0x100] ss:$16 sps:$4 sm:$0xff]  }
  0xfc   :  { %v16813_v2 = vld [vmem:[#allocation6 + $0x124] ss:$16 sps:$4 sm:$0xff]   ;;  %v16796_v3 = vld [vmem:[#allocation6 + $0xc8] ss:$16 sps:$4 sm:$0xff]   ;;  %v16804_v4 = vld [vmem:[#allocation6 + $0xec] ss:$16 sps:$4 sm:$0xff]  }
  0xfd   :  { %440 = vmatpush1.bf16.msra.mxu0 %v16726_v17  ;;  %481 = vmatpush1.bf16.msra.mxu1 %v16750_v31  ;;  %v16811_v5 = vld [vmem:[#allocation6 + $0x120] ss:$16 sps:$4 sm:$0xff]   ;;  %v16819_v6 = vld [vmem:[#allocation6 + $0x144] ss:$16 sps:$4 sm:$0xff]   ;;  %v16802_v7 = vld [vmem:[#allocation6 + $0xe8] ss:$16 sps:$4 sm:$0xff]  }
  0xfe   :  { %441 = vmatprep.subr.bf16.mxu0 %v16727_v20  ;;  %482 = vmatprep.subr.bf16.mxu1 %v16751_v32  ;;  %v16810_v8 = vld [vmem:[#allocation6 + $0x10c] ss:$16 sps:$4 sm:$0xff]   ;;  %v16817_v9 = vld [vmem:[#allocation6 + $0x140] ss:$16 sps:$4 sm:$0xff]   ;;  %v16825_v10 = vld [vmem:[#allocation6 + $0x164] ss:$16 sps:$4 sm:$0xff]  }
  0xff   :  { %v16808_v11 = vld [vmem:[#allocation6 + $0x108] ss:$16 sps:$4 sm:$0xff]   ;;  %v16816_v12 = vld [vmem:[#allocation6 + $0x12c] ss:$16 sps:$4 sm:$0xff]   ;;  %v16823_v13 = vld [vmem:[#allocation6 + $0x160] ss:$16 sps:$4 sm:$0xff]  }
 0x100   :  { %v16831_v14 = vld [vmem:[#allocation6 + $0x184] ss:$16 sps:$4 sm:$0xff]   ;;  %v16814_v15 = vld [vmem:[#allocation6 + $0x128] ss:$16 sps:$4 sm:$0xff]   ;;  %v16822_v16 = vld [vmem:[#allocation6 + $0x14c] ss:$16 sps:$4 sm:$0xff]  }
 0x101   :  { %442 = vmatpush1.bf16.msra.mxu0 %v16729_v21  ;;  %483 = vmatpush1.bf16.msra.mxu1 %v16753_v35  ;;  %v16829_v17 = vld [vmem:[#allocation6 + $0x180] ss:$16 sps:$4 sm:$0xff]   ;;  %v16837_v18 = vld [vmem:[#allocation6 + $0x1a4] ss:$16 sps:$4 sm:$0xff]   ;;  %v16820_v19 = vld [vmem:[#allocation6 + $0x148] ss:$16 sps:$4 sm:$0xff]  }
 0x102   :  { %443 = vmatprep.subr.bf16.mxu0 %v16730_v24  ;;  %484 = vmatprep.subr.bf16.mxu1 %v16754_v36  ;;  %v16828_v20 = vld [vmem:[#allocation6 + $0x16c] ss:$16 sps:$4 sm:$0xff]   ;;  %v16835_v21 = vld [vmem:[#allocation6 + $0x1a0] ss:$16 sps:$4 sm:$0xff]   ;;  %v16826_v22 = vld [vmem:[#allocation6 + $0x168] ss:$16 sps:$4 sm:$0xff]  }
 0x103   :  { %v16834_v23 = vld [vmem:[#allocation6 + $0x18c] ss:$16 sps:$4 sm:$0xff]   ;;  %v16832_v24 = vld [vmem:[#allocation6 + $0x188] ss:$16 sps:$4 sm:$0xff]   ;;  %v16843_v27 = vld [vmem:[#allocation6 + $0x1c4] ss:$16 sps:$4 sm:$0xff]  }
 0x104   :  { %v16838_v26 = vld [vmem:[#allocation6 + $0x1a8] ss:$16 sps:$4 sm:$0xff]   ;;  %v16846_v28 = vld [vmem:[#allocation6 + $0x1cc] ss:$16 sps:$4 sm:$0xff]   ;;  %v16849_v31 = vld [vmem:[#allocation6 + $0x1e4] ss:$16 sps:$4 sm:$0xff]  }
 0x105   :  { %444 = vmatpush1.bf16.msra.mxu0 %v16732_v25  ;;  %485 = vmatpush1.bf16.msra.mxu1 %v16756_v39  ;;  %v16840_v25 = vld [vmem:[#allocation6 + $0x1ac] ss:$16 sps:$4 sm:$0xff]   ;;  %v16855_v35 = vld [vmem:[#allocation6 + $0x204] ss:$16 sps:$4 sm:$0xff]  }
 0x106   :  { %1309 = vmatprep.subr.bf16.mxu0 %v16759_v29  ;;  %1391 = vmatprep.subr.bf16.mxu1 %v16762_v40  ;;  %v16841_v29 = vld [vmem:[#allocation6 + $0x1c0] ss:$16 sps:$4 sm:$0xff]   ;;  %v16852_v32 = vld [vmem:[#allocation6 + $0x1ec] ss:$16 sps:$4 sm:$0xff]  }
 0x107   :  { %v16858_v36 = vld [vmem:[#allocation6 + $0x20c] ss:$16 sps:$4 sm:$0xff]  }
 0x108   :  { %462 = vmatmul.mubr.bf16.vlgmr.msra.gmra.mrb[0].mxu0 %v214_v30  ;;  %503 = vmatmul.mubr.bf16.vlgmr.msra.gmra.mrb[0].mxu1 %v214_v30  ;;  %v16844_v30 = vld [vmem:[#allocation6 + $0x1c8] ss:$16 sps:$4 sm:$0xff]   ;;  %v17794_v40 = vld [vmem:[#allocation4] sm:$0xf] }
 0x109   :  { %1310 = vmatpush1.bf16.msra.mxu0 %v16757_v33  ;;  %1392 = vmatpush1.bf16.msra.mxu1 %v16760_v43  ;;  %v16847_v33 = vld [vmem:[#allocation6 + $0x1e0] ss:$16 sps:$4 sm:$0xff]  }
 0x10a   :  { %1311 = vmatprep.subr.bf16.mxu0 %v16765_v34  ;;  %1393 = vmatprep.subr.bf16.mxu1 %v16768_v44  ;;  %v16850_v34 = vld [vmem:[#allocation6 + $0x1e8] ss:$16 sps:$4 sm:$0xff]  }
 0x10d   :  { %1312 = vmatpush1.bf16.msra.mxu0 %v16763_v37  ;;  %1394 = vmatpush1.bf16.msra.mxu1 %v16766_v47  ;;  %v249_v37 = vlaneseq }
 0x10e   :  { %1313 = vmatprep.subr.bf16.mxu0 %v16771_v38  ;;  %1395 = vmatprep.subr.bf16.mxu1 %v16774_v48 }
 0x10f   :  { %v17789_v38 = vshrl.u32 %v249_v37, 7  ;;  %v16915_v37 = vld [vmem:[#allocation6 + $0x344] ss:$16 sps:$4 sm:$0xff]  }
 0x111   :  { %1314 = vmatpush1.bf16.msra.mxu0 %v16769_v41  ;;  %1396 = vmatpush1.bf16.msra.mxu1 %v16772_v51  ;;  %v17792_v39 = vsub.s32 0, %v17789_v38  ;;  %v17797_v41 = vsub.s32 1, %v17789_v38 }
 0x112   :  { %1315 = vmatprep.subr.bf16.mxu0 %v16777_v42  ;;  %1397 = vmatprep.subr.bf16.mxu1 %v16780_v52  ;;  %v17804_v52 = vsub.s32 3, %v17789_v38 }
 0x113   :  { %v252_v42 = vrot.slane %v17794_v40, %v17792_v39  ;;  %v256_v43 = vrot.slane %v17794_v40, %v17797_v41 }
 0x115   :  { %1316 = vmatpush1.bf16.msra.mxu0 %v16775_v45  ;;  %1398 = vmatpush1.bf16.msra.mxu1 %v16778_v55  ;;  %v16856_v55 = vld [vmem:[#allocation6 + $0x208] ss:$16 sps:$4 sm:$0xff]  }
 0x116   :  { %1317 = vmatprep.subr.bf16.mxu0 %v16783_v46  ;;  %1399 = vmatprep.subr.bf16.mxu1 %v16786_v56 }
 0x119   :  { %1318 = vmatpush1.bf16.msra.mxu0 %v16781_v49  ;;  %1400 = vmatpush1.bf16.msra.mxu1 %v16784_v59  ;;  %v264_v59 = vrot.slane %v17794_v40, %v17804_v52 }
 0x11a   :  { %1319 = vmatprep.subr.bf16.mxu0 %v16789_v50  ;;  %1401 = vmatprep.subr.bf16.mxu1 %v16792_v60  ;;  %v16859_v60 = vld [vmem:[#allocation6 + $0x220] ss:$16 sps:$4 sm:$0xff]  }
 0x11d   :  { %1320 = vmatpush1.bf16.msra.mxu0 %v16787_v53  ;;  %1402 = vmatpush1.bf16.msra.mxu1 %v16790_v63  ;;  %v16870_v63 = vld [vmem:[#allocation6 + $0x24c] ss:$16 sps:$4 sm:$0xff]  }
 0x11e   :  { %1321 = vmatprep.subr.bf16.mxu0 %v16795_v54  ;;  %1403 = vmatprep.subr.bf16.mxu1 %v16798_v0  ;;  %v16853_v54 = vld [vmem:[#allocation6 + $0x200] ss:$16 sps:$4 sm:$0xff]  }
 0x121   :  { %1322 = vmatpush1.bf16.msra.mxu0 %v16793_v57  ;;  %1404 = vmatpush1.bf16.msra.mxu1 %v16796_v3  ;;  %v16861_v57 = vld [vmem:[#allocation6 + $0x224] ss:$16 sps:$4 sm:$0xff]  }
 0x122   :  { %1323 = vmatprep.subr.bf16.mxu0 %v16801_v58  ;;  %1405 = vmatprep.subr.bf16.mxu1 %v16804_v4  ;;  %v16864_v58 = vld [vmem:[#allocation6 + $0x22c] ss:$16 sps:$4 sm:$0xff]   ;;  %v16865_v4 = vld [vmem:[#allocation6 + $0x240] ss:$16 sps:$4 sm:$0xff]  }
 0x125   :  { %1324 = vmatpush1.bf16.msra.mxu0 %v16799_v61  ;;  %1406 = vmatpush1.bf16.msra.mxu1 %v16802_v7  ;;  %v16862_v61 = vld [vmem:[#allocation6 + $0x228] ss:$16 sps:$4 sm:$0xff]   ;;  %v16873_v7 = vld [vmem:[#allocation6 + $0x264] ss:$16 sps:$4 sm:$0xff]  }
 0x126   :  { %1325 = vmatprep.subr.bf16.mxu0 %v16807_v62  ;;  %1407 = vmatprep.subr.bf16.mxu1 %v16810_v8  ;;  %v16867_v62 = vld [vmem:[#allocation6 + $0x244] ss:$16 sps:$4 sm:$0xff]   ;;  %v16876_v8 = vld [vmem:[#allocation6 + $0x26c] ss:$16 sps:$4 sm:$0xff]  }
 0x129   :  { %1326 = vmatpush1.bf16.msra.mxu0 %v16805_v1  ;;  %1408 = vmatpush1.bf16.msra.mxu1 %v16808_v11  ;;  %v16871_v11 = vld [vmem:[#allocation6 + $0x260] ss:$16 sps:$4 sm:$0xff]  }
 0x12a   :  { %1327 = vmatprep.subr.bf16.mxu0 %v16813_v2  ;;  %1409 = vmatprep.subr.bf16.mxu1 %v16816_v12  ;;  %v16874_v12 = vld [vmem:[#allocation6 + $0x268] ss:$16 sps:$4 sm:$0xff]  }
 0x12d   :  { %1328 = vmatpush1.bf16.msra.mxu0 %v16811_v5  ;;  %1410 = vmatpush1.bf16.msra.mxu1 %v16814_v15  ;;  %v16868_v5 = vld [vmem:[#allocation6 + $0x248] ss:$16 sps:$4 sm:$0xff]   ;;  %v16877_v15 = vld [vmem:[#allocation6 + $0x280] ss:$16 sps:$4 sm:$0xff]  }
 0x12e   :  { %1329 = vmatprep.subr.bf16.mxu0 %v16819_v6  ;;  %1411 = vmatprep.subr.bf16.mxu1 %v16822_v16  ;;  %v16880_v16 = vld [vmem:[#allocation6 + $0x288] ss:$16 sps:$4 sm:$0xff]  }
 0x131   :  { %1330 = vmatpush1.bf16.msra.mxu0 %v16817_v9  ;;  %1412 = vmatpush1.bf16.msra.mxu1 %v16820_v19  ;;  %v16883_v19 = vld [vmem:[#allocation6 + $0x2a0] ss:$16 sps:$4 sm:$0xff]  }
 0x132   :  { %1331 = vmatprep.subr.bf16.mxu0 %v16825_v10  ;;  %1413 = vmatprep.subr.bf16.mxu1 %v16828_v20  ;;  %v16886_v20 = vld [vmem:[#allocation6 + $0x2a8] ss:$16 sps:$4 sm:$0xff]  }
 0x135   :  { %1332 = vmatpush1.bf16.msra.mxu0 %v16823_v13  ;;  %1414 = vmatpush1.bf16.msra.mxu1 %v16826_v22  ;;  %v16879_v13 = vld [vmem:[#allocation6 + $0x284] ss:$16 sps:$4 sm:$0xff]   ;;  %v16894_v22 = vld [vmem:[#allocation6 + $0x2cc] ss:$16 sps:$4 sm:$0xff]  }
 0x136   :  { %1333 = vmatprep.subr.bf16.mxu0 %v16831_v14  ;;  %1415 = vmatprep.subr.bf16.mxu1 %v16834_v23  ;;  %v16882_v14 = vld [vmem:[#allocation6 + $0x28c] ss:$16 sps:$4 sm:$0xff]   ;;  %v16889_v23 = vld [vmem:[#allocation6 + $0x2c0] ss:$16 sps:$4 sm:$0xff]  }
 0x139   :  { %1334 = vmatpush1.bf16.msra.mxu0 %v16829_v17  ;;  %1416 = vmatpush1.bf16.msra.mxu1 %v16832_v24  ;;  %v16885_v17 = vld [vmem:[#allocation6 + $0x2a4] ss:$16 sps:$4 sm:$0xff]   ;;  %v16892_v24 = vld [vmem:[#allocation6 + $0x2c8] ss:$16 sps:$4 sm:$0xff]  }
 0x13a   :  { %1335 = vmatprep.subr.bf16.mxu0 %v16837_v18  ;;  %1417 = vmatprep.subr.bf16.mxu1 %v16840_v25  ;;  %v16888_v18 = vld [vmem:[#allocation6 + $0x2ac] ss:$16 sps:$4 sm:$0xff]   ;;  %v16897_v25 = vld [vmem:[#allocation6 + $0x2e4] ss:$16 sps:$4 sm:$0xff]  }
 0x13d   :  { %1336 = vmatpush1.bf16.msra.mxu0 %v16835_v21  ;;  %1418 = vmatpush1.bf16.msra.mxu1 %v16838_v26  ;;  %v16891_v21 = vld [vmem:[#allocation6 + $0x2c4] ss:$16 sps:$4 sm:$0xff]   ;;  %v16900_v26 = vld [vmem:[#allocation6 + $0x2ec] ss:$16 sps:$4 sm:$0xff]  }
 0x13e   :  { %1337 = vmatprep.subr.bf16.mxu0 %v16843_v27  ;;  %1419 = vmatprep.subr.bf16.mxu1 %v16846_v28  ;;  %v16895_v27 = vld [vmem:[#allocation6 + $0x2e0] ss:$16 sps:$4 sm:$0xff]   ;;  %v16898_v28 = vld [vmem:[#allocation6 + $0x2e8] ss:$16 sps:$4 sm:$0xff]  }
 0x141   :  { %1338 = vmatpush1.bf16.msra.mxu0 %v16841_v29  ;;  %1420 = vmatpush1.bf16.msra.mxu1 %v16844_v30  ;;  %v16903_v29 = vld [vmem:[#allocation6 + $0x304] ss:$16 sps:$4 sm:$0xff]   ;;  %v16906_v30 = vld [vmem:[#allocation6 + $0x30c] ss:$16 sps:$4 sm:$0xff]  }
 0x142   :  { %1339 = vmatprep.subr.bf16.mxu0 %v16849_v31  ;;  %1421 = vmatprep.subr.bf16.mxu1 %v16852_v32  ;;  %v16901_v31 = vld [vmem:[#allocation6 + $0x300] ss:$16 sps:$4 sm:$0xff]   ;;  %v16904_v32 = vld [vmem:[#allocation6 + $0x308] ss:$16 sps:$4 sm:$0xff]  }
 0x145   :  { %1340 = vmatpush1.bf16.msra.mxu0 %v16847_v33  ;;  %1422 = vmatpush1.bf16.msra.mxu1 %v16850_v34  ;;  %v16909_v33 = vld [vmem:[#allocation6 + $0x324] ss:$16 sps:$4 sm:$0xff]   ;;  %v16912_v34 = vld [vmem:[#allocation6 + $0x32c] ss:$16 sps:$4 sm:$0xff]  }
 0x146   :  { %1350 = vmatprep.subr.bf16.mxu0 %v16855_v35  ;;  %1432 = vmatprep.subr.bf16.mxu1 %v16858_v36  ;;  %v16907_v35 = vld [vmem:[#allocation6 + $0x320] ss:$16 sps:$4 sm:$0xff]   ;;  %v16910_v36 = vld [vmem:[#allocation6 + $0x328] ss:$16 sps:$4 sm:$0xff]  }
 0x1db   :  { %v463_v44 = vpop.f32.mrb[0].mxu0  ;;  %v17808_v0 = vpop.f32.mrb[0].mxu1 }
 0x1dc   :  { %v464_v45 = vadd.f32 %v463_v44, %v252_v42  ;;  %v465_v46 = vpop.f32.mrb[1].mxu0  ;;  %v506_v1 = vpop.f32.mrb[1].mxu1  ;;  %v16918_v42 = vld [vmem:[#allocation6 + $0x34c] ss:$16 sps:$4 sm:$0xff]   ;;  %v16916_v44 = vld [vmem:[#allocation6 + $0x348] ss:$16 sps:$4 sm:$0xff]  }
 0x1dd   :  { %v466_v47 = vadd.f32 %v465_v46, %v256_v43  ;;  %v467_v48 = vpop.f32.mrb[2].mxu0  ;;  %v507_v2 = vadd.f32 %v506_v1, %v264_v59  ;;  %v508_v3 = vpop.f32.mrb[2].mxu1  ;;  %v16913_v43 = vld [vmem:[#allocation6 + $0x340] ss:$16 sps:$4 sm:$0xff]   ;;  %v16924_v46 = vld [vmem:[#allocation6 + $0x36c] ss:$16 sps:$4 sm:$0xff]  }
 0x1de   :  { %v511_v49 = vmax.f32 %v464_v45, 0.0  ;;  %v468_v50 = vpop.f32.mrb[3].mxu0  ;;  %v509_v6 = vpop.f32.mrb[3].mxu1  ;;  %v16921_v45 = vld [vmem:[#allocation6 + $0x364] ss:$16 sps:$4 sm:$0xff]  }
 0x1df   :  { %v512_v51 = vmax.f32 %v466_v47, 0.0  ;;  %v514_v9 = vmax.f32 %v507_v2, 0.0  ;;  %v16919_v47 = vld [vmem:[#allocation6 + $0x360] ss:$16 sps:$4 sm:$0xff]   ;;  %v16922_v48 = vld [vmem:[#allocation6 + $0x368] ss:$16 sps:$4 sm:$0xff]  }
 0x1e0   :  { %v515_v56 = vpack.c.bf16 %v511_v49, %v511_v49  ;;  %v16927_v49 = vld [vmem:[#allocation6 + $0x384] ss:$16 sps:$4 sm:$0xff]   ;;  %v16930_v50 = vld [vmem:[#allocation6 + $0x38c] ss:$16 sps:$4 sm:$0xff]  }
 0x1e1   :  { %v516_v53 = vpack.c.bf16 %v512_v51, %v512_v51  ;;  %v518_v10 = vpack.c.bf16 %v514_v9, %v514_v9  ;;  %v16925_v51 = vld [vmem:[#allocation6 + $0x380] ss:$16 sps:$4 sm:$0xff]   ;;  %v16945_v2 = vld [vmem:[#allocation6 + $0x3e4] ss:$16 sps:$4 sm:$0xff]   ;;  %v16948_v3 = vld [vmem:[#allocation6 + $0x3ec] ss:$16 sps:$4 sm:$0xff]  }
 0x1e2   :  { %v16952_v9 = vld [vmem:[#allocation9 + $0x8] ss:$16 sps:$4 sm:$0xff]  }
 0x1e3   :  { %1341 = vmatprep.mubr.bf16.mxu0 %v516_v53  ;;  %1423 = vmatprep.mubr.bf16.mxu1 %v516_v53  ;;  %v16928_v53 = vld [vmem:[#allocation6 + $0x388] ss:$16 sps:$4 sm:$0xff]  }
 0x1e4   :  { %1342 = vmatmul.mubr.bf16.vlgmr.msra.gmra.mrb[4].mxu0 %v515_v56  ;;  %1424 = vmatmul.mubr.bf16.vlgmr.msra.gmra.mrb[4].mxu1 %v515_v56  ;;  %v16936_v56 = vld [vmem:[#allocation6 + $0x3ac] ss:$16 sps:$4 sm:$0xff]  }
 0x1e5   :  { %1351 = vmatpush1.bf16.msra.mxu0 %v16853_v54  ;;  %1433 = vmatpush1.bf16.msra.mxu1 %v16856_v55  ;;  %v17811_v54 = vsub.s32 2, %v17789_v38  ;;  %v16933_v55 = vld [vmem:[#allocation6 + $0x3a4] ss:$16 sps:$4 sm:$0xff]  }
 0x1e6   :  { %1352 = vmatprep.subr.bf16.mxu0 %v16861_v57  ;;  %1434 = vmatprep.subr.bf16.mxu1 %v16864_v58  ;;  %v16931_v57 = vld [vmem:[#allocation6 + $0x3a0] ss:$16 sps:$4 sm:$0xff]   ;;  %v16934_v58 = vld [vmem:[#allocation6 + $0x3a8] ss:$16 sps:$4 sm:$0xff]  }
 0x1e7   :  { %1382 = vmatprep.mubr.bf16.mxu0 %v518_v10  ;;  %1464 = vmatprep.mubr.bf16.mxu1 %v518_v10  ;;  %v260_v59 = vrot.slane %v17794_v40, %v17811_v54  ;;  %v16951_v40 = vld [vmem:[#allocation9 + $0x4] ss:$16 sps:$4 sm:$0xff]  }
 0x1e9   :  { %1353 = vmatpush1.bf16.msra.mxu0 %v16859_v60  ;;  %1435 = vmatpush1.bf16.msra.mxu1 %v16862_v61  ;;  %v16939_v60 = vld [vmem:[#allocation6 + $0x3c4] ss:$16 sps:$4 sm:$0xff]   ;;  %v16942_v61 = vld [vmem:[#allocation6 + $0x3cc] ss:$16 sps:$4 sm:$0xff]   ;;  %v505_v1 = vadd.f32 %v17808_v0, %v260_v59  ;;  %v16957_v0 = vld [vmem:[#allocation9 + $0x24] ss:$16 sps:$4 sm:$0xff]  }
 0x1ea   :  { %1354 = vmatprep.subr.bf16.mxu0 %v16867_v62  ;;  %1436 = vmatprep.subr.bf16.mxu1 %v16870_v63  ;;  %v16937_v62 = vld [vmem:[#allocation6 + $0x3c0] ss:$16 sps:$4 sm:$0xff]   ;;  %v16940_v63 = vld [vmem:[#allocation6 + $0x3c8] ss:$16 sps:$4 sm:$0xff]   ;;  %v17018_v59 = vld [vmem:[#allocation9 + $0x168] ss:$16 sps:$4 sm:$0xff]  }
 0x1eb   :  { %v513_v6 = vmax.f32 %v505_v1, 0.0  ;;  %v17029_v1 = vld [vmem:[#allocation9 + $0x1a4] ss:$16 sps:$4 sm:$0xff]  }
 0x1ed   :  { %1355 = vmatpush1.bf16.msra.mxu0 %v16865_v4  ;;  %1437 = vmatpush1.bf16.msra.mxu1 %v16868_v5  ;;  %v16943_v4 = vld [vmem:[#allocation6 + $0x3e0] ss:$16 sps:$4 sm:$0xff]   ;;  %v16946_v5 = vld [vmem:[#allocation6 + $0x3e8] ss:$16 sps:$4 sm:$0xff]   ;;  %v517_v10 = vpack.c.bf16 %v513_v6, %v513_v6 }
 0x1ee   :  { %1356 = vmatprep.subr.bf16.mxu0 %v16873_v7  ;;  %1438 = vmatprep.subr.bf16.mxu1 %v16876_v8  ;;  %v16954_v7 = vld [vmem:[#allocation9 + $0xc] ss:$16 sps:$4 sm:$0xff]   ;;  %v16949_v8 = vld [vmem:[#allocation9] ss:$16 sps:$4 sm:$0xff]  }
 0x1ef   :  { %v17038_v6 = vld [vmem:[#allocation9 + $0x1cc] ss:$16 sps:$4 sm:$0xff]  }
 0x1f1   :  { %1357 = vmatpush1.bf16.msra.mxu0 %v16871_v11  ;;  %1439 = vmatpush1.bf16.msra.mxu1 %v16874_v12  ;;  %v16960_v11 = vld [vmem:[#allocation9 + $0x2c] ss:$16 sps:$4 sm:$0xff]   ;;  %v16955_v12 = vld [vmem:[#allocation9 + $0x20] ss:$16 sps:$4 sm:$0xff]  }
 0x1f2   :  { %1358 = vmatprep.subr.bf16.mxu0 %v16879_v13  ;;  %1440 = vmatprep.subr.bf16.mxu1 %v16882_v14  ;;  %v16958_v13 = vld [vmem:[#allocation9 + $0x28] ss:$16 sps:$4 sm:$0xff]   ;;  %v16963_v14 = vld [vmem:[#allocation9 + $0x44] ss:$16 sps:$4 sm:$0xff]  }
 0x1f5   :  { %1359 = vmatpush1.bf16.msra.mxu0 %v16877_v15  ;;  %1441 = vmatpush1.bf16.msra.mxu1 %v16880_v16  ;;  %v16966_v15 = vld [vmem:[#allocation9 + $0x4c] ss:$16 sps:$4 sm:$0xff]   ;;  %v16961_v16 = vld [vmem:[#allocation9 + $0x40] ss:$16 sps:$4 sm:$0xff]  }
 0x1f6   :  { %1360 = vmatprep.subr.bf16.mxu0 %v16885_v17  ;;  %1442 = vmatprep.subr.bf16.mxu1 %v16888_v18  ;;  %v16964_v17 = vld [vmem:[#allocation9 + $0x48] ss:$16 sps:$4 sm:$0xff]   ;;  %v16969_v18 = vld [vmem:[#allocation9 + $0x64] ss:$16 sps:$4 sm:$0xff]  }
 0x1f9   :  { %1361 = vmatpush1.bf16.msra.mxu0 %v16883_v19  ;;  %1443 = vmatpush1.bf16.msra.mxu1 %v16886_v20  ;;  %v16972_v19 = vld [vmem:[#allocation9 + $0x6c] ss:$16 sps:$4 sm:$0xff]   ;;  %v16967_v20 = vld [vmem:[#allocation9 + $0x60] ss:$16 sps:$4 sm:$0xff]  }
 0x1fa   :  { %1362 = vmatprep.subr.bf16.mxu0 %v16891_v21  ;;  %1444 = vmatprep.subr.bf16.mxu1 %v16894_v22  ;;  %v16970_v21 = vld [vmem:[#allocation9 + $0x68] ss:$16 sps:$4 sm:$0xff]   ;;  %v16975_v22 = vld [vmem:[#allocation9 + $0x84] ss:$16 sps:$4 sm:$0xff]  }
 0x1fd   :  { %1363 = vmatpush1.bf16.msra.mxu0 %v16889_v23  ;;  %1445 = vmatpush1.bf16.msra.mxu1 %v16892_v24  ;;  %v16978_v23 = vld [vmem:[#allocation9 + $0x8c] ss:$16 sps:$4 sm:$0xff]   ;;  %v16973_v24 = vld [vmem:[#allocation9 + $0x80] ss:$16 sps:$4 sm:$0xff]  }
 0x1fe   :  { %1364 = vmatprep.subr.bf16.mxu0 %v16897_v25  ;;  %1446 = vmatprep.subr.bf16.mxu1 %v16900_v26  ;;  %v16976_v25 = vld [vmem:[#allocation9 + $0x88] ss:$16 sps:$4 sm:$0xff]   ;;  %v16981_v26 = vld [vmem:[#allocation9 + $0xa4] ss:$16 sps:$4 sm:$0xff]  }
 0x201   :  { %1365 = vmatpush1.bf16.msra.mxu0 %v16895_v27  ;;  %1447 = vmatpush1.bf16.msra.mxu1 %v16898_v28  ;;  %v16984_v27 = vld [vmem:[#allocation9 + $0xac] ss:$16 sps:$4 sm:$0xff]   ;;  %v16979_v28 = vld [vmem:[#allocation9 + $0xa0] ss:$16 sps:$4 sm:$0xff]  }
 0x202   :  { %1366 = vmatprep.subr.bf16.mxu0 %v16903_v29  ;;  %1448 = vmatprep.subr.bf16.mxu1 %v16906_v30  ;;  %v16982_v29 = vld [vmem:[#allocation9 + $0xa8] ss:$16 sps:$4 sm:$0xff]   ;;  %v16987_v30 = vld [vmem:[#allocation9 + $0xc4] ss:$16 sps:$4 sm:$0xff]  }
 0x205   :  { %1367 = vmatpush1.bf16.msra.mxu0 %v16901_v31  ;;  %1449 = vmatpush1.bf16.msra.mxu1 %v16904_v32  ;;  %v16990_v31 = vld [vmem:[#allocation9 + $0xcc] ss:$16 sps:$4 sm:$0xff]   ;;  %v16985_v32 = vld [vmem:[#allocation9 + $0xc0] ss:$16 sps:$4 sm:$0xff]  }
 0x206   :  { %1368 = vmatprep.subr.bf16.mxu0 %v16909_v33  ;;  %1450 = vmatprep.subr.bf16.mxu1 %v16912_v34  ;;  %v16988_v33 = vld [vmem:[#allocation9 + $0xc8] ss:$16 sps:$4 sm:$0xff]   ;;  %v16993_v34 = vld [vmem:[#allocation9 + $0xe4] ss:$16 sps:$4 sm:$0xff]  }
 0x209   :  { %1369 = vmatpush1.bf16.msra.mxu0 %v16907_v35  ;;  %1451 = vmatpush1.bf16.msra.mxu1 %v16910_v36  ;;  %v16996_v35 = vld [vmem:[#allocation9 + $0xec] ss:$16 sps:$4 sm:$0xff]   ;;  %v16991_v36 = vld [vmem:[#allocation9 + $0xe0] ss:$16 sps:$4 sm:$0xff]  }
 0x20a   :  { %1370 = vmatprep.subr.bf16.mxu0 %v16915_v37  ;;  %1452 = vmatprep.subr.bf16.mxu1 %v16918_v42  ;;  %v16994_v37 = vld [vmem:[#allocation9 + $0xe8] ss:$16 sps:$4 sm:$0xff]   ;;  %v16999_v42 = vld [vmem:[#allocation9 + $0x104] ss:$16 sps:$4 sm:$0xff]  }
 0x20d   :  { %1371 = vmatpush1.bf16.msra.mxu0 %v16913_v43  ;;  %1453 = vmatpush1.bf16.msra.mxu1 %v16916_v44  ;;  %v17002_v43 = vld [vmem:[#allocation9 + $0x10c] ss:$16 sps:$4 sm:$0xff]   ;;  %v16997_v44 = vld [vmem:[#allocation9 + $0x100] ss:$16 sps:$4 sm:$0xff]  }
 0x20e   :  { %1372 = vmatprep.subr.bf16.mxu0 %v16921_v45  ;;  %1454 = vmatprep.subr.bf16.mxu1 %v16924_v46  ;;  %v17000_v45 = vld [vmem:[#allocation9 + $0x108] ss:$16 sps:$4 sm:$0xff]   ;;  %v17005_v46 = vld [vmem:[#allocation9 + $0x124] ss:$16 sps:$4 sm:$0xff]  }
 0x211   :  { %1373 = vmatpush1.bf16.msra.mxu0 %v16919_v47  ;;  %1455 = vmatpush1.bf16.msra.mxu1 %v16922_v48  ;;  %v17008_v47 = vld [vmem:[#allocation9 + $0x12c] ss:$16 sps:$4 sm:$0xff]   ;;  %v17003_v48 = vld [vmem:[#allocation9 + $0x120] ss:$16 sps:$4 sm:$0xff]  }
 0x212   :  { %1374 = vmatprep.subr.bf16.mxu0 %v16927_v49  ;;  %1456 = vmatprep.subr.bf16.mxu1 %v16930_v50  ;;  %v17006_v49 = vld [vmem:[#allocation9 + $0x128] ss:$16 sps:$4 sm:$0xff]   ;;  %v17011_v50 = vld [vmem:[#allocation9 + $0x144] ss:$16 sps:$4 sm:$0xff]  }
 0x215   :  { %1375 = vmatpush1.bf16.msra.mxu0 %v16925_v51  ;;  %1457 = vmatpush1.bf16.msra.mxu1 %v16928_v53  ;;  %v17014_v51 = vld [vmem:[#allocation9 + $0x14c] ss:$16 sps:$4 sm:$0xff]   ;;  %v17009_v53 = vld [vmem:[#allocation9 + $0x140] ss:$16 sps:$4 sm:$0xff]  }
 0x216   :  { %1376 = vmatprep.subr.bf16.mxu0 %v16933_v55  ;;  %1458 = vmatprep.subr.bf16.mxu1 %v16936_v56  ;;  %v17012_v55 = vld [vmem:[#allocation9 + $0x148] ss:$16 sps:$4 sm:$0xff]   ;;  %v17017_v56 = vld [vmem:[#allocation9 + $0x164] ss:$16 sps:$4 sm:$0xff]  }
 0x219   :  { %1377 = vmatpush1.bf16.msra.mxu0 %v16931_v57  ;;  %1459 = vmatpush1.bf16.msra.mxu1 %v16934_v58  ;;  %v17020_v57 = vld [vmem:[#allocation9 + $0x16c] ss:$16 sps:$4 sm:$0xff]   ;;  %v17015_v58 = vld [vmem:[#allocation9 + $0x160] ss:$16 sps:$4 sm:$0xff]  }
 0x21a   :  { %1378 = vmatprep.subr.bf16.mxu0 %v16939_v60  ;;  %1460 = vmatprep.subr.bf16.mxu1 %v16942_v61  ;;  %v17023_v60 = vld [vmem:[#allocation9 + $0x184] ss:$16 sps:$4 sm:$0xff]   ;;  %v17026_v61 = vld [vmem:[#allocation9 + $0x18c] ss:$16 sps:$4 sm:$0xff]  }
 0x21d   :  { %1379 = vmatpush1.bf16.msra.mxu0 %v16937_v62  ;;  %1461 = vmatpush1.bf16.msra.mxu1 %v16940_v63  ;;  %v17021_v62 = vld [vmem:[#allocation9 + $0x180] ss:$16 sps:$4 sm:$0xff]   ;;  %v17024_v63 = vld [vmem:[#allocation9 + $0x188] ss:$16 sps:$4 sm:$0xff]  }
 0x21e   :  { %1380 = vmatprep.subr.bf16.mxu0 %v16945_v2  ;;  %1462 = vmatprep.subr.bf16.mxu1 %v16948_v3  ;;  %v17032_v2 = vld [vmem:[#allocation9 + $0x1ac] ss:$16 sps:$4 sm:$0xff]   ;;  %v17027_v3 = vld [vmem:[#allocation9 + $0x1a0] ss:$16 sps:$4 sm:$0xff]  }
 0x221   :  { %1381 = vmatpush1.bf16.msra.mxu0 %v16943_v4  ;;  %1463 = vmatpush1.bf16.msra.mxu1 %v16946_v5  ;;  %v17030_v4 = vld [vmem:[#allocation9 + $0x1a8] ss:$16 sps:$4 sm:$0xff]   ;;  %v17035_v5 = vld [vmem:[#allocation9 + $0x1c4] ss:$16 sps:$4 sm:$0xff]  }
 0x222   :  { %2271 = vmatprep.subr.bf16.mxu0 %v16951_v40  ;;  %2353 = vmatprep.subr.bf16.mxu1 %v16954_v7  ;;  %v17033_v40 = vld [vmem:[#allocation9 + $0x1c0] ss:$16 sps:$4 sm:$0xff]   ;;  %v17036_v7 = vld [vmem:[#allocation9 + $0x1c8] ss:$16 sps:$4 sm:$0xff]  }
 0x224   :  { %1383 = vmatmul.mubr.bf16.vlgmr.msra.gmra.mrb[4].mxu0 %v517_v10  ;;  %1465 = vmatmul.mubr.bf16.vlgmr.msra.gmra.mrb[4].mxu1 %v517_v10  ;;  %v17039_v10 = vld [vmem:[#allocation9 + $0x1e0] ss:$16 sps:$4 sm:$0xff]  }
 0x225   :  { %2272 = vmatpush1.bf16.msra.mxu0 %v16949_v8  ;;  %2354 = vmatpush1.bf16.msra.mxu1 %v16952_v9  ;;  %v17041_v8 = vld [vmem:[#allocation9 + $0x1e4] ss:$16 sps:$4 sm:$0xff]   ;;  %v17044_v9 = vld [vmem:[#allocation9 + $0x1ec] ss:$16 sps:$4 sm:$0xff]  }
 0x226   :  { %2273 = vmatprep.subr.bf16.mxu0 %v16957_v0  ;;  %2355 = vmatprep.subr.bf16.mxu1 %v16960_v11  ;;  %v17042_v0 = vld [vmem:[#allocation9 + $0x1e8] ss:$16 sps:$4 sm:$0xff]   ;;  %v17047_v11 = vld [vmem:[#allocation9 + $0x204] ss:$16 sps:$4 sm:$0xff]  }
 0x229   :  { %2274 = vmatpush1.bf16.msra.mxu0 %v16955_v12  ;;  %2356 = vmatpush1.bf16.msra.mxu1 %v16958_v13  ;;  %v17050_v12 = vld [vmem:[#allocation9 + $0x20c] ss:$16 sps:$4 sm:$0xff]  }
 0x22a   :  { %2275 = vmatprep.subr.bf16.mxu0 %v16963_v14  ;;  %2357 = vmatprep.subr.bf16.mxu1 %v16966_v15  ;;  %v17816_v13 = vld [vmem:[#allocation7] sm:$0xf] }
 0x22b   :  { %v652_v14 = vrot.slane %v17816_v13, %v17792_v39  ;;  %v656_v15 = vrot.slane %v17816_v13, %v17797_v41 }
 0x22d   :  { %2276 = vmatpush1.bf16.msra.mxu0 %v16961_v16  ;;  %2358 = vmatpush1.bf16.msra.mxu1 %v16964_v17  ;;  %v664_v16 = vrot.slane %v17816_v13, %v17804_v52 }
 0x22e   :  { %2277 = vmatprep.subr.bf16.mxu0 %v16969_v18  ;;  %2359 = vmatprep.subr.bf16.mxu1 %v16972_v19 }
 0x231   :  { %2278 = vmatpush1.bf16.msra.mxu0 %v16967_v20  ;;  %2360 = vmatpush1.bf16.msra.mxu1 %v16970_v21 }
 0x232   :  { %2279 = vmatprep.subr.bf16.mxu0 %v16975_v22  ;;  %2361 = vmatprep.subr.bf16.mxu1 %v16978_v23 }
 0x235   :  { %2280 = vmatpush1.bf16.msra.mxu0 %v16973_v24  ;;  %2362 = vmatpush1.bf16.msra.mxu1 %v16976_v25 }
 0x236   :  { %2281 = vmatprep.subr.bf16.mxu0 %v16981_v26  ;;  %2363 = vmatprep.subr.bf16.mxu1 %v16984_v27 }
 0x239   :  { %2282 = vmatpush1.bf16.msra.mxu0 %v16979_v28  ;;  %2364 = vmatpush1.bf16.msra.mxu1 %v16982_v29 }
 0x23a   :  { %2283 = vmatprep.subr.bf16.mxu0 %v16987_v30  ;;  %2365 = vmatprep.subr.bf16.mxu1 %v16990_v31 }
 0x23d   :  { %2284 = vmatpush1.bf16.msra.mxu0 %v16985_v32  ;;  %2366 = vmatpush1.bf16.msra.mxu1 %v16988_v33  ;;  %v17045_v32 = vld [vmem:[#allocation9 + $0x200] ss:$16 sps:$4 sm:$0xff]   ;;  %v17048_v33 = vld [vmem:[#allocation9 + $0x208] ss:$16 sps:$4 sm:$0xff]  }
 0x23e   :  { %2285 = vmatprep.subr.bf16.mxu0 %v16993_v34  ;;  %2367 = vmatprep.subr.bf16.mxu1 %v16996_v35  ;;  %v17053_v35 = vld [vmem:[#allocation9 + $0x224] ss:$16 sps:$4 sm:$0xff]  }
 0x241   :  { %2286 = vmatpush1.bf16.msra.mxu0 %v16991_v36  ;;  %2368 = vmatpush1.bf16.msra.mxu1 %v16994_v37  ;;  %v17056_v36 = vld [vmem:[#allocation9 + $0x22c] ss:$16 sps:$4 sm:$0xff]  }
 0x242   :  { %2287 = vmatprep.subr.bf16.mxu0 %v16999_v42  ;;  %2369 = vmatprep.subr.bf16.mxu1 %v17002_v43  ;;  %v17051_v42 = vld [vmem:[#allocation9 + $0x220] ss:$16 sps:$4 sm:$0xff]   ;;  %v17054_v43 = vld [vmem:[#allocation9 + $0x228] ss:$16 sps:$4 sm:$0xff]  }
 0x245   :  { %2288 = vmatpush1.bf16.msra.mxu0 %v16997_v44  ;;  %2370 = vmatpush1.bf16.msra.mxu1 %v17000_v45  ;;  %v17059_v44 = vld [vmem:[#allocation9 + $0x244] ss:$16 sps:$4 sm:$0xff]   ;;  %v17062_v45 = vld [vmem:[#allocation9 + $0x24c] ss:$16 sps:$4 sm:$0xff]  }
 0x246   :  { %2289 = vmatprep.subr.bf16.mxu0 %v17005_v46  ;;  %2371 = vmatprep.subr.bf16.mxu1 %v17008_v47  ;;  %v17057_v46 = vld [vmem:[#allocation9 + $0x240] ss:$16 sps:$4 sm:$0xff]   ;;  %v17060_v47 = vld [vmem:[#allocation9 + $0x248] ss:$16 sps:$4 sm:$0xff]  }
 0x249   :  { %2290 = vmatpush1.bf16.msra.mxu0 %v17003_v48  ;;  %2372 = vmatpush1.bf16.msra.mxu1 %v17006_v49  ;;  %v17065_v48 = vld [vmem:[#allocation9 + $0x264] ss:$16 sps:$4 sm:$0xff]   ;;  %v17068_v49 = vld [vmem:[#allocation9 + $0x26c] ss:$16 sps:$4 sm:$0xff]  }
 0x24a   :  { %2291 = vmatprep.subr.bf16.mxu0 %v17011_v50  ;;  %2373 = vmatprep.subr.bf16.mxu1 %v17014_v51  ;;  %v17063_v50 = vld [vmem:[#allocation9 + $0x260] ss:$16 sps:$4 sm:$0xff]   ;;  %v17066_v51 = vld [vmem:[#allocation9 + $0x268] ss:$16 sps:$4 sm:$0xff]  }
 0x24d   :  { %2292 = vmatpush1.bf16.msra.mxu0 %v17009_v53  ;;  %2374 = vmatpush1.bf16.msra.mxu1 %v17012_v55  ;;  %v17071_v53 = vld [vmem:[#allocation9 + $0x284] ss:$16 sps:$4 sm:$0xff]   ;;  %v17074_v55 = vld [vmem:[#allocation9 + $0x28c] ss:$16 sps:$4 sm:$0xff]  }
 0x24e   :  { %2293 = vmatprep.subr.bf16.mxu0 %v17017_v56  ;;  %2375 = vmatprep.subr.bf16.mxu1 %v17020_v57  ;;  %v17069_v56 = vld [vmem:[#allocation9 + $0x280] ss:$16 sps:$4 sm:$0xff]   ;;  %v17072_v57 = vld [vmem:[#allocation9 + $0x288] ss:$16 sps:$4 sm:$0xff]  }
 0x251   :  { %2294 = vmatpush1.bf16.msra.mxu0 %v17015_v58  ;;  %2376 = vmatpush1.bf16.msra.mxu1 %v17018_v59  ;;  %v17077_v58 = vld [vmem:[#allocation9 + $0x2a4] ss:$16 sps:$4 sm:$0xff]   ;;  %v17080_v59 = vld [vmem:[#allocation9 + $0x2ac] ss:$16 sps:$4 sm:$0xff]  }
 0x252   :  { %2295 = vmatprep.subr.bf16.mxu0 %v17023_v60  ;;  %2377 = vmatprep.subr.bf16.mxu1 %v17026_v61  ;;  %v17075_v60 = vld [vmem:[#allocation9 + $0x2a0] ss:$16 sps:$4 sm:$0xff]   ;;  %v17078_v61 = vld [vmem:[#allocation9 + $0x2a8] ss:$16 sps:$4 sm:$0xff]  }
 0x255   :  { %2296 = vmatpush1.bf16.msra.mxu0 %v17021_v62  ;;  %2378 = vmatpush1.bf16.msra.mxu1 %v17024_v63  ;;  %v17083_v62 = vld [vmem:[#allocation9 + $0x2c4] ss:$16 sps:$4 sm:$0xff]   ;;  %v17086_v63 = vld [vmem:[#allocation9 + $0x2cc] ss:$16 sps:$4 sm:$0xff]  }
 0x256   :  { %2297 = vmatprep.subr.bf16.mxu0 %v17029_v1  ;;  %2379 = vmatprep.subr.bf16.mxu1 %v17032_v2  ;;  %v17081_v1 = vld [vmem:[#allocation9 + $0x2c0] ss:$16 sps:$4 sm:$0xff]   ;;  %v17084_v2 = vld [vmem:[#allocation9 + $0x2c8] ss:$16 sps:$4 sm:$0xff]  }
 0x259   :  { %2298 = vmatpush1.bf16.msra.mxu0 %v17027_v3  ;;  %2380 = vmatpush1.bf16.msra.mxu1 %v17030_v4  ;;  %v17089_v3 = vld [vmem:[#allocation9 + $0x2e4] ss:$16 sps:$4 sm:$0xff]   ;;  %v17092_v4 = vld [vmem:[#allocation9 + $0x2ec] ss:$16 sps:$4 sm:$0xff]  }
 0x25a   :  { %2299 = vmatprep.subr.bf16.mxu0 %v17035_v5  ;;  %2381 = vmatprep.subr.bf16.mxu1 %v17038_v6  ;;  %v17087_v5 = vld [vmem:[#allocation9 + $0x2e0] ss:$16 sps:$4 sm:$0xff]   ;;  %v17090_v6 = vld [vmem:[#allocation9 + $0x2e8] ss:$16 sps:$4 sm:$0xff]  }
 0x25d   :  { %2300 = vmatpush1.bf16.msra.mxu0 %v17033_v40  ;;  %2382 = vmatpush1.bf16.msra.mxu1 %v17036_v7  ;;  %v17095_v40 = vld [vmem:[#allocation9 + $0x304] ss:$16 sps:$4 sm:$0xff]   ;;  %v17098_v7 = vld [vmem:[#allocation9 + $0x30c] ss:$16 sps:$4 sm:$0xff]  }
 0x25e   :  { %2301 = vmatprep.subr.bf16.mxu0 %v17041_v8  ;;  %2383 = vmatprep.subr.bf16.mxu1 %v17044_v9  ;;  %v17093_v8 = vld [vmem:[#allocation9 + $0x300] ss:$16 sps:$4 sm:$0xff]   ;;  %v17096_v9 = vld [vmem:[#allocation9 + $0x308] ss:$16 sps:$4 sm:$0xff]  }
 0x261   :  { %2302 = vmatpush1.bf16.msra.mxu0 %v17039_v10  ;;  %2384 = vmatpush1.bf16.msra.mxu1 %v17042_v0  ;;  %v17101_v10 = vld [vmem:[#allocation9 + $0x324] ss:$16 sps:$4 sm:$0xff]   ;;  %v17104_v0 = vld [vmem:[#allocation9 + $0x32c] ss:$16 sps:$4 sm:$0xff]  }
 0x262   :  { %2312 = vmatprep.subr.bf16.mxu0 %v17047_v11  ;;  %2394 = vmatprep.subr.bf16.mxu1 %v17050_v12  ;;  %v17099_v11 = vld [vmem:[#allocation9 + $0x320] ss:$16 sps:$4 sm:$0xff]   ;;  %v17102_v12 = vld [vmem:[#allocation9 + $0x328] ss:$16 sps:$4 sm:$0xff]  }
 0x2f7   :  { %v1384_v17 = vpop.f32.mrb[4].mxu0  ;;  %v17824_v18 = vpop.f32.mrb[4].mxu1 }
 0x2f8   :  { %v16499_v19 = vadd.f32 %v1384_v17, %v652_v14  ;;  %v1386_v20 = vpop.f32.mrb[5].mxu0  ;;  %v1468_v21 = vpop.f32.mrb[5].mxu1  ;;  %v17107_v14 = vld [vmem:[#allocation9 + $0x344] ss:$16 sps:$4 sm:$0xff]   ;;  %v17108_v17 = vld [vmem:[#allocation9 + $0x348] ss:$16 sps:$4 sm:$0xff]  }
 0x2f9   :  { %v16500_v22 = vadd.f32 %v1386_v20, %v656_v15  ;;  %v16502_v23 = vadd.f32 %v1468_v21, %v664_v16  ;;  %v1388_v24 = vpop.f32.mrb[6].mxu0  ;;  %v1470_v25 = vpop.f32.mrb[6].mxu1  ;;  %v17110_v15 = vld [vmem:[#allocation9 + $0x34c] ss:$16 sps:$4 sm:$0xff]   ;;  %v17105_v16 = vld [vmem:[#allocation9 + $0x340] ss:$16 sps:$4 sm:$0xff]  }
 0x2fa   :  { %v1473_v26 = vmax.f32 %v16499_v19, 0.0  ;;  %v1389_v27 = vpop.f32.mrb[7].mxu0  ;;  %v1471_v28 = vpop.f32.mrb[7].mxu1  ;;  %v17113_v19 = vld [vmem:[#allocation9 + $0x364] ss:$16 sps:$4 sm:$0xff]  }
 0x2fb   :  { %v1474_v29 = vmax.f32 %v16500_v22, 0.0  ;;  %v1476_v30 = vmax.f32 %v16502_v23, 0.0  ;;  %v17116_v20 = vld [vmem:[#allocation9 + $0x36c] ss:$16 sps:$4 sm:$0xff]   ;;  %v17111_v21 = vld [vmem:[#allocation9 + $0x360] ss:$16 sps:$4 sm:$0xff]  }
 0x2fc   :  { %v1477_v34 = vpack.c.bf16 %v1473_v26, %v1473_v26  ;;  %v17114_v22 = vld [vmem:[#allocation9 + $0x368] ss:$16 sps:$4 sm:$0xff]   ;;  %v17119_v23 = vld [vmem:[#allocation9 + $0x384] ss:$16 sps:$4 sm:$0xff]   ;;  %v17122_v24 = vld [vmem:[#allocation9 + $0x38c] ss:$16 sps:$4 sm:$0xff]  }
 0x2fd   :  { %v1478_v31 = vpack.c.bf16 %v1474_v29, %v1474_v29  ;;  %v1480_v37 = vpack.c.bf16 %v1476_v30, %v1476_v30  ;;  %v17117_v25 = vld [vmem:[#allocation9 + $0x380] ss:$16 sps:$4 sm:$0xff]   ;;  %v17120_v26 = vld [vmem:[#allocation9 + $0x388] ss:$16 sps:$4 sm:$0xff]   ;;  %v17125_v27 = vld [vmem:[#allocation9 + $0x3a4] ss:$16 sps:$4 sm:$0xff]  }
 0x2fe   :  { %v17128_v28 = vld [vmem:[#allocation9 + $0x3ac] ss:$16 sps:$4 sm:$0xff]   ;;  %v17123_v29 = vld [vmem:[#allocation9 + $0x3a0] ss:$16 sps:$4 sm:$0xff]   ;;  %v17126_v30 = vld [vmem:[#allocation9 + $0x3a8] ss:$16 sps:$4 sm:$0xff]  }
 0x2ff   :  { %2303 = vmatprep.mubr.bf16.mxu0 %v1478_v31  ;;  %2385 = vmatprep.mubr.bf16.mxu1 %v1478_v31  ;;  %v660_v31 = vrot.slane %v17816_v13, %v17811_v54  ;;  %v17135_v13 = vld [vmem:[#allocation9 + $0x3e0] ss:$16 sps:$4 sm:$0xff]  }
 0x300   :  { %2304 = vmatmul.mubr.bf16.vlgmr.msra.gmra.mrb[8].mxu0 %v1477_v34  ;;  %2386 = vmatmul.mubr.bf16.vlgmr.msra.gmra.mrb[8].mxu1 %v1477_v34  ;;  %v17129_v34 = vld [vmem:[#allocation9 + $0x3c0] ss:$16 sps:$4 sm:$0xff]  }
 0x301   :  { %2313 = vmatpush1.bf16.msra.mxu0 %v17045_v32  ;;  %2395 = vmatpush1.bf16.msra.mxu1 %v17048_v33  ;;  %v17131_v32 = vld [vmem:[#allocation9 + $0x3c4] ss:$16 sps:$4 sm:$0xff]   ;;  %v17134_v33 = vld [vmem:[#allocation9 + $0x3cc] ss:$16 sps:$4 sm:$0xff]  }
 0x302   :  { %2344 = vmatprep.mubr.bf16.mxu0 %v1480_v37  ;;  %2426 = vmatprep.mubr.bf16.mxu1 %v1480_v37  ;;  %v17137_v37 = vld [vmem:[#allocation9 + $0x3e4] ss:$16 sps:$4 sm:$0xff]  }
 0x303   :  { %2314 = vmatprep.subr.bf16.mxu0 %v17053_v35  ;;  %2396 = vmatprep.subr.bf16.mxu1 %v17056_v36  ;;  %v17132_v35 = vld [vmem:[#allocation9 + $0x3c8] ss:$16 sps:$4 sm:$0xff]   ;;  %v16501_v36 = vadd.f32 %v17824_v18, %v660_v31  ;;  %v2453_v18 = vld [vmem:[#allocation12 + $0x48] sm:$0xff] }
 0x304   :  { %v2496_v31 = vld [vmem:[#allocation12 + $0x1a0] sm:$0xff] }
 0x305   :  { %2315 = vmatpush1.bf16.msra.mxu0 %v17051_v42  ;;  %2397 = vmatpush1.bf16.msra.mxu1 %v17054_v43  ;;  %v17140_v42 = vld [vmem:[#allocation9 + $0x3ec] ss:$16 sps:$4 sm:$0xff]   ;;  %v2444_v43 = vld [vmem:[#allocation12] sm:$0xff] }
 0x306   :  { %2316 = vmatprep.subr.bf16.mxu0 %v17059_v44  ;;  %2398 = vmatprep.subr.bf16.mxu1 %v17062_v45  ;;  %v2448_v44 = vld [vmem:[#allocation12 + $0x20] sm:$0xff]  ;;  %v2445_v45 = vld [vmem:[#allocation12 + $0x8] sm:$0xff] }
 0x309   :  { %2317 = vmatpush1.bf16.msra.mxu0 %v17057_v46  ;;  %2399 = vmatpush1.bf16.msra.mxu1 %v17060_v47  ;;  %v2449_v46 = vld [vmem:[#allocation12 + $0x28] sm:$0xff]  ;;  %v17138_v47 = vld [vmem:[#allocation9 + $0x3e8] ss:$16 sps:$4 sm:$0xff]  }
 0x30a   :  { %2318 = vmatprep.subr.bf16.mxu0 %v17065_v48  ;;  %2400 = vmatprep.subr.bf16.mxu1 %v17068_v49  ;;  %v1475_v48 = vmax.f32 %v16501_v36, 0.0  ;;  %v14811_v49 = vcombine.high %v2444_v43, %v2448_v44 }
 0x30d   :  { %2319 = vmatpush1.bf16.msra.mxu0 %v17063_v50  ;;  %2401 = vmatpush1.bf16.msra.mxu1 %v17066_v51  ;;  %v14813_v50 = vcombine.high %v2445_v45, %v2449_v46  ;;  %v2452_v51 = vld [vmem:[#allocation12 + $0x40] sm:$0xff] }
 0x30e   :  { %2320 = vmatprep.subr.bf16.mxu0 %v17071_v53  ;;  %2402 = vmatprep.subr.bf16.mxu1 %v17074_v55  ;;  %v2456_v53 = vld [vmem:[#allocation12 + $0x60] sm:$0xff]  ;;  %v2457_v55 = vld [vmem:[#allocation12 + $0x68] sm:$0xff] }
 0x311   :  { %2321 = vmatpush1.bf16.msra.mxu0 %v17069_v56  ;;  %2403 = vmatpush1.bf16.msra.mxu1 %v17072_v57  ;;  %v14810_v56 = vcombine.low %v2444_v43, %v2448_v44  ;;  %v14812_v57 = vcombine.low %v2445_v45, %v2449_v46  ;;  %v2504_v43 = vld [vmem:[#allocation12 + $0x1e0] sm:$0xff]  ;;  %v2501_v44 = vld [vmem:[#allocation12 + $0x1c8] sm:$0xff] }
 0x312   :  { %2322 = vmatprep.subr.bf16.mxu0 %v17077_v58  ;;  %2404 = vmatprep.subr.bf16.mxu1 %v17080_v59  ;;  %v1479_v58 = vpack.c.bf16 %v1475_v48, %v1475_v48  ;;  %v14819_v59 = vcombine.high %v2452_v51, %v2456_v53  ;;  %v2505_v45 = vld [vmem:[#allocation12 + $0x1e8] sm:$0xff] }
 0x313   :  { %v14869_v48 = vcombine.high %v2501_v44, %v2505_v45 }
 0x315   :  { %2323 = vmatpush1.bf16.msra.mxu0 %v17075_v60  ;;  %2405 = vmatpush1.bf16.msra.mxu1 %v17078_v61  ;;  %v14821_v60 = vcombine.high %v2453_v18, %v2457_v55  ;;  %v2460_v61 = vld [vmem:[#allocation12 + $0x80] sm:$0xff] }
 0x316   :  { %2324 = vmatprep.subr.bf16.mxu0 %v17083_v62  ;;  %2406 = vmatprep.subr.bf16.mxu1 %v17086_v63  ;;  %v2464_v62 = vld [vmem:[#allocation12 + $0xa0] sm:$0xff]  ;;  %v2461_v63 = vld [vmem:[#allocation12 + $0x88] sm:$0xff] }
 0x319   :  { %2325 = vmatpush1.bf16.msra.mxu0 %v17081_v1  ;;  %2407 = vmatpush1.bf16.msra.mxu1 %v17084_v2  ;;  %v2465_v1 = vld [vmem:[#allocation12 + $0xa8] sm:$0xff]  ;;  %v14818_v2 = vcombine.low %v2452_v51, %v2456_v53 }
 0x31a   :  { %2326 = vmatprep.subr.bf16.mxu0 %v17089_v3  ;;  %2408 = vmatprep.subr.bf16.mxu1 %v17092_v4  ;;  %v14820_v3 = vcombine.low %v2453_v18, %v2457_v55  ;;  %v14827_v4 = vcombine.high %v2460_v61, %v2464_v62  ;;  %v2509_v51 = vld [vmem:[#allocation12 + $0x208] sm:$0xff]  ;;  %v14868_v55 = vcombine.low %v2501_v44, %v2505_v45 }
 0x31b   :  { %v2513_v53 = vld [vmem:[#allocation12 + $0x228] sm:$0xff] }
 0x31c   :  { %v2561_v45 = vld [vmem:[#allocation12 + $0x3a8] sm:$0xff] }
 0x31d   :  { %2327 = vmatpush1.bf16.msra.mxu0 %v17087_v5  ;;  %2409 = vmatpush1.bf16.msra.mxu1 %v17090_v6  ;;  %v14829_v5 = vcombine.high %v2461_v63, %v2465_v1  ;;  %v2468_v6 = vld [vmem:[#allocation12 + $0xc0] sm:$0xff] }
 0x31e   :  { %2328 = vmatprep.subr.bf16.mxu0 %v17095_v40  ;;  %2410 = vmatprep.subr.bf16.mxu1 %v17098_v7  ;;  %v2472_v40 = vld [vmem:[#allocation12 + $0xe0] sm:$0xff]  ;;  %v2469_v7 = vld [vmem:[#allocation12 + $0xc8] sm:$0xff] }
 0x321   :  { %2329 = vmatpush1.bf16.msra.mxu0 %v17093_v8  ;;  %2411 = vmatpush1.bf16.msra.mxu1 %v17096_v9  ;;  %v2473_v8 = vld [vmem:[#allocation12 + $0xe8] sm:$0xff]  ;;  %v14826_v9 = vcombine.low %v2460_v61, %v2464_v62 }
 0x322   :  { %2330 = vmatprep.subr.bf16.mxu0 %v17101_v10  ;;  %2412 = vmatprep.subr.bf16.mxu1 %v17104_v0  ;;  %v14828_v10 = vcombine.low %v2461_v63, %v2465_v1  ;;  %v14835_v0 = vcombine.high %v2468_v6, %v2472_v40  ;;  %v2521_v61 = vld [vmem:[#allocation12 + $0x268] sm:$0xff]  ;;  %v14876_v63 = vcombine.low %v2509_v51, %v2513_v53 }
 0x325   :  { %2331 = vmatpush1.bf16.msra.mxu0 %v17099_v11  ;;  %2413 = vmatpush1.bf16.msra.mxu1 %v17102_v12  ;;  %v14837_v11 = vcombine.high %v2469_v7, %v2473_v8  ;;  %v2476_v12 = vld [vmem:[#allocation12 + $0x100] sm:$0xff] }
 0x326   :  { %2332 = vmatprep.subr.bf16.mxu0 %v17107_v14  ;;  %2414 = vmatprep.subr.bf16.mxu1 %v17110_v15  ;;  %v2480_v14 = vld [vmem:[#allocation12 + $0x120] sm:$0xff]  ;;  %v2477_v15 = vld [vmem:[#allocation12 + $0x108] sm:$0xff] }
 0x329   :  { %2333 = vmatpush1.bf16.msra.mxu0 %v17105_v16  ;;  %2415 = vmatpush1.bf16.msra.mxu1 %v17108_v17  ;;  %v2481_v16 = vld [vmem:[#allocation12 + $0x128] sm:$0xff]  ;;  %v14834_v17 = vcombine.low %v2468_v6, %v2472_v40 }
 0x32a   :  { %2334 = vmatprep.subr.bf16.mxu0 %v17113_v19  ;;  %2416 = vmatprep.subr.bf16.mxu1 %v17116_v20  ;;  %v14836_v19 = vcombine.low %v2469_v7, %v2473_v8  ;;  %v14843_v20 = vcombine.high %v2476_v12, %v2480_v14  ;;  %v2529_v6 = vld [vmem:[#allocation12 + $0x2a8] sm:$0xff] }
 0x32d   :  { %2335 = vmatpush1.bf16.msra.mxu0 %v17111_v21  ;;  %2417 = vmatpush1.bf16.msra.mxu1 %v17114_v22  ;;  %v14845_v21 = vcombine.high %v2477_v15, %v2481_v16  ;;  %v2484_v22 = vld [vmem:[#allocation12 + $0x140] sm:$0xff] }
 0x32e   :  { %2336 = vmatprep.subr.bf16.mxu0 %v17119_v23  ;;  %2418 = vmatprep.subr.bf16.mxu1 %v17122_v24  ;;  %v2488_v23 = vld [vmem:[#allocation12 + $0x160] sm:$0xff]  ;;  %v2485_v24 = vld [vmem:[#allocation12 + $0x148] sm:$0xff] }
 0x331   :  { %2337 = vmatpush1.bf16.msra.mxu0 %v17117_v25  ;;  %2419 = vmatpush1.bf16.msra.mxu1 %v17120_v26  ;;  %v2489_v25 = vld [vmem:[#allocation12 + $0x168] sm:$0xff]  ;;  %v14842_v26 = vcombine.low %v2476_v12, %v2480_v14 }
 0x332   :  { %2338 = vmatprep.subr.bf16.mxu0 %v17125_v27  ;;  %2420 = vmatprep.subr.bf16.mxu1 %v17128_v28  ;;  %v14844_v27 = vcombine.low %v2477_v15, %v2481_v16  ;;  %v14851_v28 = vcombine.high %v2484_v22, %v2488_v23  ;;  %v2537_v12 = vld [vmem:[#allocation12 + $0x2e8] sm:$0xff] }
 0x335   :  { %2339 = vmatpush1.bf16.msra.mxu0 %v17123_v29  ;;  %2421 = vmatpush1.bf16.msra.mxu1 %v17126_v30  ;;  %v14853_v29 = vcombine.high %v2485_v24, %v2489_v25  ;;  %v2492_v30 = vld [vmem:[#allocation12 + $0x180] sm:$0xff] }
 0x336   :  { %2340 = vmatprep.subr.bf16.mxu0 %v17131_v32  ;;  %2422 = vmatprep.subr.bf16.mxu1 %v17134_v33  ;;  %v2493_v32 = vld [vmem:[#allocation12 + $0x188] sm:$0xff]  ;;  %v14859_v36 = vcombine.high %v2492_v30, %v2496_v31  ;;  %v14858_v46 = vcombine.low %v2492_v30, %v2496_v31 }
 0x337   :  { %v2497_v33 = vld [vmem:[#allocation12 + $0x1a8] sm:$0xff] }
 0x338   :  { %v2553_v30 = vld [vmem:[#allocation12 + $0x368] sm:$0xff] }
 0x339   :  { %2341 = vmatpush1.bf16.msra.mxu0 %v17129_v34  ;;  %2423 = vmatpush1.bf16.msra.mxu1 %v17132_v35  ;;  %v14850_v34 = vcombine.low %v2484_v22, %v2488_v23  ;;  %v14852_v35 = vcombine.low %v2485_v24, %v2489_v25  ;;  %v2545_v22 = vld [vmem:[#allocation12 + $0x328] sm:$0xff] }
 0x33a   :  { %2342 = vmatprep.subr.bf16.mxu0 %v17137_v37  ;;  %2424 = vmatprep.subr.bf16.mxu1 %v17140_v42  ;;  %v14861_v37 = vcombine.high %v2493_v32, %v2497_v33  ;;  %v2500_v42 = vld [vmem:[#allocation12 + $0x1c0] sm:$0xff] }
 0x33b   :  { %v14866_v18 = vcombine.low %v2500_v42, %v2504_v43 }
 0x33d   :  { %2343 = vmatpush1.bf16.msra.mxu0 %v17135_v13  ;;  %2425 = vmatpush1.bf16.msra.mxu1 %v17138_v47  ;;  %v14860_v13 = vcombine.low %v2493_v32, %v2497_v33  ;;  %v14867_v47 = vcombine.high %v2500_v42, %v2504_v43  ;;  %v2560_v42 = vld [vmem:[#allocation12 + $0x3a0] sm:$0xff]  ;;  %v2557_v43 = vld [vmem:[#allocation12 + $0x388] sm:$0xff] }
 0x33e   :  { %3980 = vmatprep.subr.bf16.mxu0 %v14811_v49  ;;  %4062 = vmatprep.subr.bf16.mxu1 %v14813_v50  ;;  %v2508_v49 = vld [vmem:[#allocation12 + $0x200] sm:$0xff] }
 0x33f   :  { %v2512_v50 = vld [vmem:[#allocation12 + $0x220] sm:$0xff] }
 0x340   :  { %2345 = vmatmul.mubr.bf16.vlgmr.msra.gmra.mrb[8].mxu0 %v1479_v58  ;;  %2427 = vmatmul.mubr.bf16.vlgmr.msra.gmra.mrb[8].mxu1 %v1479_v58  ;;  %v2516_v58 = vld [vmem:[#allocation12 + $0x240] sm:$0xff]  ;;  %v14874_v62 = vcombine.low %v2508_v49, %v2512_v50 }
 0x341   :  { %3981 = vmatpush1.bf16.msra.mxu0 %v14810_v56  ;;  %4063 = vmatpush1.bf16.msra.mxu1 %v14812_v57  ;;  %v14875_v56 = vcombine.high %v2508_v49, %v2512_v50  ;;  %v14877_v57 = vcombine.high %v2509_v51, %v2513_v53  ;;  %v2568_v49 = vld [vmem:[#allocation12 + $0x3e0] sm:$0xff]  ;;  %v2565_v50 = vld [vmem:[#allocation12 + $0x3c8] sm:$0xff] }
 0x342   :  { %3982 = vmatprep.subr.bf16.mxu0 %v14819_v59  ;;  %4064 = vmatprep.subr.bf16.mxu1 %v14821_v60  ;;  %v2520_v59 = vld [vmem:[#allocation12 + $0x260] sm:$0xff]  ;;  %v2517_v60 = vld [vmem:[#allocation12 + $0x248] sm:$0xff] }
 0x343   :  { %v14883_v1 = vcombine.high %v2516_v58, %v2520_v59  ;;  %v14882_v40 = vcombine.low %v2516_v58, %v2520_v59  ;;  %v14884_v7 = vcombine.low %v2517_v60, %v2521_v61  ;;  %v2569_v53 = vld [vmem:[#allocation12 + $0x3e8] sm:$0xff]  ;;  %v2576_v58 = vld [vmem:[#allocation12 + $0x420] sm:$0xff] }
 0x344   :  { %v2573_v59 = vld [vmem:[#allocation12 + $0x408] sm:$0xff] }
 0x345   :  { %3983 = vmatpush1.bf16.msra.mxu0 %v14818_v2  ;;  %4065 = vmatpush1.bf16.msra.mxu1 %v14820_v3  ;;  %v14885_v2 = vcombine.high %v2517_v60, %v2521_v61  ;;  %v2524_v3 = vld [vmem:[#allocation12 + $0x280] sm:$0xff]  ;;  %v2577_v61 = vld [vmem:[#allocation12 + $0x428] sm:$0xff] }
 0x346   :  { %3984 = vmatprep.subr.bf16.mxu0 %v14827_v4  ;;  %4066 = vmatprep.subr.bf16.mxu1 %v14829_v5  ;;  %v2528_v4 = vld [vmem:[#allocation12 + $0x2a0] sm:$0xff]  ;;  %v2525_v5 = vld [vmem:[#allocation12 + $0x288] sm:$0xff] }
 0x347   :  { %v14891_v8 = vcombine.high %v2524_v3, %v2528_v4  ;;  %v14890_v14 = vcombine.low %v2524_v3, %v2528_v4  ;;  %v14892_v15 = vcombine.low %v2525_v5, %v2529_v6 }
 0x349   :  { %3985 = vmatpush1.bf16.msra.mxu0 %v14826_v9  ;;  %4067 = vmatpush1.bf16.msra.mxu1 %v14828_v10  ;;  %v14893_v9 = vcombine.high %v2525_v5, %v2529_v6  ;;  %v2532_v10 = vld [vmem:[#allocation12 + $0x2c0] sm:$0xff] }
 0x34a   :  { %3986 = vmatprep.subr.bf16.mxu0 %v14835_v0  ;;  %4068 = vmatprep.subr.bf16.mxu1 %v14837_v11  ;;  %v2536_v0 = vld [vmem:[#allocation12 + $0x2e0] sm:$0xff]  ;;  %v2533_v11 = vld [vmem:[#allocation12 + $0x2c8] sm:$0xff] }
 0x34b   :  { %v14899_v16 = vcombine.high %v2532_v10, %v2536_v0  ;;  %v14898_v23 = vcombine.low %v2532_v10, %v2536_v0  ;;  %v14900_v24 = vcombine.low %v2533_v11, %v2537_v12 }
 0x34d   :  { %3987 = vmatpush1.bf16.msra.mxu0 %v14834_v17  ;;  %4069 = vmatpush1.bf16.msra.mxu1 %v14836_v19  ;;  %v14901_v17 = vcombine.high %v2533_v11, %v2537_v12  ;;  %v2540_v19 = vld [vmem:[#allocation12 + $0x300] sm:$0xff] }
 0x34e   :  { %3988 = vmatprep.subr.bf16.mxu0 %v14843_v20  ;;  %4070 = vmatprep.subr.bf16.mxu1 %v14845_v21  ;;  %v2544_v20 = vld [vmem:[#allocation12 + $0x320] sm:$0xff]  ;;  %v2541_v21 = vld [vmem:[#allocation12 + $0x308] sm:$0xff] }
 0x34f   :  { %v14907_v25 = vcombine.high %v2540_v19, %v2544_v20  ;;  %v14906_v31 = vcombine.low %v2540_v19, %v2544_v20  ;;  %v14908_v32 = vcombine.low %v2541_v21, %v2545_v22  ;;  %v2580_v19 = vld [vmem:[#allocation12 + $0x440] sm:$0xff] }
 0x351   :  { %3989 = vmatpush1.bf16.msra.mxu0 %v14842_v26  ;;  %4071 = vmatpush1.bf16.msra.mxu1 %v14844_v27  ;;  %v14909_v26 = vcombine.high %v2541_v21, %v2545_v22  ;;  %v2548_v27 = vld [vmem:[#allocation12 + $0x340] sm:$0xff]  ;;  %v2581_v22 = vld [vmem:[#allocation12 + $0x448] sm:$0xff] }
 0x352   :  { %3990 = vmatprep.subr.bf16.mxu0 %v14851_v28  ;;  %4072 = vmatprep.subr.bf16.mxu1 %v14853_v29  ;;  %v2552_v28 = vld [vmem:[#allocation12 + $0x360] sm:$0xff]  ;;  %v2549_v29 = vld [vmem:[#allocation12 + $0x348] sm:$0xff] }
 0x353   :  { %v14915_v33 = vcombine.high %v2548_v27, %v2552_v28  ;;  %v2584_v21 = vld [vmem:[#allocation12 + $0x460] sm:$0xff] }
 0x355   :  { %3991 = vmatpush1.bf16.msra.mxu0 %v14850_v34  ;;  %4073 = vmatpush1.bf16.msra.mxu1 %v14852_v35  ;;  %v14917_v34 = vcombine.high %v2549_v29, %v2553_v30  ;;  %v14914_v35 = vcombine.low %v2548_v27, %v2552_v28  ;;  %v14947_v27 = vcombine.high %v2580_v19, %v2584_v21 }
 0x356   :  { %3992 = vmatprep.subr.bf16.mxu0 %v14859_v36  ;;  %4074 = vmatprep.subr.bf16.mxu1 %v14861_v37  ;;  %v14916_v36 = vcombine.low %v2549_v29, %v2553_v30  ;;  %v2556_v37 = vld [vmem:[#allocation12 + $0x380] sm:$0xff]  ;;  %v2589_v30 = vld [vmem:[#allocation12 + $0x488] sm:$0xff] }
 0x357   :  { %v14923_v44 = vcombine.high %v2556_v37, %v2560_v42  ;;  %v2592_v29 = vld [vmem:[#allocation12 + $0x4a0] sm:$0xff] }
 0x359   :  { %3993 = vmatpush1.bf16.msra.mxu0 %v14858_v46  ;;  %4075 = vmatpush1.bf16.msra.mxu1 %v14860_v13  ;;  %v14922_v46 = vcombine.low %v2556_v37, %v2560_v42  ;;  %v14924_v13 = vcombine.low %v2557_v43, %v2561_v45  ;;  %v2596_v37 = vld [vmem:[#allocation12 + $0x4c0] sm:$0xff] }
 0x35a   :  { %3994 = vmatprep.subr.bf16.mxu0 %v14867_v47  ;;  %4076 = vmatprep.subr.bf16.mxu1 %v14869_v48  ;;  %v14925_v47 = vcombine.high %v2557_v43, %v2561_v45  ;;  %v2564_v48 = vld [vmem:[#allocation12 + $0x3c0] sm:$0xff]  ;;  %v2597_v43 = vld [vmem:[#allocation12 + $0x4c8] sm:$0xff] }
 0x35b   :  { %v14931_v51 = vcombine.high %v2564_v48, %v2568_v49  ;;  %v2600_v42 = vld [vmem:[#allocation12 + $0x4e0] sm:$0xff] }
 0x35d   :  { %3995 = vmatpush1.bf16.msra.mxu0 %v14866_v18  ;;  %4077 = vmatpush1.bf16.msra.mxu1 %v14868_v55  ;;  %v14930_v18 = vcombine.low %v2564_v48, %v2568_v49  ;;  %v14932_v55 = vcombine.low %v2565_v50, %v2569_v53  ;;  %v2604_v48 = vld [vmem:[#allocation12 + $0x500] sm:$0xff] }
 0x35e   :  { %3996 = vmatprep.subr.bf16.mxu0 %v14875_v56  ;;  %4078 = vmatprep.subr.bf16.mxu1 %v14877_v57  ;;  %v14933_v56 = vcombine.high %v2565_v50, %v2569_v53  ;;  %v2572_v57 = vld [vmem:[#allocation12 + $0x400] sm:$0xff]  ;;  %v2605_v50 = vld [vmem:[#allocation12 + $0x508] sm:$0xff]  ;;  %v14962_v53 = vcombine.low %v2596_v37, %v2600_v42 }
 0x35f   :  { %v14939_v60 = vcombine.high %v2572_v57, %v2576_v58  ;;  %v2608_v49 = vld [vmem:[#allocation12 + $0x520] sm:$0xff] }
 0x361   :  { %3997 = vmatpush1.bf16.msra.mxu0 %v14874_v62  ;;  %4079 = vmatpush1.bf16.msra.mxu1 %v14876_v63  ;;  %v14938_v62 = vcombine.low %v2572_v57, %v2576_v58  ;;  %v14940_v63 = vcombine.low %v2573_v59, %v2577_v61  ;;  %v2612_v57 = vld [vmem:[#allocation12 + $0x540] sm:$0xff] }
 0x362   :  { %3998 = vmatprep.subr.bf16.mxu0 %v14883_v1  ;;  %4080 = vmatprep.subr.bf16.mxu1 %v14885_v2  ;;  %v14941_v1 = vcombine.high %v2573_v59, %v2577_v61  ;;  %v17829_v2 = vld [vmem:[#allocation10] sm:$0xf]  ;;  %v2616_v58 = vld [vmem:[#allocation12 + $0x560] sm:$0xff]  ;;  %v2613_v59 = vld [vmem:[#allocation12 + $0x548] sm:$0xff]  ;;  %v14970_v61 = vcombine.low %v2604_v48, %v2608_v49 }
 0x363   :  { %v1614_v3 = vrot.slane %v17829_v2, %v17792_v39  ;;  %v1618_v4 = vrot.slane %v17829_v2, %v17797_v41  ;;  %v1626_v5 = vrot.slane %v17829_v2, %v17804_v52 }
 0x365   :  { %3999 = vmatpush1.bf16.msra.mxu0 %v14882_v40  ;;  %4081 = vmatpush1.bf16.msra.mxu1 %v14884_v7 }
 0x366   :  { %4000 = vmatprep.subr.bf16.mxu0 %v14891_v8  ;;  %4082 = vmatprep.subr.bf16.mxu1 %v14893_v9 }
 0x369   :  { %4001 = vmatpush1.bf16.msra.mxu0 %v14890_v14  ;;  %4083 = vmatpush1.bf16.msra.mxu1 %v14892_v15 }
 0x36a   :  { %4002 = vmatprep.subr.bf16.mxu0 %v14899_v16  ;;  %4084 = vmatprep.subr.bf16.mxu1 %v14901_v17 }
 0x36d   :  { %4003 = vmatpush1.bf16.msra.mxu0 %v14898_v23  ;;  %4085 = vmatpush1.bf16.msra.mxu1 %v14900_v24  ;;  %v2585_v23 = vld [vmem:[#allocation12 + $0x468] sm:$0xff] }
 0x36e   :  { %4004 = vmatprep.subr.bf16.mxu0 %v14907_v25  ;;  %4086 = vmatprep.subr.bf16.mxu1 %v14909_v26  ;;  %v2588_v26 = vld [vmem:[#allocation12 + $0x480] sm:$0xff]  ;;  %v14949_v28 = vcombine.high %v2581_v22, %v2585_v23 }
 0x36f   :  { %v14954_v45 = vcombine.low %v2588_v26, %v2592_v29 }
 0x371   :  { %4005 = vmatpush1.bf16.msra.mxu0 %v14906_v31  ;;  %4087 = vmatpush1.bf16.msra.mxu1 %v14908_v32  ;;  %v2593_v31 = vld [vmem:[#allocation12 + $0x4a8] sm:$0xff] }
 0x372   :  { %4006 = vmatprep.subr.bf16.mxu0 %v14915_v33  ;;  %4088 = vmatprep.subr.bf16.mxu1 %v14917_v34  ;;  %v14946_v33 = vcombine.low %v2580_v19, %v2584_v21  ;;  %v14948_v34 = vcombine.low %v2581_v22, %v2585_v23  ;;  %v2640_v21 = vld [vmem:[#allocation12 + $0x620] sm:$0xff]  ;;  %v2637_v22 = vld [vmem:[#allocation12 + $0x608] sm:$0xff] }
 0x373   :  { %v2641_v23 = vld [vmem:[#allocation12 + $0x628] sm:$0xff] }
 0x375   :  { %4007 = vmatpush1.bf16.msra.mxu0 %v14914_v35  ;;  %4089 = vmatpush1.bf16.msra.mxu1 %v14916_v36  ;;  %v14955_v35 = vcombine.high %v2588_v26, %v2592_v29  ;;  %v14957_v36 = vcombine.high %v2589_v30, %v2593_v31  ;;  %v15005_v29 = vcombine.high %v2637_v22, %v2641_v23 }
 0x376   :  { %4008 = vmatprep.subr.bf16.mxu0 %v14923_v44  ;;  %4090 = vmatprep.subr.bf16.mxu1 %v14925_v47  ;;  %v2601_v44 = vld [vmem:[#allocation12 + $0x4e8] sm:$0xff] }
 0x377   :  { %v14965_v47 = vcombine.high %v2597_v43, %v2601_v44 }
 0x379   :  { %4009 = vmatpush1.bf16.msra.mxu0 %v14922_v46  ;;  %4091 = vmatpush1.bf16.msra.mxu1 %v14924_v13  ;;  %v14956_v46 = vcombine.low %v2589_v30, %v2593_v31  ;;  %v14963_v13 = vcombine.high %v2596_v37, %v2600_v42  ;;  %v2644_v30 = vld [vmem:[#allocation12 + $0x640] sm:$0xff] }
 0x37a   :  { %4010 = vmatprep.subr.bf16.mxu0 %v14931_v51  ;;  %4092 = vmatprep.subr.bf16.mxu1 %v14933_v56  ;;  %v2609_v51 = vld [vmem:[#allocation12 + $0x528] sm:$0xff]  ;;  %v2648_v31 = vld [vmem:[#allocation12 + $0x660] sm:$0xff] }
 0x37b   :  { %v14973_v56 = vcombine.high %v2605_v50, %v2609_v51  ;;  %v15011_v37 = vcombine.high %v2644_v30, %v2648_v31 }
 0x37d   :  { %4011 = vmatpush1.bf16.msra.mxu0 %v14930_v18  ;;  %4093 = vmatpush1.bf16.msra.mxu1 %v14932_v55  ;;  %v14964_v18 = vcombine.low %v2597_v43, %v2601_v44  ;;  %v14971_v55 = vcombine.high %v2604_v48, %v2608_v49  ;;  %v2652_v43 = vld [vmem:[#allocation12 + $0x680] sm:$0xff] }
 0x37e   :  { %4021 = vmatprep.subr.bf16.mxu0 %v14939_v60  ;;  %4103 = vmatprep.subr.bf16.mxu1 %v14941_v1  ;;  %v2617_v60 = vld [vmem:[#allocation12 + $0x568] sm:$0xff]  ;;  %v2656_v44 = vld [vmem:[#allocation12 + $0x6a0] sm:$0xff] }
 0x37f   :  { %v14981_v1 = vcombine.high %v2613_v59, %v2617_v60  ;;  %v15019_v48 = vcombine.high %v2652_v43, %v2656_v44 }
 0x413   :  { %v2346_v6 = vpop.f32.mrb[8].mxu0  ;;  %v17837_v40 = vpop.f32.mrb[8].mxu1 }
 0x414   :  { %v16503_v7 = vadd.f32 %v2346_v6, %v1614_v3  ;;  %v2348_v8 = vpop.f32.mrb[9].mxu0  ;;  %v2430_v9 = vpop.f32.mrb[9].mxu1  ;;  %v2620_v3 = vld [vmem:[#allocation12 + $0x580] sm:$0xff]  ;;  %v2625_v6 = vld [vmem:[#allocation12 + $0x5a8] sm:$0xff] }
 0x415   :  { %v16504_v10 = vadd.f32 %v2348_v8, %v1618_v4  ;;  %v16506_v0 = vadd.f32 %v2430_v9, %v1626_v5  ;;  %v2350_v11 = vpop.f32.mrb[10].mxu0  ;;  %v2432_v12 = vpop.f32.mrb[10].mxu1  ;;  %v2624_v4 = vld [vmem:[#allocation12 + $0x5a0] sm:$0xff]  ;;  %v2621_v5 = vld [vmem:[#allocation12 + $0x588] sm:$0xff]  ;;  %v14980_v8 = vcombine.low %v2613_v59, %v2617_v60 }
 0x416   :  { %v2435_v14 = vmax.f32 %v16503_v7, 0.0  ;;  %v2351_v15 = vpop.f32.mrb[11].mxu0  ;;  %v2433_v16 = vpop.f32.mrb[11].mxu1  ;;  %v14978_v7 = vcombine.low %v2612_v57, %v2616_v58  ;;  %v14987_v9 = vcombine.high %v2620_v3, %v2624_v4  ;;  %v2632_v11 = vld [vmem:[#allocation12 + $0x5e0] sm:$0xff]  ;;  %v2629_v12 = vld [vmem:[#allocation12 + $0x5c8] sm:$0xff] }
 0x417   :  { %v2436_v17 = vmax.f32 %v16504_v10, 0.0  ;;  %v2438_v20 = vmax.f32 %v16506_v0, 0.0  ;;  %v14989_v10 = vcombine.high %v2621_v5, %v2625_v6  ;;  %v2628_v0 = vld [vmem:[#allocation12 + $0x5c0] sm:$0xff]  ;;  %v14986_v15 = vcombine.low %v2620_v3, %v2624_v4 }
 0x418   :  { %v17841_v25 = vpack.c.bf16 %v2435_v14, %v2435_v14  ;;  %v2633_v14 = vld [vmem:[#allocation12 + $0x5e8] sm:$0xff]  ;;  %v14988_v16 = vcombine.low %v2621_v5, %v2625_v6  ;;  %v14994_v26 = vcombine.low %v2628_v0, %v2632_v11  ;;  %v2668_v59 = vld [vmem:[#allocation12 + $0x700] sm:$0xff] }
 0x419   :  { %v17839_v24 = vpack.c.bf16 %v2436_v17, %v2436_v17  ;;  %v17845_v32 = vpack.c.bf16 %v2438_v20, %v2438_v20  ;;  %v14995_v17 = vcombine.high %v2628_v0, %v2632_v11  ;;  %v14997_v19 = vcombine.high %v2629_v12, %v2633_v14  ;;  %v2636_v20 = vld [vmem:[#allocation12 + $0x600] sm:$0xff] }
 0x41a   :  { %v2672_v60 = vld [vmem:[#allocation12 + $0x720] sm:$0xff] }
 0x41b   :  { %4012 = vmatprep.mubr.bf16.mxu0 %v17839_v24  ;;  %4094 = vmatprep.mubr.bf16.mxu1 %v17839_v24  ;;  %v15035_v3 = vcombine.high %v2668_v59, %v2672_v60  ;;  %v2676_v5 = vld [vmem:[#allocation12 + $0x740] sm:$0xff] }
 0x41c   :  { %4013 = vmatmul.mubr.bf16.vlgmr.msra.gmra.mrb[12].mxu0 %v17841_v25  ;;  %4095 = vmatmul.mubr.bf16.vlgmr.msra.gmra.mrb[12].mxu1 %v17841_v25  ;;  %v2680_v6 = vld [vmem:[#allocation12 + $0x760] sm:$0xff] }
 0x41d   :  { %4022 = vmatpush1.bf16.msra.mxu0 %v14938_v62  ;;  %4104 = vmatpush1.bf16.msra.mxu1 %v14940_v63  ;;  %v14972_v62 = vcombine.low %v2605_v50, %v2609_v51  ;;  %v14979_v63 = vcombine.high %v2612_v57, %v2616_v58  ;;  %v2660_v50 = vld [vmem:[#allocation12 + $0x6c0] sm:$0xff]  ;;  %v15043_v0 = vcombine.high %v2676_v5, %v2680_v6 }
 0x41e   :  { %4053 = vmatprep.mubr.bf16.mxu0 %v17845_v32  ;;  %4135 = vmatprep.mubr.bf16.mxu1 %v17845_v32  ;;  %v2664_v51 = vld [vmem:[#allocation12 + $0x6e0] sm:$0xff] }
 0x41f   :  { %4023 = vmatprep.subr.bf16.mxu0 %v14947_v27  ;;  %4105 = vmatprep.subr.bf16.mxu1 %v14949_v28  ;;  %v14996_v27 = vcombine.low %v2629_v12, %v2633_v14  ;;  %v15003_v28 = vcombine.high %v2636_v20, %v2640_v21  ;;  %v15027_v57 = vcombine.high %v2660_v50, %v2664_v51  ;;  %v2684_v12 = vld [vmem:[#allocation12 + $0x780] sm:$0xff] }
 0x420   :  { %v2688_v14 = vld [vmem:[#allocation12 + $0x7a0] sm:$0xff] }
 0x421   :  { %4024 = vmatpush1.bf16.msra.mxu0 %v14946_v33  ;;  %4106 = vmatpush1.bf16.msra.mxu1 %v14948_v34  ;;  %v2645_v33 = vld [vmem:[#allocation12 + $0x648] sm:$0xff] }
 0x422   :  { %4025 = vmatprep.subr.bf16.mxu0 %v14955_v35  ;;  %4107 = vmatprep.subr.bf16.mxu1 %v14957_v36  ;;  %v2649_v34 = vld [vmem:[#allocation12 + $0x668] sm:$0xff]  ;;  %v15002_v35 = vcombine.low %v2636_v20, %v2640_v21  ;;  %v15004_v36 = vcombine.low %v2637_v22, %v2641_v23  ;;  %v1622_v20 = vrot.slane %v17829_v2, %v17811_v54  ;;  %v2692_v23 = vld [vmem:[#allocation12 + $0x7c0] sm:$0xff]  ;;  %v2450_v2 = vld [vmem:[#allocation12 + $0x30] sm:$0xff] }
 0x423   :  { %v15013_v42 = vcombine.high %v2645_v33, %v2649_v34  ;;  %v15051_v21 = vcombine.high %v2684_v12, %v2688_v14 }
 0x425   :  { %4026 = vmatpush1.bf16.msra.mxu0 %v14954_v45  ;;  %4108 = vmatpush1.bf16.msra.mxu1 %v14956_v46  ;;  %v2653_v45 = vld [vmem:[#allocation12 + $0x688] sm:$0xff] }
 0x426   :  { %4027 = vmatprep.subr.bf16.mxu0 %v14963_v13  ;;  %4109 = vmatprep.subr.bf16.mxu1 %v14965_v47  ;;  %v2657_v46 = vld [vmem:[#allocation12 + $0x6a8] sm:$0xff]  ;;  %v15010_v13 = vcombine.low %v2644_v30, %v2648_v31  ;;  %v15012_v47 = vcombine.low %v2645_v33, %v2649_v34  ;;  %v16505_v31 = vadd.f32 %v17837_v40, %v1622_v20  ;;  %v2455_v40 = vld [vmem:[#allocation12 + $0x58] sm:$0xff] }
 0x427   :  { %v15021_v49 = vcombine.high %v2653_v45, %v2657_v46  ;;  %v2487_v20 = vld [vmem:[#allocation12 + $0x158] sm:$0xff] }
 0x429   :  { %4028 = vmatpush1.bf16.msra.mxu0 %v14962_v53  ;;  %4110 = vmatpush1.bf16.msra.mxu1 %v14964_v18  ;;  %v2661_v53 = vld [vmem:[#allocation12 + $0x6c8] sm:$0xff] }
 0x42a   :  { %4029 = vmatprep.subr.bf16.mxu0 %v14971_v55  ;;  %4111 = vmatprep.subr.bf16.mxu1 %v14973_v56  ;;  %v2665_v18 = vld [vmem:[#allocation12 + $0x6e8] sm:$0xff]  ;;  %v15018_v55 = vcombine.low %v2652_v43, %v2656_v44  ;;  %v15020_v56 = vcombine.low %v2653_v45, %v2657_v46  ;;  %v2437_v44 = vmax.f32 %v16505_v31, 0.0  ;;  %v2499_v31 = vld [vmem:[#allocation12 + $0x1b8] sm:$0xff] }
 0x42b   :  { %v15029_v58 = vcombine.high %v2661_v53, %v2665_v18 }
 0x42d   :  { %4030 = vmatpush1.bf16.msra.mxu0 %v14970_v61  ;;  %4112 = vmatpush1.bf16.msra.mxu1 %v14972_v62  ;;  %v2669_v61 = vld [vmem:[#allocation12 + $0x708] sm:$0xff] }
 0x42e   :  { %4031 = vmatprep.subr.bf16.mxu0 %v14979_v63  ;;  %4113 = vmatprep.subr.bf16.mxu1 %v14981_v1  ;;  %v2673_v62 = vld [vmem:[#allocation12 + $0x728] sm:$0xff]  ;;  %v15026_v63 = vcombine.low %v2660_v50, %v2664_v51  ;;  %v15028_v1 = vcombine.low %v2661_v53, %v2665_v18  ;;  %v17854_v50 = vpack.c.bf16 %v2437_v44, %v2437_v44 }
 0x42f   :  { %v15037_v4 = vcombine.high %v2669_v61, %v2673_v62 }
 0x431   :  { %4032 = vmatpush1.bf16.msra.mxu0 %v14978_v7  ;;  %4114 = vmatpush1.bf16.msra.mxu1 %v14980_v8  ;;  %v2677_v7 = vld [vmem:[#allocation12 + $0x748] sm:$0xff] }
 0x432   :  { %4033 = vmatprep.subr.bf16.mxu0 %v14987_v9  ;;  %4115 = vmatprep.subr.bf16.mxu1 %v14989_v10  ;;  %v2681_v8 = vld [vmem:[#allocation12 + $0x768] sm:$0xff]  ;;  %v15034_v9 = vcombine.low %v2668_v59, %v2672_v60  ;;  %v15036_v10 = vcombine.low %v2669_v61, %v2673_v62 }
 0x433   :  { %v15045_v11 = vcombine.high %v2677_v7, %v2681_v8 }
 0x435   :  { %4034 = vmatpush1.bf16.msra.mxu0 %v14986_v15  ;;  %4116 = vmatpush1.bf16.msra.mxu1 %v14988_v16  ;;  %v2685_v15 = vld [vmem:[#allocation12 + $0x788] sm:$0xff] }
 0x436   :  { %4035 = vmatprep.subr.bf16.mxu0 %v14995_v17  ;;  %4117 = vmatprep.subr.bf16.mxu1 %v14997_v19  ;;  %v2689_v16 = vld [vmem:[#allocation12 + $0x7a8] sm:$0xff]  ;;  %v15042_v17 = vcombine.low %v2676_v5, %v2680_v6  ;;  %v15044_v19 = vcombine.low %v2677_v7, %v2681_v8 }
 0x437   :  { %v15053_v22 = vcombine.high %v2685_v15, %v2689_v16  ;;  %v15052_v30 = vcombine.low %v2685_v15, %v2689_v16 }
 0x439   :  { %4036 = vmatpush1.bf16.msra.mxu0 %v14994_v26  ;;  %4118 = vmatpush1.bf16.msra.mxu1 %v14996_v27  ;;  %v2696_v26 = vld [vmem:[#allocation12 + $0x7e0] sm:$0xff]  ;;  %v2693_v27 = vld [vmem:[#allocation12 + $0x7c8] sm:$0xff] }
 0x43a   :  { %4037 = vmatprep.subr.bf16.mxu0 %v15003_v28  ;;  %4119 = vmatprep.subr.bf16.mxu1 %v15005_v29  ;;  %v2697_v28 = vld [vmem:[#allocation12 + $0x7e8] sm:$0xff]  ;;  %v15050_v29 = vcombine.low %v2684_v12, %v2688_v14  ;;  %v15059_v33 = vcombine.high %v2692_v23, %v2696_v26 }
 0x43b   :  { %v15061_v34 = vcombine.high %v2693_v27, %v2697_v28  ;;  %v15060_v43 = vcombine.low %v2693_v27, %v2697_v28  ;;  %v2494_v28 = vld [vmem:[#allocation12 + $0x190] sm:$0xff] }
 0x43d   :  { %4038 = vmatpush1.bf16.msra.mxu0 %v15002_v35  ;;  %4120 = vmatpush1.bf16.msra.mxu1 %v15004_v36  ;;  %v2446_v35 = vld [vmem:[#allocation12 + $0x10] sm:$0xff]  ;;  %v2447_v36 = vld [vmem:[#allocation12 + $0x18] sm:$0xff] }
 0x43e   :  { %4039 = vmatprep.subr.bf16.mxu0 %v15011_v37  ;;  %4121 = vmatprep.subr.bf16.mxu1 %v15013_v42  ;;  %v2451_v37 = vld [vmem:[#allocation12 + $0x38] sm:$0xff]  ;;  %v15058_v42 = vcombine.low %v2692_v23, %v2696_v26  ;;  %v14815_v45 = vcombine.high %v2446_v35, %v2450_v2 }
 0x43f   :  { %v14817_v46 = vcombine.high %v2447_v36, %v2451_v37  ;;  %v14816_v51 = vcombine.low %v2447_v36, %v2451_v37  ;;  %v2502_v36 = vld [vmem:[#allocation12 + $0x1d0] sm:$0xff] }
 0x440   :  { %v2506_v37 = vld [vmem:[#allocation12 + $0x1f0] sm:$0xff] }
 0x441   :  { %4040 = vmatpush1.bf16.msra.mxu0 %v15010_v13  ;;  %4122 = vmatpush1.bf16.msra.mxu1 %v15012_v47  ;;  %v2454_v13 = vld [vmem:[#allocation12 + $0x50] sm:$0xff] }
 0x442   :  { %4041 = vmatprep.subr.bf16.mxu0 %v15019_v48  ;;  %4123 = vmatprep.subr.bf16.mxu1 %v15021_v49  ;;  %v2458_v47 = vld [vmem:[#allocation12 + $0x70] sm:$0xff]  ;;  %v2459_v48 = vld [vmem:[#allocation12 + $0x78] sm:$0xff]  ;;  %v14814_v49 = vcombine.low %v2446_v35, %v2450_v2 }
 0x443   :  { %v14823_v53 = vcombine.high %v2454_v13, %v2458_v47  ;;  %v14825_v18 = vcombine.high %v2455_v40, %v2459_v48  ;;  %v14822_v59 = vcombine.low %v2454_v13, %v2458_v47  ;;  %v14824_v60 = vcombine.low %v2455_v40, %v2459_v48  ;;  %v2510_v47 = vld [vmem:[#allocation12 + $0x210] sm:$0xff]  ;;  %v2511_v48 = vld [vmem:[#allocation12 + $0x218] sm:$0xff] }
 0x444   :  { %v2514_v40 = vld [vmem:[#allocation12 + $0x230] sm:$0xff] }
 0x445   :  { %4042 = vmatpush1.bf16.msra.mxu0 %v15018_v55  ;;  %4124 = vmatpush1.bf16.msra.mxu1 %v15020_v56  ;;  %v2462_v55 = vld [vmem:[#allocation12 + $0x90] sm:$0xff] }
 0x446   :  { %4043 = vmatprep.subr.bf16.mxu0 %v15027_v57  ;;  %4125 = vmatprep.subr.bf16.mxu1 %v15029_v58  ;;  %v2466_v56 = vld [vmem:[#allocation12 + $0xb0] sm:$0xff]  ;;  %v2463_v57 = vld [vmem:[#allocation12 + $0x98] sm:$0xff] }
 0x447   :  { %v2467_v58 = vld [vmem:[#allocation12 + $0xb8] sm:$0xff]  ;;  %v14831_v61 = vcombine.high %v2462_v55, %v2466_v56  ;;  %v14830_v5 = vcombine.low %v2462_v55, %v2466_v56  ;;  %v2518_v56 = vld [vmem:[#allocation12 + $0x250] sm:$0xff] }
 0x448   :  { %v14833_v62 = vcombine.high %v2463_v57, %v2467_v58  ;;  %v14832_v6 = vcombine.low %v2463_v57, %v2467_v58  ;;  %v2522_v57 = vld [vmem:[#allocation12 + $0x270] sm:$0xff]  ;;  %v2519_v58 = vld [vmem:[#allocation12 + $0x258] sm:$0xff] }
 0x449   :  { %4044 = vmatpush1.bf16.msra.mxu0 %v15026_v63  ;;  %4126 = vmatpush1.bf16.msra.mxu1 %v15028_v1  ;;  %v2470_v63 = vld [vmem:[#allocation12 + $0xd0] sm:$0xff] }
 0x44a   :  { %4045 = vmatprep.subr.bf16.mxu0 %v15035_v3  ;;  %4127 = vmatprep.subr.bf16.mxu1 %v15037_v4  ;;  %v2474_v1 = vld [vmem:[#allocation12 + $0xf0] sm:$0xff]  ;;  %v2471_v3 = vld [vmem:[#allocation12 + $0xd8] sm:$0xff] }
 0x44b   :  { %v2475_v4 = vld [vmem:[#allocation12 + $0xf8] sm:$0xff]  ;;  %v14839_v7 = vcombine.high %v2470_v63, %v2474_v1  ;;  %v14838_v12 = vcombine.low %v2470_v63, %v2474_v1  ;;  %v2526_v1 = vld [vmem:[#allocation12 + $0x290] sm:$0xff] }
 0x44c   :  { %v14841_v8 = vcombine.high %v2471_v3, %v2475_v4  ;;  %v14840_v14 = vcombine.low %v2471_v3, %v2475_v4  ;;  %v2530_v3 = vld [vmem:[#allocation12 + $0x2b0] sm:$0xff]  ;;  %v2527_v4 = vld [vmem:[#allocation12 + $0x298] sm:$0xff] }
 0x44d   :  { %4046 = vmatpush1.bf16.msra.mxu0 %v15034_v9  ;;  %4128 = vmatpush1.bf16.msra.mxu1 %v15036_v10  ;;  %v2478_v9 = vld [vmem:[#allocation12 + $0x110] sm:$0xff] }
 0x44e   :  { %4047 = vmatprep.subr.bf16.mxu0 %v15043_v0  ;;  %4129 = vmatprep.subr.bf16.mxu1 %v15045_v11  ;;  %v2482_v10 = vld [vmem:[#allocation12 + $0x130] sm:$0xff]  ;;  %v2479_v0 = vld [vmem:[#allocation12 + $0x118] sm:$0xff] }
 0x44f   :  { %v2483_v11 = vld [vmem:[#allocation12 + $0x138] sm:$0xff]  ;;  %v14847_v15 = vcombine.high %v2478_v9, %v2482_v10 }
 0x450   :  { %v14849_v16 = vcombine.high %v2479_v0, %v2483_v11  ;;  %v14848_v23 = vcombine.low %v2479_v0, %v2483_v11  ;;  %v2538_v0 = vld [vmem:[#allocation12 + $0x2f0] sm:$0xff]  ;;  %v2535_v11 = vld [vmem:[#allocation12 + $0x2d8] sm:$0xff] }
 0x451   :  { %4048 = vmatpush1.bf16.msra.mxu0 %v15042_v17  ;;  %4130 = vmatpush1.bf16.msra.mxu1 %v15044_v19  ;;  %v2486_v17 = vld [vmem:[#allocation12 + $0x150] sm:$0xff] }
 0x452   :  { %4049 = vmatprep.subr.bf16.mxu0 %v15051_v21  ;;  %4131 = vmatprep.subr.bf16.mxu1 %v15053_v22  ;;  %v2490_v19 = vld [vmem:[#allocation12 + $0x170] sm:$0xff]  ;;  %v2491_v21 = vld [vmem:[#allocation12 + $0x178] sm:$0xff]  ;;  %v14846_v22 = vcombine.low %v2478_v9, %v2482_v10 }
 0x453   :  { %v14855_v26 = vcombine.high %v2486_v17, %v2490_v19  ;;  %v14857_v27 = vcombine.high %v2487_v20, %v2491_v21  ;;  %v2534_v10 = vld [vmem:[#allocation12 + $0x2d0] sm:$0xff] }
 0x455   :  { %4050 = vmatpush1.bf16.msra.mxu0 %v15050_v29  ;;  %4132 = vmatpush1.bf16.msra.mxu1 %v15052_v30  ;;  %v2498_v29 = vld [vmem:[#allocation12 + $0x1b0] sm:$0xff]  ;;  %v2495_v30 = vld [vmem:[#allocation12 + $0x198] sm:$0xff] }
 0x456   :  { %4051 = vmatprep.subr.bf16.mxu0 %v15059_v33  ;;  %4133 = vmatprep.subr.bf16.mxu1 %v15061_v34  ;;  %v14854_v33 = vcombine.low %v2486_v17, %v2490_v19  ;;  %v14856_v34 = vcombine.low %v2487_v20, %v2491_v21  ;;  %v14863_v35 = vcombine.high %v2494_v28, %v2498_v29  ;;  %v2542_v19 = vld [vmem:[#allocation12 + $0x310] sm:$0xff]  ;;  %v2543_v21 = vld [vmem:[#allocation12 + $0x318] sm:$0xff] }
 0x457   :  { %v14865_v2 = vcombine.high %v2495_v30, %v2499_v31  ;;  %v14862_v44 = vcombine.low %v2494_v28, %v2498_v29  ;;  %v2546_v20 = vld [vmem:[#allocation12 + $0x330] sm:$0xff] }
 0x458   :  { %v2550_v29 = vld [vmem:[#allocation12 + $0x350] sm:$0xff] }
 0x459   :  { %4052 = vmatpush1.bf16.msra.mxu0 %v15058_v42  ;;  %4134 = vmatpush1.bf16.msra.mxu1 %v15060_v43  ;;  %v2503_v42 = vld [vmem:[#allocation12 + $0x1d8] sm:$0xff] }
 0x45a   :  { %4144 = vmatprep.subr.bf16.mxu0 %v14815_v45  ;;  %4226 = vmatprep.subr.bf16.mxu1 %v14817_v46  ;;  %v2507_v43 = vld [vmem:[#allocation12 + $0x1f8] sm:$0xff]  ;;  %v14864_v45 = vcombine.low %v2495_v30, %v2499_v31  ;;  %v14871_v46 = vcombine.high %v2502_v36, %v2506_v37  ;;  %v2554_v30 = vld [vmem:[#allocation12 + $0x370] sm:$0xff] }
 0x45b   :  { %v14873_v13 = vcombine.high %v2503_v42, %v2507_v43  ;;  %v2551_v31 = vld [vmem:[#allocation12 + $0x358] sm:$0xff] }
 0x45c   :  { %4054 = vmatmul.mubr.bf16.vlgmr.msra.gmra.mrb[12].mxu0 %v17854_v50  ;;  %4136 = vmatmul.mubr.bf16.vlgmr.msra.gmra.mrb[12].mxu1 %v17854_v50 }
 0x45d   :  { %4145 = vmatpush1.bf16.msra.mxu0 %v14814_v49  ;;  %4176 = vmatprep.mubr.bf16.mxu0 %v17839_v24  ;;  %v2515_v49 = vld [vmem:[#allocation12 + $0x238] sm:$0xff] }
 0x45e   :  { %4227 = vmatpush1.bf16.msra.mxu1 %v14816_v51  ;;  %4258 = vmatprep.mubr.bf16.mxu1 %v17839_v24  ;;  %v14870_v51 = vcombine.low %v2502_v36, %v2506_v37  ;;  %v14881_v55 = vcombine.high %v2511_v48, %v2515_v49  ;;  %v2558_v37 = vld [vmem:[#allocation12 + $0x390] sm:$0xff] }
 0x45f   :  { %4146 = vmatprep.subr.bf16.mxu0 %v14823_v53  ;;  %4228 = vmatprep.subr.bf16.mxu1 %v14825_v18  ;;  %v14872_v53 = vcombine.low %v2503_v42, %v2507_v43  ;;  %v14879_v18 = vcombine.high %v2510_v47, %v2514_v40  ;;  %v2562_v42 = vld [vmem:[#allocation12 + $0x3b0] sm:$0xff]  ;;  %v2559_v43 = vld [vmem:[#allocation12 + $0x398] sm:$0xff] }
 0x461   :  { %4147 = vmatpush1.bf16.msra.mxu0 %v14822_v59  ;;  %v2523_v59 = vld [vmem:[#allocation12 + $0x278] sm:$0xff] }
 0x462   :  { %4229 = vmatpush1.bf16.msra.mxu1 %v14824_v60  ;;  %4148 = vmatprep.subr.bf16.mxu0 %v14831_v61  ;;  %v14878_v60 = vcombine.low %v2510_v47, %v2514_v40  ;;  %v14880_v61 = vcombine.low %v2511_v48, %v2515_v49  ;;  %v14889_v63 = vcombine.high %v2519_v58, %v2523_v59  ;;  %v2566_v40 = vld [vmem:[#allocation12 + $0x3d0] sm:$0xff]  ;;  %v2567_v49 = vld [vmem:[#allocation12 + $0x3d8] sm:$0xff] }
 0x463   :  { %4230 = vmatprep.subr.bf16.mxu1 %v14833_v62  ;;  %v14887_v62 = vcombine.high %v2518_v56, %v2522_v57  ;;  %v2570_v48 = vld [vmem:[#allocation12 + $0x3f0] sm:$0xff] }
 0x465   :  { %4149 = vmatpush1.bf16.msra.mxu0 %v14830_v5  ;;  %v2531_v5 = vld [vmem:[#allocation12 + $0x2b8] sm:$0xff] }
 0x466   :  { %4231 = vmatpush1.bf16.msra.mxu1 %v14832_v6  ;;  %4150 = vmatprep.subr.bf16.mxu0 %v14839_v7  ;;  %v14886_v6 = vcombine.low %v2518_v56, %v2522_v57  ;;  %v14888_v7 = vcombine.low %v2519_v58, %v2523_v59  ;;  %v14897_v9 = vcombine.high %v2527_v4, %v2531_v5  ;;  %v2574_v57 = vld [vmem:[#allocation12 + $0x410] sm:$0xff]  ;;  %v2575_v59 = vld [vmem:[#allocation12 + $0x418] sm:$0xff] }
 0x467   :  { %4232 = vmatprep.subr.bf16.mxu1 %v14841_v8  ;;  %v14895_v8 = vcombine.high %v2526_v1, %v2530_v3  ;;  %v2578_v58 = vld [vmem:[#allocation12 + $0x430] sm:$0xff] }
 0x469   :  { %4151 = vmatpush1.bf16.msra.mxu0 %v14838_v12  ;;  %v2539_v12 = vld [vmem:[#allocation12 + $0x2f8] sm:$0xff] }
 0x46a   :  { %4233 = vmatpush1.bf16.msra.mxu1 %v14840_v14  ;;  %4152 = vmatprep.subr.bf16.mxu0 %v14847_v15  ;;  %v14894_v14 = vcombine.low %v2526_v1, %v2530_v3  ;;  %v14896_v15 = vcombine.low %v2527_v4, %v2531_v5  ;;  %v14905_v17 = vcombine.high %v2535_v11, %v2539_v12  ;;  %v2582_v3 = vld [vmem:[#allocation12 + $0x450] sm:$0xff] }
 0x46b   :  { %4234 = vmatprep.subr.bf16.mxu1 %v14849_v16  ;;  %v14903_v16 = vcombine.high %v2534_v10, %v2538_v0  ;;  %v2586_v4 = vld [vmem:[#allocation12 + $0x470] sm:$0xff]  ;;  %v14942_v5 = vcombine.low %v2574_v57, %v2578_v58 }
 0x46d   :  { %4153 = vmatpush1.bf16.msra.mxu0 %v14846_v22  ;;  %v2547_v22 = vld [vmem:[#allocation12 + $0x338] sm:$0xff] }
 0x46e   :  { %4235 = vmatpush1.bf16.msra.mxu1 %v14848_v23  ;;  %4154 = vmatprep.subr.bf16.mxu0 %v14855_v26  ;;  %v14902_v23 = vcombine.low %v2534_v10, %v2538_v0  ;;  %v14904_v26 = vcombine.low %v2535_v11, %v2539_v12  ;;  %v14913_v28 = vcombine.high %v2543_v21, %v2547_v22  ;;  %v2590_v10 = vld [vmem:[#allocation12 + $0x490] sm:$0xff]  ;;  %v2591_v12 = vld [vmem:[#allocation12 + $0x498] sm:$0xff] }
 0x46f   :  { %4236 = vmatprep.subr.bf16.mxu1 %v14857_v27  ;;  %v14911_v27 = vcombine.high %v2542_v19, %v2546_v20  ;;  %v2594_v0 = vld [vmem:[#allocation12 + $0x4b0] sm:$0xff] }
 0x471   :  { %4155 = vmatpush1.bf16.msra.mxu0 %v14854_v33  ;;  %v2555_v33 = vld [vmem:[#allocation12 + $0x378] sm:$0xff] }
 0x472   :  { %4237 = vmatpush1.bf16.msra.mxu1 %v14856_v34  ;;  %4156 = vmatprep.subr.bf16.mxu0 %v14863_v35  ;;  %v14910_v34 = vcombine.low %v2542_v19, %v2546_v20  ;;  %v14912_v35 = vcombine.low %v2543_v21, %v2547_v22  ;;  %v14921_v36 = vcombine.high %v2551_v31, %v2555_v33  ;;  %v2598_v20 = vld [vmem:[#allocation12 + $0x4d0] sm:$0xff]  ;;  %v2599_v22 = vld [vmem:[#allocation12 + $0x4d8] sm:$0xff] }
 0x473   :  { %4238 = vmatprep.subr.bf16.mxu1 %v14865_v2  ;;  %v14919_v2 = vcombine.high %v2550_v29, %v2554_v30  ;;  %v2602_v21 = vld [vmem:[#allocation12 + $0x4f0] sm:$0xff] }
 0x475   :  { %4157 = vmatpush1.bf16.msra.mxu0 %v14862_v44  ;;  %v2563_v44 = vld [vmem:[#allocation12 + $0x3b8] sm:$0xff] }
 0x476   :  { %4239 = vmatpush1.bf16.msra.mxu1 %v14864_v45  ;;  %4158 = vmatprep.subr.bf16.mxu0 %v14871_v46  ;;  %v14918_v45 = vcombine.low %v2550_v29, %v2554_v30  ;;  %v14920_v46 = vcombine.low %v2551_v31, %v2555_v33  ;;  %v14929_v47 = vcombine.high %v2559_v43, %v2563_v44  ;;  %v2606_v30 = vld [vmem:[#allocation12 + $0x510] sm:$0xff]  ;;  %v2607_v33 = vld [vmem:[#allocation12 + $0x518] sm:$0xff] }
 0x477   :  { %4240 = vmatprep.subr.bf16.mxu1 %v14873_v13  ;;  %v14927_v13 = vcombine.high %v2558_v37, %v2562_v42  ;;  %v2610_v31 = vld [vmem:[#allocation12 + $0x530] sm:$0xff] }
 0x479   :  { %4159 = vmatpush1.bf16.msra.mxu0 %v14870_v51  ;;  %v2571_v51 = vld [vmem:[#allocation12 + $0x3f8] sm:$0xff] }
 0x47a   :  { %4241 = vmatpush1.bf16.msra.mxu1 %v14872_v53  ;;  %4160 = vmatprep.subr.bf16.mxu0 %v14879_v18  ;;  %v14926_v53 = vcombine.low %v2558_v37, %v2562_v42  ;;  %v14928_v18 = vcombine.low %v2559_v43, %v2563_v44  ;;  %v14937_v56 = vcombine.high %v2567_v49, %v2571_v51  ;;  %v2614_v42 = vld [vmem:[#allocation12 + $0x550] sm:$0xff]  ;;  %v2615_v44 = vld [vmem:[#allocation12 + $0x558] sm:$0xff] }
 0x47b   :  { %4242 = vmatprep.subr.bf16.mxu1 %v14881_v55  ;;  %v14935_v55 = vcombine.high %v2566_v40, %v2570_v48  ;;  %v2618_v43 = vld [vmem:[#allocation12 + $0x570] sm:$0xff] }
 0x47d   :  { %4161 = vmatpush1.bf16.msra.mxu0 %v14878_v60  ;;  %v2579_v60 = vld [vmem:[#allocation12 + $0x438] sm:$0xff] }
 0x47e   :  { %4243 = vmatpush1.bf16.msra.mxu1 %v14880_v61  ;;  %4162 = vmatprep.subr.bf16.mxu0 %v14887_v62  ;;  %v14934_v61 = vcombine.low %v2566_v40, %v2570_v48  ;;  %v14936_v62 = vcombine.low %v2567_v49, %v2571_v51  ;;  %v14945_v1 = vcombine.high %v2575_v59, %v2579_v60  ;;  %v2622_v48 = vld [vmem:[#allocation12 + $0x590] sm:$0xff]  ;;  %v2623_v51 = vld [vmem:[#allocation12 + $0x598] sm:$0xff] }
 0x47f   :  { %4244 = vmatprep.subr.bf16.mxu1 %v14889_v63  ;;  %v14943_v63 = vcombine.high %v2574_v57, %v2578_v58  ;;  %v2626_v49 = vld [vmem:[#allocation12 + $0x5b0] sm:$0xff] }
 0x480   :  { %v2630_v58 = vld [vmem:[#allocation12 + $0x5d0] sm:$0xff] }
 0x481   :  { %4163 = vmatpush1.bf16.msra.mxu0 %v14886_v6  ;;  %v2583_v6 = vld [vmem:[#allocation12 + $0x458] sm:$0xff] }
 0x482   :  { %4245 = vmatpush1.bf16.msra.mxu1 %v14888_v7  ;;  %4164 = vmatprep.subr.bf16.mxu0 %v14895_v8  ;;  %v2587_v7 = vld [vmem:[#allocation12 + $0x478] sm:$0xff]  ;;  %v14944_v8 = vcombine.low %v2575_v59, %v2579_v60  ;;  %v2634_v59 = vld [vmem:[#allocation12 + $0x5f0] sm:$0xff] }
 0x483   :  { %4246 = vmatprep.subr.bf16.mxu1 %v14897_v9  ;;  %v14951_v9 = vcombine.high %v2582_v3, %v2586_v4  ;;  %v14953_v11 = vcombine.high %v2583_v6, %v2587_v7  ;;  %v2631_v60 = vld [vmem:[#allocation12 + $0x5d8] sm:$0xff] }
 0x485   :  { %4165 = vmatpush1.bf16.msra.mxu0 %v14894_v14  ;;  %v2595_v14 = vld [vmem:[#allocation12 + $0x4b8] sm:$0xff] }
 0x486   :  { %4247 = vmatpush1.bf16.msra.mxu1 %v14896_v15  ;;  %4166 = vmatprep.subr.bf16.mxu0 %v14903_v16  ;;  %v14950_v15 = vcombine.low %v2582_v3, %v2586_v4  ;;  %v14952_v16 = vcombine.low %v2583_v6, %v2587_v7  ;;  %v14961_v19 = vcombine.high %v2591_v12, %v2595_v14  ;;  %v2638_v4 = vld [vmem:[#allocation12 + $0x610] sm:$0xff]  ;;  %v2639_v6 = vld [vmem:[#allocation12 + $0x618] sm:$0xff] }
 0x487   :  { %4248 = vmatprep.subr.bf16.mxu1 %v14905_v17  ;;  %v14959_v17 = vcombine.high %v2590_v10, %v2594_v0  ;;  %v2643_v7 = vld [vmem:[#allocation12 + $0x638] sm:$0xff] }
 0x489   :  { %4167 = vmatpush1.bf16.msra.mxu0 %v14902_v23  ;;  %v2603_v23 = vld [vmem:[#allocation12 + $0x4f8] sm:$0xff] }
 0x48a   :  { %4249 = vmatpush1.bf16.msra.mxu1 %v14904_v26  ;;  %4168 = vmatprep.subr.bf16.mxu0 %v14911_v27  ;;  %v14958_v26 = vcombine.low %v2590_v10, %v2594_v0  ;;  %v14960_v27 = vcombine.low %v2591_v12, %v2595_v14  ;;  %v14969_v29 = vcombine.high %v2599_v22, %v2603_v23  ;;  %v2650_v12 = vld [vmem:[#allocation12 + $0x670] sm:$0xff]  ;;  %v2647_v14 = vld [vmem:[#allocation12 + $0x658] sm:$0xff] }
 0x48b   :  { %4250 = vmatprep.subr.bf16.mxu1 %v14913_v28  ;;  %v14967_v28 = vcombine.high %v2598_v20, %v2602_v21  ;;  %v15009_v0 = vcombine.high %v2639_v6, %v2643_v7 }
 0x48d   :  { %4169 = vmatpush1.bf16.msra.mxu0 %v14910_v34  ;;  %v2611_v34 = vld [vmem:[#allocation12 + $0x538] sm:$0xff] }
 0x48e   :  { %4251 = vmatpush1.bf16.msra.mxu1 %v14912_v35  ;;  %4170 = vmatprep.subr.bf16.mxu0 %v14919_v2  ;;  %v14966_v35 = vcombine.low %v2598_v20, %v2602_v21  ;;  %v14968_v2 = vcombine.low %v2599_v22, %v2603_v23  ;;  %v14977_v37 = vcombine.high %v2607_v33, %v2611_v34  ;;  %v2654_v21 = vld [vmem:[#allocation12 + $0x690] sm:$0xff]  ;;  %v2655_v23 = vld [vmem:[#allocation12 + $0x698] sm:$0xff] }
 0x48f   :  { %4252 = vmatprep.subr.bf16.mxu1 %v14921_v36  ;;  %v14975_v36 = vcombine.high %v2606_v30, %v2610_v31  ;;  %v2658_v22 = vld [vmem:[#allocation12 + $0x6b0] sm:$0xff] }
 0x491   :  { %4171 = vmatpush1.bf16.msra.mxu0 %v14918_v45  ;;  %v2619_v45 = vld [vmem:[#allocation12 + $0x578] sm:$0xff] }
 0x492   :  { %4253 = vmatpush1.bf16.msra.mxu1 %v14920_v46  ;;  %4172 = vmatprep.subr.bf16.mxu0 %v14927_v13  ;;  %v14974_v46 = vcombine.low %v2606_v30, %v2610_v31  ;;  %v14976_v13 = vcombine.low %v2607_v33, %v2611_v34  ;;  %v14985_v40 = vcombine.high %v2615_v44, %v2619_v45  ;;  %v2662_v31 = vld [vmem:[#allocation12 + $0x6d0] sm:$0xff]  ;;  %v2663_v34 = vld [vmem:[#allocation12 + $0x6d8] sm:$0xff] }
 0x493   :  { %4254 = vmatprep.subr.bf16.mxu1 %v14929_v47  ;;  %v14983_v47 = vcombine.high %v2614_v42, %v2618_v43  ;;  %v2666_v33 = vld [vmem:[#allocation12 + $0x6f0] sm:$0xff] }
 0x495   :  { %4173 = vmatpush1.bf16.msra.mxu0 %v14926_v53  ;;  %v2627_v53 = vld [vmem:[#allocation12 + $0x5b8] sm:$0xff] }
 0x496   :  { %4255 = vmatpush1.bf16.msra.mxu1 %v14928_v18  ;;  %4174 = vmatprep.subr.bf16.mxu0 %v14935_v55  ;;  %v14982_v18 = vcombine.low %v2614_v42, %v2618_v43  ;;  %v14984_v55 = vcombine.low %v2615_v44, %v2619_v45  ;;  %v14993_v57 = vcombine.high %v2623_v51, %v2627_v53  ;;  %v2670_v43 = vld [vmem:[#allocation12 + $0x710] sm:$0xff]  ;;  %v2671_v45 = vld [vmem:[#allocation12 + $0x718] sm:$0xff] }
 0x497   :  { %4256 = vmatprep.subr.bf16.mxu1 %v14937_v56  ;;  %v14991_v56 = vcombine.high %v2622_v48, %v2626_v49  ;;  %v2674_v44 = vld [vmem:[#allocation12 + $0x730] sm:$0xff] }
 0x499   :  { %4175 = vmatpush1.bf16.msra.mxu0 %v14934_v61  ;;  %v2635_v61 = vld [vmem:[#allocation12 + $0x5f8] sm:$0xff] }
 0x49a   :  { %4257 = vmatpush1.bf16.msra.mxu1 %v14936_v62  ;;  %4185 = vmatprep.subr.bf16.mxu0 %v14943_v63  ;;  %v14990_v62 = vcombine.low %v2622_v48, %v2626_v49  ;;  %v14992_v63 = vcombine.low %v2623_v51, %v2627_v53  ;;  %v15001_v3 = vcombine.high %v2631_v60, %v2635_v61  ;;  %v2678_v49 = vld [vmem:[#allocation12 + $0x750] sm:$0xff]  ;;  %v2679_v53 = vld [vmem:[#allocation12 + $0x758] sm:$0xff] }
 0x49b   :  { %4267 = vmatprep.subr.bf16.mxu1 %v14945_v1  ;;  %v14999_v1 = vcombine.high %v2630_v58, %v2634_v59  ;;  %v2682_v51 = vld [vmem:[#allocation12 + $0x770] sm:$0xff] }
 0x49c   :  { %4177 = vmatmul.mubr.bf16.vlgmr.msra.gmra.mrb[16].mxu0 %v17841_v25 }
 0x49d   :  { %4259 = vmatmul.mubr.bf16.vlgmr.msra.gmra.mrb[16].mxu1 %v17841_v25  ;;  %4186 = vmatpush1.bf16.msra.mxu0 %v14942_v5  ;;  %v2642_v5 = vld [vmem:[#allocation12 + $0x630] sm:$0xff] }
 0x49e   :  { %4217 = vmatprep.mubr.bf16.mxu0 %v17845_v32  ;;  %4268 = vmatpush1.bf16.msra.mxu1 %v14944_v8  ;;  %v14998_v8 = vcombine.low %v2630_v58, %v2634_v59  ;;  %v15007_v10 = vcombine.high %v2638_v4, %v2642_v5  ;;  %v2686_v59 = vld [vmem:[#allocation12 + $0x790] sm:$0xff] }
 0x49f   :  { %4299 = vmatprep.mubr.bf16.mxu1 %v17845_v32  ;;  %4187 = vmatprep.subr.bf16.mxu0 %v14951_v9  ;;  %v15000_v9 = vcombine.low %v2631_v60, %v2635_v61  ;;  %v2690_v60 = vld [vmem:[#allocation12 + $0x7b0] sm:$0xff]  ;;  %v2687_v61 = vld [vmem:[#allocation12 + $0x798] sm:$0xff] }
 0x4a0   :  { %4269 = vmatprep.subr.bf16.mxu1 %v14953_v11  ;;  %v2646_v11 = vld [vmem:[#allocation12 + $0x650] sm:$0xff] }
 0x4a1   :  { %4188 = vmatpush1.bf16.msra.mxu0 %v14950_v15  ;;  %v2651_v15 = vld [vmem:[#allocation12 + $0x678] sm:$0xff] }
 0x4a2   :  { %4270 = vmatpush1.bf16.msra.mxu1 %v14952_v16  ;;  %4189 = vmatprep.subr.bf16.mxu0 %v14959_v17  ;;  %v15006_v16 = vcombine.low %v2638_v4, %v2642_v5  ;;  %v15008_v17 = vcombine.low %v2639_v6, %v2643_v7  ;;  %v15017_v20 = vcombine.high %v2647_v14, %v2651_v15  ;;  %v2694_v5 = vld [vmem:[#allocation12 + $0x7d0] sm:$0xff]  ;;  %v2695_v7 = vld [vmem:[#allocation12 + $0x7d8] sm:$0xff] }
 0x4a3   :  { %4271 = vmatprep.subr.bf16.mxu1 %v14961_v19  ;;  %v15015_v19 = vcombine.high %v2646_v11, %v2650_v12  ;;  %v2698_v6 = vld [vmem:[#allocation12 + $0x7f0] sm:$0xff] }
 0x4a5   :  { %4190 = vmatpush1.bf16.msra.mxu0 %v14958_v26  ;;  %v2659_v26 = vld [vmem:[#allocation12 + $0x6b8] sm:$0xff] }
 0x4a6   :  { %4272 = vmatpush1.bf16.msra.mxu1 %v14960_v27  ;;  %4191 = vmatprep.subr.bf16.mxu0 %v14967_v28  ;;  %v15014_v27 = vcombine.low %v2646_v11, %v2650_v12  ;;  %v15016_v28 = vcombine.low %v2647_v14, %v2651_v15  ;;  %v15025_v30 = vcombine.high %v2655_v23, %v2659_v26  ;;  %v4358_v12 = vld [vmem:[#allocation12 + $0x800] sm:$0xff]  ;;  %v4359_v15 = vld [vmem:[#allocation12 + $0x808] sm:$0xff] }
 0x4a7   :  { %4273 = vmatprep.subr.bf16.mxu1 %v14969_v29  ;;  %v15023_v29 = vcombine.high %v2654_v21, %v2658_v22  ;;  %v4362_v14 = vld [vmem:[#allocation12 + $0x820] sm:$0xff] }
 0x4a9   :  { %4192 = vmatpush1.bf16.msra.mxu0 %v14966_v35  ;;  %v2667_v35 = vld [vmem:[#allocation12 + $0x6f8] sm:$0xff] }
 0x4aa   :  { %4274 = vmatpush1.bf16.msra.mxu1 %v14968_v2  ;;  %4193 = vmatprep.subr.bf16.mxu0 %v14975_v36  ;;  %v15022_v2 = vcombine.low %v2654_v21, %v2658_v22  ;;  %v15024_v36 = vcombine.low %v2655_v23, %v2659_v26  ;;  %v15033_v42 = vcombine.high %v2663_v34, %v2667_v35  ;;  %v4366_v22 = vld [vmem:[#allocation12 + $0x840] sm:$0xff] }
 0x4ab   :  { %4275 = vmatprep.subr.bf16.mxu1 %v14977_v37  ;;  %v15031_v37 = vcombine.high %v2662_v31, %v2666_v33  ;;  %v4370_v23 = vld [vmem:[#allocation12 + $0x860] sm:$0xff]  ;;  %v15066_v26 = vcombine.low %v4358_v12, %v4362_v14 }
 0x4ad   :  { %4194 = vmatpush1.bf16.msra.mxu0 %v14974_v46  ;;  %v2675_v46 = vld [vmem:[#allocation12 + $0x738] sm:$0xff] }
 0x4ae   :  { %4276 = vmatpush1.bf16.msra.mxu1 %v14976_v13  ;;  %4195 = vmatprep.subr.bf16.mxu0 %v14983_v47  ;;  %v15030_v13 = vcombine.low %v2662_v31, %v2666_v33  ;;  %v15032_v47 = vcombine.low %v2663_v34, %v2667_v35  ;;  %v15041_v48 = vcombine.high %v2671_v45, %v2675_v46  ;;  %v4374_v31 = vld [vmem:[#allocation12 + $0x880] sm:$0xff]  ;;  %v17866_v34 = vrot.slane %v17839_v24, 2  ;;  %v4383_v24 = vld [vmem:[#allocation12 + $0x8c8] sm:$0xff] }
 0x4af   :  { %4277 = vmatprep.subr.bf16.mxu1 %v14985_v40  ;;  %v15039_v40 = vcombine.high %v2670_v43, %v2674_v44  ;;  %v4378_v33 = vld [vmem:[#allocation12 + $0x8a0] sm:$0xff] }
 0x4b1   :  { %4196 = vmatpush1.bf16.msra.mxu0 %v14982_v18  ;;  %v2683_v18 = vld [vmem:[#allocation12 + $0x778] sm:$0xff] }
 0x4b2   :  { %4278 = vmatpush1.bf16.msra.mxu1 %v14984_v55  ;;  %4197 = vmatprep.subr.bf16.mxu0 %v14991_v56  ;;  %v15038_v55 = vcombine.low %v2670_v43, %v2674_v44  ;;  %v15040_v56 = vcombine.low %v2671_v45, %v2675_v46  ;;  %v15049_v58 = vcombine.high %v2679_v53, %v2683_v18  ;;  %v4382_v45 = vld [vmem:[#allocation12 + $0x8c0] sm:$0xff] }
 0x4b3   :  { %4279 = vmatprep.subr.bf16.mxu1 %v14993_v57  ;;  %v15047_v57 = vcombine.high %v2678_v49, %v2682_v51  ;;  %v15083_v43 = vcombine.high %v4374_v31, %v4378_v33  ;;  %v4386_v46 = vld [vmem:[#allocation12 + $0x8e0] sm:$0xff] }
 0x4b5   :  { %4198 = vmatpush1.bf16.msra.mxu0 %v14990_v62  ;;  %v2691_v62 = vld [vmem:[#allocation12 + $0x7b8] sm:$0xff] }
 0x4b6   :  { %4280 = vmatpush1.bf16.msra.mxu1 %v14992_v63  ;;  %4199 = vmatprep.subr.bf16.mxu0 %v14999_v1  ;;  %v15046_v63 = vcombine.low %v2678_v49, %v2682_v51  ;;  %v15048_v1 = vcombine.low %v2679_v53, %v2683_v18  ;;  %v15057_v4 = vcombine.high %v2687_v61, %v2691_v62  ;;  %v4390_v51 = vld [vmem:[#allocation12 + $0x900] sm:$0xff]  ;;  %v4391_v18 = vld [vmem:[#allocation12 + $0x908] sm:$0xff] }
 0x4b7   :  { %4281 = vmatprep.subr.bf16.mxu1 %v15001_v3  ;;  %v15055_v3 = vcombine.high %v2686_v59, %v2690_v60  ;;  %v4394_v53 = vld [vmem:[#allocation12 + $0x920] sm:$0xff] }
 0x4b9   :  { %4200 = vmatpush1.bf16.msra.mxu0 %v14998_v8  ;;  %v2699_v8 = vld [vmem:[#allocation12 + $0x7f8] sm:$0xff] }
 0x4ba   :  { %4282 = vmatpush1.bf16.msra.mxu1 %v15000_v9  ;;  %4201 = vmatprep.subr.bf16.mxu0 %v15007_v10  ;;  %v15054_v9 = vcombine.low %v2686_v59, %v2690_v60  ;;  %v15056_v10 = vcombine.low %v2687_v61, %v2691_v62  ;;  %v15065_v11 = vcombine.high %v2695_v7, %v2699_v8  ;;  %v4398_v60 = vld [vmem:[#allocation12 + $0x940] sm:$0xff]  ;;  %v4399_v62 = vld [vmem:[#allocation12 + $0x948] sm:$0xff] }
 0x4bb   :  { %4283 = vmatprep.subr.bf16.mxu1 %v15009_v0  ;;  %v15063_v0 = vcombine.high %v2694_v5, %v2698_v6  ;;  %v4402_v61 = vld [vmem:[#allocation12 + $0x960] sm:$0xff] }
 0x4bd   :  { %4202 = vmatpush1.bf16.msra.mxu0 %v15006_v16  ;;  %v4363_v16 = vld [vmem:[#allocation12 + $0x828] sm:$0xff] }
 0x4be   :  { %4284 = vmatpush1.bf16.msra.mxu1 %v15008_v17  ;;  %4203 = vmatprep.subr.bf16.mxu0 %v15015_v19  ;;  %v15062_v17 = vcombine.low %v2694_v5, %v2698_v6  ;;  %v15064_v19 = vcombine.low %v2695_v7, %v2699_v8  ;;  %v15069_v21 = vcombine.high %v4359_v15, %v4363_v16  ;;  %v4406_v6 = vld [vmem:[#allocation12 + $0x980] sm:$0xff]  ;;  %v4407_v8 = vld [vmem:[#allocation12 + $0x988] sm:$0xff] }
 0x4bf   :  { %4285 = vmatprep.subr.bf16.mxu1 %v15017_v20  ;;  %v15067_v20 = vcombine.high %v4358_v12, %v4362_v14  ;;  %v4410_v7 = vld [vmem:[#allocation12 + $0x9a0] sm:$0xff] }
 0x4c0   :  { %v4414_v14 = vld [vmem:[#allocation12 + $0x9c0] sm:$0xff] }
 0x4c1   :  { %4204 = vmatpush1.bf16.msra.mxu0 %v15014_v27  ;;  %v4367_v27 = vld [vmem:[#allocation12 + $0x848] sm:$0xff] }
 0x4c2   :  { %4286 = vmatpush1.bf16.msra.mxu1 %v15016_v28  ;;  %4205 = vmatprep.subr.bf16.mxu0 %v15023_v29  ;;  %v4371_v28 = vld [vmem:[#allocation12 + $0x868] sm:$0xff]  ;;  %v15068_v29 = vcombine.low %v4359_v15, %v4363_v16  ;;  %v4418_v15 = vld [vmem:[#allocation12 + $0x9e0] sm:$0xff] }
 0x4c3   :  { %4287 = vmatprep.subr.bf16.mxu1 %v15025_v30  ;;  %v15075_v30 = vcombine.high %v4366_v22, %v4370_v23  ;;  %v15077_v35 = vcombine.high %v4367_v27, %v4371_v28  ;;  %v4415_v16 = vld [vmem:[#allocation12 + $0x9c8] sm:$0xff] }
 0x4c5   :  { %4206 = vmatpush1.bf16.msra.mxu0 %v15022_v2  ;;  %v4375_v2 = vld [vmem:[#allocation12 + $0x888] sm:$0xff] }
 0x4c6   :  { %4288 = vmatpush1.bf16.msra.mxu1 %v15024_v36  ;;  %4207 = vmatprep.subr.bf16.mxu0 %v15031_v37  ;;  %v4379_v36 = vld [vmem:[#allocation12 + $0x8a8] sm:$0xff]  ;;  %v15074_v37 = vcombine.low %v4366_v22, %v4370_v23  ;;  %v4422_v23 = vld [vmem:[#allocation12 + $0xa00] sm:$0xff] }
 0x4c7   :  { %4289 = vmatprep.subr.bf16.mxu1 %v15033_v42  ;;  %v15076_v42 = vcombine.low %v4367_v27, %v4371_v28  ;;  %v15085_v44 = vcombine.high %v4375_v2, %v4379_v36  ;;  %v4423_v27 = vld [vmem:[#allocation12 + $0xa08] sm:$0xff] }
 0x4c8   :  { %v4427_v28 = vld [vmem:[#allocation12 + $0xa28] sm:$0xff] }
 0x4c9   :  { %4208 = vmatpush1.bf16.msra.mxu0 %v15030_v13  ;;  %v4387_v13 = vld [vmem:[#allocation12 + $0x8e8] sm:$0xff] }
 0x4ca   :  { %4290 = vmatpush1.bf16.msra.mxu1 %v15032_v47  ;;  %4209 = vmatprep.subr.bf16.mxu0 %v15039_v40  ;;  %v15082_v47 = vcombine.low %v4374_v31, %v4378_v33  ;;  %v15084_v40 = vcombine.low %v4375_v2, %v4379_v36  ;;  %v15093_v49 = vcombine.high %v4383_v24, %v4387_v13  ;;  %v4434_v2 = vld [vmem:[#allocation12 + $0xa60] sm:$0xff]  ;;  %v4431_v36 = vld [vmem:[#allocation12 + $0xa48] sm:$0xff] }
 0x4cb   :  { %4291 = vmatprep.subr.bf16.mxu1 %v15041_v48  ;;  %v15091_v48 = vcombine.high %v4382_v45, %v4386_v46  ;;  %v15133_v33 = vcombine.high %v4423_v27, %v4427_v28 }
 0x4cd   :  { %4210 = vmatpush1.bf16.msra.mxu0 %v15038_v55  ;;  %v4395_v55 = vld [vmem:[#allocation12 + $0x928] sm:$0xff] }
 0x4ce   :  { %4292 = vmatpush1.bf16.msra.mxu1 %v15040_v56  ;;  %4211 = vmatprep.subr.bf16.mxu0 %v15047_v57  ;;  %v15090_v56 = vcombine.low %v4382_v45, %v4386_v46  ;;  %v15092_v57 = vcombine.low %v4383_v24, %v4387_v13  ;;  %v15101_v59 = vcombine.high %v4391_v18, %v4395_v55  ;;  %v4438_v46 = vld [vmem:[#allocation12 + $0xa80] sm:$0xff]  ;;  %v4439_v13 = vld [vmem:[#allocation12 + $0xa88] sm:$0xff] }
 0x4cf   :  { %4293 = vmatprep.subr.bf16.mxu1 %v15049_v58  ;;  %v15099_v58 = vcombine.high %v4390_v51, %v4394_v53  ;;  %v4442_v24 = vld [vmem:[#allocation12 + $0xaa0] sm:$0xff] }
 0x4d1   :  { %4212 = vmatpush1.bf16.msra.mxu0 %v15046_v63  ;;  %v4403_v63 = vld [vmem:[#allocation12 + $0x968] sm:$0xff] }
 0x4d2   :  { %4294 = vmatpush1.bf16.msra.mxu1 %v15048_v1  ;;  %4213 = vmatprep.subr.bf16.mxu0 %v15055_v3  ;;  %v15098_v1 = vcombine.low %v4390_v51, %v4394_v53  ;;  %v15100_v3 = vcombine.low %v4391_v18, %v4395_v55  ;;  %v15109_v5 = vcombine.high %v4399_v62, %v4403_v63  ;;  %v4446_v53 = vld [vmem:[#allocation12 + $0xac0] sm:$0xff]  ;;  %v4447_v55 = vld [vmem:[#allocation12 + $0xac8] sm:$0xff] }
 0x4d3   :  { %4295 = vmatprep.subr.bf16.mxu1 %v15057_v4  ;;  %v15107_v4 = vcombine.high %v4398_v60, %v4402_v61  ;;  %v4450_v18 = vld [vmem:[#allocation12 + $0xae0] sm:$0xff] }
 0x4d5   :  { %4214 = vmatpush1.bf16.msra.mxu0 %v15054_v9  ;;  %v4411_v9 = vld [vmem:[#allocation12 + $0x9a8] sm:$0xff] }
 0x4d6   :  { %4296 = vmatpush1.bf16.msra.mxu1 %v15056_v10  ;;  %4215 = vmatprep.subr.bf16.mxu0 %v15063_v0  ;;  %v15106_v10 = vcombine.low %v4398_v60, %v4402_v61  ;;  %v15108_v0 = vcombine.low %v4399_v62, %v4403_v63  ;;  %v15117_v12 = vcombine.high %v4407_v8, %v4411_v9  ;;  %v4454_v61 = vld [vmem:[#allocation12 + $0xb00] sm:$0xff]  ;;  %v4455_v63 = vld [vmem:[#allocation12 + $0xb08] sm:$0xff] }
 0x4d7   :  { %4297 = vmatprep.subr.bf16.mxu1 %v15065_v11  ;;  %v15115_v11 = vcombine.high %v4406_v6, %v4410_v7  ;;  %v4458_v62 = vld [vmem:[#allocation12 + $0xb20] sm:$0xff] }
 0x4d9   :  { %4216 = vmatpush1.bf16.msra.mxu0 %v15062_v17  ;;  %v4419_v17 = vld [vmem:[#allocation12 + $0x9e8] sm:$0xff] }
 0x4da   :  { %4298 = vmatpush1.bf16.msra.mxu1 %v15064_v19  ;;  %5906 = vmatprep.subr.bf16.mxu0 %v15067_v20  ;;  %v15114_v19 = vcombine.low %v4406_v6, %v4410_v7  ;;  %v15116_v20 = vcombine.low %v4407_v8, %v4411_v9  ;;  %v15125_v22 = vcombine.high %v4415_v16, %v4419_v17  ;;  %v4462_v7 = vld [vmem:[#allocation12 + $0xb40] sm:$0xff]  ;;  %v4463_v9 = vld [vmem:[#allocation12 + $0xb48] sm:$0xff] }
 0x4db   :  { %5988 = vmatprep.subr.bf16.mxu1 %v15069_v21  ;;  %v15123_v21 = vcombine.high %v4414_v14, %v4418_v15  ;;  %v4466_v8 = vld [vmem:[#allocation12 + $0xb60] sm:$0xff] }
 0x4dc   :  { %4218 = vmatmul.mubr.bf16.vlgmr.msra.gmra.mrb[16].mxu0 %v17854_v50 }
 0x4dd   :  { %4300 = vmatmul.mubr.bf16.vlgmr.msra.gmra.mrb[16].mxu1 %v17854_v50  ;;  %5907 = vmatpush1.bf16.msra.mxu0 %v15066_v26  ;;  %v4426_v26 = vld [vmem:[#allocation12 + $0xa20] sm:$0xff] }
 0x4de   :  { %5938 = vmatprep.mubr.bf16.mxu0 %v17866_v34  ;;  %5989 = vmatpush1.bf16.msra.mxu1 %v15068_v29  ;;  %v15122_v29 = vcombine.low %v4414_v14, %v4418_v15  ;;  %v15131_v31 = vcombine.high %v4422_v23, %v4426_v26  ;;  %v4470_v15 = vld [vmem:[#allocation12 + $0xb80] sm:$0xff] }
 0x4df   :  { %6020 = vmatprep.mubr.bf16.mxu1 %v17866_v34  ;;  %5908 = vmatprep.subr.bf16.mxu0 %v15075_v30  ;;  %v15124_v30 = vcombine.low %v4415_v16, %v4419_v17  ;;  %v4474_v16 = vld [vmem:[#allocation12 + $0xba0] sm:$0xff]  ;;  %v4471_v17 = vld [vmem:[#allocation12 + $0xb88] sm:$0xff] }
 0x4e0   :  { %5990 = vmatprep.subr.bf16.mxu1 %v15077_v35  ;;  %v4430_v35 = vld [vmem:[#allocation12 + $0xa40] sm:$0xff] }
 0x4e1   :  { %5909 = vmatpush1.bf16.msra.mxu0 %v15074_v37  ;;  %v4435_v37 = vld [vmem:[#allocation12 + $0xa68] sm:$0xff] }
 0x4e2   :  { %5991 = vmatpush1.bf16.msra.mxu1 %v15076_v42  ;;  %5910 = vmatprep.subr.bf16.mxu0 %v15083_v43  ;;  %v15130_v42 = vcombine.low %v4422_v23, %v4426_v26  ;;  %v15132_v43 = vcombine.low %v4423_v27, %v4427_v28  ;;  %v15141_v45 = vcombine.high %v4431_v36, %v4435_v37  ;;  %v4478_v26 = vld [vmem:[#allocation12 + $0xbc0] sm:$0xff]  ;;  %v4479_v28 = vld [vmem:[#allocation12 + $0xbc8] sm:$0xff] }
 0x4e3   :  { %5992 = vmatprep.subr.bf16.mxu1 %v15085_v44  ;;  %v15139_v44 = vcombine.high %v4430_v35, %v4434_v2  ;;  %v4482_v27 = vld [vmem:[#allocation12 + $0xbe0] sm:$0xff] }
 0x4e5   :  { %5911 = vmatpush1.bf16.msra.mxu0 %v15082_v47  ;;  %v4443_v47 = vld [vmem:[#allocation12 + $0xaa8] sm:$0xff] }
 0x4e6   :  { %5993 = vmatpush1.bf16.msra.mxu1 %v15084_v40  ;;  %5912 = vmatprep.subr.bf16.mxu0 %v15091_v48  ;;  %v15138_v40 = vcombine.low %v4430_v35, %v4434_v2  ;;  %v15140_v48 = vcombine.low %v4431_v36, %v4435_v37  ;;  %v15149_v51 = vcombine.high %v4439_v13, %v4443_v47  ;;  %v4486_v2 = vld [vmem:[#allocation12 + $0xc00] sm:$0xff]  ;;  %v4487_v37 = vld [vmem:[#allocation12 + $0xc08] sm:$0xff] }
 0x4e7   :  { %5994 = vmatprep.subr.bf16.mxu1 %v15093_v49  ;;  %v15147_v49 = vcombine.high %v4438_v46, %v4442_v24  ;;  %v4490_v36 = vld [vmem:[#allocation12 + $0xc20] sm:$0xff] }
 0x4e9   :  { %5913 = vmatpush1.bf16.msra.mxu0 %v15090_v56  ;;  %v4451_v56 = vld [vmem:[#allocation12 + $0xae8] sm:$0xff] }
 0x4ea   :  { %5995 = vmatpush1.bf16.msra.mxu1 %v15092_v57  ;;  %5914 = vmatprep.subr.bf16.mxu0 %v15099_v58  ;;  %v15146_v57 = vcombine.low %v4438_v46, %v4442_v24  ;;  %v15148_v58 = vcombine.low %v4439_v13, %v4443_v47  ;;  %v15157_v60 = vcombine.high %v4447_v55, %v4451_v56  ;;  %v4494_v24 = vld [vmem:[#allocation12 + $0xc40] sm:$0xff] }
 0x4eb   :  { %5996 = vmatprep.subr.bf16.mxu1 %v15101_v59  ;;  %v15155_v59 = vcombine.high %v4446_v53, %v4450_v18  ;;  %v4498_v13 = vld [vmem:[#allocation12 + $0xc60] sm:$0xff]  ;;  %v15194_v47 = vcombine.low %v4486_v2, %v4490_v36 }
 0x4ed   :  { %5915 = vmatpush1.bf16.msra.mxu0 %v15098_v1  ;;  %v4459_v1 = vld [vmem:[#allocation12 + $0xb28] sm:$0xff] }
 0x4ee   :  { %5997 = vmatpush1.bf16.msra.mxu1 %v15100_v3  ;;  %5916 = vmatprep.subr.bf16.mxu0 %v15107_v4  ;;  %v15154_v3 = vcombine.low %v4446_v53, %v4450_v18  ;;  %v15156_v4 = vcombine.low %v4447_v55, %v4451_v56  ;;  %v15165_v6 = vcombine.high %v4455_v63, %v4459_v1  ;;  %v4502_v18 = vld [vmem:[#allocation12 + $0xc80] sm:$0xff]  ;;  %v17876_v56 = vrot.slane %v17845_v32, 2  ;;  %v4511_v32 = vld [vmem:[#allocation12 + $0xcc8] sm:$0xff] }
 0x4ef   :  { %5998 = vmatprep.subr.bf16.mxu1 %v15109_v5  ;;  %v15163_v5 = vcombine.high %v4454_v61, %v4458_v62  ;;  %v15203_v53 = vcombine.high %v4494_v24, %v4498_v13  ;;  %v4506_v55 = vld [vmem:[#allocation12 + $0xca0] sm:$0xff] }
 0x4f1   :  { %5917 = vmatpush1.bf16.msra.mxu0 %v15106_v10  ;;  %v4467_v10 = vld [vmem:[#allocation12 + $0xb68] sm:$0xff] }
 0x4f2   :  { %5999 = vmatpush1.bf16.msra.mxu1 %v15108_v0  ;;  %5918 = vmatprep.subr.bf16.mxu0 %v15115_v11  ;;  %v15162_v0 = vcombine.low %v4454_v61, %v4458_v62  ;;  %v15164_v11 = vcombine.low %v4455_v63, %v4459_v1  ;;  %v15173_v14 = vcombine.high %v4463_v9, %v4467_v10  ;;  %v4510_v63 = vld [vmem:[#allocation12 + $0xcc0] sm:$0xff] }
 0x4f3   :  { %6000 = vmatprep.subr.bf16.mxu1 %v15117_v12  ;;  %v15171_v12 = vcombine.high %v4462_v7, %v4466_v8  ;;  %v15211_v61 = vcombine.high %v4502_v18, %v4506_v55  ;;  %v4514_v1 = vld [vmem:[#allocation12 + $0xce0] sm:$0xff] }
 0x4f5   :  { %5919 = vmatpush1.bf16.msra.mxu0 %v15114_v19  ;;  %v4475_v19 = vld [vmem:[#allocation12 + $0xba8] sm:$0xff] }
 0x4f6   :  { %6001 = vmatpush1.bf16.msra.mxu1 %v15116_v20  ;;  %5920 = vmatprep.subr.bf16.mxu0 %v15123_v21  ;;  %v15170_v20 = vcombine.low %v4462_v7, %v4466_v8  ;;  %v15172_v21 = vcombine.low %v4463_v9, %v4467_v10  ;;  %v15181_v23 = vcombine.high %v4471_v17, %v4475_v19  ;;  %v4518_v8 = vld [vmem:[#allocation12 + $0xd00] sm:$0xff]  ;;  %v4519_v10 = vld [vmem:[#allocation12 + $0xd08] sm:$0xff] }
 0x4f7   :  { %6002 = vmatprep.subr.bf16.mxu1 %v15125_v22  ;;  %v15179_v22 = vcombine.high %v4470_v15, %v4474_v16  ;;  %v4522_v9 = vld [vmem:[#allocation12 + $0xd20] sm:$0xff] }
 0x4f9   :  { %5921 = vmatpush1.bf16.msra.mxu0 %v15122_v29  ;;  %v4483_v29 = vld [vmem:[#allocation12 + $0xbe8] sm:$0xff] }
 0x4fa   :  { %6003 = vmatpush1.bf16.msra.mxu1 %v15124_v30  ;;  %5922 = vmatprep.subr.bf16.mxu0 %v15131_v31  ;;  %v15178_v30 = vcombine.low %v4470_v15, %v4474_v16  ;;  %v15180_v31 = vcombine.low %v4471_v17, %v4475_v19  ;;  %v15189_v35 = vcombine.high %v4479_v28, %v4483_v29  ;;  %v4526_v16 = vld [vmem:[#allocation12 + $0xd40] sm:$0xff]  ;;  %v4527_v19 = vld [vmem:[#allocation12 + $0xd48] sm:$0xff] }
 0x4fb   :  { %6004 = vmatprep.subr.bf16.mxu1 %v15133_v33  ;;  %v15187_v33 = vcombine.high %v4478_v26, %v4482_v27  ;;  %v4530_v17 = vld [vmem:[#allocation12 + $0xd60] sm:$0xff] }
 0x4fd   :  { %5923 = vmatpush1.bf16.msra.mxu0 %v15130_v42  ;;  %v4491_v42 = vld [vmem:[#allocation12 + $0xc28] sm:$0xff] }
 0x4fe   :  { %6005 = vmatpush1.bf16.msra.mxu1 %v15132_v43  ;;  %5924 = vmatprep.subr.bf16.mxu0 %v15139_v44  ;;  %v15186_v43 = vcombine.low %v4478_v26, %v4482_v27  ;;  %v15188_v44 = vcombine.low %v4479_v28, %v4483_v29  ;;  %v15197_v46 = vcombine.high %v4487_v37, %v4491_v42  ;;  %v4534_v27 = vld [vmem:[#allocation12 + $0xd80] sm:$0xff]  ;;  %v4535_v29 = vld [vmem:[#allocation12 + $0xd88] sm:$0xff] }
 0x4ff   :  { %6006 = vmatprep.subr.bf16.mxu1 %v15141_v45  ;;  %v15195_v45 = vcombine.high %v4486_v2, %v4490_v36  ;;  %v4538_v28 = vld [vmem:[#allocation12 + $0xda0] sm:$0xff] }
 0x500   :  { %v4542_v36 = vld [vmem:[#allocation12 + $0xdc0] sm:$0xff] }
 0x501   :  { %5925 = vmatpush1.bf16.msra.mxu0 %v15138_v40  ;;  %v4495_v40 = vld [vmem:[#allocation12 + $0xc48] sm:$0xff] }
 0x502   :  { %6007 = vmatpush1.bf16.msra.mxu1 %v15140_v48  ;;  %5926 = vmatprep.subr.bf16.mxu0 %v15147_v49  ;;  %v4499_v48 = vld [vmem:[#allocation12 + $0xc68] sm:$0xff]  ;;  %v17872_v49 = vrot.slane %v17841_v25, 2 }
 0x503   :  { %6008 = vmatprep.subr.bf16.mxu1 %v15149_v51  ;;  %v15196_v51 = vcombine.low %v4487_v37, %v4491_v42  ;;  %v15204_v25 = vcombine.low %v4495_v40, %v4499_v48  ;;  %v4546_v37 = vld [vmem:[#allocation12 + $0xde0] sm:$0xff]  ;;  %v4543_v42 = vld [vmem:[#allocation12 + $0xdc8] sm:$0xff] }
 0x505   :  { %5927 = vmatpush1.bf16.msra.mxu0 %v15146_v57  ;;  %v15205_v57 = vcombine.high %v4495_v40, %v4499_v48  ;;  %v4551_v40 = vld [vmem:[#allocation12 + $0xe08] sm:$0xff] }
 0x506   :  { %6009 = vmatpush1.bf16.msra.mxu1 %v15148_v58  ;;  %5928 = vmatprep.subr.bf16.mxu0 %v15155_v59  ;;  %v4503_v58 = vld [vmem:[#allocation12 + $0xc88] sm:$0xff] }
 0x507   :  { %6010 = vmatprep.subr.bf16.mxu1 %v15157_v60  ;;  %v4507_v59 = vld [vmem:[#allocation12 + $0xca8] sm:$0xff]  ;;  %v15202_v60 = vcombine.low %v4494_v24, %v4498_v13  ;;  %v4550_v13 = vld [vmem:[#allocation12 + $0xe00] sm:$0xff] }
 0x508   :  { %v15213_v62 = vcombine.high %v4503_v58, %v4507_v59  ;;  %v4555_v48 = vld [vmem:[#allocation12 + $0xe28] sm:$0xff] }
 0x509   :  { %5929 = vmatpush1.bf16.msra.mxu0 %v15154_v3  ;;  %v4515_v3 = vld [vmem:[#allocation12 + $0xce8] sm:$0xff] }
 0x50a   :  { %6011 = vmatpush1.bf16.msra.mxu1 %v15156_v4  ;;  %5930 = vmatprep.subr.bf16.mxu0 %v15163_v5  ;;  %v15210_v4 = vcombine.low %v4502_v18, %v4506_v55  ;;  %v15212_v5 = vcombine.low %v4503_v58, %v4507_v59  ;;  %v15221_v7 = vcombine.high %v4511_v32, %v4515_v3  ;;  %v4562_v58 = vld [vmem:[#allocation12 + $0xe60] sm:$0xff]  ;;  %v4559_v59 = vld [vmem:[#allocation12 + $0xe48] sm:$0xff] }
 0x50b   :  { %6012 = vmatprep.subr.bf16.mxu1 %v15165_v6  ;;  %v15219_v6 = vcombine.high %v4510_v63, %v4514_v1  ;;  %v15261_v55 = vcombine.high %v4551_v40, %v4555_v48 }
 0x50d   :  { %5931 = vmatpush1.bf16.msra.mxu0 %v15162_v0  ;;  %v4523_v0 = vld [vmem:[#allocation12 + $0xd28] sm:$0xff] }
 0x50e   :  { %6013 = vmatpush1.bf16.msra.mxu1 %v15164_v11  ;;  %5932 = vmatprep.subr.bf16.mxu0 %v15171_v12  ;;  %v15218_v11 = vcombine.low %v4510_v63, %v4514_v1  ;;  %v15220_v12 = vcombine.low %v4511_v32, %v4515_v3  ;;  %v15229_v15 = vcombine.high %v4519_v10, %v4523_v0  ;;  %v4566_v1 = vld [vmem:[#allocation12 + $0xe80] sm:$0xff]  ;;  %v4567_v3 = vld [vmem:[#allocation12 + $0xe88] sm:$0xff] }
 0x50f   :  { %6014 = vmatprep.subr.bf16.mxu1 %v15173_v14  ;;  %v15227_v14 = vcombine.high %v4518_v8, %v4522_v9  ;;  %v4570_v32 = vld [vmem:[#allocation12 + $0xea0] sm:$0xff] }
 0x511   :  { %5933 = vmatpush1.bf16.msra.mxu0 %v15170_v20  ;;  %v4531_v20 = vld [vmem:[#allocation12 + $0xd68] sm:$0xff] }
 0x512   :  { %6015 = vmatpush1.bf16.msra.mxu1 %v15172_v21  ;;  %5934 = vmatprep.subr.bf16.mxu0 %v15179_v22  ;;  %v15226_v21 = vcombine.low %v4518_v8, %v4522_v9  ;;  %v15228_v22 = vcombine.low %v4519_v10, %v4523_v0  ;;  %v15237_v26 = vcombine.high %v4527_v19, %v4531_v20  ;;  %v4574_v9 = vld [vmem:[#allocation12 + $0xec0] sm:$0xff]  ;;  %v4575_v0 = vld [vmem:[#allocation12 + $0xec8] sm:$0xff] }
 0x513   :  { %6016 = vmatprep.subr.bf16.mxu1 %v15181_v23  ;;  %v15235_v23 = vcombine.high %v4526_v16, %v4530_v17  ;;  %v4578_v10 = vld [vmem:[#allocation12 + $0xee0] sm:$0xff] }
 0x515   :  { %5935 = vmatpush1.bf16.msra.mxu0 %v15178_v30  ;;  %v4539_v30 = vld [vmem:[#allocation12 + $0xda8] sm:$0xff] }
 0x516   :  { %6017 = vmatpush1.bf16.msra.mxu1 %v15180_v31  ;;  %5936 = vmatprep.subr.bf16.mxu0 %v15187_v33  ;;  %v15234_v31 = vcombine.low %v4526_v16, %v4530_v17  ;;  %v15236_v33 = vcombine.low %v4527_v19, %v4531_v20  ;;  %v15245_v2 = vcombine.high %v4535_v29, %v4539_v30  ;;  %v4582_v17 = vld [vmem:[#allocation12 + $0xf00] sm:$0xff]  ;;  %v4583_v20 = vld [vmem:[#allocation12 + $0xf08] sm:$0xff] }
 0x517   :  { %6018 = vmatprep.subr.bf16.mxu1 %v15189_v35  ;;  %v15243_v35 = vcombine.high %v4534_v27, %v4538_v28  ;;  %v4586_v19 = vld [vmem:[#allocation12 + $0xf20] sm:$0xff] }
 0x519   :  { %5937 = vmatpush1.bf16.msra.mxu0 %v15186_v43  ;;  %v4547_v43 = vld [vmem:[#allocation12 + $0xde8] sm:$0xff] }
 0x51a   :  { %6019 = vmatpush1.bf16.msra.mxu1 %v15188_v44  ;;  %5947 = vmatprep.subr.bf16.mxu0 %v15195_v45  ;;  %v15242_v44 = vcombine.low %v4534_v27, %v4538_v28  ;;  %v15244_v45 = vcombine.low %v4535_v29, %v4539_v30  ;;  %v15253_v24 = vcombine.high %v4543_v42, %v4547_v43  ;;  %v4590_v28 = vld [vmem:[#allocation12 + $0xf40] sm:$0xff]  ;;  %v4591_v30 = vld [vmem:[#allocation12 + $0xf48] sm:$0xff] }
 0x51b   :  { %6029 = vmatprep.subr.bf16.mxu1 %v15197_v46  ;;  %v15251_v46 = vcombine.high %v4542_v36, %v4546_v37  ;;  %v4594_v29 = vld [vmem:[#allocation12 + $0xf60] sm:$0xff] }
 0x51c   :  { %5939 = vmatmul.mubr.bf16.vlgmr.msra.gmra.mrb[12].mxu0 %v17872_v49 }
 0x51d   :  { %6021 = vmatmul.mubr.bf16.vlgmr.msra.gmra.mrb[12].mxu1 %v17872_v49  ;;  %5948 = vmatpush1.bf16.msra.mxu0 %v15194_v47  ;;  %v4554_v47 = vld [vmem:[#allocation12 + $0xe20] sm:$0xff] }
 0x51e   :  { %5979 = vmatprep.mubr.bf16.mxu0 %v17876_v56  ;;  %6030 = vmatpush1.bf16.msra.mxu1 %v15196_v51  ;;  %v15250_v51 = vcombine.low %v4542_v36, %v4546_v37  ;;  %v15259_v18 = vcombine.high %v4550_v13, %v4554_v47  ;;  %v4598_v37 = vld [vmem:[#allocation12 + $0xf80] sm:$0xff] }
 0x51f   :  { %6061 = vmatprep.mubr.bf16.mxu1 %v17876_v56  ;;  %5949 = vmatprep.subr.bf16.mxu0 %v15203_v53  ;;  %v15252_v53 = vcombine.low %v4543_v42, %v4547_v43  ;;  %v4602_v42 = vld [vmem:[#allocation12 + $0xfa0] sm:$0xff]  ;;  %v4599_v43 = vld [vmem:[#allocation12 + $0xf88] sm:$0xff] }
 0x520   :  { %6031 = vmatprep.subr.bf16.mxu1 %v15205_v57  ;;  %v4558_v57 = vld [vmem:[#allocation12 + $0xe40] sm:$0xff] }
 0x521   :  { %5950 = vmatpush1.bf16.msra.mxu0 %v15202_v60  ;;  %v4563_v60 = vld [vmem:[#allocation12 + $0xe68] sm:$0xff] }
 0x522   :  { %6032 = vmatpush1.bf16.msra.mxu1 %v15204_v25  ;;  %5951 = vmatprep.subr.bf16.mxu0 %v15211_v61  ;;  %v15258_v25 = vcombine.low %v4550_v13, %v4554_v47  ;;  %v15260_v61 = vcombine.low %v4551_v40, %v4555_v48  ;;  %v15269_v63 = vcombine.high %v4559_v59, %v4563_v60  ;;  %v4606_v47 = vld [vmem:[#allocation12 + $0xfc0] sm:$0xff]  ;;  %v4607_v48 = vld [vmem:[#allocation12 + $0xfc8] sm:$0xff] }
 0x523   :  { %6033 = vmatprep.subr.bf16.mxu1 %v15213_v62  ;;  %v15267_v62 = vcombine.high %v4558_v57, %v4562_v58  ;;  %v4610_v40 = vld [vmem:[#allocation12 + $0xfe0] sm:$0xff] }
 0x525   :  { %5952 = vmatpush1.bf16.msra.mxu0 %v15210_v4  ;;  %v4571_v4 = vld [vmem:[#allocation12 + $0xea8] sm:$0xff] }
 0x526   :  { %6034 = vmatpush1.bf16.msra.mxu1 %v15212_v5  ;;  %5953 = vmatprep.subr.bf16.mxu0 %v15219_v6  ;;  %v15266_v5 = vcombine.low %v4558_v57, %v4562_v58  ;;  %v15268_v6 = vcombine.low %v4559_v59, %v4563_v60  ;;  %v15277_v8 = vcombine.high %v4567_v3, %v4571_v4  ;;  %v4360_v58 = vld [vmem:[#allocation12 + $0x810] sm:$0xff]  ;;  %v4361_v60 = vld [vmem:[#allocation12 + $0x818] sm:$0xff] }
 0x527   :  { %6035 = vmatprep.subr.bf16.mxu1 %v15221_v7  ;;  %v15275_v7 = vcombine.high %v4566_v1, %v4570_v32  ;;  %v4364_v59 = vld [vmem:[#allocation12 + $0x830] sm:$0xff] }
 0x529   :  { %5954 = vmatpush1.bf16.msra.mxu0 %v15218_v11  ;;  %v4579_v11 = vld [vmem:[#allocation12 + $0xee8] sm:$0xff] }
 0x52a   :  { %6036 = vmatpush1.bf16.msra.mxu1 %v15220_v12  ;;  %5955 = vmatprep.subr.bf16.mxu0 %v15227_v14  ;;  %v15274_v12 = vcombine.low %v4566_v1, %v4570_v32  ;;  %v15276_v14 = vcombine.low %v4567_v3, %v4571_v4  ;;  %v15285_v16 = vcombine.high %v4575_v0, %v4579_v11  ;;  %v4368_v32 = vld [vmem:[#allocation12 + $0x850] sm:$0xff] }
 0x52b   :  { %6037 = vmatprep.subr.bf16.mxu1 %v15229_v15  ;;  %v15283_v15 = vcombine.high %v4574_v9, %v4578_v10  ;;  %v4372_v3 = vld [vmem:[#allocation12 + $0x870] sm:$0xff]  ;;  %v15070_v4 = vcombine.low %v4360_v58, %v4364_v59 }
 0x52d   :  { %5956 = vmatpush1.bf16.msra.mxu0 %v15226_v21  ;;  %v4587_v21 = vld [vmem:[#allocation12 + $0xf28] sm:$0xff] }
 0x52e   :  { %6038 = vmatpush1.bf16.msra.mxu1 %v15228_v22  ;;  %5957 = vmatprep.subr.bf16.mxu0 %v15235_v23  ;;  %v15282_v22 = vcombine.low %v4574_v9, %v4578_v10  ;;  %v15284_v23 = vcombine.low %v4575_v0, %v4579_v11  ;;  %v15293_v27 = vcombine.high %v4583_v20, %v4587_v21  ;;  %v4376_v10 = vld [vmem:[#allocation12 + $0x890] sm:$0xff] }
 0x52f   :  { %6039 = vmatprep.subr.bf16.mxu1 %v15237_v26  ;;  %v15291_v26 = vcombine.high %v4582_v17, %v4586_v19  ;;  %v15079_v9 = vcombine.high %v4368_v32, %v4372_v3  ;;  %v4380_v0 = vld [vmem:[#allocation12 + $0x8b0] sm:$0xff] }
 0x531   :  { %5958 = vmatpush1.bf16.msra.mxu0 %v15234_v31  ;;  %v4595_v31 = vld [vmem:[#allocation12 + $0xf68] sm:$0xff] }
 0x532   :  { %6040 = vmatpush1.bf16.msra.mxu1 %v15236_v33  ;;  %5959 = vmatprep.subr.bf16.mxu0 %v15243_v35  ;;  %v15290_v33 = vcombine.low %v4582_v17, %v4586_v19  ;;  %v15292_v35 = vcombine.low %v4583_v20, %v4587_v21  ;;  %v15301_v36 = vcombine.high %v4591_v30, %v4595_v31  ;;  %v4384_v19 = vld [vmem:[#allocation12 + $0x8d0] sm:$0xff]  ;;  %v4385_v21 = vld [vmem:[#allocation12 + $0x8d8] sm:$0xff] }
 0x533   :  { %6041 = vmatprep.subr.bf16.mxu1 %v15245_v2  ;;  %v15299_v2 = vcombine.high %v4590_v28, %v4594_v29  ;;  %v4388_v20 = vld [vmem:[#allocation12 + $0x8f0] sm:$0xff] }
 0x535   :  { %5960 = vmatpush1.bf16.msra.mxu0 %v15242_v44  ;;  %v4603_v44 = vld [vmem:[#allocation12 + $0xfa8] sm:$0xff] }
 0x536   :  { %6042 = vmatpush1.bf16.msra.mxu1 %v15244_v45  ;;  %5961 = vmatprep.subr.bf16.mxu0 %v15251_v46  ;;  %v15298_v45 = vcombine.low %v4590_v28, %v4594_v29  ;;  %v15300_v46 = vcombine.low %v4591_v30, %v4595_v31  ;;  %v15309_v13 = vcombine.high %v4599_v43, %v4603_v44  ;;  %v4392_v29 = vld [vmem:[#allocation12 + $0x910] sm:$0xff]  ;;  %v4393_v31 = vld [vmem:[#allocation12 + $0x918] sm:$0xff] }
 0x537   :  { %6043 = vmatprep.subr.bf16.mxu1 %v15253_v24  ;;  %v15307_v24 = vcombine.high %v4598_v37, %v4602_v42  ;;  %v4396_v30 = vld [vmem:[#allocation12 + $0x930] sm:$0xff] }
 0x539   :  { %5962 = vmatpush1.bf16.msra.mxu0 %v15250_v51  ;;  %v4611_v51 = vld [vmem:[#allocation12 + $0xfe8] sm:$0xff] }
 0x53a   :  { %6044 = vmatpush1.bf16.msra.mxu1 %v15252_v53  ;;  %5963 = vmatprep.subr.bf16.mxu0 %v15259_v18  ;;  %v15306_v53 = vcombine.low %v4598_v37, %v4602_v42  ;;  %v15308_v18 = vcombine.low %v4599_v43, %v4603_v44  ;;  %v15317_v57 = vcombine.high %v4607_v48, %v4611_v51  ;;  %v4400_v37 = vld [vmem:[#allocation12 + $0x950] sm:$0xff]  ;;  %v4401_v43 = vld [vmem:[#allocation12 + $0x958] sm:$0xff] }
 0x53b   :  { %6045 = vmatprep.subr.bf16.mxu1 %v15261_v55  ;;  %v15315_v55 = vcombine.high %v4606_v47, %v4610_v40  ;;  %v4404_v42 = vld [vmem:[#allocation12 + $0x970] sm:$0xff]  ;;  %v4405_v44 = vld [vmem:[#allocation12 + $0x978] sm:$0xff] }
 0x53d   :  { %5964 = vmatpush1.bf16.msra.mxu0 %v15258_v25  ;;  %v4365_v25 = vld [vmem:[#allocation12 + $0x838] sm:$0xff] }
 0x53e   :  { %6046 = vmatpush1.bf16.msra.mxu1 %v15260_v61  ;;  %5965 = vmatprep.subr.bf16.mxu0 %v15267_v62  ;;  %v15314_v61 = vcombine.low %v4606_v47, %v4610_v40  ;;  %v15316_v62 = vcombine.low %v4607_v48, %v4611_v51  ;;  %v15073_v1 = vcombine.high %v4361_v60, %v4365_v25  ;;  %v4408_v47 = vld [vmem:[#allocation12 + $0x990] sm:$0xff]  ;;  %v4409_v48 = vld [vmem:[#allocation12 + $0x998] sm:$0xff] }
 0x53f   :  { %6047 = vmatprep.subr.bf16.mxu1 %v15269_v63  ;;  %v15071_v63 = vcombine.high %v4360_v58, %v4364_v59  ;;  %v4412_v40 = vld [vmem:[#allocation12 + $0x9b0] sm:$0xff]  ;;  %v4413_v51 = vld [vmem:[#allocation12 + $0x9b8] sm:$0xff] }
 0x540   :  { %v4416_v58 = vld [vmem:[#allocation12 + $0x9d0] sm:$0xff] }
 0x541   :  { %5966 = vmatpush1.bf16.msra.mxu0 %v15266_v5  ;;  %v4369_v5 = vld [vmem:[#allocation12 + $0x858] sm:$0xff]  ;;  %v4420_v59 = vld [vmem:[#allocation12 + $0x9f0] sm:$0xff] }
 0x542   :  { %6048 = vmatpush1.bf16.msra.mxu1 %v15268_v6  ;;  %5967 = vmatprep.subr.bf16.mxu0 %v15275_v7  ;;  %v4373_v6 = vld [vmem:[#allocation12 + $0x878] sm:$0xff]  ;;  %v17882_v7 = vrot.slane %v17854_v50, 2 }
 0x543   :  { %6049 = vmatprep.subr.bf16.mxu1 %v15277_v8  ;;  %v15072_v8 = vcombine.low %v4361_v60, %v4365_v25  ;;  %v15081_v11 = vcombine.high %v4369_v5, %v4373_v6  ;;  %v15080_v50 = vcombine.low %v4369_v5, %v4373_v6  ;;  %v4417_v60 = vld [vmem:[#allocation12 + $0x9d8] sm:$0xff]  ;;  %v15126_v6 = vcombine.low %v4416_v58, %v4420_v59 }
 0x544   :  { %v4421_v25 = vld [vmem:[#allocation12 + $0x9f8] sm:$0xff] }
 0x545   :  { %5968 = vmatpush1.bf16.msra.mxu0 %v15274_v12  ;;  %v4377_v12 = vld [vmem:[#allocation12 + $0x898] sm:$0xff] }
 0x546   :  { %6050 = vmatpush1.bf16.msra.mxu1 %v15276_v14  ;;  %5969 = vmatprep.subr.bf16.mxu0 %v15283_v15  ;;  %v4381_v14 = vld [vmem:[#allocation12 + $0x8b8] sm:$0xff]  ;;  %v15078_v15 = vcombine.low %v4368_v32, %v4372_v3  ;;  %v4424_v32 = vld [vmem:[#allocation12 + $0xa10] sm:$0xff] }
 0x547   :  { %6051 = vmatprep.subr.bf16.mxu1 %v15285_v16  ;;  %v15087_v16 = vcombine.high %v4376_v10, %v4380_v0  ;;  %v15089_v17 = vcombine.high %v4377_v12, %v4381_v14  ;;  %v4428_v3 = vld [vmem:[#allocation12 + $0xa30] sm:$0xff]  ;;  %v4429_v5 = vld [vmem:[#allocation12 + $0xa38] sm:$0xff] }
 0x549   :  { %5970 = vmatpush1.bf16.msra.mxu0 %v15282_v22  ;;  %v4389_v22 = vld [vmem:[#allocation12 + $0x8f8] sm:$0xff] }
 0x54a   :  { %6052 = vmatpush1.bf16.msra.mxu1 %v15284_v23  ;;  %5971 = vmatprep.subr.bf16.mxu0 %v15291_v26  ;;  %v15086_v23 = vcombine.low %v4376_v10, %v4380_v0  ;;  %v15088_v26 = vcombine.low %v4377_v12, %v4381_v14  ;;  %v15097_v28 = vcombine.high %v4385_v21, %v4389_v22  ;;  %v4432_v0 = vld [vmem:[#allocation12 + $0xa50] sm:$0xff]  ;;  %v4433_v12 = vld [vmem:[#allocation12 + $0xa58] sm:$0xff] }
 0x54b   :  { %6053 = vmatprep.subr.bf16.mxu1 %v15293_v27  ;;  %v15095_v27 = vcombine.high %v4384_v19, %v4388_v20  ;;  %v4437_v14 = vld [vmem:[#allocation12 + $0xa78] sm:$0xff] }
 0x54d   :  { %5972 = vmatpush1.bf16.msra.mxu0 %v15290_v33  ;;  %v4397_v33 = vld [vmem:[#allocation12 + $0x938] sm:$0xff] }
 0x54e   :  { %6054 = vmatpush1.bf16.msra.mxu1 %v15292_v35  ;;  %5973 = vmatprep.subr.bf16.mxu0 %v15299_v2  ;;  %v15096_v35 = vcombine.low %v4385_v21, %v4389_v22  ;;  %v15103_v2 = vcombine.high %v4392_v29, %v4396_v30  ;;  %v4441_v21 = vld [vmem:[#allocation12 + $0xa98] sm:$0xff] }
 0x54f   :  { %6055 = vmatprep.subr.bf16.mxu1 %v15301_v36  ;;  %v15105_v36 = vcombine.high %v4393_v31, %v4397_v33  ;;  %v4445_v22 = vld [vmem:[#allocation12 + $0xab8] sm:$0xff] }
 0x551   :  { %5974 = vmatpush1.bf16.msra.mxu0 %v15298_v45  ;;  %v15102_v45 = vcombine.low %v4392_v29, %v4396_v30  ;;  %v4448_v29 = vld [vmem:[#allocation12 + $0xad0] sm:$0xff] }
 0x552   :  { %6056 = vmatpush1.bf16.msra.mxu1 %v15300_v46  ;;  %5975 = vmatprep.subr.bf16.mxu0 %v15307_v24  ;;  %v15104_v46 = vcombine.low %v4393_v31, %v4397_v33  ;;  %v15111_v24 = vcombine.high %v4400_v37, %v4404_v42  ;;  %v4452_v30 = vld [vmem:[#allocation12 + $0xaf0] sm:$0xff]  ;;  %v4449_v31 = vld [vmem:[#allocation12 + $0xad8] sm:$0xff] }
 0x553   :  { %6057 = vmatprep.subr.bf16.mxu1 %v15309_v13  ;;  %v15113_v13 = vcombine.high %v4401_v43, %v4405_v44  ;;  %v4453_v33 = vld [vmem:[#allocation12 + $0xaf8] sm:$0xff] }
 0x555   :  { %5976 = vmatpush1.bf16.msra.mxu0 %v15306_v53  ;;  %v15110_v53 = vcombine.low %v4400_v37, %v4404_v42  ;;  %v4456_v37 = vld [vmem:[#allocation12 + $0xb10] sm:$0xff] }
 0x556   :  { %6058 = vmatpush1.bf16.msra.mxu1 %v15308_v18  ;;  %5977 = vmatprep.subr.bf16.mxu0 %v15315_v55  ;;  %v15112_v18 = vcombine.low %v4401_v43, %v4405_v44  ;;  %v15119_v55 = vcombine.high %v4408_v47, %v4412_v40  ;;  %v4460_v42 = vld [vmem:[#allocation12 + $0xb30] sm:$0xff]  ;;  %v4457_v43 = vld [vmem:[#allocation12 + $0xb18] sm:$0xff] }
 0x557   :  { %6059 = vmatprep.subr.bf16.mxu1 %v15317_v57  ;;  %v15121_v57 = vcombine.high %v4409_v48, %v4413_v51  ;;  %v4461_v44 = vld [vmem:[#allocation12 + $0xb38] sm:$0xff] }
 0x559   :  { %5978 = vmatpush1.bf16.msra.mxu0 %v15314_v61  ;;  %v15118_v61 = vcombine.low %v4408_v47, %v4412_v40  ;;  %v4464_v47 = vld [vmem:[#allocation12 + $0xb50] sm:$0xff] }
 0x55a   :  { %6060 = vmatpush1.bf16.msra.mxu1 %v15316_v62  ;;  %6070 = vmatprep.subr.bf16.mxu0 %v15071_v63  ;;  %v15120_v62 = vcombine.low %v4409_v48, %v4413_v51  ;;  %v15127_v63 = vcombine.high %v4416_v58, %v4420_v59  ;;  %v4468_v40 = vld [vmem:[#allocation12 + $0xb70] sm:$0xff]  ;;  %v4465_v48 = vld [vmem:[#allocation12 + $0xb58] sm:$0xff] }
 0x55b   :  { %6152 = vmatprep.subr.bf16.mxu1 %v15073_v1  ;;  %v15129_v1 = vcombine.high %v4417_v60, %v4421_v25  ;;  %v4469_v51 = vld [vmem:[#allocation12 + $0xb78] sm:$0xff]  ;;  %v4472_v58 = vld [vmem:[#allocation12 + $0xb90] sm:$0xff] }
 0x55c   :  { %5980 = vmatmul.mubr.bf16.vlgmr.msra.gmra.mrb[12].mxu0 %v17882_v7  ;;  %v4476_v59 = vld [vmem:[#allocation12 + $0xbb0] sm:$0xff] }
 0x55d   :  { %6062 = vmatmul.mubr.bf16.vlgmr.msra.gmra.mrb[12].mxu1 %v17882_v7  ;;  %6071 = vmatpush1.bf16.msra.mxu0 %v15070_v4  ;;  %v4425_v4 = vld [vmem:[#allocation12 + $0xa18] sm:$0xff] }
 0x55e   :  { %6102 = vmatprep.mubr.bf16.mxu0 %v17866_v34  ;;  %6153 = vmatpush1.bf16.msra.mxu1 %v15072_v8  ;;  %v15128_v8 = vcombine.low %v4417_v60, %v4421_v25  ;;  %v15137_v10 = vcombine.high %v4425_v4, %v4429_v5  ;;  %v4473_v60 = vld [vmem:[#allocation12 + $0xb98] sm:$0xff] }
 0x55f   :  { %6184 = vmatprep.mubr.bf16.mxu1 %v17866_v34  ;;  %6072 = vmatprep.subr.bf16.mxu0 %v15079_v9  ;;  %v15094_v34 = vcombine.low %v4384_v19, %v4388_v20  ;;  %v15135_v9 = vcombine.high %v4424_v32, %v4428_v3  ;;  %v4440_v19 = vld [vmem:[#allocation12 + $0xa90] sm:$0xff]  ;;  %v4477_v25 = vld [vmem:[#allocation12 + $0xbb8] sm:$0xff] }
 0x560   :  { %6154 = vmatprep.subr.bf16.mxu1 %v15081_v11  ;;  %v4436_v11 = vld [vmem:[#allocation12 + $0xa70] sm:$0xff] }
 0x561   :  { %6073 = vmatpush1.bf16.msra.mxu0 %v15078_v15  ;;  %v15134_v15 = vcombine.low %v4424_v32, %v4428_v3  ;;  %v4444_v20 = vld [vmem:[#allocation12 + $0xab0] sm:$0xff] }
 0x562   :  { %6155 = vmatpush1.bf16.msra.mxu1 %v15080_v50  ;;  %6074 = vmatprep.subr.bf16.mxu0 %v15087_v16  ;;  %v15136_v50 = vcombine.low %v4425_v4, %v4429_v5  ;;  %v15143_v16 = vcombine.high %v4432_v0, %v4436_v11  ;;  %v4480_v32 = vld [vmem:[#allocation12 + $0xbd0] sm:$0xff]  ;;  %v4481_v4 = vld [vmem:[#allocation12 + $0xbd8] sm:$0xff] }
 0x563   :  { %6156 = vmatprep.subr.bf16.mxu1 %v15089_v17  ;;  %v15145_v17 = vcombine.high %v4433_v12, %v4437_v14  ;;  %v4484_v3 = vld [vmem:[#allocation12 + $0xbf0] sm:$0xff]  ;;  %v4485_v5 = vld [vmem:[#allocation12 + $0xbf8] sm:$0xff] }
 0x565   :  { %6075 = vmatpush1.bf16.msra.mxu0 %v15086_v23  ;;  %v15142_v23 = vcombine.low %v4432_v0, %v4436_v11  ;;  %v4488_v0 = vld [vmem:[#allocation12 + $0xc10] sm:$0xff] }
 0x566   :  { %6157 = vmatpush1.bf16.msra.mxu1 %v15088_v26  ;;  %6076 = vmatprep.subr.bf16.mxu0 %v15095_v27  ;;  %v15144_v26 = vcombine.low %v4433_v12, %v4437_v14  ;;  %v15151_v27 = vcombine.high %v4440_v19, %v4444_v20  ;;  %v4492_v11 = vld [vmem:[#allocation12 + $0xc30] sm:$0xff]  ;;  %v4489_v12 = vld [vmem:[#allocation12 + $0xc18] sm:$0xff] }
 0x567   :  { %6158 = vmatprep.subr.bf16.mxu1 %v15097_v28  ;;  %v15153_v28 = vcombine.high %v4441_v21, %v4445_v22  ;;  %v4493_v14 = vld [vmem:[#allocation12 + $0xc38] sm:$0xff] }
 0x569   :  { %6077 = vmatpush1.bf16.msra.mxu0 %v15094_v34  ;;  %v15150_v34 = vcombine.low %v4440_v19, %v4444_v20  ;;  %v4496_v19 = vld [vmem:[#allocation12 + $0xc50] sm:$0xff] }
 0x56a   :  { %6159 = vmatpush1.bf16.msra.mxu1 %v15096_v35  ;;  %6078 = vmatprep.subr.bf16.mxu0 %v15103_v2  ;;  %v15152_v35 = vcombine.low %v4441_v21, %v4445_v22  ;;  %v15159_v2 = vcombine.high %v4448_v29, %v4452_v30  ;;  %v4500_v20 = vld [vmem:[#allocation12 + $0xc70] sm:$0xff]  ;;  %v15198_v21 = vcombine.low %v4488_v0, %v4492_v11  ;;  %v4497_v22 = vld [vmem:[#allocation12 + $0xc58] sm:$0xff] }
 0x56b   :  { %6160 = vmatprep.subr.bf16.mxu1 %v15105_v36  ;;  %v15161_v36 = vcombine.high %v4449_v31, %v4453_v33 }
 0x56d   :  { %6079 = vmatpush1.bf16.msra.mxu0 %v15102_v45  ;;  %v15158_v45 = vcombine.low %v4448_v29, %v4452_v30  ;;  %v4508_v29 = vld [vmem:[#allocation12 + $0xcb0] sm:$0xff] }
 0x56e   :  { %6161 = vmatpush1.bf16.msra.mxu1 %v15104_v46  ;;  %6080 = vmatprep.subr.bf16.mxu0 %v15111_v24  ;;  %v15160_v46 = vcombine.low %v4449_v31, %v4453_v33  ;;  %v15167_v24 = vcombine.high %v4456_v37, %v4460_v42  ;;  %v4505_v31 = vld [vmem:[#allocation12 + $0xc98] sm:$0xff] }
 0x56f   :  { %6162 = vmatprep.subr.bf16.mxu1 %v15113_v13  ;;  %v15169_v13 = vcombine.high %v4457_v43, %v4461_v44  ;;  %v4509_v33 = vld [vmem:[#allocation12 + $0xcb8] sm:$0xff] }
 0x571   :  { %6081 = vmatpush1.bf16.msra.mxu0 %v15110_v53  ;;  %v15166_v53 = vcombine.low %v4456_v37, %v4460_v42  ;;  %v4512_v37 = vld [vmem:[#allocation12 + $0xcd0] sm:$0xff] }
 0x572   :  { %6163 = vmatpush1.bf16.msra.mxu1 %v15112_v18  ;;  %6082 = vmatprep.subr.bf16.mxu0 %v15119_v55  ;;  %v15168_v18 = vcombine.low %v4457_v43, %v4461_v44  ;;  %v15175_v55 = vcombine.high %v4464_v47, %v4468_v40  ;;  %v4516_v42 = vld [vmem:[#allocation12 + $0xcf0] sm:$0xff]  ;;  %v4513_v43 = vld [vmem:[#allocation12 + $0xcd8] sm:$0xff] }
 0x573   :  { %6164 = vmatprep.subr.bf16.mxu1 %v15121_v57  ;;  %v15177_v57 = vcombine.high %v4465_v48, %v4469_v51  ;;  %v4517_v44 = vld [vmem:[#allocation12 + $0xcf8] sm:$0xff] }
 0x575   :  { %6083 = vmatpush1.bf16.msra.mxu0 %v15118_v61  ;;  %v15174_v61 = vcombine.low %v4464_v47, %v4468_v40  ;;  %v4524_v47 = vld [vmem:[#allocation12 + $0xd30] sm:$0xff]  ;;  %v4521_v40 = vld [vmem:[#allocation12 + $0xd18] sm:$0xff] }
 0x576   :  { %6165 = vmatpush1.bf16.msra.mxu1 %v15120_v62  ;;  %6084 = vmatprep.subr.bf16.mxu0 %v15127_v63  ;;  %v15176_v62 = vcombine.low %v4465_v48, %v4469_v51  ;;  %v15183_v63 = vcombine.high %v4472_v58, %v4476_v59  ;;  %v4525_v48 = vld [vmem:[#allocation12 + $0xd38] sm:$0xff]  ;;  %v15224_v51 = vcombine.low %v4513_v43, %v4517_v44 }
 0x577   :  { %6166 = vmatprep.subr.bf16.mxu1 %v15129_v1  ;;  %v15185_v1 = vcombine.high %v4473_v60, %v4477_v25 }
 0x579   :  { %6085 = vmatpush1.bf16.msra.mxu0 %v15126_v6  ;;  %v15182_v6 = vcombine.low %v4472_v58, %v4476_v59  ;;  %v4529_v58 = vld [vmem:[#allocation12 + $0xd58] sm:$0xff] }
 0x57a   :  { %6167 = vmatpush1.bf16.msra.mxu1 %v15128_v8  ;;  %6086 = vmatprep.subr.bf16.mxu0 %v15135_v9  ;;  %v15184_v8 = vcombine.low %v4473_v60, %v4477_v25  ;;  %v15191_v9 = vcombine.high %v4480_v32, %v4484_v3  ;;  %v4533_v59 = vld [vmem:[#allocation12 + $0xd78] sm:$0xff]  ;;  %v15232_v25 = vcombine.low %v4521_v40, %v4525_v48 }
 0x57b   :  { %6168 = vmatprep.subr.bf16.mxu1 %v15137_v10  ;;  %v15193_v10 = vcombine.high %v4481_v4, %v4485_v5 }
 0x57d   :  { %6087 = vmatpush1.bf16.msra.mxu0 %v15134_v15  ;;  %v15190_v15 = vcombine.low %v4480_v32, %v4484_v3  ;;  %v4537_v32 = vld [vmem:[#allocation12 + $0xd98] sm:$0xff] }
 0x57e   :  { %6169 = vmatpush1.bf16.msra.mxu1 %v15136_v50  ;;  %6088 = vmatprep.subr.bf16.mxu0 %v15143_v16  ;;  %v15192_v50 = vcombine.low %v4481_v4, %v4485_v5  ;;  %v15199_v16 = vcombine.high %v4488_v0, %v4492_v11  ;;  %v4541_v3 = vld [vmem:[#allocation12 + $0xdb8] sm:$0xff]  ;;  %v15240_v5 = vcombine.low %v4529_v58, %v4533_v59 }
 0x57f   :  { %6170 = vmatprep.subr.bf16.mxu1 %v15145_v17  ;;  %v15201_v17 = vcombine.high %v4489_v12, %v4493_v14  ;;  %v4545_v0 = vld [vmem:[#allocation12 + $0xdd8] sm:$0xff] }
 0x580   :  { %v4549_v11 = vld [vmem:[#allocation12 + $0xdf8] sm:$0xff] }
 0x581   :  { %6089 = vmatpush1.bf16.msra.mxu0 %v15142_v23  ;;  %v4501_v23 = vld [vmem:[#allocation12 + $0xc78] sm:$0xff] }
 0x582   :  { %6171 = vmatpush1.bf16.msra.mxu1 %v15144_v26  ;;  %6090 = vmatprep.subr.bf16.mxu0 %v15151_v27  ;;  %v15200_v26 = vcombine.low %v4489_v12, %v4493_v14  ;;  %v15207_v27 = vcombine.high %v4496_v19, %v4500_v20  ;;  %v15209_v30 = vcombine.high %v4497_v22, %v4501_v23 }
 0x583   :  { %6172 = vmatprep.subr.bf16.mxu1 %v15153_v28  ;;  %v4504_v28 = vld [vmem:[#allocation12 + $0xc90] sm:$0xff]  ;;  %v15248_v14 = vcombine.low %v4537_v32, %v4541_v3 }
 0x585   :  { %6091 = vmatpush1.bf16.msra.mxu0 %v15150_v34  ;;  %v15206_v34 = vcombine.low %v4496_v19, %v4500_v20  ;;  %v4553_v19 = vld [vmem:[#allocation12 + $0xe18] sm:$0xff] }
 0x586   :  { %6173 = vmatpush1.bf16.msra.mxu1 %v15152_v35  ;;  %6092 = vmatprep.subr.bf16.mxu0 %v15159_v2  ;;  %v15208_v35 = vcombine.low %v4497_v22, %v4501_v23  ;;  %v15215_v2 = vcombine.high %v4504_v28, %v4508_v29  ;;  %v4557_v20 = vld [vmem:[#allocation12 + $0xe38] sm:$0xff]  ;;  %v15256_v22 = vcombine.low %v4545_v0, %v4549_v11 }
 0x587   :  { %6174 = vmatprep.subr.bf16.mxu1 %v15161_v36  ;;  %v15217_v36 = vcombine.high %v4505_v31, %v4509_v33 }
 0x589   :  { %6093 = vmatpush1.bf16.msra.mxu0 %v15158_v45  ;;  %v15214_v45 = vcombine.low %v4504_v28, %v4508_v29  ;;  %v4564_v28 = vld [vmem:[#allocation12 + $0xe70] sm:$0xff]  ;;  %v4561_v29 = vld [vmem:[#allocation12 + $0xe58] sm:$0xff] }
 0x58a   :  { %6175 = vmatpush1.bf16.msra.mxu1 %v15160_v46  ;;  %6094 = vmatprep.subr.bf16.mxu0 %v15167_v24  ;;  %v15223_v46 = vcombine.high %v4512_v37, %v4516_v42  ;;  %v15225_v24 = vcombine.high %v4513_v43, %v4517_v44 }
 0x58b   :  { %6176 = vmatprep.subr.bf16.mxu1 %v15169_v13  ;;  %v4520_v13 = vld [vmem:[#allocation12 + $0xd10] sm:$0xff] }
 0x58c   :  { %v15230_v60 = vcombine.low %v4520_v13, %v4524_v47 }
 0x58d   :  { %6095 = vmatpush1.bf16.msra.mxu0 %v15166_v53  ;;  %v15231_v53 = vcombine.high %v4520_v13, %v4524_v47  ;;  %v4577_v13 = vld [vmem:[#allocation12 + $0xed8] sm:$0xff] }
 0x58e   :  { %6177 = vmatpush1.bf16.msra.mxu1 %v15168_v18  ;;  %6096 = vmatprep.subr.bf16.mxu0 %v15175_v55  ;;  %v15233_v18 = vcombine.high %v4521_v40, %v4525_v48  ;;  %v4528_v55 = vld [vmem:[#allocation12 + $0xd50] sm:$0xff]  ;;  %v4581_v47 = vld [vmem:[#allocation12 + $0xef8] sm:$0xff] }
 0x58f   :  { %6178 = vmatprep.subr.bf16.mxu1 %v15177_v57  ;;  %v4532_v57 = vld [vmem:[#allocation12 + $0xd70] sm:$0xff] }
 0x590   :  { %v15238_v4 = vcombine.low %v4528_v55, %v4532_v57 }
 0x591   :  { %6097 = vmatpush1.bf16.msra.mxu0 %v15174_v61  ;;  %v15239_v61 = vcombine.high %v4528_v55, %v4532_v57  ;;  %v4585_v55 = vld [vmem:[#allocation12 + $0xf18] sm:$0xff] }
 0x592   :  { %6179 = vmatpush1.bf16.msra.mxu1 %v15176_v62  ;;  %6098 = vmatprep.subr.bf16.mxu0 %v15183_v63  ;;  %v15241_v62 = vcombine.high %v4529_v58, %v4533_v59  ;;  %v4536_v63 = vld [vmem:[#allocation12 + $0xd90] sm:$0xff]  ;;  %v4589_v57 = vld [vmem:[#allocation12 + $0xf38] sm:$0xff]  ;;  %v15288_v59 = vcombine.low %v4577_v13, %v4581_v47 }
 0x593   :  { %6180 = vmatprep.subr.bf16.mxu1 %v15185_v1  ;;  %v4540_v1 = vld [vmem:[#allocation12 + $0xdb0] sm:$0xff] }
 0x594   :  { %v15246_v12 = vcombine.low %v4536_v63, %v4540_v1 }
 0x595   :  { %6099 = vmatpush1.bf16.msra.mxu0 %v15182_v6  ;;  %v15247_v6 = vcombine.high %v4536_v63, %v4540_v1  ;;  %v4593_v63 = vld [vmem:[#allocation12 + $0xf58] sm:$0xff] }
 0x596   :  { %6181 = vmatpush1.bf16.msra.mxu1 %v15184_v8  ;;  %6100 = vmatprep.subr.bf16.mxu0 %v15191_v9  ;;  %v15249_v8 = vcombine.high %v4537_v32, %v4541_v3  ;;  %v4544_v9 = vld [vmem:[#allocation12 + $0xdd0] sm:$0xff]  ;;  %v4597_v1 = vld [vmem:[#allocation12 + $0xf78] sm:$0xff]  ;;  %v15296_v3 = vcombine.low %v4585_v55, %v4589_v57 }
 0x597   :  { %6182 = vmatprep.subr.bf16.mxu1 %v15193_v10  ;;  %v4548_v10 = vld [vmem:[#allocation12 + $0xdf0] sm:$0xff] }
 0x599   :  { %6101 = vmatpush1.bf16.msra.mxu0 %v15190_v15  ;;  %v15255_v15 = vcombine.high %v4544_v9, %v4548_v10 }
 0x59a   :  { %6183 = vmatpush1.bf16.msra.mxu1 %v15192_v50  ;;  %6111 = vmatprep.subr.bf16.mxu0 %v15199_v16  ;;  %v15257_v50 = vcombine.high %v4545_v0, %v4549_v11  ;;  %v4552_v16 = vld [vmem:[#allocation12 + $0xe10] sm:$0xff]  ;;  %v15304_v11 = vcombine.low %v4593_v63, %v4597_v1 }
 0x59b   :  { %6193 = vmatprep.subr.bf16.mxu1 %v15201_v17  ;;  %v4556_v17 = vld [vmem:[#allocation12 + $0xe30] sm:$0xff] }
 0x59c   :  { %6103 = vmatmul.mubr.bf16.vlgmr.msra.gmra.mrb[16].mxu0 %v17872_v49  ;;  %v15263_v23 = vcombine.high %v4552_v16, %v4556_v17 }
 0x59d   :  { %6185 = vmatmul.mubr.bf16.vlgmr.msra.gmra.mrb[16].mxu1 %v17872_v49  ;;  %6112 = vmatpush1.bf16.msra.mxu0 %v15198_v21  ;;  %v15216_v49 = vcombine.low %v4505_v31, %v4509_v33  ;;  %v15254_v21 = vcombine.low %v4544_v9, %v4548_v10  ;;  %v15262_v31 = vcombine.low %v4552_v16, %v4556_v17  ;;  %v4601_v9 = vld [vmem:[#allocation12 + $0xf98] sm:$0xff] }
 0x59e   :  { %6143 = vmatprep.mubr.bf16.mxu0 %v17876_v56  ;;  %6194 = vmatpush1.bf16.msra.mxu1 %v15200_v26  ;;  %v15265_v26 = vcombine.high %v4553_v19, %v4557_v20  ;;  %v15264_v33 = vcombine.low %v4553_v19, %v4557_v20  ;;  %v4605_v10 = vld [vmem:[#allocation12 + $0xfb8] sm:$0xff] }
 0x59f   :  { %6225 = vmatprep.mubr.bf16.mxu1 %v17876_v56  ;;  %6113 = vmatprep.subr.bf16.mxu0 %v15207_v27  ;;  %v15222_v56 = vcombine.low %v4512_v37, %v4516_v42  ;;  %v4560_v27 = vld [vmem:[#allocation12 + $0xe50] sm:$0xff]  ;;  %v4569_v37 = vld [vmem:[#allocation12 + $0xe98] sm:$0xff]  ;;  %v15312_v20 = vcombine.low %v4601_v9, %v4605_v10 }
 0x5a0   :  { %6195 = vmatprep.subr.bf16.mxu1 %v15209_v30  ;;  %v4565_v30 = vld [vmem:[#allocation12 + $0xe78] sm:$0xff]  ;;  %v15270_v43 = vcombine.low %v4560_v27, %v4564_v28 }
 0x5a1   :  { %6114 = vmatpush1.bf16.msra.mxu0 %v15206_v34  ;;  %v15271_v34 = vcombine.high %v4560_v27, %v4564_v28  ;;  %v4573_v42 = vld [vmem:[#allocation12 + $0xeb8] sm:$0xff]  ;;  %v15272_v44 = vcombine.low %v4561_v29, %v4565_v30  ;;  %v6259_v27 = vld [vmem:[#allocation15 + $0x8] sm:$0xff] }
 0x5a2   :  { %6196 = vmatpush1.bf16.msra.mxu1 %v15208_v35  ;;  %6115 = vmatprep.subr.bf16.mxu0 %v15215_v2  ;;  %v15273_v35 = vcombine.high %v4561_v29, %v4565_v30  ;;  %v4568_v2 = vld [vmem:[#allocation12 + $0xe90] sm:$0xff]  ;;  %v15280_v48 = vcombine.low %v4569_v37, %v4573_v42  ;;  %v4609_v16 = vld [vmem:[#allocation12 + $0xfd8] sm:$0xff] }
 0x5a3   :  { %6197 = vmatprep.subr.bf16.mxu1 %v15217_v36  ;;  %v4572_v36 = vld [vmem:[#allocation12 + $0xeb0] sm:$0xff]  ;;  %v4613_v17 = vld [vmem:[#allocation12 + $0xff8] sm:$0xff] }
 0x5a4   :  { %v15278_v40 = vcombine.low %v4568_v2, %v4572_v36  ;;  %v6263_v28 = vld [vmem:[#allocation15 + $0x28] sm:$0xff]  ;;  %v15320_v30 = vcombine.low %v4609_v16, %v4613_v17 }
 0x5a5   :  { %6116 = vmatpush1.bf16.msra.mxu0 %v15214_v45  ;;  %v15279_v45 = vcombine.high %v4568_v2, %v4572_v36  ;;  %v6267_v2 = vld [vmem:[#allocation15 + $0x48] sm:$0xff] }
 0x5a6   :  { %6198 = vmatpush1.bf16.msra.mxu1 %v15216_v49  ;;  %6117 = vmatprep.subr.bf16.mxu0 %v15223_v46  ;;  %v15281_v49 = vcombine.high %v4569_v37, %v4573_v42  ;;  %v4576_v46 = vld [vmem:[#allocation12 + $0xed0] sm:$0xff]  ;;  %v15324_v42 = vcombine.low %v6259_v27, %v6263_v28 }
 0x5a7   :  { %6199 = vmatprep.subr.bf16.mxu1 %v15225_v24  ;;  %v4580_v24 = vld [vmem:[#allocation12 + $0xef0] sm:$0xff] }
 0x5a8   :  { %v15286_v58 = vcombine.low %v4576_v46, %v4580_v24  ;;  %v6271_v36 = vld [vmem:[#allocation15 + $0x68] sm:$0xff] }
 0x5a9   :  { %6118 = vmatpush1.bf16.msra.mxu0 %v15222_v56  ;;  %v15287_v56 = vcombine.high %v4576_v46, %v4580_v24  ;;  %v6275_v46 = vld [vmem:[#allocation15 + $0x88] sm:$0xff] }
 0x5aa   :  { %6200 = vmatpush1.bf16.msra.mxu1 %v15224_v51  ;;  %6119 = vmatprep.subr.bf16.mxu0 %v15231_v53  ;;  %v15289_v51 = vcombine.high %v4577_v13, %v4581_v47  ;;  %v4584_v53 = vld [vmem:[#allocation12 + $0xf10] sm:$0xff]  ;;  %v15332_v47 = vcombine.low %v6267_v2, %v6271_v36 }
 0x5ab   :  { %6201 = vmatprep.subr.bf16.mxu1 %v15233_v18  ;;  %v4588_v18 = vld [vmem:[#allocation12 + $0xf30] sm:$0xff] }
 0x5ac   :  { %v15294_v32 = vcombine.low %v4584_v53, %v4588_v18  ;;  %v6279_v24 = vld [vmem:[#allocation15 + $0xa8] sm:$0xff] }
 0x5ad   :  { %6120 = vmatpush1.bf16.msra.mxu0 %v15230_v60  ;;  %v15295_v60 = vcombine.high %v4584_v53, %v4588_v18  ;;  %v6283_v53 = vld [vmem:[#allocation15 + $0xc8] sm:$0xff] }
 0x5ae   :  { %6202 = vmatpush1.bf16.msra.mxu1 %v15232_v25  ;;  %6121 = vmatprep.subr.bf16.mxu0 %v15239_v61  ;;  %v15297_v25 = vcombine.high %v4585_v55, %v4589_v57  ;;  %v4592_v61 = vld [vmem:[#allocation12 + $0xf50] sm:$0xff]  ;;  %v15340_v57 = vcombine.low %v6275_v46, %v6279_v24 }
 0x5af   :  { %6203 = vmatprep.subr.bf16.mxu1 %v15241_v62  ;;  %v4596_v62 = vld [vmem:[#allocation12 + $0xf70] sm:$0xff] }
 0x5b0   :  { %v15302_v0 = vcombine.low %v4592_v61, %v4596_v62  ;;  %v6287_v18 = vld [vmem:[#allocation15 + $0xe8] sm:$0xff] }
 0x5b1   :  { %6122 = vmatpush1.bf16.msra.mxu0 %v15238_v4  ;;  %v15303_v4 = vcombine.high %v4592_v61, %v4596_v62  ;;  %v6295_v61 = vld [vmem:[#allocation15 + $0x128] sm:$0xff] }
 0x5b2   :  { %6204 = vmatpush1.bf16.msra.mxu1 %v15240_v5  ;;  %6123 = vmatprep.subr.bf16.mxu0 %v15247_v6  ;;  %v15305_v5 = vcombine.high %v4593_v63, %v4597_v1  ;;  %v4600_v6 = vld [vmem:[#allocation12 + $0xf90] sm:$0xff]  ;;  %v15348_v63 = vcombine.low %v6283_v53, %v6287_v18 }
 0x5b3   :  { %6205 = vmatprep.subr.bf16.mxu1 %v15249_v8  ;;  %v4604_v8 = vld [vmem:[#allocation12 + $0xfb0] sm:$0xff] }
 0x5b4   :  { %v15310_v19 = vcombine.low %v4600_v6, %v4604_v8 }
 0x5b5   :  { %6124 = vmatpush1.bf16.msra.mxu0 %v15246_v12  ;;  %v15311_v12 = vcombine.high %v4600_v6, %v4604_v8  ;;  %v6303_v6 = vld [vmem:[#allocation15 + $0x168] sm:$0xff] }
 0x5b6   :  { %6206 = vmatpush1.bf16.msra.mxu1 %v15248_v14  ;;  %6125 = vmatprep.subr.bf16.mxu0 %v15255_v15  ;;  %v15313_v14 = vcombine.high %v4601_v9, %v4605_v10  ;;  %v4608_v15 = vld [vmem:[#allocation12 + $0xfd0] sm:$0xff] }
 0x5b7   :  { %6207 = vmatprep.subr.bf16.mxu1 %v15257_v50  ;;  %v4612_v50 = vld [vmem:[#allocation12 + $0xff0] sm:$0xff] }
 0x5b8   :  { %v15318_v29 = vcombine.low %v4608_v15, %v4612_v50 }
 0x5b9   :  { %6126 = vmatpush1.bf16.msra.mxu0 %v15254_v21  ;;  %v15319_v21 = vcombine.high %v4608_v15, %v4612_v50  ;;  %v6311_v15 = vld [vmem:[#allocation15 + $0x1a8] sm:$0xff] }
 0x5ba   :  { %6208 = vmatpush1.bf16.msra.mxu1 %v15256_v22  ;;  %6127 = vmatprep.subr.bf16.mxu0 %v15263_v23  ;;  %v15321_v22 = vcombine.high %v4609_v16, %v4613_v17  ;;  %v6258_v23 = vld [vmem:[#allocation15] sm:$0xff] }
 0x5bb   :  { %6209 = vmatprep.subr.bf16.mxu1 %v15265_v26  ;;  %v6262_v26 = vld [vmem:[#allocation15 + $0x20] sm:$0xff] }
 0x5bc   :  { %v15322_v37 = vcombine.low %v6258_v23, %v6262_v26 }
 0x5bd   :  { %6128 = vmatpush1.bf16.msra.mxu0 %v15262_v31  ;;  %v15323_v31 = vcombine.high %v6258_v23, %v6262_v26  ;;  %v6319_v23 = vld [vmem:[#allocation15 + $0x1e8] sm:$0xff] }
 0x5be   :  { %6210 = vmatpush1.bf16.msra.mxu1 %v15264_v33  ;;  %6129 = vmatprep.subr.bf16.mxu0 %v15271_v34  ;;  %v15325_v33 = vcombine.high %v6259_v27, %v6263_v28  ;;  %v6266_v34 = vld [vmem:[#allocation15 + $0x40] sm:$0xff] }
 0x5bf   :  { %6211 = vmatprep.subr.bf16.mxu1 %v15273_v35  ;;  %v6270_v35 = vld [vmem:[#allocation15 + $0x60] sm:$0xff] }
 0x5c0   :  { %v15330_v13 = vcombine.low %v6266_v34, %v6270_v35 }
 0x5c1   :  { %6130 = vmatpush1.bf16.msra.mxu0 %v15270_v43  ;;  %v15331_v43 = vcombine.high %v6266_v34, %v6270_v35  ;;  %v6327_v34 = vld [vmem:[#allocation15 + $0x228] sm:$0xff] }
 0x5c2   :  { %6212 = vmatpush1.bf16.msra.mxu1 %v15272_v44  ;;  %6131 = vmatprep.subr.bf16.mxu0 %v15279_v45  ;;  %v15333_v44 = vcombine.high %v6267_v2, %v6271_v36  ;;  %v6274_v45 = vld [vmem:[#allocation15 + $0x80] sm:$0xff] }
 0x5c3   :  { %6213 = vmatprep.subr.bf16.mxu1 %v15281_v49  ;;  %v6278_v49 = vld [vmem:[#allocation15 + $0xa0] sm:$0xff] }
 0x5c4   :  { %v15338_v55 = vcombine.low %v6274_v45, %v6278_v49 }
 0x5c5   :  { %6132 = vmatpush1.bf16.msra.mxu0 %v15278_v40  ;;  %v15339_v40 = vcombine.high %v6274_v45, %v6278_v49  ;;  %v6335_v45 = vld [vmem:[#allocation15 + $0x268] sm:$0xff] }
 0x5c6   :  { %6214 = vmatpush1.bf16.msra.mxu1 %v15280_v48  ;;  %6133 = vmatprep.subr.bf16.mxu0 %v15287_v56  ;;  %v15341_v48 = vcombine.high %v6275_v46, %v6279_v24  ;;  %v6282_v56 = vld [vmem:[#allocation15 + $0xc0] sm:$0xff] }
 0x5c7   :  { %6215 = vmatprep.subr.bf16.mxu1 %v15289_v51  ;;  %v6286_v51 = vld [vmem:[#allocation15 + $0xe0] sm:$0xff] }
 0x5c8   :  { %v15346_v62 = vcombine.low %v6282_v56, %v6286_v51 }
 0x5c9   :  { %6134 = vmatpush1.bf16.msra.mxu0 %v15286_v58  ;;  %v15347_v58 = vcombine.high %v6282_v56, %v6286_v51  ;;  %v6343_v56 = vld [vmem:[#allocation15 + $0x2a8] sm:$0xff] }
 0x5ca   :  { %6216 = vmatpush1.bf16.msra.mxu1 %v15288_v59  ;;  %6135 = vmatprep.subr.bf16.mxu0 %v15295_v60  ;;  %v6290_v59 = vld [vmem:[#allocation15 + $0x100] sm:$0xff] }
 0x5cb   :  { %6217 = vmatprep.subr.bf16.mxu1 %v15297_v25  ;;  %v6294_v60 = vld [vmem:[#allocation15 + $0x120] sm:$0xff]  ;;  %v6291_v25 = vld [vmem:[#allocation15 + $0x108] sm:$0xff] }
 0x5cc   :  { %v15355_v1 = vcombine.high %v6290_v59, %v6294_v60  ;;  %v15354_v8 = vcombine.low %v6290_v59, %v6294_v60  ;;  %v15356_v9 = vcombine.low %v6291_v25, %v6295_v61  ;;  %v6351_v59 = vld [vmem:[#allocation15 + $0x2e8] sm:$0xff] }
 0x5cd   :  { %6136 = vmatpush1.bf16.msra.mxu0 %v15294_v32  ;;  %v15357_v32 = vcombine.high %v6291_v25, %v6295_v61 }
 0x5ce   :  { %6218 = vmatpush1.bf16.msra.mxu1 %v15296_v3  ;;  %6137 = vmatprep.subr.bf16.mxu0 %v15303_v4  ;;  %v6298_v3 = vld [vmem:[#allocation15 + $0x140] sm:$0xff] }
 0x5cf   :  { %6219 = vmatprep.subr.bf16.mxu1 %v15305_v5  ;;  %v6302_v4 = vld [vmem:[#allocation15 + $0x160] sm:$0xff]  ;;  %v6299_v5 = vld [vmem:[#allocation15 + $0x148] sm:$0xff] }
 0x5d0   :  { %v15363_v10 = vcombine.high %v6298_v3, %v6302_v4  ;;  %v15362_v50 = vcombine.low %v6298_v3, %v6302_v4  ;;  %v15364_v16 = vcombine.low %v6299_v5, %v6303_v6  ;;  %v6359_v3 = vld [vmem:[#allocation15 + $0x328] sm:$0xff] }
 0x5d1   :  { %6138 = vmatpush1.bf16.msra.mxu0 %v15302_v0  ;;  %v15365_v0 = vcombine.high %v6299_v5, %v6303_v6 }
 0x5d2   :  { %6220 = vmatpush1.bf16.msra.mxu1 %v15304_v11  ;;  %6139 = vmatprep.subr.bf16.mxu0 %v15311_v12  ;;  %v6306_v11 = vld [vmem:[#allocation15 + $0x180] sm:$0xff] }
 0x5d3   :  { %6221 = vmatprep.subr.bf16.mxu1 %v15313_v14  ;;  %v6310_v12 = vld [vmem:[#allocation15 + $0x1a0] sm:$0xff]  ;;  %v6307_v14 = vld [vmem:[#allocation15 + $0x188] sm:$0xff] }
 0x5d4   :  { %v15371_v17 = vcombine.high %v6306_v11, %v6310_v12  ;;  %v15370_v26 = vcombine.low %v6306_v11, %v6310_v12  ;;  %v15372_v27 = vcombine.low %v6307_v14, %v6311_v15  ;;  %v6367_v11 = vld [vmem:[#allocation15 + $0x368] sm:$0xff] }
 0x5d5   :  { %6140 = vmatpush1.bf16.msra.mxu0 %v15310_v19  ;;  %v15373_v19 = vcombine.high %v6307_v14, %v6311_v15 }
 0x5d6   :  { %6222 = vmatpush1.bf16.msra.mxu1 %v15312_v20  ;;  %6141 = vmatprep.subr.bf16.mxu0 %v15319_v21  ;;  %v6314_v20 = vld [vmem:[#allocation15 + $0x1c0] sm:$0xff] }
 0x5d7   :  { %6223 = vmatprep.subr.bf16.mxu1 %v15321_v22  ;;  %v6318_v21 = vld [vmem:[#allocation15 + $0x1e0] sm:$0xff]  ;;  %v6315_v22 = vld [vmem:[#allocation15 + $0x1c8] sm:$0xff] }
 0x5d8   :  { %v15379_v28 = vcombine.high %v6314_v20, %v6318_v21  ;;  %v15378_v35 = vcombine.low %v6314_v20, %v6318_v21  ;;  %v15380_v2 = vcombine.low %v6315_v22, %v6319_v23  ;;  %v6375_v20 = vld [vmem:[#allocation15 + $0x3a8] sm:$0xff] }
 0x5d9   :  { %6142 = vmatpush1.bf16.msra.mxu0 %v15318_v29  ;;  %v15381_v29 = vcombine.high %v6315_v22, %v6319_v23 }
 0x5da   :  { %6224 = vmatpush1.bf16.msra.mxu1 %v15320_v30  ;;  %9372 = vmatprep.subr.bf16.mxu0 %v15323_v31  ;;  %v6322_v30 = vld [vmem:[#allocation15 + $0x200] sm:$0xff] }
 0x5db   :  { %9536 = vmatprep.subr.bf16.mxu1 %v15325_v33  ;;  %v6326_v31 = vld [vmem:[#allocation15 + $0x220] sm:$0xff]  ;;  %v6323_v33 = vld [vmem:[#allocation15 + $0x208] sm:$0xff] }
 0x5dc   :  { %6144 = vmatmul.mubr.bf16.vlgmr.msra.gmra.mrb[16].mxu0 %v17882_v7  ;;  %v15387_v36 = vcombine.high %v6322_v30, %v6326_v31  ;;  %v15386_v49 = vcombine.low %v6322_v30, %v6326_v31  ;;  %v15388_v46 = vcombine.low %v6323_v33, %v6327_v34  ;;  %v6383_v30 = vld [vmem:[#allocation15 + $0x3e8] sm:$0xff] }
 0x5dd   :  { %6226 = vmatmul.mubr.bf16.vlgmr.msra.gmra.mrb[16].mxu1 %v17882_v7  ;;  %9373 = vmatpush1.bf16.msra.mxu0 %v15322_v37  ;;  %v15349_v7 = vcombine.high %v6283_v53, %v6287_v18  ;;  %v15389_v37 = vcombine.high %v6323_v33, %v6327_v34 }
 0x5de   :  { %9537 = vmatpush1.bf16.msra.mxu1 %v15324_v42  ;;  %9374 = vmatprep.subr.bf16.mxu0 %v15331_v43  ;;  %v6330_v42 = vld [vmem:[#allocation15 + $0x240] sm:$0xff] }
 0x5df   :  { %9538 = vmatprep.subr.bf16.mxu1 %v15333_v44  ;;  %v6334_v43 = vld [vmem:[#allocation15 + $0x260] sm:$0xff]  ;;  %v6331_v44 = vld [vmem:[#allocation15 + $0x248] sm:$0xff] }
 0x5e0   :  { %v15395_v24 = vcombine.high %v6330_v42, %v6334_v43  ;;  %v15394_v51 = vcombine.low %v6330_v42, %v6334_v43  ;;  %v15396_v53 = vcombine.low %v6331_v44, %v6335_v45  ;;  %v6391_v42 = vld [vmem:[#allocation15 + $0x428] sm:$0xff] }
 0x5e1   :  { %9375 = vmatpush1.bf16.msra.mxu0 %v15330_v13  ;;  %v15397_v13 = vcombine.high %v6331_v44, %v6335_v45 }
 0x5e2   :  { %9539 = vmatpush1.bf16.msra.mxu1 %v15332_v47  ;;  %9376 = vmatprep.subr.bf16.mxu0 %v15339_v40  ;;  %v6338_v47 = vld [vmem:[#allocation15 + $0x280] sm:$0xff] }
 0x5e3   :  { %9540 = vmatprep.subr.bf16.mxu1 %v15341_v48  ;;  %v6342_v40 = vld [vmem:[#allocation15 + $0x2a0] sm:$0xff]  ;;  %v6339_v48 = vld [vmem:[#allocation15 + $0x288] sm:$0xff] }
 0x5e4   :  { %v15403_v18 = vcombine.high %v6338_v47, %v6342_v40  ;;  %v15402_v60 = vcombine.low %v6338_v47, %v6342_v40  ;;  %v15404_v25 = vcombine.low %v6339_v48, %v6343_v56 }
 0x5e5   :  { %9377 = vmatpush1.bf16.msra.mxu0 %v15338_v55  ;;  %v15405_v55 = vcombine.high %v6339_v48, %v6343_v56 }
 0x5e6   :  { %9541 = vmatpush1.bf16.msra.mxu1 %v15340_v57  ;;  %9378 = vmatprep.subr.bf16.mxu0 %v15347_v58  ;;  %v6346_v57 = vld [vmem:[#allocation15 + $0x2c0] sm:$0xff] }
 0x5e7   :  { %9542 = vmatprep.subr.bf16.mxu1 %v15349_v7  ;;  %v6350_v58 = vld [vmem:[#allocation15 + $0x2e0] sm:$0xff]  ;;  %v6347_v7 = vld [vmem:[#allocation15 + $0x2c8] sm:$0xff] }
 0x5e8   :  { %v15411_v61 = vcombine.high %v6346_v57, %v6350_v58  ;;  %v15410_v4 = vcombine.low %v6346_v57, %v6350_v58  ;;  %v15412_v5 = vcombine.low %v6347_v7, %v6351_v59 }
 0x5e9   :  { %9379 = vmatpush1.bf16.msra.mxu0 %v15346_v62  ;;  %v15413_v62 = vcombine.high %v6347_v7, %v6351_v59 }
 0x5ea   :  { %9543 = vmatpush1.bf16.msra.mxu1 %v15348_v63  ;;  %9380 = vmatprep.subr.bf16.mxu0 %v15355_v1  ;;  %v6354_v63 = vld [vmem:[#allocation15 + $0x300] sm:$0xff] }
 0x5eb   :  { %9544 = vmatprep.subr.bf16.mxu1 %v15357_v32  ;;  %v6358_v1 = vld [vmem:[#allocation15 + $0x320] sm:$0xff]  ;;  %v6355_v32 = vld [vmem:[#allocation15 + $0x308] sm:$0xff] }
 0x5ec   :  { %v15419_v6 = vcombine.high %v6354_v63, %v6358_v1  ;;  %v15418_v12 = vcombine.low %v6354_v63, %v6358_v1  ;;  %v15420_v14 = vcombine.low %v6355_v32, %v6359_v3  ;;  %v6398_v63 = vld [vmem:[#allocation15 + $0x460] sm:$0xff]  ;;  %v6395_v1 = vld [vmem:[#allocation15 + $0x448] sm:$0xff] }
 0x5ed   :  { %9381 = vmatpush1.bf16.msra.mxu0 %v15354_v8  ;;  %v15421_v8 = vcombine.high %v6355_v32, %v6359_v3  ;;  %v6399_v32 = vld [vmem:[#allocation15 + $0x468] sm:$0xff] }
 0x5ee   :  { %9545 = vmatpush1.bf16.msra.mxu1 %v15356_v9  ;;  %9382 = vmatprep.subr.bf16.mxu0 %v15363_v10  ;;  %v6362_v9 = vld [vmem:[#allocation15 + $0x340] sm:$0xff] }
 0x5ef   :  { %9546 = vmatprep.subr.bf16.mxu1 %v15365_v0  ;;  %v6366_v10 = vld [vmem:[#allocation15 + $0x360] sm:$0xff]  ;;  %v6363_v0 = vld [vmem:[#allocation15 + $0x348] sm:$0xff] }
 0x5f0   :  { %v15427_v15 = vcombine.high %v6362_v9, %v6366_v10  ;;  %v15426_v21 = vcombine.low %v6362_v9, %v6366_v10  ;;  %v15428_v22 = vcombine.low %v6363_v0, %v6367_v11  ;;  %v15461_v10 = vcombine.high %v6395_v1, %v6399_v32 }
 0x5f1   :  { %9383 = vmatpush1.bf16.msra.mxu0 %v15362_v50  ;;  %v15429_v50 = vcombine.high %v6363_v0, %v6367_v11  ;;  %v6406_v0 = vld [vmem:[#allocation15 + $0x4a0] sm:$0xff]  ;;  %v6403_v11 = vld [vmem:[#allocation15 + $0x488] sm:$0xff] }
 0x5f2   :  { %9547 = vmatpush1.bf16.msra.mxu1 %v15364_v16  ;;  %9384 = vmatprep.subr.bf16.mxu0 %v15371_v17  ;;  %v6370_v16 = vld [vmem:[#allocation15 + $0x380] sm:$0xff] }
 0x5f3   :  { %9548 = vmatprep.subr.bf16.mxu1 %v15373_v19  ;;  %v6374_v17 = vld [vmem:[#allocation15 + $0x3a0] sm:$0xff]  ;;  %v6371_v19 = vld [vmem:[#allocation15 + $0x388] sm:$0xff] }
 0x5f4   :  { %v15435_v23 = vcombine.high %v6370_v16, %v6374_v17  ;;  %v15434_v31 = vcombine.low %v6370_v16, %v6374_v17  ;;  %v15436_v33 = vcombine.low %v6371_v19, %v6375_v20 }
 0x5f5   :  { %9385 = vmatpush1.bf16.msra.mxu0 %v15370_v26  ;;  %v15437_v26 = vcombine.high %v6371_v19, %v6375_v20  ;;  %v6410_v19 = vld [vmem:[#allocation15 + $0x4c0] sm:$0xff] }
 0x5f6   :  { %9549 = vmatpush1.bf16.msra.mxu1 %v15372_v27  ;;  %9386 = vmatprep.subr.bf16.mxu0 %v15379_v28  ;;  %v6378_v27 = vld [vmem:[#allocation15 + $0x3c0] sm:$0xff] }
 0x5f7   :  { %9550 = vmatprep.subr.bf16.mxu1 %v15381_v29  ;;  %v6382_v28 = vld [vmem:[#allocation15 + $0x3e0] sm:$0xff]  ;;  %v6379_v29 = vld [vmem:[#allocation15 + $0x3c8] sm:$0xff] }
 0x5f8   :  { %v15443_v34 = vcombine.high %v6378_v27, %v6382_v28  ;;  %v15442_v43 = vcombine.low %v6378_v27, %v6382_v28  ;;  %v15444_v44 = vcombine.low %v6379_v29, %v6383_v30  ;;  %v6414_v20 = vld [vmem:[#allocation15 + $0x4e0] sm:$0xff] }
 0x5f9   :  { %9387 = vmatpush1.bf16.msra.mxu0 %v15378_v35  ;;  %v15445_v35 = vcombine.high %v6379_v29, %v6383_v30  ;;  %v15475_v27 = vcombine.high %v6410_v19, %v6414_v20  ;;  %v6418_v29 = vld [vmem:[#allocation15 + $0x500] sm:$0xff] }
 0x5fa   :  { %9551 = vmatpush1.bf16.msra.mxu1 %v15380_v2  ;;  %9388 = vmatprep.subr.bf16.mxu0 %v15387_v36  ;;  %v6386_v2 = vld [vmem:[#allocation15 + $0x400] sm:$0xff] }
 0x5fb   :  { %9552 = vmatprep.subr.bf16.mxu1 %v15389_v37  ;;  %v6390_v36 = vld [vmem:[#allocation15 + $0x420] sm:$0xff]  ;;  %v6387_v37 = vld [vmem:[#allocation15 + $0x408] sm:$0xff] }
 0x5fc   :  { %v15451_v45 = vcombine.high %v6386_v2, %v6390_v36  ;;  %v6422_v30 = vld [vmem:[#allocation15 + $0x520] sm:$0xff] }
 0x5fd   :  { %9389 = vmatpush1.bf16.msra.mxu0 %v15386_v49  ;;  %v15453_v49 = vcombine.high %v6387_v37, %v6391_v42 }
 0x5fe   :  { %9553 = vmatpush1.bf16.msra.mxu1 %v15388_v46  ;;  %9390 = vmatprep.subr.bf16.mxu0 %v15395_v24  ;;  %v17894_v46 = vld [vmem:[#allocation13] sm:$0xff] }
 0x5ff   :  { %9554 = vmatprep.subr.bf16.mxu1 %v15397_v13  ;;  %v4312_v24 = vrot.slane %v17894_v46, %v17792_v39  ;;  %v4316_v13 = vrot.slane %v17894_v46, %v17797_v41  ;;  %v4324_v47 = vrot.slane %v17894_v46, %v17804_v52 }
 0x601   :  { %9391 = vmatpush1.bf16.msra.mxu0 %v15394_v51 }
 0x602   :  { %9555 = vmatpush1.bf16.msra.mxu1 %v15396_v53  ;;  %9392 = vmatprep.subr.bf16.mxu0 %v15403_v18 }
 0x603   :  { %9556 = vmatprep.subr.bf16.mxu1 %v15405_v55 }
 0x605   :  { %9393 = vmatpush1.bf16.msra.mxu0 %v15402_v60 }
 0x606   :  { %9557 = vmatpush1.bf16.msra.mxu1 %v15404_v25  ;;  %9394 = vmatprep.subr.bf16.mxu0 %v15411_v61  ;;  %v6394_v61 = vld [vmem:[#allocation15 + $0x440] sm:$0xff] }
 0x607   :  { %9558 = vmatprep.subr.bf16.mxu1 %v15413_v62  ;;  %v15459_v9 = vcombine.high %v6394_v61, %v6398_v63 }
 0x609   :  { %9395 = vmatpush1.bf16.msra.mxu0 %v15410_v4  ;;  %v15450_v4 = vcombine.low %v6386_v2, %v6390_v36  ;;  %v15483_v2 = vcombine.high %v6418_v29, %v6422_v30 }
 0x60a   :  { %9559 = vmatpush1.bf16.msra.mxu1 %v15412_v5  ;;  %9396 = vmatprep.subr.bf16.mxu0 %v15419_v6  ;;  %v15452_v5 = vcombine.low %v6387_v37, %v6391_v42  ;;  %v6426_v37 = vld [vmem:[#allocation15 + $0x540] sm:$0xff] }
 0x60b   :  { %9560 = vmatprep.subr.bf16.mxu1 %v15421_v8  ;;  %v6402_v8 = vld [vmem:[#allocation15 + $0x480] sm:$0xff] }
 0x60c   :  { %v15467_v16 = vcombine.high %v6402_v8, %v6406_v0  ;;  %v6430_v42 = vld [vmem:[#allocation15 + $0x560] sm:$0xff] }
 0x60d   :  { %9397 = vmatpush1.bf16.msra.mxu0 %v15418_v12  ;;  %v6407_v12 = vld [vmem:[#allocation15 + $0x4a8] sm:$0xff] }
 0x60e   :  { %9561 = vmatpush1.bf16.msra.mxu1 %v15420_v14  ;;  %9398 = vmatprep.subr.bf16.mxu0 %v15427_v15  ;;  %v15458_v15 = vcombine.low %v6394_v61, %v6398_v63  ;;  %v15469_v17 = vcombine.high %v6403_v11, %v6407_v12 }
 0x60f   :  { %9562 = vmatprep.subr.bf16.mxu1 %v15429_v50  ;;  %v15460_v50 = vcombine.low %v6395_v1, %v6399_v32  ;;  %v6450_v1 = vld [vmem:[#allocation15 + $0x600] sm:$0xff] }
 0x610   :  { %v6454_v32 = vld [vmem:[#allocation15 + $0x620] sm:$0xff] }
 0x611   :  { %9399 = vmatpush1.bf16.msra.mxu0 %v15426_v21  ;;  %v6411_v21 = vld [vmem:[#allocation15 + $0x4c8] sm:$0xff] }
 0x612   :  { %9563 = vmatpush1.bf16.msra.mxu1 %v15428_v22  ;;  %9400 = vmatprep.subr.bf16.mxu0 %v15435_v23  ;;  %v6415_v22 = vld [vmem:[#allocation15 + $0x4e8] sm:$0xff]  ;;  %v15466_v23 = vcombine.low %v6402_v8, %v6406_v0 }
 0x613   :  { %9564 = vmatprep.subr.bf16.mxu1 %v15437_v26  ;;  %v15468_v26 = vcombine.low %v6403_v11, %v6407_v12  ;;  %v15477_v28 = vcombine.high %v6411_v21, %v6415_v22  ;;  %v6458_v11 = vld [vmem:[#allocation15 + $0x640] sm:$0xff] }
 0x614   :  { %v6462_v12 = vld [vmem:[#allocation15 + $0x660] sm:$0xff] }
 0x615   :  { %9401 = vmatpush1.bf16.msra.mxu0 %v15434_v31  ;;  %v6419_v31 = vld [vmem:[#allocation15 + $0x508] sm:$0xff] }
 0x616   :  { %9565 = vmatpush1.bf16.msra.mxu1 %v15436_v33  ;;  %9402 = vmatprep.subr.bf16.mxu0 %v15443_v34  ;;  %v6423_v33 = vld [vmem:[#allocation15 + $0x528] sm:$0xff]  ;;  %v15474_v34 = vcombine.low %v6410_v19, %v6414_v20  ;;  %v15523_v19 = vcombine.high %v6458_v11, %v6462_v12 }
 0x617   :  { %9566 = vmatprep.subr.bf16.mxu1 %v15445_v35  ;;  %v15476_v35 = vcombine.low %v6411_v21, %v6415_v22  ;;  %v15485_v36 = vcombine.high %v6419_v31, %v6423_v33  ;;  %v6466_v21 = vld [vmem:[#allocation15 + $0x680] sm:$0xff] }
 0x618   :  { %v6470_v22 = vld [vmem:[#allocation15 + $0x6a0] sm:$0xff] }
 0x619   :  { %9403 = vmatpush1.bf16.msra.mxu0 %v15442_v43  ;;  %v6427_v43 = vld [vmem:[#allocation15 + $0x548] sm:$0xff] }
 0x61a   :  { %9567 = vmatpush1.bf16.msra.mxu1 %v15444_v44  ;;  %9413 = vmatprep.subr.bf16.mxu0 %v15451_v45  ;;  %v6431_v44 = vld [vmem:[#allocation15 + $0x568] sm:$0xff]  ;;  %v15482_v45 = vcombine.low %v6418_v29, %v6422_v30  ;;  %v15531_v29 = vcombine.high %v6466_v21, %v6470_v22 }
 0x61b   :  { %9577 = vmatprep.subr.bf16.mxu1 %v15453_v49  ;;  %v15484_v49 = vcombine.low %v6419_v31, %v6423_v33  ;;  %v6474_v31 = vld [vmem:[#allocation15 + $0x6c0] sm:$0xff] }
 0x61c   :  { %v6478_v33 = vld [vmem:[#allocation15 + $0x6e0] sm:$0xff] }
 0x62f   :  { %v5981_v40 = vpop.f32.mrb[12].mxu0 }
 0x630   :  { %v16507_v48 = vadd.f32 %v5981_v40, %v4312_v24  ;;  %v17902_v56 = vpop.f32.mrb[12].mxu1  ;;  %v5983_v51 = vpop.f32.mrb[13].mxu0  ;;  %v15491_v24 = vcombine.high %v6426_v37, %v6430_v42  ;;  %v6438_v40 = vld [vmem:[#allocation15 + $0x5a0] sm:$0xff] }
 0x631   :  { %v16508_v53 = vadd.f32 %v5983_v51, %v4316_v13  ;;  %v6065_v18 = vpop.f32.mrb[13].mxu1  ;;  %v5985_v55 = vpop.f32.mrb[14].mxu0  ;;  %v15493_v13 = vcombine.high %v6427_v43, %v6431_v44  ;;  %v6439_v51 = vld [vmem:[#allocation15 + $0x5a8] sm:$0xff] }
 0x632   :  { %v6242_v57 = vmax.f32 %v16507_v48, 0.0  ;;  %v16510_v58 = vadd.f32 %v6065_v18, %v4324_v47  ;;  %v6067_v7 = vpop.f32.mrb[14].mxu1  ;;  %v5986_v59 = vpop.f32.mrb[15].mxu0  ;;  %v6434_v47 = vld [vmem:[#allocation15 + $0x580] sm:$0xff]  ;;  %v6435_v48 = vld [vmem:[#allocation15 + $0x588] sm:$0xff]  ;;  %v15492_v18 = vcombine.low %v6427_v43, %v6431_v44 }
 0x633   :  { %v6243_v60 = vmax.f32 %v16508_v53, 0.0  ;;  %v6068_v25 = vpop.f32.mrb[15].mxu1  ;;  %v15490_v53 = vcombine.low %v6426_v37, %v6430_v42  ;;  %v15499_v55 = vcombine.high %v6434_v47, %v6438_v40  ;;  %v6446_v7 = vld [vmem:[#allocation15 + $0x5e0] sm:$0xff]  ;;  %v6443_v59 = vld [vmem:[#allocation15 + $0x5c8] sm:$0xff]  ;;  %v15500_v61 = vcombine.low %v6435_v48, %v6439_v51 }
 0x634   :  { %v6245_v62 = vmax.f32 %v16510_v58, 0.0  ;;  %v17906_v6 = vpack.c.bf16 %v6242_v57, %v6242_v57  ;;  %v15501_v57 = vcombine.high %v6435_v48, %v6439_v51  ;;  %v6442_v58 = vld [vmem:[#allocation15 + $0x5c0] sm:$0xff]  ;;  %v15498_v25 = vcombine.low %v6434_v47, %v6438_v40 }
 0x635   :  { %v17904_v3 = vpack.c.bf16 %v6243_v60, %v6243_v60  ;;  %v6447_v60 = vld [vmem:[#allocation15 + $0x5e8] sm:$0xff]  ;;  %v15506_v8 = vcombine.low %v6442_v58, %v6446_v7  ;;  %v15539_v37 = vcombine.high %v6474_v31, %v6478_v33  ;;  %v6482_v43 = vld [vmem:[#allocation15 + $0x700] sm:$0xff] }
 0x636   :  { %v17910_v14 = vpack.c.bf16 %v6245_v62, %v6245_v62  ;;  %v15507_v62 = vcombine.high %v6442_v58, %v6446_v7  ;;  %v15509_v63 = vcombine.high %v6443_v59, %v6447_v60  ;;  %v6486_v44 = vld [vmem:[#allocation15 + $0x720] sm:$0xff] }
 0x637   :  { %9404 = vmatprep.mubr.bf16.mxu0 %v17904_v3  ;;  %9568 = vmatprep.mubr.bf16.mxu1 %v17904_v3  ;;  %v15547_v47 = vcombine.high %v6482_v43, %v6486_v44  ;;  %v6490_v48 = vld [vmem:[#allocation15 + $0x740] sm:$0xff] }
 0x638   :  { %9405 = vmatmul.mubr.bf16.vlgmr.msra.gmra.mrb[20].mxu0 %v17906_v6  ;;  %9569 = vmatmul.mubr.bf16.vlgmr.msra.gmra.mrb[20].mxu1 %v17906_v6  ;;  %v6494_v51 = vld [vmem:[#allocation15 + $0x760] sm:$0xff] }
 0x639   :  { %9414 = vmatpush1.bf16.msra.mxu0 %v15450_v4  ;;  %9578 = vmatpush1.bf16.msra.mxu1 %v15452_v5  ;;  %v6451_v4 = vld [vmem:[#allocation15 + $0x608] sm:$0xff]  ;;  %v15555_v58 = vcombine.high %v6490_v48, %v6494_v51 }
 0x63a   :  { %9445 = vmatprep.mubr.bf16.mxu0 %v17910_v14  ;;  %9609 = vmatprep.mubr.bf16.mxu1 %v17910_v14  ;;  %v6455_v5 = vld [vmem:[#allocation15 + $0x628] sm:$0xff] }
 0x63b   :  { %9415 = vmatprep.subr.bf16.mxu0 %v15459_v9  ;;  %9579 = vmatprep.subr.bf16.mxu1 %v15461_v10  ;;  %v15508_v9 = vcombine.low %v6443_v59, %v6447_v60  ;;  %v15515_v10 = vcombine.high %v6450_v1, %v6454_v32  ;;  %v15517_v0 = vcombine.high %v6451_v4, %v6455_v5  ;;  %v6498_v59 = vld [vmem:[#allocation15 + $0x780] sm:$0xff] }
 0x63c   :  { %v6502_v60 = vld [vmem:[#allocation15 + $0x7a0] sm:$0xff] }
 0x63d   :  { %9416 = vmatpush1.bf16.msra.mxu0 %v15458_v15  ;;  %9580 = vmatpush1.bf16.msra.mxu1 %v15460_v50  ;;  %v6459_v15 = vld [vmem:[#allocation15 + $0x648] sm:$0xff] }
 0x63e   :  { %9417 = vmatprep.subr.bf16.mxu0 %v15467_v16  ;;  %9581 = vmatprep.subr.bf16.mxu1 %v15469_v17  ;;  %v6463_v50 = vld [vmem:[#allocation15 + $0x668] sm:$0xff]  ;;  %v15514_v16 = vcombine.low %v6450_v1, %v6454_v32  ;;  %v15516_v17 = vcombine.low %v6451_v4, %v6455_v5  ;;  %v4320_v1 = vrot.slane %v17894_v46, %v17811_v54  ;;  %v6506_v5 = vld [vmem:[#allocation15 + $0x7c0] sm:$0xff] }
 0x63f   :  { %v15525_v20 = vcombine.high %v6459_v15, %v6463_v50  ;;  %v15563_v32 = vcombine.high %v6498_v59, %v6502_v60 }
 0x641   :  { %9418 = vmatpush1.bf16.msra.mxu0 %v15466_v23  ;;  %9582 = vmatpush1.bf16.msra.mxu1 %v15468_v26  ;;  %v6467_v23 = vld [vmem:[#allocation15 + $0x688] sm:$0xff] }
 0x642   :  { %9419 = vmatprep.subr.bf16.mxu0 %v15475_v27  ;;  %9583 = vmatprep.subr.bf16.mxu1 %v15477_v28  ;;  %v6471_v26 = vld [vmem:[#allocation15 + $0x6a8] sm:$0xff]  ;;  %v15522_v27 = vcombine.low %v6458_v11, %v6462_v12  ;;  %v15524_v28 = vcombine.low %v6459_v15, %v6463_v50  ;;  %v16509_v12 = vadd.f32 %v17902_v56, %v4320_v1  ;;  %v6558_v1 = vld [vmem:[#allocation15 + $0x960] sm:$0xff] }
 0x643   :  { %v15533_v30 = vcombine.high %v6467_v23, %v6471_v26  ;;  %v6523_v56 = vld [vmem:[#allocation15 + $0x848] sm:$0xff] }
 0x645   :  { %9420 = vmatpush1.bf16.msra.mxu0 %v15474_v34  ;;  %9584 = vmatpush1.bf16.msra.mxu1 %v15476_v35  ;;  %v6475_v34 = vld [vmem:[#allocation15 + $0x6c8] sm:$0xff] }
 0x646   :  { %9421 = vmatprep.subr.bf16.mxu0 %v15483_v2  ;;  %9585 = vmatprep.subr.bf16.mxu1 %v15485_v36  ;;  %v6479_v35 = vld [vmem:[#allocation15 + $0x6e8] sm:$0xff]  ;;  %v15530_v2 = vcombine.low %v6466_v21, %v6470_v22  ;;  %v15532_v36 = vcombine.low %v6467_v23, %v6471_v26  ;;  %v6244_v23 = vmax.f32 %v16509_v12, 0.0 }
 0x647   :  { %v15541_v42 = vcombine.high %v6475_v34, %v6479_v35  ;;  %v6563_v12 = vld [vmem:[#allocation15 + $0x988] sm:$0xff] }
 0x649   :  { %9422 = vmatpush1.bf16.msra.mxu0 %v15482_v45  ;;  %9586 = vmatpush1.bf16.msra.mxu1 %v15484_v49  ;;  %v6483_v45 = vld [vmem:[#allocation15 + $0x708] sm:$0xff] }
 0x64a   :  { %9423 = vmatprep.subr.bf16.mxu0 %v15491_v24  ;;  %9587 = vmatprep.subr.bf16.mxu1 %v15493_v13  ;;  %v6487_v49 = vld [vmem:[#allocation15 + $0x728] sm:$0xff]  ;;  %v15538_v24 = vcombine.low %v6474_v31, %v6478_v33  ;;  %v15540_v13 = vcombine.low %v6475_v34, %v6479_v35  ;;  %v17919_v34 = vpack.c.bf16 %v6244_v23, %v6244_v23 }
 0x64b   :  { %v15549_v40 = vcombine.high %v6483_v45, %v6487_v49  ;;  %v6575_v23 = vld [vmem:[#allocation15 + $0x9e8] sm:$0xff] }
 0x64d   :  { %9424 = vmatpush1.bf16.msra.mxu0 %v15490_v53  ;;  %9588 = vmatpush1.bf16.msra.mxu1 %v15492_v18  ;;  %v6491_v53 = vld [vmem:[#allocation15 + $0x748] sm:$0xff] }
 0x64e   :  { %9425 = vmatprep.subr.bf16.mxu0 %v15499_v55  ;;  %9589 = vmatprep.subr.bf16.mxu1 %v15501_v57  ;;  %v6495_v18 = vld [vmem:[#allocation15 + $0x768] sm:$0xff]  ;;  %v15546_v55 = vcombine.low %v6482_v43, %v6486_v44  ;;  %v15548_v57 = vcombine.low %v6483_v45, %v6487_v49 }
 0x64f   :  { %v15557_v7 = vcombine.high %v6491_v53, %v6495_v18  ;;  %v6535_v43 = vld [vmem:[#allocation15 + $0x8a8] sm:$0xff] }
 0x651   :  { %9426 = vmatpush1.bf16.msra.mxu0 %v15498_v25  ;;  %9590 = vmatpush1.bf16.msra.mxu1 %v15500_v61  ;;  %v6499_v25 = vld [vmem:[#allocation15 + $0x788] sm:$0xff] }
 0x652   :  { %9427 = vmatprep.subr.bf16.mxu0 %v15507_v62  ;;  %9591 = vmatprep.subr.bf16.mxu1 %v15509_v63  ;;  %v6503_v61 = vld [vmem:[#allocation15 + $0x7a8] sm:$0xff]  ;;  %v15554_v62 = vcombine.low %v6490_v48, %v6494_v51  ;;  %v15556_v63 = vcombine.low %v6491_v53, %v6495_v18 }
 0x653   :  { %v15565_v4 = vcombine.high %v6499_v25, %v6503_v61  ;;  %v15564_v11 = vcombine.low %v6499_v25, %v6503_v61  ;;  %v6543_v48 = vld [vmem:[#allocation15 + $0x8e8] sm:$0xff] }
 0x655   :  { %9428 = vmatpush1.bf16.msra.mxu0 %v15506_v8  ;;  %9592 = vmatpush1.bf16.msra.mxu1 %v15508_v9  ;;  %v6510_v8 = vld [vmem:[#allocation15 + $0x7e0] sm:$0xff]  ;;  %v6507_v9 = vld [vmem:[#allocation15 + $0x7c8] sm:$0xff] }
 0x656   :  { %9429 = vmatprep.subr.bf16.mxu0 %v15515_v10  ;;  %9593 = vmatprep.subr.bf16.mxu1 %v15517_v0  ;;  %v6511_v10 = vld [vmem:[#allocation15 + $0x7e8] sm:$0xff]  ;;  %v15562_v0 = vcombine.low %v6498_v59, %v6502_v60  ;;  %v15571_v15 = vcombine.high %v6506_v5, %v6510_v8  ;;  %v15570_v21 = vcombine.low %v6506_v5, %v6510_v8 }
 0x657   :  { %v15573_v50 = vcombine.high %v6507_v9, %v6511_v10  ;;  %v15572_v22 = vcombine.low %v6507_v9, %v6511_v10  ;;  %v6551_v59 = vld [vmem:[#allocation15 + $0x928] sm:$0xff] }
 0x659   :  { %9430 = vmatpush1.bf16.msra.mxu0 %v15514_v16  ;;  %9594 = vmatpush1.bf16.msra.mxu1 %v15516_v17  ;;  %v6514_v16 = vld [vmem:[#allocation15 + $0x800] sm:$0xff] }
 0x65a   :  { %9431 = vmatprep.subr.bf16.mxu0 %v15523_v19  ;;  %9595 = vmatprep.subr.bf16.mxu1 %v15525_v20  ;;  %v6518_v17 = vld [vmem:[#allocation15 + $0x820] sm:$0xff]  ;;  %v6515_v19 = vld [vmem:[#allocation15 + $0x808] sm:$0xff] }
 0x65b   :  { %v6519_v20 = vld [vmem:[#allocation15 + $0x828] sm:$0xff]  ;;  %v15579_v26 = vcombine.high %v6514_v16, %v6518_v17  ;;  %v15578_v31 = vcombine.low %v6514_v16, %v6518_v17 }
 0x65c   :  { %v15580_v33 = vcombine.low %v6515_v19, %v6519_v20 }
 0x65d   :  { %9432 = vmatpush1.bf16.msra.mxu0 %v15522_v27  ;;  %9596 = vmatpush1.bf16.msra.mxu1 %v15524_v28  ;;  %v15581_v27 = vcombine.high %v6515_v19, %v6519_v20  ;;  %v6522_v28 = vld [vmem:[#allocation15 + $0x840] sm:$0xff] }
 0x65e   :  { %9433 = vmatprep.subr.bf16.mxu0 %v15531_v29  ;;  %9597 = vmatprep.subr.bf16.mxu1 %v15533_v30  ;;  %v6526_v29 = vld [vmem:[#allocation15 + $0x860] sm:$0xff]  ;;  %v6527_v30 = vld [vmem:[#allocation15 + $0x868] sm:$0xff] }
 0x65f   :  { %v15587_v35 = vcombine.high %v6522_v28, %v6526_v29  ;;  %v15586_v44 = vcombine.low %v6522_v28, %v6526_v29  ;;  %v15588_v45 = vcombine.low %v6523_v56, %v6527_v30  ;;  %v6570_v20 = vld [vmem:[#allocation15 + $0x9c0] sm:$0xff] }
 0x661   :  { %9434 = vmatpush1.bf16.msra.mxu0 %v15530_v2  ;;  %9598 = vmatpush1.bf16.msra.mxu1 %v15532_v36  ;;  %v15589_v2 = vcombine.high %v6523_v56, %v6527_v30  ;;  %v6530_v36 = vld [vmem:[#allocation15 + $0x880] sm:$0xff] }
 0x662   :  { %9435 = vmatprep.subr.bf16.mxu0 %v15539_v37  ;;  %9599 = vmatprep.subr.bf16.mxu1 %v15541_v42  ;;  %v6534_v37 = vld [vmem:[#allocation15 + $0x8a0] sm:$0xff]  ;;  %v6531_v42 = vld [vmem:[#allocation15 + $0x888] sm:$0xff] }
 0x663   :  { %v15595_v49 = vcombine.high %v6530_v36, %v6534_v37  ;;  %v15594_v51 = vcombine.low %v6530_v36, %v6534_v37  ;;  %v15596_v53 = vcombine.low %v6531_v42, %v6535_v43  ;;  %v6578_v56 = vld [vmem:[#allocation15 + $0xa00] sm:$0xff] }
 0x664   :  { %v6582_v30 = vld [vmem:[#allocation15 + $0xa20] sm:$0xff] }
 0x665   :  { %9436 = vmatpush1.bf16.msra.mxu0 %v15538_v24  ;;  %9600 = vmatpush1.bf16.msra.mxu1 %v15540_v13  ;;  %v15597_v24 = vcombine.high %v6531_v42, %v6535_v43  ;;  %v6538_v13 = vld [vmem:[#allocation15 + $0x8c0] sm:$0xff]  ;;  %v15643_v36 = vcombine.high %v6578_v56, %v6582_v30 }
 0x666   :  { %9437 = vmatprep.subr.bf16.mxu0 %v15547_v47  ;;  %9601 = vmatprep.subr.bf16.mxu1 %v15549_v40  ;;  %v6542_v47 = vld [vmem:[#allocation15 + $0x8e0] sm:$0xff]  ;;  %v6539_v40 = vld [vmem:[#allocation15 + $0x8c8] sm:$0xff] }
 0x667   :  { %v15603_v18 = vcombine.high %v6538_v13, %v6542_v47  ;;  %v15602_v60 = vcombine.low %v6538_v13, %v6542_v47  ;;  %v15604_v25 = vcombine.low %v6539_v40, %v6543_v48  ;;  %v6586_v42 = vld [vmem:[#allocation15 + $0xa40] sm:$0xff] }
 0x668   :  { %v6590_v43 = vld [vmem:[#allocation15 + $0xa60] sm:$0xff] }
 0x669   :  { %9438 = vmatpush1.bf16.msra.mxu0 %v15546_v55  ;;  %9602 = vmatpush1.bf16.msra.mxu1 %v15548_v57  ;;  %v15605_v55 = vcombine.high %v6539_v40, %v6543_v48  ;;  %v6546_v57 = vld [vmem:[#allocation15 + $0x900] sm:$0xff]  ;;  %v15651_v13 = vcombine.high %v6586_v42, %v6590_v43 }
 0x66a   :  { %9439 = vmatprep.subr.bf16.mxu0 %v15555_v58  ;;  %9603 = vmatprep.subr.bf16.mxu1 %v15557_v7  ;;  %v6550_v58 = vld [vmem:[#allocation15 + $0x920] sm:$0xff]  ;;  %v6547_v7 = vld [vmem:[#allocation15 + $0x908] sm:$0xff] }
 0x66b   :  { %v15611_v61 = vcombine.high %v6546_v57, %v6550_v58  ;;  %v15610_v5 = vcombine.low %v6546_v57, %v6550_v58  ;;  %v15612_v8 = vcombine.low %v6547_v7, %v6551_v59  ;;  %v6594_v40 = vld [vmem:[#allocation15 + $0xa80] sm:$0xff] }
 0x66c   :  { %v6598_v48 = vld [vmem:[#allocation15 + $0xaa0] sm:$0xff] }
 0x66d   :  { %9440 = vmatpush1.bf16.msra.mxu0 %v15554_v62  ;;  %9604 = vmatpush1.bf16.msra.mxu1 %v15556_v63  ;;  %v15613_v62 = vcombine.high %v6547_v7, %v6551_v59  ;;  %v6554_v63 = vld [vmem:[#allocation15 + $0x940] sm:$0xff]  ;;  %v15659_v57 = vcombine.high %v6594_v40, %v6598_v48 }
 0x66e   :  { %9441 = vmatprep.subr.bf16.mxu0 %v15563_v32  ;;  %9605 = vmatprep.subr.bf16.mxu1 %v15565_v4  ;;  %v6555_v32 = vld [vmem:[#allocation15 + $0x948] sm:$0xff]  ;;  %v15619_v9 = vcombine.high %v6554_v63, %v6558_v1  ;;  %v6602_v7 = vld [vmem:[#allocation15 + $0xac0] sm:$0xff] }
 0x66f   :  { %v6559_v4 = vld [vmem:[#allocation15 + $0x968] sm:$0xff]  ;;  %v6606_v59 = vld [vmem:[#allocation15 + $0xae0] sm:$0xff] }
 0x670   :  { %v15621_v10 = vcombine.high %v6555_v32, %v6559_v4  ;;  %v15620_v16 = vcombine.low %v6555_v32, %v6559_v4  ;;  %v6610_v32 = vld [vmem:[#allocation15 + $0xb00] sm:$0xff] }
 0x671   :  { %9442 = vmatpush1.bf16.msra.mxu0 %v15562_v0  ;;  %9606 = vmatpush1.bf16.msra.mxu1 %v15564_v11  ;;  %v6562_v0 = vld [vmem:[#allocation15 + $0x980] sm:$0xff] }
 0x672   :  { %9443 = vmatprep.subr.bf16.mxu0 %v15571_v15  ;;  %9607 = vmatprep.subr.bf16.mxu1 %v15573_v50  ;;  %v6566_v11 = vld [vmem:[#allocation15 + $0x9a0] sm:$0xff]  ;;  %v6567_v15 = vld [vmem:[#allocation15 + $0x9a8] sm:$0xff]  ;;  %v15618_v50 = vcombine.low %v6554_v63, %v6558_v1  ;;  %v15667_v63 = vcombine.high %v6602_v7, %v6606_v59 }
 0x673   :  { %v15627_v17 = vcombine.high %v6562_v0, %v6566_v11  ;;  %v15629_v19 = vcombine.high %v6563_v12, %v6567_v15  ;;  %v6614_v4 = vld [vmem:[#allocation15 + $0xb20] sm:$0xff] }
 0x675   :  { %9444 = vmatpush1.bf16.msra.mxu0 %v15570_v21  ;;  %9608 = vmatpush1.bf16.msra.mxu1 %v15572_v22  ;;  %v6574_v21 = vld [vmem:[#allocation15 + $0x9e0] sm:$0xff]  ;;  %v6571_v22 = vld [vmem:[#allocation15 + $0x9c8] sm:$0xff] }
 0x676   :  { %9454 = vmatprep.subr.bf16.mxu0 %v15579_v26  ;;  %9618 = vmatprep.subr.bf16.mxu1 %v15581_v27  ;;  %v15626_v26 = vcombine.low %v6562_v0, %v6566_v11  ;;  %v15628_v27 = vcombine.low %v6563_v12, %v6567_v15  ;;  %v15635_v28 = vcombine.high %v6570_v20, %v6574_v21  ;;  %v6618_v12 = vld [vmem:[#allocation15 + $0xb40] sm:$0xff] }
 0x677   :  { %v15637_v29 = vcombine.high %v6571_v22, %v6575_v23  ;;  %v15675_v0 = vcombine.high %v6610_v32, %v6614_v4  ;;  %v6622_v15 = vld [vmem:[#allocation15 + $0xb60] sm:$0xff] }
 0x678   :  { %9446 = vmatmul.mubr.bf16.vlgmr.msra.gmra.mrb[20].mxu0 %v17919_v34  ;;  %9610 = vmatmul.mubr.bf16.vlgmr.msra.gmra.mrb[20].mxu1 %v17919_v34 }
 0x679   :  { %9455 = vmatpush1.bf16.msra.mxu0 %v15578_v31  ;;  %9619 = vmatpush1.bf16.msra.mxu1 %v15580_v33  ;;  %v6579_v31 = vld [vmem:[#allocation15 + $0xa08] sm:$0xff] }
 0x67a   :  { %9456 = vmatprep.subr.bf16.mxu0 %v15587_v35  ;;  %9620 = vmatprep.subr.bf16.mxu1 %v15589_v2  ;;  %v6583_v33 = vld [vmem:[#allocation15 + $0xa28] sm:$0xff]  ;;  %v15634_v35 = vcombine.low %v6570_v20, %v6574_v21  ;;  %v15636_v2 = vcombine.low %v6571_v22, %v6575_v23  ;;  %v15683_v20 = vcombine.high %v6618_v12, %v6622_v15  ;;  %v6626_v22 = vld [vmem:[#allocation15 + $0xb80] sm:$0xff] }
 0x67b   :  { %v15645_v37 = vcombine.high %v6579_v31, %v6583_v33  ;;  %v6630_v23 = vld [vmem:[#allocation15 + $0xba0] sm:$0xff] }
 0x67d   :  { %9457 = vmatpush1.bf16.msra.mxu0 %v15586_v44  ;;  %9621 = vmatpush1.bf16.msra.mxu1 %v15588_v45  ;;  %v6587_v44 = vld [vmem:[#allocation15 + $0xa48] sm:$0xff] }
 0x67e   :  { %9458 = vmatprep.subr.bf16.mxu0 %v15595_v49  ;;  %9622 = vmatprep.subr.bf16.mxu1 %v15597_v24  ;;  %v6591_v45 = vld [vmem:[#allocation15 + $0xa68] sm:$0xff]  ;;  %v15642_v49 = vcombine.low %v6578_v56, %v6582_v30  ;;  %v15644_v24 = vcombine.low %v6579_v31, %v6583_v33  ;;  %v17927_v30 = vsub.s32 5, %v17789_v38  ;;  %v15691_v31 = vcombine.high %v6626_v22, %v6630_v23 }
 0x67f   :  { %v15653_v47 = vcombine.high %v6587_v44, %v6591_v45 }
 0x681   :  { %9459 = vmatpush1.bf16.msra.mxu0 %v15594_v51  ;;  %9623 = vmatpush1.bf16.msra.mxu1 %v15596_v53  ;;  %v6595_v51 = vld [vmem:[#allocation15 + $0xa88] sm:$0xff] }
 0x682   :  { %9460 = vmatprep.subr.bf16.mxu0 %v15603_v18  ;;  %9624 = vmatprep.subr.bf16.mxu1 %v15605_v55  ;;  %v6599_v53 = vld [vmem:[#allocation15 + $0xaa8] sm:$0xff]  ;;  %v15650_v18 = vcombine.low %v6586_v42, %v6590_v43  ;;  %v15652_v55 = vcombine.low %v6587_v44, %v6591_v45  ;;  %v15690_v44 = vcombine.low %v6626_v22, %v6630_v23  ;;  %v6662_v22 = vld [vmem:[#allocation15 + $0xca0] sm:$0xff] }
 0x683   :  { %v15661_v58 = vcombine.high %v6595_v51, %v6599_v53  ;;  %v6639_v42 = vld [vmem:[#allocation15 + $0xbe8] sm:$0xff] }
 0x684   :  { %v6659_v23 = vld [vmem:[#allocation15 + $0xc88] sm:$0xff] }
 0x685   :  { %9461 = vmatpush1.bf16.msra.mxu0 %v15602_v60  ;;  %9625 = vmatpush1.bf16.msra.mxu1 %v15604_v25  ;;  %v6603_v60 = vld [vmem:[#allocation15 + $0xac8] sm:$0xff] }
 0x686   :  { %9462 = vmatprep.subr.bf16.mxu0 %v15611_v61  ;;  %9626 = vmatprep.subr.bf16.mxu1 %v15613_v62  ;;  %v6607_v25 = vld [vmem:[#allocation15 + $0xae8] sm:$0xff]  ;;  %v15658_v61 = vcombine.low %v6594_v40, %v6598_v48  ;;  %v15660_v62 = vcombine.low %v6595_v51, %v6599_v53  ;;  %v6642_v40 = vld [vmem:[#allocation15 + $0xc00] sm:$0xff] }
 0x687   :  { %v15669_v1 = vcombine.high %v6603_v60, %v6607_v25  ;;  %v6646_v51 = vld [vmem:[#allocation15 + $0xc20] sm:$0xff]  ;;  %v6643_v53 = vld [vmem:[#allocation15 + $0xc08] sm:$0xff] }
 0x689   :  { %9463 = vmatpush1.bf16.msra.mxu0 %v15610_v5  ;;  %9627 = vmatpush1.bf16.msra.mxu1 %v15612_v8  ;;  %v6611_v5 = vld [vmem:[#allocation15 + $0xb08] sm:$0xff] }
 0x68a   :  { %9464 = vmatprep.subr.bf16.mxu0 %v15619_v9  ;;  %9628 = vmatprep.subr.bf16.mxu1 %v15621_v10  ;;  %v6615_v8 = vld [vmem:[#allocation15 + $0xb28] sm:$0xff]  ;;  %v15666_v9 = vcombine.low %v6602_v7, %v6606_v59  ;;  %v15668_v10 = vcombine.low %v6603_v60, %v6607_v25 }
 0x68b   :  { %v15677_v11 = vcombine.high %v6611_v5, %v6615_v8 }
 0x68d   :  { %9465 = vmatpush1.bf16.msra.mxu0 %v15618_v50  ;;  %9629 = vmatpush1.bf16.msra.mxu1 %v15620_v16  ;;  %v6619_v50 = vld [vmem:[#allocation15 + $0xb48] sm:$0xff] }
 0x68e   :  { %9466 = vmatprep.subr.bf16.mxu0 %v15627_v17  ;;  %9630 = vmatprep.subr.bf16.mxu1 %v15629_v19  ;;  %v6623_v16 = vld [vmem:[#allocation15 + $0xb68] sm:$0xff]  ;;  %v15674_v17 = vcombine.low %v6610_v32, %v6614_v4  ;;  %v15676_v19 = vcombine.low %v6611_v5, %v6615_v8  ;;  %v15707_v32 = vcombine.high %v6642_v40, %v6646_v51 }
 0x68f   :  { %v15685_v21 = vcombine.high %v6619_v50, %v6623_v16  ;;  %v15684_v56 = vcombine.low %v6619_v50, %v6623_v16  ;;  %v15706_v50 = vcombine.low %v6642_v40, %v6646_v51  ;;  %v6679_v40 = vld [vmem:[#allocation15 + $0xd28] sm:$0xff] }
 0x691   :  { %9467 = vmatpush1.bf16.msra.mxu0 %v15626_v26  ;;  %9631 = vmatpush1.bf16.msra.mxu1 %v15628_v27  ;;  %v6627_v26 = vld [vmem:[#allocation15 + $0xb88] sm:$0xff] }
 0x692   :  { %9468 = vmatprep.subr.bf16.mxu0 %v15635_v28  ;;  %9632 = vmatprep.subr.bf16.mxu1 %v15637_v29  ;;  %v6631_v27 = vld [vmem:[#allocation15 + $0xba8] sm:$0xff]  ;;  %v17924_v28 = vsub.s32 4, %v17789_v38  ;;  %v15682_v29 = vcombine.low %v6618_v12, %v6622_v15 }
 0x693   :  { %v15693_v33 = vcombine.high %v6627_v26, %v6631_v27  ;;  %v15692_v45 = vcombine.low %v6627_v26, %v6631_v27  ;;  %v6655_v12 = vld [vmem:[#allocation15 + $0xc68] sm:$0xff] }
 0x694   :  { %v4328_v43 = vrot.slane %v17894_v46, %v17924_v28  ;;  %v6663_v26 = vld [vmem:[#allocation15 + $0xca8] sm:$0xff] }
 0x695   :  { %9469 = vmatpush1.bf16.msra.mxu0 %v15634_v35  ;;  %9633 = vmatpush1.bf16.msra.mxu1 %v15636_v2  ;;  %v17930_v35 = vsub.s32 7, %v17789_v38  ;;  %v6634_v2 = vld [vmem:[#allocation15 + $0xbc0] sm:$0xff] }
 0x696   :  { %9470 = vmatprep.subr.bf16.mxu0 %v15643_v36  ;;  %9634 = vmatprep.subr.bf16.mxu1 %v15645_v37  ;;  %v6638_v36 = vld [vmem:[#allocation15 + $0xbe0] sm:$0xff]  ;;  %v6635_v37 = vld [vmem:[#allocation15 + $0xbc8] sm:$0xff] }
 0x697   :  { %v15698_v25 = vcombine.low %v6634_v2, %v6638_v36 }
 0x699   :  { %9471 = vmatpush1.bf16.msra.mxu0 %v15642_v49  ;;  %9635 = vmatpush1.bf16.msra.mxu1 %v15644_v24  ;;  %v4332_v49 = vrot.slane %v17894_v46, %v17927_v30  ;;  %v4340_v24 = vrot.slane %v17894_v46, %v17930_v35 }
 0x69a   :  { %9472 = vmatprep.subr.bf16.mxu0 %v15651_v13  ;;  %9636 = vmatprep.subr.bf16.mxu1 %v15653_v47  ;;  %v15699_v13 = vcombine.high %v6634_v2, %v6638_v36  ;;  %v15701_v47 = vcombine.high %v6635_v37, %v6639_v42  ;;  %v6666_v2 = vld [vmem:[#allocation15 + $0xcc0] sm:$0xff] }
 0x69b   :  { %v6670_v36 = vld [vmem:[#allocation15 + $0xce0] sm:$0xff] }
 0x69d   :  { %9473 = vmatpush1.bf16.msra.mxu0 %v15650_v18  ;;  %9637 = vmatpush1.bf16.msra.mxu1 %v15652_v55  ;;  %v6647_v18 = vld [vmem:[#allocation15 + $0xc28] sm:$0xff] }
 0x69e   :  { %9474 = vmatprep.subr.bf16.mxu0 %v15659_v57  ;;  %9638 = vmatprep.subr.bf16.mxu1 %v15661_v58  ;;  %v15709_v4 = vcombine.high %v6643_v53, %v6647_v18  ;;  %v15708_v16 = vcombine.low %v6643_v53, %v6647_v18 }
 0x6a1   :  { %9475 = vmatpush1.bf16.msra.mxu0 %v15658_v61  ;;  %9639 = vmatpush1.bf16.msra.mxu1 %v15660_v62  ;;  %v15700_v61 = vcombine.low %v6635_v37, %v6639_v42  ;;  %v6667_v37 = vld [vmem:[#allocation15 + $0xcc8] sm:$0xff] }
 0x6a2   :  { %9476 = vmatprep.subr.bf16.mxu0 %v15667_v63  ;;  %9640 = vmatprep.subr.bf16.mxu1 %v15669_v1  ;;  %v6671_v42 = vld [vmem:[#allocation15 + $0xce8] sm:$0xff] }
 0x6a3   :  { %v15732_v51 = vcombine.low %v6667_v37, %v6671_v42 }
 0x6a5   :  { %9477 = vmatpush1.bf16.msra.mxu0 %v15666_v9  ;;  %9641 = vmatpush1.bf16.msra.mxu1 %v15668_v10  ;;  %v6650_v9 = vld [vmem:[#allocation15 + $0xc40] sm:$0xff] }
 0x6a6   :  { %9478 = vmatprep.subr.bf16.mxu0 %v15675_v0  ;;  %9642 = vmatprep.subr.bf16.mxu1 %v15677_v11  ;;  %v6654_v0 = vld [vmem:[#allocation15 + $0xc60] sm:$0xff]  ;;  %v6651_v11 = vld [vmem:[#allocation15 + $0xc48] sm:$0xff] }
 0x6a9   :  { %9479 = vmatpush1.bf16.msra.mxu0 %v15674_v17  ;;  %9643 = vmatpush1.bf16.msra.mxu1 %v15676_v19  ;;  %v6658_v19 = vld [vmem:[#allocation15 + $0xc80] sm:$0xff] }
 0x6aa   :  { %9480 = vmatprep.subr.bf16.mxu0 %v15683_v20  ;;  %9644 = vmatprep.subr.bf16.mxu1 %v15685_v21  ;;  %v15715_v20 = vcombine.high %v6650_v9, %v6654_v0  ;;  %v15717_v21 = vcombine.high %v6651_v11, %v6655_v12 }
 0x6ad   :  { %9481 = vmatpush1.bf16.msra.mxu0 %v15682_v29  ;;  %9645 = vmatpush1.bf16.msra.mxu1 %v15684_v56  ;;  %v15714_v29 = vcombine.low %v6650_v9, %v6654_v0  ;;  %v15716_v56 = vcombine.low %v6651_v11, %v6655_v12  ;;  %v6702_v0 = vld [vmem:[#allocation15 + $0xde0] sm:$0xff]  ;;  %v6699_v11 = vld [vmem:[#allocation15 + $0xdc8] sm:$0xff] }
 0x6ae   :  { %9482 = vmatprep.subr.bf16.mxu0 %v15691_v31  ;;  %9646 = vmatprep.subr.bf16.mxu1 %v15693_v33  ;;  %v15723_v31 = vcombine.high %v6658_v19, %v6662_v22  ;;  %v15725_v33 = vcombine.high %v6659_v23, %v6663_v26  ;;  %v6703_v12 = vld [vmem:[#allocation15 + $0xde8] sm:$0xff] }
 0x6af   :  { %v6145_v48 = vpop.f32.mrb[16].mxu0 }
 0x6b0   :  { %v16511_v55 = vadd.f32 %v6145_v48, %v4328_v43  ;;  %v17938_v57 = vpop.f32.mrb[16].mxu1  ;;  %v6147_v58 = vpop.f32.mrb[17].mxu0  ;;  %v15722_v43 = vcombine.low %v6658_v19, %v6662_v22  ;;  %v15730_v48 = vcombine.low %v6666_v2, %v6670_v36  ;;  %v6710_v22 = vld [vmem:[#allocation15 + $0xe20] sm:$0xff] }
 0x6b1   :  { %v16512_v7 = vadd.f32 %v6147_v58, %v4332_v49  ;;  %v6229_v59 = vpop.f32.mrb[17].mxu1  ;;  %9483 = vmatpush1.bf16.msra.mxu0 %v15690_v44  ;;  %9647 = vmatpush1.bf16.msra.mxu1 %v15692_v45  ;;  %v6149_v60 = vpop.f32.mrb[18].mxu0  ;;  %v15724_v44 = vcombine.low %v6659_v23, %v6663_v26  ;;  %v15731_v45 = vcombine.high %v6666_v2, %v6670_v36  ;;  %v6686_v58 = vld [vmem:[#allocation15 + $0xd60] sm:$0xff]  ;;  %v6707_v23 = vld [vmem:[#allocation15 + $0xe08] sm:$0xff] }
 0x6b2   :  { %v6246_v62 = vmax.f32 %v16511_v55, 0.0  ;;  %v16514_v46 = vadd.f32 %v6229_v59, %v4340_v24  ;;  %v6231_v63 = vpop.f32.mrb[18].mxu1  ;;  %v6150_v1 = vpop.f32.mrb[19].mxu0  ;;  %9484 = vmatprep.subr.bf16.mxu0 %v15699_v13  ;;  %9648 = vmatprep.subr.bf16.mxu1 %v15701_v47  ;;  %v15733_v49 = vcombine.high %v6667_v37, %v6671_v42  ;;  %v6674_v24 = vld [vmem:[#allocation15 + $0xd00] sm:$0xff]  ;;  %v6675_v47 = vld [vmem:[#allocation15 + $0xd08] sm:$0xff] }
 0x6b3   :  { %v6247_v5 = vmax.f32 %v16512_v7, 0.0  ;;  %v6232_v8 = vpop.f32.mrb[19].mxu1  ;;  %v6678_v13 = vld [vmem:[#allocation15 + $0xd20] sm:$0xff]  ;;  %v15741_v18 = vcombine.high %v6675_v47, %v6679_v40  ;;  %v6683_v7 = vld [vmem:[#allocation15 + $0xd48] sm:$0xff] }
 0x6b4   :  { %v6249_v10 = vmax.f32 %v16514_v46, 0.0  ;;  %v17942_v17 = vpack.c.bf16 %v6246_v62, %v6246_v62  ;;  %v15739_v53 = vcombine.high %v6674_v24, %v6678_v13  ;;  %v6682_v55 = vld [vmem:[#allocation15 + $0xd40] sm:$0xff]  ;;  %v6687_v59 = vld [vmem:[#allocation15 + $0xd68] sm:$0xff]  ;;  %v15738_v60 = vcombine.low %v6674_v24, %v6678_v13 }
 0x6b5   :  { %v17940_v15 = vpack.c.bf16 %v6247_v5, %v6247_v5  ;;  %9485 = vmatpush1.bf16.msra.mxu0 %v15698_v25  ;;  %9649 = vmatpush1.bf16.msra.mxu1 %v15700_v61  ;;  %v15740_v25 = vcombine.low %v6675_v47, %v6679_v40  ;;  %v15747_v61 = vcombine.high %v6682_v55, %v6686_v58  ;;  %v6690_v46 = vld [vmem:[#allocation15 + $0xd80] sm:$0xff]  ;;  %v6691_v1 = vld [vmem:[#allocation15 + $0xd88] sm:$0xff] }
 0x6b6   :  { %9495 = vmatprep.subr.bf16.mxu0 %v15707_v32  ;;  %9659 = vmatprep.subr.bf16.mxu1 %v15709_v4  ;;  %v17946_v27 = vpack.c.bf16 %v6249_v10, %v6249_v10  ;;  %v15749_v62 = vcombine.high %v6683_v7, %v6687_v59  ;;  %v6694_v63 = vld [vmem:[#allocation15 + $0xda0] sm:$0xff]  ;;  %v6695_v32 = vld [vmem:[#allocation15 + $0xda8] sm:$0xff]  ;;  %v15746_v4 = vcombine.low %v6682_v55, %v6686_v58 }
 0x6b7   :  { %9486 = vmatprep.mubr.bf16.mxu0 %v17940_v15  ;;  %9650 = vmatprep.mubr.bf16.mxu1 %v17940_v15  ;;  %v15748_v5 = vcombine.low %v6683_v7, %v6687_v59  ;;  %v15755_v8 = vcombine.high %v6690_v46, %v6694_v63  ;;  %v15757_v9 = vcombine.high %v6691_v1, %v6695_v32  ;;  %v6698_v10 = vld [vmem:[#allocation15 + $0xdc0] sm:$0xff]  ;;  %v6711_v26 = vld [vmem:[#allocation15 + $0xe28] sm:$0xff] }
 0x6b8   :  { %9487 = vmatmul.mubr.bf16.vlgmr.msra.gmra.mrb[20].mxu0 %v17942_v17  ;;  %9651 = vmatmul.mubr.bf16.vlgmr.msra.gmra.mrb[20].mxu1 %v17942_v17  ;;  %v15763_v19 = vcombine.high %v6698_v10, %v6702_v0  ;;  %v6714_v2 = vld [vmem:[#allocation15 + $0xe40] sm:$0xff]  ;;  %v6715_v37 = vld [vmem:[#allocation15 + $0xe48] sm:$0xff] }
 0x6b9   :  { %9496 = vmatpush1.bf16.msra.mxu0 %v15706_v50  ;;  %9660 = vmatpush1.bf16.msra.mxu1 %v15708_v16  ;;  %v15754_v50 = vcombine.low %v6690_v46, %v6694_v63  ;;  %v15756_v16 = vcombine.low %v6691_v1, %v6695_v32  ;;  %v6718_v36 = vld [vmem:[#allocation15 + $0xe60] sm:$0xff]  ;;  %v6719_v42 = vld [vmem:[#allocation15 + $0xe68] sm:$0xff] }
 0x6ba   :  { %9527 = vmatprep.mubr.bf16.mxu0 %v17946_v27  ;;  %9691 = vmatprep.mubr.bf16.mxu1 %v17946_v27  ;;  %v6722_v24 = vld [vmem:[#allocation15 + $0xe80] sm:$0xff]  ;;  %v6723_v47 = vld [vmem:[#allocation15 + $0xe88] sm:$0xff] }
 0x6bb   :  { %9497 = vmatprep.subr.bf16.mxu0 %v15715_v20  ;;  %9661 = vmatprep.subr.bf16.mxu1 %v15717_v21  ;;  %v15765_v20 = vcombine.high %v6699_v11, %v6703_v12  ;;  %v6706_v21 = vld [vmem:[#allocation15 + $0xe00] sm:$0xff]  ;;  %v6727_v40 = vld [vmem:[#allocation15 + $0xea8] sm:$0xff] }
 0x6bc   :  { %v6726_v13 = vld [vmem:[#allocation15 + $0xea0] sm:$0xff]  ;;  %v6731_v7 = vld [vmem:[#allocation15 + $0xec8] sm:$0xff] }
 0x6bd   :  { %9498 = vmatpush1.bf16.msra.mxu0 %v15714_v29  ;;  %9662 = vmatpush1.bf16.msra.mxu1 %v15716_v56  ;;  %v15762_v29 = vcombine.low %v6698_v10, %v6702_v0  ;;  %v15764_v56 = vcombine.low %v6699_v11, %v6703_v12  ;;  %v6730_v55 = vld [vmem:[#allocation15 + $0xec0] sm:$0xff]  ;;  %v6735_v59 = vld [vmem:[#allocation15 + $0xee8] sm:$0xff] }
 0x6be   :  { %9499 = vmatprep.subr.bf16.mxu0 %v15723_v31  ;;  %9663 = vmatprep.subr.bf16.mxu1 %v15725_v33  ;;  %v15771_v31 = vcombine.high %v6706_v21, %v6710_v22  ;;  %v15773_v33 = vcombine.high %v6707_v23, %v6711_v26  ;;  %v6734_v58 = vld [vmem:[#allocation15 + $0xee0] sm:$0xff]  ;;  %v6739_v1 = vld [vmem:[#allocation15 + $0xf08] sm:$0xff] }
 0x6bf   :  { %v6738_v46 = vld [vmem:[#allocation15 + $0xf00] sm:$0xff]  ;;  %v6743_v32 = vld [vmem:[#allocation15 + $0xf28] sm:$0xff] }
 0x6c0   :  { %v6742_v63 = vld [vmem:[#allocation15 + $0xf20] sm:$0xff]  ;;  %v6747_v11 = vld [vmem:[#allocation15 + $0xf48] sm:$0xff] }
 0x6c1   :  { %9500 = vmatpush1.bf16.msra.mxu0 %v15722_v43  ;;  %9664 = vmatpush1.bf16.msra.mxu1 %v15724_v44  ;;  %v15770_v43 = vcombine.low %v6706_v21, %v6710_v22  ;;  %v15772_v44 = vcombine.low %v6707_v23, %v6711_v26  ;;  %v6746_v10 = vld [vmem:[#allocation15 + $0xf40] sm:$0xff]  ;;  %v6751_v12 = vld [vmem:[#allocation15 + $0xf68] sm:$0xff] }
 0x6c2   :  { %9501 = vmatprep.subr.bf16.mxu0 %v15731_v45  ;;  %9665 = vmatprep.subr.bf16.mxu1 %v15733_v49  ;;  %v15779_v45 = vcombine.high %v6714_v2, %v6718_v36  ;;  %v15781_v49 = vcombine.high %v6715_v37, %v6719_v42  ;;  %v6750_v0 = vld [vmem:[#allocation15 + $0xf60] sm:$0xff]  ;;  %v15813_v21 = vcombine.high %v6747_v11, %v6751_v12  ;;  %v6755_v26 = vld [vmem:[#allocation15 + $0xf88] sm:$0xff] }
 0x6c3   :  { %v6754_v22 = vld [vmem:[#allocation15 + $0xf80] sm:$0xff] }
 0x6c4   :  { %v6758_v23 = vld [vmem:[#allocation15 + $0xfa0] sm:$0xff] }
 0x6c5   :  { %9502 = vmatpush1.bf16.msra.mxu0 %v15730_v48  ;;  %9666 = vmatpush1.bf16.msra.mxu1 %v15732_v51  ;;  %v15778_v48 = vcombine.low %v6714_v2, %v6718_v36  ;;  %v15780_v51 = vcombine.low %v6715_v37, %v6719_v42  ;;  %v15819_v36 = vcombine.high %v6754_v22, %v6758_v23  ;;  %v6762_v37 = vld [vmem:[#allocation15 + $0xfc0] sm:$0xff] }
 0x6c6   :  { %9503 = vmatprep.subr.bf16.mxu0 %v15739_v53  ;;  %9667 = vmatprep.subr.bf16.mxu1 %v15741_v18  ;;  %v15787_v53 = vcombine.high %v6722_v24, %v6726_v13  ;;  %v15789_v18 = vcombine.high %v6723_v47, %v6727_v40  ;;  %v6766_v42 = vld [vmem:[#allocation15 + $0xfe0] sm:$0xff] }
 0x6c9   :  { %9504 = vmatpush1.bf16.msra.mxu0 %v15738_v60  ;;  %9668 = vmatpush1.bf16.msra.mxu1 %v15740_v25  ;;  %v15786_v60 = vcombine.low %v6722_v24, %v6726_v13  ;;  %v15788_v25 = vcombine.low %v6723_v47, %v6727_v40  ;;  %v15827_v13 = vcombine.high %v6762_v37, %v6766_v42  ;;  %v6260_v40 = vld [vmem:[#allocation15 + $0x10] sm:$0xff] }
 0x6ca   :  { %9505 = vmatprep.subr.bf16.mxu0 %v15747_v61  ;;  %9669 = vmatprep.subr.bf16.mxu1 %v15749_v62  ;;  %v15795_v61 = vcombine.high %v6730_v55, %v6734_v58  ;;  %v15797_v62 = vcombine.high %v6731_v7, %v6735_v59 }
 0x6cd   :  { %9506 = vmatpush1.bf16.msra.mxu0 %v15746_v4  ;;  %9670 = vmatpush1.bf16.msra.mxu1 %v15748_v5  ;;  %v15794_v4 = vcombine.low %v6730_v55, %v6734_v58  ;;  %v15796_v5 = vcombine.low %v6731_v7, %v6735_v59 }
 0x6ce   :  { %9507 = vmatprep.subr.bf16.mxu0 %v15755_v8  ;;  %9671 = vmatprep.subr.bf16.mxu1 %v15757_v9  ;;  %v15803_v8 = vcombine.high %v6738_v46, %v6742_v63  ;;  %v15805_v9 = vcombine.high %v6739_v1, %v6743_v32 }
 0x6d1   :  { %9508 = vmatpush1.bf16.msra.mxu0 %v15754_v50  ;;  %9672 = vmatpush1.bf16.msra.mxu1 %v15756_v16  ;;  %v15802_v50 = vcombine.low %v6738_v46, %v6742_v63  ;;  %v15804_v16 = vcombine.low %v6739_v1, %v6743_v32 }
 0x6d2   :  { %9509 = vmatprep.subr.bf16.mxu0 %v15763_v19  ;;  %9673 = vmatprep.subr.bf16.mxu1 %v15765_v20  ;;  %v17953_v19 = vsub.s32 6, %v17789_v38  ;;  %v15811_v20 = vcombine.high %v6746_v10, %v6750_v0 }
 0x6d5   :  { %9510 = vmatpush1.bf16.msra.mxu0 %v15762_v29  ;;  %9674 = vmatpush1.bf16.msra.mxu1 %v15764_v56  ;;  %v6759_v29 = vld [vmem:[#allocation15 + $0xfa8] sm:$0xff]  ;;  %v15810_v56 = vcombine.low %v6746_v10, %v6750_v0 }
 0x6d6   :  { %9511 = vmatprep.subr.bf16.mxu0 %v15771_v31  ;;  %9675 = vmatprep.subr.bf16.mxu1 %v15773_v33  ;;  %v15812_v31 = vcombine.low %v6747_v11, %v6751_v12  ;;  %v17205_v33 = vld [vmem:[#allocation13] sm:$0xff]  ;;  %v15821_v38 = vcombine.high %v6755_v26, %v6759_v29 }
 0x6d7   :  { %v4336_v2 = vrot.slane %v17205_v33, %v17953_v19  ;;  %v6297_v33 = vld [vmem:[#allocation15 + $0x138] sm:$0xff] }
 0x6d9   :  { %9512 = vmatpush1.bf16.msra.mxu0 %v15770_v43  ;;  %9676 = vmatpush1.bf16.msra.mxu1 %v15772_v44  ;;  %v6763_v43 = vld [vmem:[#allocation15 + $0xfc8] sm:$0xff]  ;;  %v16513_v24 = vadd.f32 %v17938_v57, %v4336_v2  ;;  %v6269_v57 = vld [vmem:[#allocation15 + $0x58] sm:$0xff] }
 0x6da   :  { %9513 = vmatprep.subr.bf16.mxu0 %v15779_v45  ;;  %9677 = vmatprep.subr.bf16.mxu1 %v15781_v49  ;;  %v6767_v44 = vld [vmem:[#allocation15 + $0xfe8] sm:$0xff]  ;;  %v15818_v45 = vcombine.low %v6754_v22, %v6758_v23  ;;  %v15820_v49 = vcombine.low %v6755_v26, %v6759_v29 }
 0x6db   :  { %v15829_v47 = vcombine.high %v6763_v43, %v6767_v44  ;;  %v15828_v55 = vcombine.low %v6763_v43, %v6767_v44  ;;  %v6248_v58 = vmax.f32 %v16513_v24, 0.0  ;;  %v6304_v43 = vld [vmem:[#allocation15 + $0x170] sm:$0xff]  ;;  %v6301_v44 = vld [vmem:[#allocation15 + $0x158] sm:$0xff] }
 0x6dd   :  { %9514 = vmatpush1.bf16.msra.mxu0 %v15778_v48  ;;  %9678 = vmatpush1.bf16.msra.mxu1 %v15780_v51  ;;  %v6264_v48 = vld [vmem:[#allocation15 + $0x30] sm:$0xff]  ;;  %v6261_v51 = vld [vmem:[#allocation15 + $0x18] sm:$0xff]  ;;  %v17957_v46 = vpack.c.bf16 %v6248_v58, %v6248_v58 }
 0x6de   :  { %9515 = vmatprep.subr.bf16.mxu0 %v15787_v53  ;;  %9679 = vmatprep.subr.bf16.mxu1 %v15789_v18  ;;  %v6265_v53 = vld [vmem:[#allocation15 + $0x38] sm:$0xff]  ;;  %v15826_v18 = vcombine.low %v6762_v37, %v6766_v42  ;;  %v15327_v7 = vcombine.high %v6260_v40, %v6264_v48  ;;  %v6300_v42 = vld [vmem:[#allocation15 + $0x150] sm:$0xff] }
 0x6df   :  { %v15329_v59 = vcombine.high %v6261_v51, %v6265_v53  ;;  %v15328_v63 = vcombine.low %v6261_v51, %v6265_v53  ;;  %v6309_v51 = vld [vmem:[#allocation15 + $0x198] sm:$0xff] }
 0x6e0   :  { %v6313_v53 = vld [vmem:[#allocation15 + $0x1b8] sm:$0xff] }
 0x6e1   :  { %9516 = vmatpush1.bf16.msra.mxu0 %v15786_v60  ;;  %9680 = vmatpush1.bf16.msra.mxu1 %v15788_v25  ;;  %v6268_v60 = vld [vmem:[#allocation15 + $0x50] sm:$0xff] }
 0x6e2   :  { %9517 = vmatprep.subr.bf16.mxu0 %v15795_v61  ;;  %9681 = vmatprep.subr.bf16.mxu1 %v15797_v62  ;;  %v6272_v25 = vld [vmem:[#allocation15 + $0x70] sm:$0xff]  ;;  %v6273_v61 = vld [vmem:[#allocation15 + $0x78] sm:$0xff]  ;;  %v15326_v62 = vcombine.low %v6260_v40, %v6264_v48 }
 0x6e3   :  { %v15335_v1 = vcombine.high %v6268_v60, %v6272_v25  ;;  %v15337_v32 = vcombine.high %v6269_v57, %v6273_v61  ;;  %v15334_v10 = vcombine.low %v6268_v60, %v6272_v25  ;;  %v15336_v0 = vcombine.low %v6269_v57, %v6273_v61  ;;  %v6308_v40 = vld [vmem:[#allocation15 + $0x190] sm:$0xff]  ;;  %v6317_v25 = vld [vmem:[#allocation15 + $0x1d8] sm:$0xff] }
 0x6e4   :  { %v6312_v48 = vld [vmem:[#allocation15 + $0x1b0] sm:$0xff]  ;;  %v6321_v57 = vld [vmem:[#allocation15 + $0x1f8] sm:$0xff] }
 0x6e5   :  { %9518 = vmatpush1.bf16.msra.mxu0 %v15794_v4  ;;  %9682 = vmatpush1.bf16.msra.mxu1 %v15796_v5  ;;  %v6276_v4 = vld [vmem:[#allocation15 + $0x90] sm:$0xff]  ;;  %v15375_v58 = vcombine.high %v6308_v40, %v6312_v48  ;;  %v15374_v61 = vcombine.low %v6308_v40, %v6312_v48  ;;  %v6357_v48 = vld [vmem:[#allocation15 + $0x318] sm:$0xff] }
 0x6e6   :  { %9519 = vmatprep.subr.bf16.mxu0 %v15803_v8  ;;  %9683 = vmatprep.subr.bf16.mxu1 %v15805_v9  ;;  %v6280_v5 = vld [vmem:[#allocation15 + $0xb0] sm:$0xff]  ;;  %v6277_v8 = vld [vmem:[#allocation15 + $0x98] sm:$0xff] }
 0x6e7   :  { %v6281_v9 = vld [vmem:[#allocation15 + $0xb8] sm:$0xff]  ;;  %v15343_v11 = vcombine.high %v6276_v4, %v6280_v5  ;;  %v15342_v22 = vcombine.low %v6276_v4, %v6280_v5  ;;  %v6320_v60 = vld [vmem:[#allocation15 + $0x1f0] sm:$0xff] }
 0x6e8   :  { %v15345_v12 = vcombine.high %v6277_v8, %v6281_v9  ;;  %v15344_v23 = vcombine.low %v6277_v8, %v6281_v9  ;;  %v6328_v4 = vld [vmem:[#allocation15 + $0x230] sm:$0xff]  ;;  %v6325_v5 = vld [vmem:[#allocation15 + $0x218] sm:$0xff] }
 0x6e9   :  { %9520 = vmatpush1.bf16.msra.mxu0 %v15802_v50  ;;  %9684 = vmatpush1.bf16.msra.mxu1 %v15804_v16  ;;  %v6284_v50 = vld [vmem:[#allocation15 + $0xd0] sm:$0xff]  ;;  %v6329_v8 = vld [vmem:[#allocation15 + $0x238] sm:$0xff] }
 0x6ea   :  { %9521 = vmatprep.subr.bf16.mxu0 %v15811_v20  ;;  %9685 = vmatprep.subr.bf16.mxu1 %v15813_v21  ;;  %v6288_v16 = vld [vmem:[#allocation15 + $0xf0] sm:$0xff]  ;;  %v6285_v20 = vld [vmem:[#allocation15 + $0xd8] sm:$0xff] }
 0x6eb   :  { %v6289_v21 = vld [vmem:[#allocation15 + $0xf8] sm:$0xff]  ;;  %v15351_v26 = vcombine.high %v6284_v50, %v6288_v16  ;;  %v15350_v2 = vcombine.low %v6284_v50, %v6288_v16  ;;  %v6336_v50 = vld [vmem:[#allocation15 + $0x270] sm:$0xff] }
 0x6ec   :  { %v15353_v29 = vcombine.high %v6285_v20, %v6289_v21  ;;  %v6333_v16 = vld [vmem:[#allocation15 + $0x258] sm:$0xff]  ;;  %v6360_v40 = vld [vmem:[#allocation15 + $0x330] sm:$0xff] }
 0x6ed   :  { %9522 = vmatpush1.bf16.msra.mxu0 %v15810_v56  ;;  %9686 = vmatpush1.bf16.msra.mxu1 %v15812_v31  ;;  %v6292_v56 = vld [vmem:[#allocation15 + $0x110] sm:$0xff] }
 0x6ee   :  { %9523 = vmatprep.subr.bf16.mxu0 %v15819_v36  ;;  %9687 = vmatprep.subr.bf16.mxu1 %v15821_v38  ;;  %v6296_v31 = vld [vmem:[#allocation15 + $0x130] sm:$0xff]  ;;  %v15352_v36 = vcombine.low %v6285_v20, %v6289_v21  ;;  %v6337_v20 = vld [vmem:[#allocation15 + $0x278] sm:$0xff] }
 0x6ef   :  { %v15359_v38 = vcombine.high %v6292_v56, %v6296_v31 }
 0x6f1   :  { %9524 = vmatpush1.bf16.msra.mxu0 %v15818_v45  ;;  %9688 = vmatpush1.bf16.msra.mxu1 %v15820_v49  ;;  %v6305_v45 = vld [vmem:[#allocation15 + $0x178] sm:$0xff]  ;;  %v15358_v49 = vcombine.low %v6292_v56, %v6296_v31  ;;  %v6344_v56 = vld [vmem:[#allocation15 + $0x2b0] sm:$0xff] }
 0x6f2   :  { %9525 = vmatprep.subr.bf16.mxu0 %v15827_v13  ;;  %9689 = vmatprep.subr.bf16.mxu1 %v15829_v47  ;;  %v15367_v13 = vcombine.high %v6300_v42, %v6304_v43  ;;  %v15369_v47 = vcombine.high %v6301_v44, %v6305_v45  ;;  %v6341_v31 = vld [vmem:[#allocation15 + $0x298] sm:$0xff] }
 0x6f5   :  { %9526 = vmatpush1.bf16.msra.mxu0 %v15826_v18  ;;  %9690 = vmatpush1.bf16.msra.mxu1 %v15828_v55  ;;  %v15366_v18 = vcombine.low %v6300_v42, %v6304_v43  ;;  %v15368_v55 = vcombine.low %v6301_v44, %v6305_v45  ;;  %v6352_v42 = vld [vmem:[#allocation15 + $0x2f0] sm:$0xff]  ;;  %v6349_v43 = vld [vmem:[#allocation15 + $0x2d8] sm:$0xff] }
 0x6f6   :  { %9700 = vmatprep.subr.bf16.mxu0 %v15327_v7  ;;  %9864 = vmatprep.subr.bf16.mxu1 %v15329_v59  ;;  %v15377_v7 = vcombine.high %v6309_v51, %v6313_v53  ;;  %v6316_v59 = vld [vmem:[#allocation15 + $0x1d0] sm:$0xff]  ;;  %v6353_v44 = vld [vmem:[#allocation15 + $0x2f8] sm:$0xff] }
 0x6f7   :  { %v15382_v9 = vcombine.low %v6316_v59, %v6320_v60 }
 0x6f8   :  { %9528 = vmatmul.mubr.bf16.vlgmr.msra.gmra.mrb[20].mxu0 %v17957_v46  ;;  %9692 = vmatmul.mubr.bf16.vlgmr.msra.gmra.mrb[20].mxu1 %v17957_v46 }
 0x6f9   :  { %9701 = vmatpush1.bf16.msra.mxu0 %v15326_v62  ;;  %9732 = vmatprep.mubr.bf16.mxu0 %v17904_v3  ;;  %v15376_v62 = vcombine.low %v6309_v51, %v6313_v53  ;;  %v6361_v51 = vld [vmem:[#allocation15 + $0x338] sm:$0xff] }
 0x6fa   :  { %9865 = vmatpush1.bf16.msra.mxu1 %v15328_v63  ;;  %9896 = vmatprep.mubr.bf16.mxu1 %v17904_v3  ;;  %v6293_v3 = vld [vmem:[#allocation15 + $0x118] sm:$0xff]  ;;  %v15383_v63 = vcombine.high %v6316_v59, %v6320_v60  ;;  %v6368_v59 = vld [vmem:[#allocation15 + $0x370] sm:$0xff] }
 0x6fb   :  { %9702 = vmatprep.subr.bf16.mxu0 %v15335_v1  ;;  %9866 = vmatprep.subr.bf16.mxu1 %v15337_v32  ;;  %v15361_v37 = vcombine.high %v6293_v3, %v6297_v33  ;;  %v15360_v24 = vcombine.low %v6293_v3, %v6297_v33  ;;  %v15385_v1 = vcombine.high %v6317_v25, %v6321_v57  ;;  %v6324_v32 = vld [vmem:[#allocation15 + $0x210] sm:$0xff]  ;;  %v6345_v3 = vld [vmem:[#allocation15 + $0x2b8] sm:$0xff] }
 0x6fc   :  { %v15390_v21 = vcombine.low %v6324_v32, %v6328_v4  ;;  %v6365_v60 = vld [vmem:[#allocation15 + $0x358] sm:$0xff] }
 0x6fd   :  { %9703 = vmatpush1.bf16.msra.mxu0 %v15334_v10  ;;  %v15384_v10 = vcombine.low %v6317_v25, %v6321_v57  ;;  %v6369_v25 = vld [vmem:[#allocation15 + $0x378] sm:$0xff] }
 0x6fe   :  { %9867 = vmatpush1.bf16.msra.mxu1 %v15336_v0  ;;  %9704 = vmatprep.subr.bf16.mxu0 %v15343_v11  ;;  %v15391_v0 = vcombine.high %v6324_v32, %v6328_v4  ;;  %v15393_v11 = vcombine.high %v6325_v5, %v6329_v8  ;;  %v6376_v32 = vld [vmem:[#allocation15 + $0x3b0] sm:$0xff]  ;;  %v6373_v4 = vld [vmem:[#allocation15 + $0x398] sm:$0xff] }
 0x6ff   :  { %9868 = vmatprep.subr.bf16.mxu1 %v15345_v12  ;;  %v6332_v12 = vld [vmem:[#allocation15 + $0x250] sm:$0xff] }
 0x700   :  { %v15398_v33 = vcombine.low %v6332_v12, %v6336_v50 }
 0x701   :  { %9705 = vmatpush1.bf16.msra.mxu0 %v15342_v22  ;;  %v15392_v22 = vcombine.low %v6325_v5, %v6329_v8  ;;  %v6377_v5 = vld [vmem:[#allocation15 + $0x3b8] sm:$0xff] }
 0x702   :  { %9869 = vmatpush1.bf16.msra.mxu1 %v15344_v23  ;;  %9706 = vmatprep.subr.bf16.mxu0 %v15351_v26  ;;  %v15399_v23 = vcombine.high %v6332_v12, %v6336_v50  ;;  %v15401_v26 = vcombine.high %v6333_v16, %v6337_v20  ;;  %v6384_v12 = vld [vmem:[#allocation15 + $0x3f0] sm:$0xff]  ;;  %v6381_v50 = vld [vmem:[#allocation15 + $0x3d8] sm:$0xff] }
 0x703   :  { %9870 = vmatprep.subr.bf16.mxu1 %v15353_v29  ;;  %v6340_v29 = vld [vmem:[#allocation15 + $0x290] sm:$0xff] }
 0x704   :  { %v15406_v45 = vcombine.low %v6340_v29, %v6344_v56 }
 0x705   :  { %9707 = vmatpush1.bf16.msra.mxu0 %v15350_v2  ;;  %v15400_v2 = vcombine.low %v6333_v16, %v6337_v20  ;;  %v6385_v16 = vld [vmem:[#allocation15 + $0x3f8] sm:$0xff] }
 0x706   :  { %9871 = vmatpush1.bf16.msra.mxu1 %v15352_v36  ;;  %9708 = vmatprep.subr.bf16.mxu0 %v15359_v38  ;;  %v15407_v36 = vcombine.high %v6340_v29, %v6344_v56  ;;  %v15409_v38 = vcombine.high %v6341_v31, %v6345_v3  ;;  %v6392_v29 = vld [vmem:[#allocation15 + $0x430] sm:$0xff]  ;;  %v6389_v56 = vld [vmem:[#allocation15 + $0x418] sm:$0xff] }
 0x707   :  { %9872 = vmatprep.subr.bf16.mxu1 %v15361_v37  ;;  %v6348_v37 = vld [vmem:[#allocation15 + $0x2d0] sm:$0xff] }
 0x708   :  { %v15414_v53 = vcombine.low %v6348_v37, %v6352_v42 }
 0x709   :  { %9709 = vmatpush1.bf16.msra.mxu0 %v15358_v49  ;;  %v15408_v49 = vcombine.low %v6341_v31, %v6345_v3  ;;  %v6393_v31 = vld [vmem:[#allocation15 + $0x438] sm:$0xff] }
 0x70a   :  { %9873 = vmatpush1.bf16.msra.mxu1 %v15360_v24  ;;  %9710 = vmatprep.subr.bf16.mxu0 %v15367_v13  ;;  %v15415_v24 = vcombine.high %v6348_v37, %v6352_v42  ;;  %v15417_v13 = vcombine.high %v6349_v43, %v6353_v44  ;;  %v6400_v37 = vld [vmem:[#allocation15 + $0x470] sm:$0xff] }
 0x70b   :  { %9874 = vmatprep.subr.bf16.mxu1 %v15369_v47  ;;  %v6356_v47 = vld [vmem:[#allocation15 + $0x310] sm:$0xff] }
 0x70c   :  { %v15422_v57 = vcombine.low %v6356_v47, %v6360_v40 }
 0x70d   :  { %9711 = vmatpush1.bf16.msra.mxu0 %v15366_v18  ;;  %v15416_v18 = vcombine.low %v6349_v43, %v6353_v44  ;;  %v6397_v43 = vld [vmem:[#allocation15 + $0x458] sm:$0xff] }
 0x70e   :  { %9875 = vmatpush1.bf16.msra.mxu1 %v15368_v55  ;;  %9712 = vmatprep.subr.bf16.mxu0 %v15375_v58  ;;  %v15423_v55 = vcombine.high %v6356_v47, %v6360_v40  ;;  %v15425_v58 = vcombine.high %v6357_v48, %v6361_v51  ;;  %v6401_v44 = vld [vmem:[#allocation15 + $0x478] sm:$0xff] }
 0x70f   :  { %9876 = vmatprep.subr.bf16.mxu1 %v15377_v7  ;;  %v6364_v7 = vld [vmem:[#allocation15 + $0x350] sm:$0xff]  ;;  %v15465_v47 = vcombine.high %v6397_v43, %v6401_v44  ;;  %v6405_v40 = vld [vmem:[#allocation15 + $0x498] sm:$0xff] }
 0x710   :  { %v15430_v8 = vcombine.low %v6364_v7, %v6368_v59 }
 0x711   :  { %9713 = vmatpush1.bf16.msra.mxu0 %v15374_v61  ;;  %v15424_v61 = vcombine.low %v6357_v48, %v6361_v51  ;;  %v6409_v48 = vld [vmem:[#allocation15 + $0x4b8] sm:$0xff] }
 0x712   :  { %9877 = vmatpush1.bf16.msra.mxu1 %v15376_v62  ;;  %9714 = vmatprep.subr.bf16.mxu0 %v15383_v63  ;;  %v15431_v62 = vcombine.high %v6364_v7, %v6368_v59  ;;  %v15433_v63 = vcombine.high %v6365_v60, %v6369_v25  ;;  %v6416_v7 = vld [vmem:[#allocation15 + $0x4f0] sm:$0xff]  ;;  %v6413_v59 = vld [vmem:[#allocation15 + $0x4d8] sm:$0xff] }
 0x713   :  { %9878 = vmatprep.subr.bf16.mxu1 %v15385_v1  ;;  %v6372_v1 = vld [vmem:[#allocation15 + $0x390] sm:$0xff] }
 0x714   :  { %v15438_v20 = vcombine.low %v6372_v1, %v6376_v32 }
 0x715   :  { %9715 = vmatpush1.bf16.msra.mxu0 %v15382_v9  ;;  %v15432_v9 = vcombine.low %v6365_v60, %v6369_v25  ;;  %v6417_v60 = vld [vmem:[#allocation15 + $0x4f8] sm:$0xff] }
 0x716   :  { %9879 = vmatpush1.bf16.msra.mxu1 %v15384_v10  ;;  %9716 = vmatprep.subr.bf16.mxu0 %v15391_v0  ;;  %v15439_v10 = vcombine.high %v6372_v1, %v6376_v32  ;;  %v15441_v0 = vcombine.high %v6373_v4, %v6377_v5  ;;  %v6421_v1 = vld [vmem:[#allocation15 + $0x518] sm:$0xff] }
 0x717   :  { %9880 = vmatprep.subr.bf16.mxu1 %v15393_v11  ;;  %v6380_v11 = vld [vmem:[#allocation15 + $0x3d0] sm:$0xff]  ;;  %v6425_v32 = vld [vmem:[#allocation15 + $0x538] sm:$0xff] }
 0x718   :  { %v15446_v3 = vcombine.low %v6380_v11, %v6384_v12 }
 0x719   :  { %9717 = vmatpush1.bf16.msra.mxu0 %v15390_v21  ;;  %v15440_v21 = vcombine.low %v6373_v4, %v6377_v5  ;;  %v15480_v4 = vcombine.low %v6413_v59, %v6417_v60 }
 0x71a   :  { %9881 = vmatpush1.bf16.msra.mxu1 %v15392_v22  ;;  %9718 = vmatprep.subr.bf16.mxu0 %v15399_v23  ;;  %v15447_v22 = vcombine.high %v6380_v11, %v6384_v12  ;;  %v15449_v23 = vcombine.high %v6381_v50, %v6385_v16  ;;  %v6433_v11 = vld [vmem:[#allocation15 + $0x578] sm:$0xff] }
 0x71b   :  { %9882 = vmatprep.subr.bf16.mxu1 %v15401_v26  ;;  %v6388_v26 = vld [vmem:[#allocation15 + $0x410] sm:$0xff] }
 0x71c   :  { %v15454_v42 = vcombine.low %v6388_v26, %v6392_v29 }
 0x71d   :  { %9719 = vmatpush1.bf16.msra.mxu0 %v15398_v33  ;;  %v15448_v33 = vcombine.low %v6381_v50, %v6385_v16  ;;  %v15488_v50 = vcombine.low %v6421_v1, %v6425_v32 }
 0x71e   :  { %9883 = vmatpush1.bf16.msra.mxu1 %v15400_v2  ;;  %9720 = vmatprep.subr.bf16.mxu0 %v15407_v36  ;;  %v15455_v2 = vcombine.high %v6388_v26, %v6392_v29  ;;  %v15457_v36 = vcombine.high %v6389_v56, %v6393_v31  ;;  %v6441_v26 = vld [vmem:[#allocation15 + $0x5b8] sm:$0xff] }
 0x71f   :  { %9884 = vmatprep.subr.bf16.mxu1 %v15409_v38  ;;  %v6396_v38 = vld [vmem:[#allocation15 + $0x450] sm:$0xff] }
 0x720   :  { %v15462_v51 = vcombine.low %v6396_v38, %v6400_v37 }
 0x721   :  { %9721 = vmatpush1.bf16.msra.mxu0 %v15406_v45  ;;  %v15456_v45 = vcombine.low %v6389_v56, %v6393_v31 }
 0x722   :  { %9885 = vmatpush1.bf16.msra.mxu1 %v15408_v49  ;;  %9722 = vmatprep.subr.bf16.mxu0 %v15415_v24  ;;  %v15463_v49 = vcombine.high %v6396_v38, %v6400_v37  ;;  %v6404_v24 = vld [vmem:[#allocation15 + $0x490] sm:$0xff]  ;;  %v6449_v38 = vld [vmem:[#allocation15 + $0x5f8] sm:$0xff] }
 0x723   :  { %9886 = vmatprep.subr.bf16.mxu1 %v15417_v13  ;;  %v6408_v13 = vld [vmem:[#allocation15 + $0x4b0] sm:$0xff] }
 0x724   :  { %v15470_v25 = vcombine.low %v6404_v24, %v6408_v13 }
 0x725   :  { %9723 = vmatpush1.bf16.msra.mxu0 %v15414_v53  ;;  %v15464_v53 = vcombine.low %v6397_v43, %v6401_v44 }
 0x726   :  { %9887 = vmatpush1.bf16.msra.mxu1 %v15416_v18  ;;  %9724 = vmatprep.subr.bf16.mxu0 %v15423_v55  ;;  %v15471_v18 = vcombine.high %v6404_v24, %v6408_v13  ;;  %v15473_v55 = vcombine.high %v6405_v40, %v6409_v48  ;;  %v6453_v24 = vld [vmem:[#allocation15 + $0x618] sm:$0xff] }
 0x727   :  { %9888 = vmatprep.subr.bf16.mxu1 %v15425_v58  ;;  %v6412_v58 = vld [vmem:[#allocation15 + $0x4d0] sm:$0xff]  ;;  %v6457_v13 = vld [vmem:[#allocation15 + $0x638] sm:$0xff] }
 0x729   :  { %9725 = vmatpush1.bf16.msra.mxu0 %v15422_v57  ;;  %v15479_v57 = vcombine.high %v6412_v58, %v6416_v7 }
 0x72a   :  { %9889 = vmatpush1.bf16.msra.mxu1 %v15424_v61  ;;  %9726 = vmatprep.subr.bf16.mxu0 %v15431_v62  ;;  %v15481_v61 = vcombine.high %v6413_v59, %v6417_v60  ;;  %v6420_v62 = vld [vmem:[#allocation15 + $0x510] sm:$0xff]  ;;  %v15520_v59 = vcombine.low %v6453_v24, %v6457_v13 }
 0x72b   :  { %9890 = vmatprep.subr.bf16.mxu1 %v15433_v63  ;;  %v6424_v63 = vld [vmem:[#allocation15 + $0x530] sm:$0xff] }
 0x72c   :  { %v15487_v5 = vcombine.high %v6420_v62, %v6424_v63  ;;  %v15486_v12 = vcombine.low %v6420_v62, %v6424_v63  ;;  %v6473_v62 = vld [vmem:[#allocation15 + $0x6b8] sm:$0xff] }
 0x72d   :  { %9727 = vmatpush1.bf16.msra.mxu0 %v15430_v8  ;;  %v15489_v8 = vcombine.high %v6421_v1, %v6425_v32 }
 0x72e   :  { %9891 = vmatpush1.bf16.msra.mxu1 %v15432_v9  ;;  %9728 = vmatprep.subr.bf16.mxu0 %v15439_v10  ;;  %v6428_v9 = vld [vmem:[#allocation15 + $0x550] sm:$0xff] }
 0x72f   :  { %9892 = vmatprep.subr.bf16.mxu1 %v15441_v0  ;;  %v6432_v10 = vld [vmem:[#allocation15 + $0x570] sm:$0xff]  ;;  %v6429_v0 = vld [vmem:[#allocation15 + $0x558] sm:$0xff] }
 0x730   :  { %v15495_v16 = vcombine.high %v6428_v9, %v6432_v10  ;;  %v15494_v29 = vcombine.low %v6428_v9, %v6432_v10  ;;  %v15496_v56 = vcombine.low %v6429_v0, %v6433_v11  ;;  %v6481_v9 = vld [vmem:[#allocation15 + $0x6f8] sm:$0xff] }
 0x731   :  { %9729 = vmatpush1.bf16.msra.mxu0 %v15438_v20  ;;  %v15497_v20 = vcombine.high %v6429_v0, %v6433_v11 }
 0x732   :  { %9893 = vmatpush1.bf16.msra.mxu1 %v15440_v21  ;;  %9730 = vmatprep.subr.bf16.mxu0 %v15447_v22  ;;  %v6436_v21 = vld [vmem:[#allocation15 + $0x590] sm:$0xff] }
 0x733   :  { %9894 = vmatprep.subr.bf16.mxu1 %v15449_v23  ;;  %v6440_v22 = vld [vmem:[#allocation15 + $0x5b0] sm:$0xff]  ;;  %v6437_v23 = vld [vmem:[#allocation15 + $0x598] sm:$0xff] }
 0x734   :  { %v15503_v31 = vcombine.high %v6436_v21, %v6440_v22  ;;  %v15502_v37 = vcombine.low %v6436_v21, %v6440_v22  ;;  %v6489_v21 = vld [vmem:[#allocation15 + $0x738] sm:$0xff] }
 0x735   :  { %9731 = vmatpush1.bf16.msra.mxu0 %v15446_v3  ;;  %v15505_v3 = vcombine.high %v6437_v23, %v6441_v26 }
 0x736   :  { %9895 = vmatpush1.bf16.msra.mxu1 %v15448_v33  ;;  %9741 = vmatprep.subr.bf16.mxu0 %v15455_v2  ;;  %v6444_v33 = vld [vmem:[#allocation15 + $0x5d0] sm:$0xff] }
 0x737   :  { %9905 = vmatprep.subr.bf16.mxu1 %v15457_v36  ;;  %v6448_v2 = vld [vmem:[#allocation15 + $0x5f0] sm:$0xff]  ;;  %v6445_v36 = vld [vmem:[#allocation15 + $0x5d8] sm:$0xff] }
 0x738   :  { %9733 = vmatmul.mubr.bf16.vlgmr.msra.gmra.mrb[24].mxu0 %v17906_v6  ;;  %v15511_v43 = vcombine.high %v6444_v33, %v6448_v2  ;;  %v15513_v44 = vcombine.high %v6445_v36, %v6449_v38 }
 0x739   :  { %9897 = vmatmul.mubr.bf16.vlgmr.msra.gmra.mrb[24].mxu1 %v17906_v6  ;;  %9742 = vmatpush1.bf16.msra.mxu0 %v15454_v42  ;;  %v15472_v6 = vcombine.low %v6405_v40, %v6409_v48  ;;  %v15504_v42 = vcombine.low %v6437_v23, %v6441_v26  ;;  %v15512_v40 = vcombine.low %v6445_v36, %v6449_v38 }
 0x73a   :  { %9773 = vmatprep.mubr.bf16.mxu0 %v17910_v14  ;;  %9906 = vmatpush1.bf16.msra.mxu1 %v15456_v45  ;;  %v6452_v45 = vld [vmem:[#allocation15 + $0x610] sm:$0xff] }
 0x73b   :  { %9937 = vmatprep.mubr.bf16.mxu1 %v17910_v14  ;;  %9743 = vmatprep.subr.bf16.mxu0 %v15463_v49  ;;  %v15478_v14 = vcombine.low %v6412_v58, %v6416_v7  ;;  %v6456_v49 = vld [vmem:[#allocation15 + $0x630] sm:$0xff]  ;;  %v6465_v58 = vld [vmem:[#allocation15 + $0x678] sm:$0xff] }
 0x73c   :  { %9907 = vmatprep.subr.bf16.mxu1 %v15465_v47  ;;  %v15510_v47 = vcombine.low %v6444_v33, %v6448_v2  ;;  %v15519_v48 = vcombine.high %v6452_v45, %v6456_v49  ;;  %v15518_v7 = vcombine.low %v6452_v45, %v6456_v49  ;;  %v6497_v33 = vld [vmem:[#allocation15 + $0x778] sm:$0xff] }
 0x73d   :  { %9744 = vmatpush1.bf16.msra.mxu0 %v15462_v51  ;;  %v15521_v51 = vcombine.high %v6453_v24, %v6457_v13  ;;  %v6505_v45 = vld [vmem:[#allocation15 + $0x7b8] sm:$0xff] }
 0x73e   :  { %9908 = vmatpush1.bf16.msra.mxu1 %v15464_v53  ;;  %9745 = vmatprep.subr.bf16.mxu0 %v15471_v18  ;;  %v6460_v53 = vld [vmem:[#allocation15 + $0x650] sm:$0xff] }
 0x73f   :  { %9909 = vmatprep.subr.bf16.mxu1 %v15473_v55  ;;  %v6464_v18 = vld [vmem:[#allocation15 + $0x670] sm:$0xff]  ;;  %v6461_v55 = vld [vmem:[#allocation15 + $0x658] sm:$0xff] }
 0x740   :  { %v15527_v60 = vcombine.high %v6460_v53, %v6464_v18  ;;  %v15526_v63 = vcombine.low %v6460_v53, %v6464_v18  ;;  %v15528_v1 = vcombine.low %v6461_v55, %v6465_v58  ;;  %v6513_v53 = vld [vmem:[#allocation15 + $0x7f8] sm:$0xff] }
 0x741   :  { %9746 = vmatpush1.bf16.msra.mxu0 %v15470_v25  ;;  %v15529_v25 = vcombine.high %v6461_v55, %v6465_v58 }
 0x742   :  { %9910 = vmatpush1.bf16.msra.mxu1 %v15472_v6  ;;  %9747 = vmatprep.subr.bf16.mxu0 %v15479_v57  ;;  %v6468_v6 = vld [vmem:[#allocation15 + $0x690] sm:$0xff] }
 0x743   :  { %9911 = vmatprep.subr.bf16.mxu1 %v15481_v61  ;;  %v6472_v57 = vld [vmem:[#allocation15 + $0x6b0] sm:$0xff]  ;;  %v6469_v61 = vld [vmem:[#allocation15 + $0x698] sm:$0xff] }
 0x744   :  { %v15535_v32 = vcombine.high %v6468_v6, %v6472_v57  ;;  %v15534_v10 = vcombine.low %v6468_v6, %v6472_v57  ;;  %v15536_v0 = vcombine.low %v6469_v61, %v6473_v62  ;;  %v6521_v6 = vld [vmem:[#allocation15 + $0x838] sm:$0xff] }
 0x745   :  { %9748 = vmatpush1.bf16.msra.mxu0 %v15478_v14  ;;  %v15537_v14 = vcombine.high %v6469_v61, %v6473_v62 }
 0x746   :  { %9912 = vmatpush1.bf16.msra.mxu1 %v15480_v4  ;;  %9749 = vmatprep.subr.bf16.mxu0 %v15487_v5  ;;  %v6476_v4 = vld [vmem:[#allocation15 + $0x6d0] sm:$0xff] }
 0x747   :  { %9913 = vmatprep.subr.bf16.mxu1 %v15489_v8  ;;  %v6480_v5 = vld [vmem:[#allocation15 + $0x6f0] sm:$0xff]  ;;  %v6477_v8 = vld [vmem:[#allocation15 + $0x6d8] sm:$0xff] }
 0x748   :  { %v15543_v11 = vcombine.high %v6476_v4, %v6480_v5  ;;  %v15542_v22 = vcombine.low %v6476_v4, %v6480_v5  ;;  %v15544_v23 = vcombine.low %v6477_v8, %v6481_v9  ;;  %v6525_v4 = vld [vmem:[#allocation15 + $0x858] sm:$0xff] }
 0x749   :  { %9750 = vmatpush1.bf16.msra.mxu0 %v15486_v12  ;;  %v15545_v12 = vcombine.high %v6477_v8, %v6481_v9  ;;  %v6529_v5 = vld [vmem:[#allocation15 + $0x878] sm:$0xff] }
 0x74a   :  { %9914 = vmatpush1.bf16.msra.mxu1 %v15488_v50  ;;  %9751 = vmatprep.subr.bf16.mxu0 %v15495_v16  ;;  %v6484_v50 = vld [vmem:[#allocation15 + $0x710] sm:$0xff] }
 0x74b   :  { %9915 = vmatprep.subr.bf16.mxu1 %v15497_v20  ;;  %v6488_v16 = vld [vmem:[#allocation15 + $0x730] sm:$0xff]  ;;  %v6485_v20 = vld [vmem:[#allocation15 + $0x718] sm:$0xff] }
 0x74c   :  { %v15551_v26 = vcombine.high %v6484_v50, %v6488_v16  ;;  %v15550_v2 = vcombine.low %v6484_v50, %v6488_v16  ;;  %v15552_v36 = vcombine.low %v6485_v20, %v6489_v21  ;;  %v6537_v50 = vld [vmem:[#allocation15 + $0x8b8] sm:$0xff] }
 0x74d   :  { %9752 = vmatpush1.bf16.msra.mxu0 %v15494_v29  ;;  %v15553_v29 = vcombine.high %v6485_v20, %v6489_v21  ;;  %v15592_v20 = vcombine.low %v6525_v4, %v6529_v5 }
 0x74e   :  { %9916 = vmatpush1.bf16.msra.mxu1 %v15496_v56  ;;  %9753 = vmatprep.subr.bf16.mxu0 %v15503_v31  ;;  %v6492_v56 = vld [vmem:[#allocation15 + $0x750] sm:$0xff] }
 0x74f   :  { %9917 = vmatprep.subr.bf16.mxu1 %v15505_v3  ;;  %v6496_v31 = vld [vmem:[#allocation15 + $0x770] sm:$0xff]  ;;  %v6493_v3 = vld [vmem:[#allocation15 + $0x758] sm:$0xff] }
 0x750   :  { %v15559_v38 = vcombine.high %v6492_v56, %v6496_v31  ;;  %v15558_v49 = vcombine.low %v6492_v56, %v6496_v31  ;;  %v15560_v24 = vcombine.low %v6493_v3, %v6497_v33  ;;  %v6545_v56 = vld [vmem:[#allocation15 + $0x8f8] sm:$0xff] }
 0x751   :  { %9754 = vmatpush1.bf16.msra.mxu0 %v15502_v37  ;;  %v15561_v37 = vcombine.high %v6493_v3, %v6497_v33 }
 0x752   :  { %9918 = vmatpush1.bf16.msra.mxu1 %v15504_v42  ;;  %9755 = vmatprep.subr.bf16.mxu0 %v15511_v43  ;;  %v6500_v42 = vld [vmem:[#allocation15 + $0x790] sm:$0xff] }
 0x753   :  { %9919 = vmatprep.subr.bf16.mxu1 %v15513_v44  ;;  %v6504_v43 = vld [vmem:[#allocation15 + $0x7b0] sm:$0xff]  ;;  %v6501_v44 = vld [vmem:[#allocation15 + $0x798] sm:$0xff] }
 0x754   :  { %v15567_v13 = vcombine.high %v6500_v42, %v6504_v43  ;;  %v15566_v18 = vcombine.low %v6500_v42, %v6504_v43  ;;  %v15568_v55 = vcombine.low %v6501_v44, %v6505_v45 }
 0x755   :  { %9756 = vmatpush1.bf16.msra.mxu0 %v15510_v47  ;;  %v15569_v47 = vcombine.high %v6501_v44, %v6505_v45  ;;  %v6556_v45 = vld [vmem:[#allocation15 + $0x950] sm:$0xff] }
 0x756   :  { %9920 = vmatpush1.bf16.msra.mxu1 %v15512_v40  ;;  %9757 = vmatprep.subr.bf16.mxu0 %v15519_v48  ;;  %v6508_v40 = vld [vmem:[#allocation15 + $0x7d0] sm:$0xff] }
 0x757   :  { %9921 = vmatprep.subr.bf16.mxu1 %v15521_v51  ;;  %v6512_v48 = vld [vmem:[#allocation15 + $0x7f0] sm:$0xff]  ;;  %v6509_v51 = vld [vmem:[#allocation15 + $0x7d8] sm:$0xff] }
 0x758   :  { %v15575_v58 = vcombine.high %v6508_v40, %v6512_v48  ;;  %v15574_v57 = vcombine.low %v6508_v40, %v6512_v48  ;;  %v15576_v61 = vcombine.low %v6509_v51, %v6513_v53 }
 0x759   :  { %9758 = vmatpush1.bf16.msra.mxu0 %v15518_v7  ;;  %v15577_v7 = vcombine.high %v6509_v51, %v6513_v53  ;;  %v6564_v53 = vld [vmem:[#allocation15 + $0x990] sm:$0xff] }
 0x75a   :  { %9922 = vmatpush1.bf16.msra.mxu1 %v15520_v59  ;;  %9759 = vmatprep.subr.bf16.mxu0 %v15527_v60  ;;  %v6516_v59 = vld [vmem:[#allocation15 + $0x810] sm:$0xff] }
 0x75b   :  { %9923 = vmatprep.subr.bf16.mxu1 %v15529_v25  ;;  %v6520_v60 = vld [vmem:[#allocation15 + $0x830] sm:$0xff]  ;;  %v6517_v25 = vld [vmem:[#allocation15 + $0x818] sm:$0xff] }
 0x75c   :  { %v15583_v62 = vcombine.high %v6516_v59, %v6520_v60  ;;  %v15584_v8 = vcombine.low %v6517_v25, %v6521_v6 }
 0x75d   :  { %9760 = vmatpush1.bf16.msra.mxu0 %v15526_v63  ;;  %v15585_v63 = vcombine.high %v6517_v25, %v6521_v6  ;;  %v6572_v6 = vld [vmem:[#allocation15 + $0x9d0] sm:$0xff] }
 0x75e   :  { %9924 = vmatpush1.bf16.msra.mxu1 %v15528_v1  ;;  %9761 = vmatprep.subr.bf16.mxu0 %v15535_v32  ;;  %v6524_v1 = vld [vmem:[#allocation15 + $0x850] sm:$0xff] }
 0x75f   :  { %9925 = vmatprep.subr.bf16.mxu1 %v15537_v14  ;;  %v6528_v32 = vld [vmem:[#allocation15 + $0x870] sm:$0xff]  ;;  %v15582_v14 = vcombine.low %v6516_v59, %v6520_v60 }
 0x760   :  { %v15591_v9 = vcombine.high %v6524_v1, %v6528_v32  ;;  %v15590_v16 = vcombine.low %v6524_v1, %v6528_v32 }
 0x761   :  { %9762 = vmatpush1.bf16.msra.mxu0 %v15534_v10  ;;  %v6532_v10 = vld [vmem:[#allocation15 + $0x890] sm:$0xff] }
 0x762   :  { %9926 = vmatpush1.bf16.msra.mxu1 %v15536_v0  ;;  %9763 = vmatprep.subr.bf16.mxu0 %v15543_v11  ;;  %v6536_v0 = vld [vmem:[#allocation15 + $0x8b0] sm:$0xff]  ;;  %v15593_v11 = vcombine.high %v6525_v4, %v6529_v5 }
 0x763   :  { %9927 = vmatprep.subr.bf16.mxu1 %v15545_v12  ;;  %v6533_v12 = vld [vmem:[#allocation15 + $0x898] sm:$0xff]  ;;  %v15599_v21 = vcombine.high %v6532_v10, %v6536_v0  ;;  %v15598_v31 = vcombine.low %v6532_v10, %v6536_v0  ;;  %v6580_v4 = vld [vmem:[#allocation15 + $0xa10] sm:$0xff] }
 0x764   :  { %v6584_v5 = vld [vmem:[#allocation15 + $0xa30] sm:$0xff] }
 0x765   :  { %9764 = vmatpush1.bf16.msra.mxu0 %v15542_v22  ;;  %v15601_v22 = vcombine.high %v6533_v12, %v6537_v50 }
 0x766   :  { %9928 = vmatpush1.bf16.msra.mxu1 %v15544_v23  ;;  %9765 = vmatprep.subr.bf16.mxu0 %v15551_v26  ;;  %v6540_v23 = vld [vmem:[#allocation15 + $0x8d0] sm:$0xff] }
 0x767   :  { %9929 = vmatprep.subr.bf16.mxu1 %v15553_v29  ;;  %v6544_v26 = vld [vmem:[#allocation15 + $0x8f0] sm:$0xff]  ;;  %v6541_v29 = vld [vmem:[#allocation15 + $0x8d8] sm:$0xff] }
 0x768   :  { %v15607_v3 = vcombine.high %v6540_v23, %v6544_v26  ;;  %v15609_v33 = vcombine.high %v6541_v29, %v6545_v56  ;;  %v15608_v42 = vcombine.low %v6541_v29, %v6545_v56  ;;  %v6596_v56 = vld [vmem:[#allocation15 + $0xa90] sm:$0xff] }
 0x769   :  { %9766 = vmatpush1.bf16.msra.mxu0 %v15550_v2  ;;  %v6548_v2 = vld [vmem:[#allocation15 + $0x910] sm:$0xff] }
 0x76a   :  { %9930 = vmatpush1.bf16.msra.mxu1 %v15552_v36  ;;  %9767 = vmatprep.subr.bf16.mxu0 %v15559_v38  ;;  %v6552_v36 = vld [vmem:[#allocation15 + $0x930] sm:$0xff]  ;;  %v6549_v38 = vld [vmem:[#allocation15 + $0x918] sm:$0xff] }
 0x76b   :  { %9931 = vmatprep.subr.bf16.mxu1 %v15561_v37  ;;  %v6553_v37 = vld [vmem:[#allocation15 + $0x938] sm:$0xff]  ;;  %v15615_v43 = vcombine.high %v6548_v2, %v6552_v36 }
 0x76c   :  { %v15617_v44 = vcombine.high %v6549_v38, %v6553_v37  ;;  %v15616_v40 = vcombine.low %v6549_v38, %v6553_v37  ;;  %v6604_v37 = vld [vmem:[#allocation15 + $0xad0] sm:$0xff] }
 0x76d   :  { %9768 = vmatpush1.bf16.msra.mxu0 %v15558_v49  ;;  %v6560_v49 = vld [vmem:[#allocation15 + $0x970] sm:$0xff] }
 0x76e   :  { %9932 = vmatpush1.bf16.msra.mxu1 %v15560_v24  ;;  %9769 = vmatprep.subr.bf16.mxu0 %v15567_v13  ;;  %v6557_v24 = vld [vmem:[#allocation15 + $0x958] sm:$0xff]  ;;  %v15623_v48 = vcombine.high %v6556_v45, %v6560_v49 }
 0x76f   :  { %9933 = vmatprep.subr.bf16.mxu1 %v15569_v47  ;;  %v6561_v13 = vld [vmem:[#allocation15 + $0x978] sm:$0xff]  ;;  %v15614_v47 = vcombine.low %v6548_v2, %v6552_v36 }
 0x770   :  { %v15625_v51 = vcombine.high %v6557_v24, %v6561_v13  ;;  %v15624_v59 = vcombine.low %v6557_v24, %v6561_v13  ;;  %v6612_v13 = vld [vmem:[#allocation15 + $0xb10] sm:$0xff] }
 0x771   :  { %9770 = vmatpush1.bf16.msra.mxu0 %v15566_v18  ;;  %v6568_v18 = vld [vmem:[#allocation15 + $0x9b0] sm:$0xff] }
 0x772   :  { %9934 = vmatpush1.bf16.msra.mxu1 %v15568_v55  ;;  %9771 = vmatprep.subr.bf16.mxu0 %v15575_v58  ;;  %v6565_v55 = vld [vmem:[#allocation15 + $0x998] sm:$0xff]  ;;  %v15631_v60 = vcombine.high %v6564_v53, %v6568_v18 }
 0x773   :  { %9935 = vmatprep.subr.bf16.mxu1 %v15577_v7  ;;  %v6569_v58 = vld [vmem:[#allocation15 + $0x9b8] sm:$0xff]  ;;  %v15622_v7 = vcombine.low %v6556_v45, %v6560_v49 }
 0x774   :  { %v15633_v25 = vcombine.high %v6565_v55, %v6569_v58  ;;  %v15632_v1 = vcombine.low %v6565_v55, %v6569_v58  ;;  %v6620_v58 = vld [vmem:[#allocation15 + $0xb50] sm:$0xff] }
 0x775   :  { %9772 = vmatpush1.bf16.msra.mxu0 %v15574_v57  ;;  %v6576_v57 = vld [vmem:[#allocation15 + $0x9f0] sm:$0xff] }
 0x776   :  { %9936 = vmatpush1.bf16.msra.mxu1 %v15576_v61  ;;  %9782 = vmatprep.subr.bf16.mxu0 %v15583_v62  ;;  %v6573_v61 = vld [vmem:[#allocation15 + $0x9d8] sm:$0xff]  ;;  %v15639_v32 = vcombine.high %v6572_v6, %v6576_v57  ;;  %v15638_v10 = vcombine.low %v6572_v6, %v6576_v57 }
 0x777   :  { %9946 = vmatprep.subr.bf16.mxu1 %v15585_v63  ;;  %v6577_v62 = vld [vmem:[#allocation15 + $0x9f8] sm:$0xff]  ;;  %v15630_v63 = vcombine.low %v6564_v53, %v6568_v18 }
 0x778   :  { %9774 = vmatmul.mubr.bf16.vlgmr.msra.gmra.mrb[24].mxu0 %v17919_v34  ;;  %v15640_v0 = vcombine.low %v6573_v61, %v6577_v62 }
 0x779   :  { %9938 = vmatmul.mubr.bf16.vlgmr.msra.gmra.mrb[24].mxu1 %v17919_v34  ;;  %9783 = vmatpush1.bf16.msra.mxu0 %v15582_v14  ;;  %v15600_v34 = vcombine.low %v6533_v12, %v6537_v50  ;;  %v15641_v14 = vcombine.high %v6573_v61, %v6577_v62  ;;  %v6588_v50 = vld [vmem:[#allocation15 + $0xa50] sm:$0xff] }
 0x77a   :  { %9814 = vmatprep.mubr.bf16.mxu0 %v17940_v15  ;;  %9947 = vmatpush1.bf16.msra.mxu1 %v15584_v8  ;;  %v6581_v8 = vld [vmem:[#allocation15 + $0xa18] sm:$0xff]  ;;  %v6628_v62 = vld [vmem:[#allocation15 + $0xb90] sm:$0xff] }
 0x77b   :  { %9978 = vmatprep.mubr.bf16.mxu1 %v17940_v15  ;;  %9784 = vmatprep.subr.bf16.mxu0 %v15591_v9  ;;  %v15606_v15 = vcombine.low %v6540_v23, %v6544_v26  ;;  %v6585_v9 = vld [vmem:[#allocation15 + $0xa38] sm:$0xff] }
 0x77c   :  { %9948 = vmatprep.subr.bf16.mxu1 %v15593_v11  ;;  %v15647_v11 = vcombine.high %v6580_v4, %v6584_v5  ;;  %v15649_v12 = vcombine.high %v6581_v8, %v6585_v9  ;;  %v15648_v23 = vcombine.low %v6581_v8, %v6585_v9  ;;  %v6636_v9 = vld [vmem:[#allocation15 + $0xbd0] sm:$0xff] }
 0x77d   :  { %9785 = vmatpush1.bf16.msra.mxu0 %v15590_v16  ;;  %v6592_v16 = vld [vmem:[#allocation15 + $0xa70] sm:$0xff] }
 0x77e   :  { %9949 = vmatpush1.bf16.msra.mxu1 %v15592_v20  ;;  %9786 = vmatprep.subr.bf16.mxu0 %v15599_v21  ;;  %v6589_v20 = vld [vmem:[#allocation15 + $0xa58] sm:$0xff]  ;;  %v15655_v26 = vcombine.high %v6588_v50, %v6592_v16 }
 0x77f   :  { %9950 = vmatprep.subr.bf16.mxu1 %v15601_v22  ;;  %v6593_v21 = vld [vmem:[#allocation15 + $0xa78] sm:$0xff]  ;;  %v15646_v22 = vcombine.low %v6580_v4, %v6584_v5 }
 0x780   :  { %v15657_v29 = vcombine.high %v6589_v20, %v6593_v21  ;;  %v15656_v2 = vcombine.low %v6589_v20, %v6593_v21  ;;  %v6644_v21 = vld [vmem:[#allocation15 + $0xc10] sm:$0xff] }
 0x781   :  { %9787 = vmatpush1.bf16.msra.mxu0 %v15598_v31  ;;  %v6600_v31 = vld [vmem:[#allocation15 + $0xab0] sm:$0xff] }
 0x782   :  { %9951 = vmatpush1.bf16.msra.mxu1 %v15600_v34  ;;  %9788 = vmatprep.subr.bf16.mxu0 %v15607_v3  ;;  %v6597_v34 = vld [vmem:[#allocation15 + $0xa98] sm:$0xff]  ;;  %v15663_v36 = vcombine.high %v6596_v56, %v6600_v31 }
 0x783   :  { %9952 = vmatprep.subr.bf16.mxu1 %v15609_v33  ;;  %v6601_v3 = vld [vmem:[#allocation15 + $0xab8] sm:$0xff]  ;;  %v15654_v33 = vcombine.low %v6588_v50, %v6592_v16 }
 0x784   :  { %v15665_v38 = vcombine.high %v6597_v34, %v6601_v3  ;;  %v15664_v45 = vcombine.low %v6597_v34, %v6601_v3  ;;  %v6652_v3 = vld [vmem:[#allocation15 + $0xc50] sm:$0xff] }
 0x785   :  { %9789 = vmatpush1.bf16.msra.mxu0 %v15606_v15  ;;  %v6608_v15 = vld [vmem:[#allocation15 + $0xaf0] sm:$0xff] }
 0x786   :  { %9953 = vmatpush1.bf16.msra.mxu1 %v15608_v42  ;;  %9790 = vmatprep.subr.bf16.mxu0 %v15615_v43  ;;  %v6605_v42 = vld [vmem:[#allocation15 + $0xad8] sm:$0xff]  ;;  %v15671_v49 = vcombine.high %v6604_v37, %v6608_v15 }
 0x787   :  { %9954 = vmatprep.subr.bf16.mxu1 %v15617_v44  ;;  %v6609_v43 = vld [vmem:[#allocation15 + $0xaf8] sm:$0xff]  ;;  %v15662_v44 = vcombine.low %v6596_v56, %v6600_v31 }
 0x788   :  { %v15673_v24 = vcombine.high %v6605_v42, %v6609_v43  ;;  %v15672_v53 = vcombine.low %v6605_v42, %v6609_v43  ;;  %v6660_v42 = vld [vmem:[#allocation15 + $0xc90] sm:$0xff] }
 0x789   :  { %9791 = vmatpush1.bf16.msra.mxu0 %v15614_v47  ;;  %v6616_v47 = vld [vmem:[#allocation15 + $0xb30] sm:$0xff] }
 0x78a   :  { %9955 = vmatpush1.bf16.msra.mxu1 %v15616_v40  ;;  %9792 = vmatprep.subr.bf16.mxu0 %v15623_v48  ;;  %v6613_v40 = vld [vmem:[#allocation15 + $0xb18] sm:$0xff]  ;;  %v15679_v18 = vcombine.high %v6612_v13, %v6616_v47  ;;  %v6664_v43 = vld [vmem:[#allocation15 + $0xcb0] sm:$0xff] }
 0x78b   :  { %9956 = vmatprep.subr.bf16.mxu1 %v15625_v51  ;;  %v6617_v48 = vld [vmem:[#allocation15 + $0xb38] sm:$0xff]  ;;  %v15670_v51 = vcombine.low %v6604_v37, %v6608_v15 }
 0x78c   :  { %v15681_v55 = vcombine.high %v6613_v40, %v6617_v48  ;;  %v15680_v6 = vcombine.low %v6613_v40, %v6617_v48  ;;  %v6668_v48 = vld [vmem:[#allocation15 + $0xcd0] sm:$0xff] }
 0x78d   :  { %9793 = vmatpush1.bf16.msra.mxu0 %v15622_v7  ;;  %v6624_v7 = vld [vmem:[#allocation15 + $0xb70] sm:$0xff] }
 0x78e   :  { %9957 = vmatpush1.bf16.msra.mxu1 %v15624_v59  ;;  %9794 = vmatprep.subr.bf16.mxu0 %v15631_v60  ;;  %v6621_v59 = vld [vmem:[#allocation15 + $0xb58] sm:$0xff]  ;;  %v15687_v57 = vcombine.high %v6620_v58, %v6624_v7 }
 0x78f   :  { %9958 = vmatprep.subr.bf16.mxu1 %v15633_v25  ;;  %v6625_v60 = vld [vmem:[#allocation15 + $0xb78] sm:$0xff]  ;;  %v15678_v25 = vcombine.low %v6612_v13, %v6616_v47  ;;  %v15727_v47 = vcombine.high %v6660_v42, %v6664_v43 }
 0x790   :  { %v15689_v61 = vcombine.high %v6621_v59, %v6625_v60  ;;  %v15688_v4 = vcombine.low %v6621_v59, %v6625_v60  ;;  %v6676_v59 = vld [vmem:[#allocation15 + $0xd10] sm:$0xff] }
 0x791   :  { %9795 = vmatpush1.bf16.msra.mxu0 %v15630_v63  ;;  %v6632_v63 = vld [vmem:[#allocation15 + $0xbb0] sm:$0xff] }
 0x792   :  { %9959 = vmatpush1.bf16.msra.mxu1 %v15632_v1  ;;  %9796 = vmatprep.subr.bf16.mxu0 %v15639_v32  ;;  %v6629_v1 = vld [vmem:[#allocation15 + $0xb98] sm:$0xff]  ;;  %v15695_v5 = vcombine.high %v6628_v62, %v6632_v63  ;;  %v6680_v60 = vld [vmem:[#allocation15 + $0xd30] sm:$0xff] }
 0x793   :  { %9960 = vmatprep.subr.bf16.mxu1 %v15641_v14  ;;  %v6633_v32 = vld [vmem:[#allocation15 + $0xbb8] sm:$0xff]  ;;  %v15686_v14 = vcombine.low %v6620_v58, %v6624_v7 }
 0x794   :  { %v15697_v8 = vcombine.high %v6629_v1, %v6633_v32  ;;  %v15696_v50 = vcombine.low %v6629_v1, %v6633_v32  ;;  %v6688_v1 = vld [vmem:[#allocation15 + $0xd70] sm:$0xff]  ;;  %v6685_v32 = vld [vmem:[#allocation15 + $0xd58] sm:$0xff] }
 0x795   :  { %9797 = vmatpush1.bf16.msra.mxu0 %v15638_v10  ;;  %v6640_v10 = vld [vmem:[#allocation15 + $0xbf0] sm:$0xff] }
 0x796   :  { %9961 = vmatpush1.bf16.msra.mxu1 %v15640_v0  ;;  %9798 = vmatprep.subr.bf16.mxu0 %v15647_v11  ;;  %v6637_v0 = vld [vmem:[#allocation15 + $0xbd8] sm:$0xff]  ;;  %v15703_v16 = vcombine.high %v6636_v9, %v6640_v10 }
 0x797   :  { %9962 = vmatprep.subr.bf16.mxu1 %v15649_v12  ;;  %v6641_v11 = vld [vmem:[#allocation15 + $0xbf8] sm:$0xff]  ;;  %v15694_v12 = vcombine.low %v6628_v62, %v6632_v63  ;;  %v6684_v63 = vld [vmem:[#allocation15 + $0xd50] sm:$0xff] }
 0x798   :  { %v15705_v20 = vcombine.high %v6637_v0, %v6641_v11  ;;  %v15704_v56 = vcombine.low %v6637_v0, %v6641_v11  ;;  %v6696_v0 = vld [vmem:[#allocation15 + $0xdb0] sm:$0xff]  ;;  %v6693_v11 = vld [vmem:[#allocation15 + $0xd98] sm:$0xff] }
 0x799   :  { %9799 = vmatpush1.bf16.msra.mxu0 %v15646_v22  ;;  %v6648_v22 = vld [vmem:[#allocation15 + $0xc30] sm:$0xff] }
 0x79a   :  { %9963 = vmatpush1.bf16.msra.mxu1 %v15648_v23  ;;  %9800 = vmatprep.subr.bf16.mxu0 %v15655_v26  ;;  %v6645_v23 = vld [vmem:[#allocation15 + $0xc18] sm:$0xff]  ;;  %v15711_v31 = vcombine.high %v6644_v21, %v6648_v22 }
 0x79b   :  { %9964 = vmatprep.subr.bf16.mxu1 %v15657_v29  ;;  %v6649_v26 = vld [vmem:[#allocation15 + $0xc38] sm:$0xff]  ;;  %v15702_v29 = vcombine.low %v6636_v9, %v6640_v10  ;;  %v6692_v10 = vld [vmem:[#allocation15 + $0xd90] sm:$0xff] }
 0x79c   :  { %v15713_v34 = vcombine.high %v6645_v23, %v6649_v26  ;;  %v15712_v37 = vcombine.low %v6645_v23, %v6649_v26  ;;  %v6700_v26 = vld [vmem:[#allocation15 + $0xdd0] sm:$0xff] }
 0x79d   :  { %9801 = vmatpush1.bf16.msra.mxu0 %v15654_v33  ;;  %v6656_v33 = vld [vmem:[#allocation15 + $0xc70] sm:$0xff] }
 0x79e   :  { %9965 = vmatpush1.bf16.msra.mxu1 %v15656_v2  ;;  %9802 = vmatprep.subr.bf16.mxu0 %v15663_v36  ;;  %v15710_v2 = vcombine.low %v6644_v21, %v6648_v22  ;;  %v6653_v36 = vld [vmem:[#allocation15 + $0xc58] sm:$0xff]  ;;  %v15719_v15 = vcombine.high %v6652_v3, %v6656_v33 }
 0x79f   :  { %9966 = vmatprep.subr.bf16.mxu1 %v15665_v38  ;;  %v6657_v38 = vld [vmem:[#allocation15 + $0xc78] sm:$0xff] }
 0x7a0   :  { %v15720_v13 = vcombine.low %v6653_v36, %v6657_v38 }
 0x7a1   :  { %9803 = vmatpush1.bf16.msra.mxu0 %v15662_v44  ;;  %v15721_v44 = vcombine.high %v6653_v36, %v6657_v38  ;;  %v15758_v36 = vcombine.low %v6692_v10, %v6696_v0 }
 0x7a2   :  { %9967 = vmatpush1.bf16.msra.mxu1 %v15664_v45  ;;  %9804 = vmatprep.subr.bf16.mxu0 %v15671_v49  ;;  %v6661_v45 = vld [vmem:[#allocation15 + $0xc98] sm:$0xff] }
 0x7a3   :  { %9968 = vmatprep.subr.bf16.mxu1 %v15673_v24  ;;  %v6665_v49 = vld [vmem:[#allocation15 + $0xcb8] sm:$0xff]  ;;  %v15718_v24 = vcombine.low %v6652_v3, %v6656_v33 }
 0x7a4   :  { %v15729_v40 = vcombine.high %v6661_v45, %v6665_v49  ;;  %v6705_v3 = vld [vmem:[#allocation15 + $0xdf8] sm:$0xff] }
 0x7a5   :  { %9805 = vmatpush1.bf16.msra.mxu0 %v15670_v51  ;;  %v6672_v51 = vld [vmem:[#allocation15 + $0xcf0] sm:$0xff] }
 0x7a6   :  { %9969 = vmatpush1.bf16.msra.mxu1 %v15672_v53  ;;  %9806 = vmatprep.subr.bf16.mxu0 %v15679_v18  ;;  %v6669_v53 = vld [vmem:[#allocation15 + $0xcd8] sm:$0xff]  ;;  %v15735_v58 = vcombine.high %v6668_v48, %v6672_v51 }
 0x7a7   :  { %9970 = vmatprep.subr.bf16.mxu1 %v15681_v55  ;;  %v6673_v18 = vld [vmem:[#allocation15 + $0xcf8] sm:$0xff]  ;;  %v15726_v55 = vcombine.low %v6660_v42, %v6664_v43 }
 0x7a8   :  { %v15737_v7 = vcombine.high %v6669_v53, %v6673_v18 }
 0x7a9   :  { %9807 = vmatpush1.bf16.msra.mxu0 %v15678_v25  ;;  %v6677_v25 = vld [vmem:[#allocation15 + $0xd18] sm:$0xff] }
 0x7aa   :  { %9971 = vmatpush1.bf16.msra.mxu1 %v15680_v6  ;;  %9808 = vmatprep.subr.bf16.mxu0 %v15687_v57  ;;  %v6681_v6 = vld [vmem:[#allocation15 + $0xd38] sm:$0xff]  ;;  %v15736_v57 = vcombine.low %v6669_v53, %v6673_v18  ;;  %v6720_v53 = vld [vmem:[#allocation15 + $0xe70] sm:$0xff] }
 0x7ab   :  { %9972 = vmatprep.subr.bf16.mxu1 %v15689_v61  ;;  %v15743_v61 = vcombine.high %v6676_v59, %v6680_v60  ;;  %v15745_v62 = vcombine.high %v6677_v25, %v6681_v6  ;;  %v6717_v18 = vld [vmem:[#allocation15 + $0xe58] sm:$0xff] }
 0x7ad   :  { %9809 = vmatpush1.bf16.msra.mxu0 %v15686_v14  ;;  %v6689_v14 = vld [vmem:[#allocation15 + $0xd78] sm:$0xff] }
 0x7ae   :  { %9973 = vmatpush1.bf16.msra.mxu1 %v15688_v4  ;;  %9810 = vmatprep.subr.bf16.mxu0 %v15695_v5  ;;  %v15742_v4 = vcombine.low %v6676_v59, %v6680_v60  ;;  %v15744_v5 = vcombine.low %v6677_v25, %v6681_v6  ;;  %v15753_v9 = vcombine.high %v6685_v32, %v6689_v14  ;;  %v6724_v60 = vld [vmem:[#allocation15 + $0xe90] sm:$0xff]  ;;  %v6725_v6 = vld [vmem:[#allocation15 + $0xe98] sm:$0xff] }
 0x7af   :  { %9974 = vmatprep.subr.bf16.mxu1 %v15697_v8  ;;  %v15751_v8 = vcombine.high %v6684_v63, %v6688_v1  ;;  %v6728_v25 = vld [vmem:[#allocation15 + $0xeb0] sm:$0xff] }
 0x7b1   :  { %9811 = vmatpush1.bf16.msra.mxu0 %v15694_v12  ;;  %v6697_v12 = vld [vmem:[#allocation15 + $0xdb8] sm:$0xff] }
 0x7b2   :  { %9975 = vmatpush1.bf16.msra.mxu1 %v15696_v50  ;;  %9812 = vmatprep.subr.bf16.mxu0 %v15703_v16  ;;  %v15750_v50 = vcombine.low %v6684_v63, %v6688_v1  ;;  %v15752_v16 = vcombine.low %v6685_v32, %v6689_v14  ;;  %v15761_v23 = vcombine.high %v6693_v11, %v6697_v12  ;;  %v6732_v1 = vld [vmem:[#allocation15 + $0xed0] sm:$0xff]  ;;  %v6733_v14 = vld [vmem:[#allocation15 + $0xed8] sm:$0xff] }
 0x7b3   :  { %9976 = vmatprep.subr.bf16.mxu1 %v15705_v20  ;;  %v15759_v20 = vcombine.high %v6692_v10, %v6696_v0  ;;  %v6736_v32 = vld [vmem:[#allocation15 + $0xef0] sm:$0xff] }
 0x7b4   :  { %v6740_v0 = vld [vmem:[#allocation15 + $0xf10] sm:$0xff] }
 0x7b5   :  { %9813 = vmatpush1.bf16.msra.mxu0 %v15702_v29  ;;  %v6704_v29 = vld [vmem:[#allocation15 + $0xdf0] sm:$0xff] }
 0x7b6   :  { %9977 = vmatpush1.bf16.msra.mxu1 %v15704_v56  ;;  %9823 = vmatprep.subr.bf16.mxu0 %v15711_v31  ;;  %v15767_v42 = vcombine.high %v6700_v26, %v6704_v29 }
 0x7b7   :  { %9987 = vmatprep.subr.bf16.mxu1 %v15713_v34  ;;  %v6701_v34 = vld [vmem:[#allocation15 + $0xdd8] sm:$0xff] }
 0x7b8   :  { %9815 = vmatmul.mubr.bf16.vlgmr.msra.gmra.mrb[24].mxu0 %v17942_v17  ;;  %v15769_v43 = vcombine.high %v6701_v34, %v6705_v3 }
 0x7b9   :  { %9979 = vmatmul.mubr.bf16.vlgmr.msra.gmra.mrb[24].mxu1 %v17942_v17  ;;  %9824 = vmatpush1.bf16.msra.mxu0 %v15710_v2  ;;  %v15728_v17 = vcombine.low %v6661_v45, %v6665_v49  ;;  %v6712_v45 = vld [vmem:[#allocation15 + $0xe30] sm:$0xff]  ;;  %v6709_v49 = vld [vmem:[#allocation15 + $0xe18] sm:$0xff] }
 0x7ba   :  { %9855 = vmatprep.mubr.bf16.mxu0 %v17946_v27  ;;  %9988 = vmatpush1.bf16.msra.mxu1 %v15712_v37 }
 0x7bb   :  { %10019 = vmatprep.mubr.bf16.mxu1 %v17946_v27  ;;  %9825 = vmatprep.subr.bf16.mxu0 %v15719_v15  ;;  %v15734_v27 = vcombine.low %v6668_v48, %v6672_v51  ;;  %v15760_v15 = vcombine.low %v6693_v11, %v6697_v12  ;;  %v6716_v51 = vld [vmem:[#allocation15 + $0xe50] sm:$0xff]  ;;  %v6741_v12 = vld [vmem:[#allocation15 + $0xf18] sm:$0xff] }
 0x7bc   :  { %9989 = vmatprep.subr.bf16.mxu1 %v15721_v44  ;;  %v6708_v44 = vld [vmem:[#allocation15 + $0xe10] sm:$0xff] }
 0x7bd   :  { %9826 = vmatpush1.bf16.msra.mxu0 %v15718_v24  ;;  %v6713_v24 = vld [vmem:[#allocation15 + $0xe38] sm:$0xff]  ;;  %v6744_v11 = vld [vmem:[#allocation15 + $0xf30] sm:$0xff] }
 0x7be   :  { %9990 = vmatpush1.bf16.msra.mxu1 %v15720_v13  ;;  %9827 = vmatprep.subr.bf16.mxu0 %v15727_v47  ;;  %v15766_v13 = vcombine.low %v6700_v26, %v6704_v29  ;;  %v15768_v47 = vcombine.low %v6701_v34, %v6705_v3  ;;  %v15777_v48 = vcombine.high %v6709_v49, %v6713_v24  ;;  %v6748_v29 = vld [vmem:[#allocation15 + $0xf50] sm:$0xff]  ;;  %v6749_v3 = vld [vmem:[#allocation15 + $0xf58] sm:$0xff] }
 0x7bf   :  { %9991 = vmatprep.subr.bf16.mxu1 %v15729_v40  ;;  %v15775_v40 = vcombine.high %v6708_v44, %v6712_v45  ;;  %v6752_v34 = vld [vmem:[#allocation15 + $0xf70] sm:$0xff] }
 0x7c1   :  { %9828 = vmatpush1.bf16.msra.mxu0 %v15726_v55  ;;  %v6721_v55 = vld [vmem:[#allocation15 + $0xe78] sm:$0xff] }
 0x7c2   :  { %9992 = vmatpush1.bf16.msra.mxu1 %v15728_v17  ;;  %9829 = vmatprep.subr.bf16.mxu0 %v15735_v58  ;;  %v15774_v17 = vcombine.low %v6708_v44, %v6712_v45  ;;  %v15776_v58 = vcombine.low %v6709_v49, %v6713_v24  ;;  %v15785_v59 = vcombine.high %v6717_v18, %v6721_v55  ;;  %v6761_v44 = vld [vmem:[#allocation15 + $0xfb8] sm:$0xff]  ;;  %v17983_v45 = vld [vmem:[#allocation16] sm:$0xff] }
 0x7c3   :  { %9993 = vmatprep.subr.bf16.mxu1 %v15737_v7  ;;  %v15783_v7 = vcombine.high %v6716_v51, %v6720_v53  ;;  %v15814_v49 = vcombine.low %v6748_v29, %v6752_v34 }
 0x7c5   :  { %9830 = vmatpush1.bf16.msra.mxu0 %v15734_v27  ;;  %v6729_v27 = vld [vmem:[#allocation15 + $0xeb8] sm:$0xff] }
 0x7c6   :  { %9994 = vmatpush1.bf16.msra.mxu1 %v15736_v57  ;;  %9831 = vmatprep.subr.bf16.mxu0 %v15743_v61  ;;  %v15782_v57 = vcombine.low %v6716_v51, %v6720_v53  ;;  %v15784_v61 = vcombine.low %v6717_v18, %v6721_v55  ;;  %v15793_v63 = vcombine.high %v6725_v6, %v6729_v27  ;;  %v6765_v53 = vld [vmem:[#allocation15 + $0xfd8] sm:$0xff] }
 0x7c7   :  { %9995 = vmatprep.subr.bf16.mxu1 %v15745_v62  ;;  %v15791_v62 = vcombine.high %v6724_v60, %v6728_v25  ;;  %v6779_v51 = vrot.slane %v17983_v45, %v17797_v41  ;;  %v6769_v18 = vld [vmem:[#allocation15 + $0xff8] sm:$0xff] }
 0x7c9   :  { %9832 = vmatpush1.bf16.msra.mxu0 %v15742_v4  ;;  %v6737_v4 = vld [vmem:[#allocation15 + $0xef8] sm:$0xff] }
 0x7ca   :  { %9996 = vmatpush1.bf16.msra.mxu1 %v15744_v5  ;;  %9833 = vmatprep.subr.bf16.mxu0 %v15751_v8  ;;  %v15790_v5 = vcombine.low %v6724_v60, %v6728_v25  ;;  %v15792_v8 = vcombine.low %v6725_v6, %v6729_v27  ;;  %v15801_v10 = vcombine.high %v6733_v14, %v6737_v4  ;;  %v10048_v60 = vld [vmem:[#allocation18 + $0x20] sm:$0xff]  ;;  %v10045_v6 = vld [vmem:[#allocation18 + $0x8] sm:$0xff] }
 0x7cb   :  { %v17975_v21 = vpop.f32.mrb[20].mxu0  ;;  %v17977_v22 = vpop.f32.mrb[20].mxu1  ;;  %9997 = vmatprep.subr.bf16.mxu1 %v15753_v9  ;;  %v15799_v9 = vcombine.high %v6732_v1, %v6736_v32  ;;  %v10049_v27 = vld [vmem:[#allocation18 + $0x28] sm:$0xff] }
 0x7cc   :  { %v17979_v56 = vpop.f32.mrb[21].mxu0  ;;  %v17981_v31 = vpop.f32.mrb[21].mxu1 }
 0x7cd   :  { %v9533_v33 = vpop.f32.mrb[22].mxu0  ;;  %v9697_v2 = vpop.f32.mrb[22].mxu1  ;;  %9834 = vmatpush1.bf16.msra.mxu0 %v15750_v50  ;;  %v6745_v50 = vld [vmem:[#allocation15 + $0xf38] sm:$0xff]  ;;  %v16516_v25 = vadd.f32 %v17979_v56, %v6779_v51  ;;  %v15836_v56 = vcombine.low %v10045_v6, %v10049_v27  ;;  %v10085_v51 = vld [vmem:[#allocation18 + $0x148] sm:$0xff] }
 0x7ce   :  { %9998 = vmatpush1.bf16.msra.mxu1 %v15752_v16  ;;  %v9534_v38 = vpop.f32.mrb[23].mxu0  ;;  %v9698_v37 = vpop.f32.mrb[23].mxu1  ;;  %9835 = vmatprep.subr.bf16.mxu0 %v15759_v20  ;;  %v15798_v16 = vcombine.low %v6732_v1, %v6736_v32  ;;  %v15800_v20 = vcombine.low %v6733_v14, %v6737_v4  ;;  %v15809_v26 = vcombine.high %v6741_v12, %v6745_v50  ;;  %v6753_v33 = vld [vmem:[#allocation15 + $0xf78] sm:$0xff]  ;;  %v10052_v32 = vld [vmem:[#allocation18 + $0x40] sm:$0xff] }
 0x7cf   :  { %9999 = vmatprep.subr.bf16.mxu1 %v15761_v23  ;;  %v15807_v23 = vcombine.high %v6740_v0, %v6744_v11  ;;  %v15806_v2 = vcombine.low %v6740_v0, %v6744_v11  ;;  %v15815_v38 = vcombine.high %v6748_v29, %v6752_v34  ;;  %v15817_v37 = vcombine.high %v6749_v3, %v6753_v33  ;;  %v10056_v14 = vld [vmem:[#allocation18 + $0x60] sm:$0xff] }
 0x7d0   :  { %v15816_v24 = vcombine.low %v6749_v3, %v6753_v33  ;;  %v10029_v1 = vmax.f32 %v16516_v25, 0.0  ;;  %v10064_v0 = vld [vmem:[#allocation18 + $0xa0] sm:$0xff]  ;;  %v10069_v33 = vld [vmem:[#allocation18 + $0xc8] sm:$0xff] }
 0x7d1   :  { %9836 = vmatpush1.bf16.msra.mxu0 %v15758_v36  ;;  %v15808_v36 = vcombine.low %v6741_v12, %v6745_v50  ;;  %v10061_v50 = vld [vmem:[#allocation18 + $0x88] sm:$0xff]  ;;  %v10068_v34 = vld [vmem:[#allocation18 + $0xc0] sm:$0xff] }
 0x7d2   :  { %10000 = vmatpush1.bf16.msra.mxu1 %v15760_v15  ;;  %9837 = vmatprep.subr.bf16.mxu0 %v15767_v42  ;;  %v6756_v15 = vld [vmem:[#allocation15 + $0xf90] sm:$0xff]  ;;  %v17988_v11 = vpack.c.bf16 %v10029_v1, %v10029_v1  ;;  %v10072_v3 = vld [vmem:[#allocation18 + $0xe0] sm:$0xff] }
 0x7d3   :  { %10001 = vmatprep.subr.bf16.mxu1 %v15769_v43  ;;  %v6760_v42 = vld [vmem:[#allocation15 + $0xfb0] sm:$0xff]  ;;  %v6757_v43 = vld [vmem:[#allocation15 + $0xf98] sm:$0xff] }
 0x7d4   :  { %v15822_v55 = vcombine.low %v6756_v15, %v6760_v42  ;;  %v10097_v25 = vld [vmem:[#allocation18 + $0x1a8] sm:$0xff] }
 0x7d5   :  { %9838 = vmatpush1.bf16.msra.mxu0 %v15766_v13  ;;  %v15823_v13 = vcombine.high %v6756_v15, %v6760_v42  ;;  %v10076_v15 = vld [vmem:[#allocation18 + $0x100] sm:$0xff]  ;;  %v10101_v1 = vld [vmem:[#allocation18 + $0x1c8] sm:$0xff] }
 0x7d6   :  { %10002 = vmatpush1.bf16.msra.mxu1 %v15768_v47  ;;  %9839 = vmatprep.subr.bf16.mxu0 %v15775_v40  ;;  %v15825_v47 = vcombine.high %v6757_v43, %v6761_v44  ;;  %v6764_v40 = vld [vmem:[#allocation15 + $0xfd0] sm:$0xff]  ;;  %v10080_v42 = vld [vmem:[#allocation18 + $0x120] sm:$0xff] }
 0x7d7   :  { %10003 = vmatprep.subr.bf16.mxu1 %v15777_v48  ;;  %v6768_v48 = vld [vmem:[#allocation15 + $0xff0] sm:$0xff] }
 0x7d9   :  { %9840 = vmatpush1.bf16.msra.mxu0 %v15774_v17  ;;  %v15824_v17 = vcombine.low %v6757_v43, %v6761_v44  ;;  %v10077_v43 = vld [vmem:[#allocation18 + $0x108] sm:$0xff] }
 0x7da   :  { %10004 = vmatpush1.bf16.msra.mxu1 %v15776_v58  ;;  %9841 = vmatprep.subr.bf16.mxu0 %v15783_v7  ;;  %v15831_v58 = vcombine.high %v6764_v40, %v6768_v48  ;;  %v15833_v7 = vcombine.high %v6765_v53, %v6769_v18  ;;  %v10081_v44 = vld [vmem:[#allocation18 + $0x128] sm:$0xff] }
 0x7db   :  { %10005 = vmatprep.subr.bf16.mxu1 %v15785_v59  ;;  %v10044_v59 = vld [vmem:[#allocation18] sm:$0xff] }
 0x7dc   :  { %v15834_v4 = vcombine.low %v10044_v59, %v10048_v60 }
 0x7dd   :  { %9842 = vmatpush1.bf16.msra.mxu0 %v15782_v57  ;;  %v15830_v57 = vcombine.low %v6764_v40, %v6768_v48  ;;  %v10084_v40 = vld [vmem:[#allocation18 + $0x140] sm:$0xff] }
 0x7de   :  { %10006 = vmatpush1.bf16.msra.mxu1 %v15784_v61  ;;  %9843 = vmatprep.subr.bf16.mxu0 %v15791_v62  ;;  %v15832_v61 = vcombine.low %v6765_v53, %v6769_v18  ;;  %v15835_v62 = vcombine.high %v10044_v59, %v10048_v60  ;;  %v10088_v48 = vld [vmem:[#allocation18 + $0x160] sm:$0xff]  ;;  %v10089_v53 = vld [vmem:[#allocation18 + $0x168] sm:$0xff]  ;;  %v15866_v18 = vcombine.low %v10076_v15, %v10080_v42 }
 0x7df   :  { %10007 = vmatprep.subr.bf16.mxu1 %v15793_v63  ;;  %v15837_v63 = vcombine.high %v10045_v6, %v10049_v27  ;;  %v10096_v59 = vld [vmem:[#allocation18 + $0x1a0] sm:$0xff]  ;;  %v10093_v60 = vld [vmem:[#allocation18 + $0x188] sm:$0xff]  ;;  %v15874_v6 = vcombine.low %v10084_v40, %v10088_v48  ;;  %v15876_v27 = vcombine.low %v10085_v51, %v10089_v53 }
 0x7e1   :  { %9844 = vmatpush1.bf16.msra.mxu0 %v15790_v5  ;;  %v10053_v5 = vld [vmem:[#allocation18 + $0x48] sm:$0xff] }
 0x7e2   :  { %10008 = vmatpush1.bf16.msra.mxu1 %v15792_v8  ;;  %9845 = vmatprep.subr.bf16.mxu0 %v15799_v9  ;;  %v10057_v8 = vld [vmem:[#allocation18 + $0x68] sm:$0xff]  ;;  %v15843_v9 = vcombine.high %v10052_v32, %v10056_v14 }
 0x7e3   :  { %10009 = vmatprep.subr.bf16.mxu1 %v15801_v10  ;;  %v10060_v10 = vld [vmem:[#allocation18 + $0x80] sm:$0xff]  ;;  %v15845_v12 = vcombine.high %v10053_v5, %v10057_v8 }
 0x7e5   :  { %9846 = vmatpush1.bf16.msra.mxu0 %v15798_v16  ;;  %v10065_v16 = vld [vmem:[#allocation18 + $0xa8] sm:$0xff] }
 0x7e6   :  { %10010 = vmatpush1.bf16.msra.mxu1 %v15800_v20  ;;  %9847 = vmatprep.subr.bf16.mxu0 %v15807_v23  ;;  %v15842_v20 = vcombine.low %v10052_v32, %v10056_v14  ;;  %v15844_v23 = vcombine.low %v10053_v5, %v10057_v8  ;;  %v15853_v29 = vcombine.high %v10061_v50, %v10065_v16  ;;  %v10105_v32 = vld [vmem:[#allocation18 + $0x1e8] sm:$0xff] }
 0x7e7   :  { %10011 = vmatprep.subr.bf16.mxu1 %v15809_v26  ;;  %v15851_v26 = vcombine.high %v10060_v10, %v10064_v0  ;;  %v15893_v8 = vcombine.high %v10101_v1, %v10105_v32 }
 0x7e9   :  { %9848 = vmatpush1.bf16.msra.mxu0 %v15806_v2  ;;  %v10073_v2 = vld [vmem:[#allocation18 + $0xe8] sm:$0xff] }
 0x7ea   :  { %10012 = vmatpush1.bf16.msra.mxu1 %v15808_v36  ;;  %9849 = vmatprep.subr.bf16.mxu0 %v15815_v38  ;;  %v15850_v36 = vcombine.low %v10060_v10, %v10064_v0  ;;  %v15859_v38 = vcombine.high %v10068_v34, %v10072_v3  ;;  %v10109_v10 = vld [vmem:[#allocation18 + $0x208] sm:$0xff] }
 0x7eb   :  { %10013 = vmatprep.subr.bf16.mxu1 %v15817_v37  ;;  %v15861_v37 = vcombine.high %v10069_v33, %v10073_v2  ;;  %v10113_v0 = vld [vmem:[#allocation18 + $0x228] sm:$0xff] }
 0x7ed   :  { %9850 = vmatpush1.bf16.msra.mxu0 %v15814_v49  ;;  %v15858_v49 = vcombine.low %v10068_v34, %v10072_v3  ;;  %v10121_v34 = vld [vmem:[#allocation18 + $0x268] sm:$0xff] }
 0x7ee   :  { %10014 = vmatpush1.bf16.msra.mxu1 %v15816_v24  ;;  %9851 = vmatprep.subr.bf16.mxu0 %v15823_v13  ;;  %v15860_v24 = vcombine.low %v10069_v33, %v10073_v2  ;;  %v15867_v13 = vcombine.high %v10076_v15, %v10080_v42  ;;  %v15900_v33 = vcombine.low %v10109_v10, %v10113_v0  ;;  %v10129_v15 = vld [vmem:[#allocation18 + $0x2a8] sm:$0xff] }
 0x7ef   :  { %10015 = vmatprep.subr.bf16.mxu1 %v15825_v47  ;;  %v15869_v47 = vcombine.high %v10077_v43, %v10081_v44 }
 0x7f1   :  { %9852 = vmatpush1.bf16.msra.mxu0 %v15822_v55  ;;  %v15868_v55 = vcombine.low %v10077_v43, %v10081_v44 }
 0x7f2   :  { %10016 = vmatpush1.bf16.msra.mxu1 %v15824_v17  ;;  %9853 = vmatprep.subr.bf16.mxu0 %v15831_v58  ;;  %v15875_v17 = vcombine.high %v10084_v40, %v10088_v48  ;;  %v15877_v58 = vcombine.high %v10085_v51, %v10089_v53  ;;  %v10137_v40 = vld [vmem:[#allocation18 + $0x2e8] sm:$0xff] }
 0x7f3   :  { %10017 = vmatprep.subr.bf16.mxu1 %v15833_v7  ;;  %v10092_v7 = vld [vmem:[#allocation18 + $0x180] sm:$0xff] }
 0x7f4   :  { %v15882_v14 = vcombine.low %v10092_v7, %v10096_v59 }
 0x7f5   :  { %9854 = vmatpush1.bf16.msra.mxu0 %v15830_v57  ;;  %v15883_v57 = vcombine.high %v10092_v7, %v10096_v59  ;;  %v10145_v7 = vld [vmem:[#allocation18 + $0x328] sm:$0xff] }
 0x7f6   :  { %10018 = vmatpush1.bf16.msra.mxu1 %v15832_v61  ;;  %13158 = vmatprep.subr.bf16.mxu0 %v15835_v62  ;;  %v15885_v61 = vcombine.high %v10093_v60, %v10097_v25  ;;  %v10100_v62 = vld [vmem:[#allocation18 + $0x1c0] sm:$0xff] }
 0x7f7   :  { %13322 = vmatprep.subr.bf16.mxu1 %v15837_v63  ;;  %v10104_v63 = vld [vmem:[#allocation18 + $0x1e0] sm:$0xff] }
 0x7f8   :  { %9856 = vmatmul.mubr.bf16.vlgmr.msra.gmra.mrb[24].mxu0 %v17957_v46  ;;  %v15891_v5 = vcombine.high %v10100_v62, %v10104_v63 }
 0x7f9   :  { %10020 = vmatmul.mubr.bf16.vlgmr.msra.gmra.mrb[24].mxu1 %v17957_v46  ;;  %13159 = vmatpush1.bf16.msra.mxu0 %v15834_v4  ;;  %v15852_v46 = vcombine.low %v10061_v50, %v10065_v16  ;;  %v15884_v4 = vcombine.low %v10093_v60, %v10097_v25  ;;  %v15892_v50 = vcombine.low %v10101_v1, %v10105_v32 }
 0x7fa   :  { %13190 = vmatprep.mubr.bf16.mxu0 %v17988_v11  ;;  %13323 = vmatpush1.bf16.msra.mxu1 %v15836_v56  ;;  %v10108_v56 = vld [vmem:[#allocation18 + $0x200] sm:$0xff] }
 0x7fb   :  { %13354 = vmatprep.mubr.bf16.mxu1 %v17988_v11  ;;  %13160 = vmatprep.subr.bf16.mxu0 %v15843_v9  ;;  %v10112_v9 = vld [vmem:[#allocation18 + $0x220] sm:$0xff] }
 0x7fc   :  { %13324 = vmatprep.subr.bf16.mxu1 %v15845_v12  ;;  %v15890_v12 = vcombine.low %v10100_v62, %v10104_v63  ;;  %v15899_v16 = vcombine.high %v10108_v56, %v10112_v9  ;;  %v15898_v3 = vcombine.low %v10108_v56, %v10112_v9  ;;  %v10153_v62 = vld [vmem:[#allocation18 + $0x368] sm:$0xff] }
 0x7fd   :  { %13161 = vmatpush1.bf16.msra.mxu0 %v15842_v20  ;;  %v15901_v20 = vcombine.high %v10109_v10, %v10113_v0  ;;  %v10161_v56 = vld [vmem:[#allocation18 + $0x3a8] sm:$0xff]  ;;  %v6775_v10 = vrot.slane %v17983_v45, %v17792_v39 }
 0x7fe   :  { %13325 = vmatpush1.bf16.msra.mxu1 %v15844_v23  ;;  %13162 = vmatprep.subr.bf16.mxu0 %v15851_v26  ;;  %v10116_v23 = vld [vmem:[#allocation18 + $0x240] sm:$0xff] }
 0x7ff   :  { %13326 = vmatprep.subr.bf16.mxu1 %v15853_v29  ;;  %v10120_v26 = vld [vmem:[#allocation18 + $0x260] sm:$0xff]  ;;  %v10117_v29 = vld [vmem:[#allocation18 + $0x248] sm:$0xff] }
 0x800   :  { %v15907_v2 = vcombine.high %v10116_v23, %v10120_v26  ;;  %v15906_v42 = vcombine.low %v10116_v23, %v10120_v26  ;;  %v15908_v43 = vcombine.low %v10117_v29, %v10121_v34  ;;  %v6787_v23 = vrot.slane %v17983_v45, %v17804_v52  ;;  %v10165_v26 = vld [vmem:[#allocation18 + $0x3c8] sm:$0xff] }
 0x801   :  { %13163 = vmatpush1.bf16.msra.mxu0 %v15850_v36  ;;  %v15909_v36 = vcombine.high %v10117_v29, %v10121_v34  ;;  %v10169_v29 = vld [vmem:[#allocation18 + $0x3e8] sm:$0xff] }
 0x802   :  { %13327 = vmatpush1.bf16.msra.mxu1 %v15852_v46  ;;  %13164 = vmatprep.subr.bf16.mxu0 %v15859_v38  ;;  %v10124_v46 = vld [vmem:[#allocation18 + $0x280] sm:$0xff] }
 0x803   :  { %13328 = vmatprep.subr.bf16.mxu1 %v15861_v37  ;;  %v10128_v38 = vld [vmem:[#allocation18 + $0x2a0] sm:$0xff]  ;;  %v10125_v37 = vld [vmem:[#allocation18 + $0x288] sm:$0xff] }
 0x804   :  { %v15915_v44 = vcombine.high %v10124_v46, %v10128_v38  ;;  %v15914_v48 = vcombine.low %v10124_v46, %v10128_v38  ;;  %v15916_v51 = vcombine.low %v10125_v37, %v10129_v15  ;;  %v10172_v46 = vld [vmem:[#allocation18 + $0x400] sm:$0xff] }
 0x805   :  { %13165 = vmatpush1.bf16.msra.mxu0 %v15858_v49  ;;  %v15917_v49 = vcombine.high %v10125_v37, %v10129_v15  ;;  %v10176_v38 = vld [vmem:[#allocation18 + $0x420] sm:$0xff]  ;;  %v16518_v37 = vadd.f32 %v17981_v31, %v6787_v23  ;;  %v10173_v15 = vld [vmem:[#allocation18 + $0x408] sm:$0xff] }
 0x806   :  { %13329 = vmatpush1.bf16.msra.mxu1 %v15860_v24  ;;  %13166 = vmatprep.subr.bf16.mxu0 %v15867_v13  ;;  %v10132_v24 = vld [vmem:[#allocation18 + $0x2c0] sm:$0xff] }
 0x807   :  { %13330 = vmatprep.subr.bf16.mxu1 %v15869_v47  ;;  %v10136_v13 = vld [vmem:[#allocation18 + $0x2e0] sm:$0xff]  ;;  %v10133_v47 = vld [vmem:[#allocation18 + $0x2c8] sm:$0xff] }
 0x808   :  { %v15923_v53 = vcombine.high %v10132_v24, %v10136_v13  ;;  %v15922_v59 = vcombine.low %v10132_v24, %v10136_v13  ;;  %v15924_v60 = vcombine.low %v10133_v47, %v10137_v40  ;;  %v15963_v24 = vcombine.high %v10172_v46, %v10176_v38  ;;  %v10212_v23 = vld [vmem:[#allocation18 + $0x540] sm:$0xff] }
 0x809   :  { %13167 = vmatpush1.bf16.msra.mxu0 %v15866_v18  ;;  %v15925_v18 = vcombine.high %v10133_v47, %v10137_v40  ;;  %v10031_v13 = vmax.f32 %v16518_v37, 0.0  ;;  %v10180_v47 = vld [vmem:[#allocation18 + $0x440] sm:$0xff]  ;;  %v10221_v37 = vld [vmem:[#allocation18 + $0x588] sm:$0xff] }
 0x80a   :  { %13331 = vmatpush1.bf16.msra.mxu1 %v15868_v55  ;;  %13168 = vmatprep.subr.bf16.mxu0 %v15875_v17  ;;  %v10140_v55 = vld [vmem:[#allocation18 + $0x300] sm:$0xff] }
 0x80b   :  { %13332 = vmatprep.subr.bf16.mxu1 %v15877_v58  ;;  %v10144_v17 = vld [vmem:[#allocation18 + $0x320] sm:$0xff]  ;;  %v10141_v58 = vld [vmem:[#allocation18 + $0x308] sm:$0xff] }
 0x80c   :  { %v15931_v25 = vcombine.high %v10140_v55, %v10144_v17  ;;  %v15930_v63 = vcombine.low %v10140_v55, %v10144_v17  ;;  %v15932_v1 = vcombine.low %v10141_v58, %v10145_v7  ;;  %v10184_v40 = vld [vmem:[#allocation18 + $0x460] sm:$0xff] }
 0x80d   :  { %13169 = vmatpush1.bf16.msra.mxu0 %v15874_v6  ;;  %v15933_v6 = vcombine.high %v10141_v58, %v10145_v7  ;;  %v15971_v55 = vcombine.high %v10180_v47, %v10184_v40  ;;  %v10188_v17 = vld [vmem:[#allocation18 + $0x480] sm:$0xff]  ;;  %v18002_v7 = vpack.c.bf16 %v10031_v13, %v10031_v13  ;;  %v10229_v13 = vld [vmem:[#allocation18 + $0x5c8] sm:$0xff] }
 0x80e   :  { %13333 = vmatpush1.bf16.msra.mxu1 %v15876_v27  ;;  %13170 = vmatprep.subr.bf16.mxu0 %v15883_v57  ;;  %v10148_v27 = vld [vmem:[#allocation18 + $0x340] sm:$0xff] }
 0x80f   :  { %13334 = vmatprep.subr.bf16.mxu1 %v15885_v61  ;;  %v10152_v57 = vld [vmem:[#allocation18 + $0x360] sm:$0xff]  ;;  %v10149_v61 = vld [vmem:[#allocation18 + $0x348] sm:$0xff] }
 0x810   :  { %v15939_v32 = vcombine.high %v10148_v27, %v10152_v57  ;;  %v15938_v9 = vcombine.low %v10148_v27, %v10152_v57  ;;  %v15940_v0 = vcombine.low %v10149_v61, %v10153_v62  ;;  %v10192_v58 = vld [vmem:[#allocation18 + $0x4a0] sm:$0xff] }
 0x811   :  { %13171 = vmatpush1.bf16.msra.mxu0 %v15882_v14  ;;  %v15941_v14 = vcombine.high %v10149_v61, %v10153_v62  ;;  %v15979_v57 = vcombine.high %v10188_v17, %v10192_v58  ;;  %v10196_v62 = vld [vmem:[#allocation18 + $0x4c0] sm:$0xff] }
 0x812   :  { %13335 = vmatpush1.bf16.msra.mxu1 %v15884_v4  ;;  %13172 = vmatprep.subr.bf16.mxu0 %v15891_v5  ;;  %v10156_v4 = vld [vmem:[#allocation18 + $0x380] sm:$0xff] }
 0x813   :  { %13336 = vmatprep.subr.bf16.mxu1 %v15893_v8  ;;  %v10160_v5 = vld [vmem:[#allocation18 + $0x3a0] sm:$0xff]  ;;  %v10157_v8 = vld [vmem:[#allocation18 + $0x388] sm:$0xff] }
 0x814   :  { %v15946_v34 = vcombine.low %v10156_v4, %v10160_v5 }
 0x815   :  { %13173 = vmatpush1.bf16.msra.mxu0 %v15890_v12  ;;  %v15947_v12 = vcombine.high %v10156_v4, %v10160_v5 }
 0x816   :  { %13337 = vmatpush1.bf16.msra.mxu1 %v15892_v50  ;;  %13174 = vmatprep.subr.bf16.mxu0 %v15899_v16  ;;  %v15949_v50 = vcombine.high %v10157_v8, %v10161_v56  ;;  %v10164_v16 = vld [vmem:[#allocation18 + $0x3c0] sm:$0xff] }
 0x817   :  { %13338 = vmatprep.subr.bf16.mxu1 %v15901_v20  ;;  %v10168_v20 = vld [vmem:[#allocation18 + $0x3e0] sm:$0xff] }
 0x819   :  { %13175 = vmatpush1.bf16.msra.mxu0 %v15898_v3  ;;  %v16515_v3 = vadd.f32 %v17975_v21, %v6775_v10  ;;  %v10205_v10 = vld [vmem:[#allocation18 + $0x508] sm:$0xff] }
 0x81a   :  { %13339 = vmatpush1.bf16.msra.mxu1 %v15900_v33  ;;  %13176 = vmatprep.subr.bf16.mxu0 %v15907_v2  ;;  %v15948_v33 = vcombine.low %v10157_v8, %v10161_v56  ;;  %v15955_v2 = vcombine.high %v10164_v16, %v10168_v20  ;;  %v10204_v56 = vld [vmem:[#allocation18 + $0x500] sm:$0xff] }
 0x81b   :  { %13340 = vmatprep.subr.bf16.mxu1 %v15909_v36  ;;  %v15957_v36 = vcombine.high %v10165_v26, %v10169_v29 }
 0x81d   :  { %13177 = vmatpush1.bf16.msra.mxu0 %v15906_v42  ;;  %v10177_v42 = vld [vmem:[#allocation18 + $0x428] sm:$0xff] }
 0x81e   :  { %13341 = vmatpush1.bf16.msra.mxu1 %v15908_v43  ;;  %13178 = vmatprep.subr.bf16.mxu0 %v15915_v44  ;;  %v15954_v43 = vcombine.low %v10164_v16, %v10168_v20  ;;  %v10028_v44 = vmax.f32 %v16515_v3, 0.0  ;;  %v15965_v21 = vcombine.high %v10173_v15, %v10177_v42  ;;  %v15964_v31 = vcombine.low %v10173_v15, %v10177_v42  ;;  %v10225_v15 = vld [vmem:[#allocation18 + $0x5a8] sm:$0xff] }
 0x81f   :  { %13342 = vmatprep.subr.bf16.mxu1 %v15917_v49  ;;  %v15956_v49 = vcombine.low %v10165_v26, %v10169_v29  ;;  %v10216_v26 = vld [vmem:[#allocation18 + $0x560] sm:$0xff]  ;;  %v10213_v29 = vld [vmem:[#allocation18 + $0x548] sm:$0xff] }
 0x820   :  { %v16002_v42 = vcombine.low %v10212_v23, %v10216_v26 }
 0x821   :  { %13179 = vmatpush1.bf16.msra.mxu0 %v15914_v48  ;;  %v15962_v48 = vcombine.low %v10172_v46, %v10176_v38  ;;  %v10220_v46 = vld [vmem:[#allocation18 + $0x580] sm:$0xff] }
 0x822   :  { %13343 = vmatpush1.bf16.msra.mxu1 %v15916_v51  ;;  %13180 = vmatprep.subr.bf16.mxu0 %v15923_v53  ;;  %v10181_v51 = vld [vmem:[#allocation18 + $0x448] sm:$0xff]  ;;  %v10224_v38 = vld [vmem:[#allocation18 + $0x5a0] sm:$0xff] }
 0x823   :  { %13344 = vmatprep.subr.bf16.mxu1 %v15925_v18  ;;  %v10185_v53 = vld [vmem:[#allocation18 + $0x468] sm:$0xff]  ;;  %v18000_v18 = vpack.c.bf16 %v10028_v44, %v10028_v44  ;;  %v16011_v44 = vcombine.high %v10220_v46, %v10224_v38 }
 0x824   :  { %v15972_v27 = vcombine.low %v10181_v51, %v10185_v53 }
 0x825   :  { %13181 = vmatpush1.bf16.msra.mxu0 %v15922_v59  ;;  %v15973_v59 = vcombine.high %v10181_v51, %v10185_v53 }
 0x826   :  { %13345 = vmatpush1.bf16.msra.mxu1 %v15924_v60  ;;  %13182 = vmatprep.subr.bf16.mxu0 %v15931_v25  ;;  %v10189_v60 = vld [vmem:[#allocation18 + $0x488] sm:$0xff] }
 0x827   :  { %13346 = vmatprep.subr.bf16.mxu1 %v15933_v6  ;;  %v10193_v25 = vld [vmem:[#allocation18 + $0x4a8] sm:$0xff]  ;;  %v15970_v6 = vcombine.low %v10180_v47, %v10184_v40  ;;  %v16010_v40 = vcombine.low %v10220_v46, %v10224_v38 }
 0x828   :  { %v15981_v61 = vcombine.high %v10189_v60, %v10193_v25  ;;  %v15980_v4 = vcombine.low %v10189_v60, %v10193_v25  ;;  %v10233_v47 = vld [vmem:[#allocation18 + $0x5e8] sm:$0xff] }
 0x829   :  { %13183 = vmatpush1.bf16.msra.mxu0 %v15930_v63  ;;  %v10200_v63 = vld [vmem:[#allocation18 + $0x4e0] sm:$0xff]  ;;  %v16021_v53 = vcombine.high %v10229_v13, %v10233_v47  ;;  %v16020_v60 = vcombine.low %v10229_v13, %v10233_v47  ;;  %v10273_v46 = vld [vmem:[#allocation18 + $0x728] sm:$0xff] }
 0x82a   :  { %13347 = vmatpush1.bf16.msra.mxu1 %v15932_v1  ;;  %13184 = vmatprep.subr.bf16.mxu0 %v15939_v32  ;;  %v10197_v1 = vld [vmem:[#allocation18 + $0x4c8] sm:$0xff]  ;;  %v15987_v5 = vcombine.high %v10196_v62, %v10200_v63 }
 0x82b   :  { %13348 = vmatprep.subr.bf16.mxu1 %v15941_v14  ;;  %v10201_v32 = vld [vmem:[#allocation18 + $0x4e8] sm:$0xff]  ;;  %v15978_v14 = vcombine.low %v10188_v17, %v10192_v58 }
 0x82c   :  { %v15989_v8 = vcombine.high %v10197_v1, %v10201_v32  ;;  %v10237_v17 = vld [vmem:[#allocation18 + $0x608] sm:$0xff] }
 0x82d   :  { %13185 = vmatpush1.bf16.msra.mxu0 %v15938_v9  ;;  %v10208_v9 = vld [vmem:[#allocation18 + $0x520] sm:$0xff]  ;;  %v10241_v58 = vld [vmem:[#allocation18 + $0x628] sm:$0xff] }
 0x82e   :  { %13349 = vmatpush1.bf16.msra.mxu1 %v15940_v0  ;;  %13186 = vmatprep.subr.bf16.mxu0 %v15947_v12  ;;  %v10209_v0 = vld [vmem:[#allocation18 + $0x528] sm:$0xff]  ;;  %v15986_v12 = vcombine.low %v10196_v62, %v10200_v63  ;;  %v15995_v16 = vcombine.high %v10204_v56, %v10208_v9  ;;  %v15994_v3 = vcombine.low %v10204_v56, %v10208_v9 }
 0x82f   :  { %13350 = vmatprep.subr.bf16.mxu1 %v15949_v50  ;;  %v15988_v50 = vcombine.low %v10197_v1, %v10201_v32  ;;  %v15997_v20 = vcombine.high %v10205_v10, %v10209_v0  ;;  %v10249_v62 = vld [vmem:[#allocation18 + $0x668] sm:$0xff]  ;;  %v16028_v1 = vcombine.low %v10237_v17, %v10241_v58 }
 0x830   :  { %v10257_v56 = vld [vmem:[#allocation18 + $0x6a8] sm:$0xff] }
 0x831   :  { %13187 = vmatpush1.bf16.msra.mxu0 %v15946_v34  ;;  %v10217_v34 = vld [vmem:[#allocation18 + $0x568] sm:$0xff] }
 0x832   :  { %13351 = vmatpush1.bf16.msra.mxu1 %v15948_v33  ;;  %13188 = vmatprep.subr.bf16.mxu0 %v15955_v2  ;;  %v15996_v33 = vcombine.low %v10205_v10, %v10209_v0  ;;  %v16003_v2 = vcombine.high %v10212_v23, %v10216_v26  ;;  %v10265_v23 = vld [vmem:[#allocation18 + $0x6e8] sm:$0xff] }
 0x833   :  { %13352 = vmatprep.subr.bf16.mxu1 %v15957_v36  ;;  %v16005_v36 = vcombine.high %v10213_v29, %v10217_v34 }
 0x835   :  { %13189 = vmatpush1.bf16.msra.mxu0 %v15954_v43  ;;  %v16004_v43 = vcombine.low %v10213_v29, %v10217_v34 }
 0x836   :  { %13353 = vmatpush1.bf16.msra.mxu1 %v15956_v49  ;;  %13199 = vmatprep.subr.bf16.mxu0 %v15963_v24  ;;  %v16013_v49 = vcombine.high %v10221_v37, %v10225_v15  ;;  %v10228_v24 = vld [vmem:[#allocation18 + $0x5c0] sm:$0xff] }
 0x837   :  { %13363 = vmatprep.subr.bf16.mxu1 %v15965_v21  ;;  %v10232_v21 = vld [vmem:[#allocation18 + $0x5e0] sm:$0xff] }
 0x838   :  { %13191 = vmatmul.mubr.bf16.vlgmr.msra.gmra.mrb[28].mxu0 %v18000_v18  ;;  %v16019_v51 = vcombine.high %v10228_v24, %v10232_v21 }
 0x839   :  { %13355 = vmatmul.mubr.bf16.vlgmr.msra.gmra.mrb[28].mxu1 %v18000_v18  ;;  %13200 = vmatpush1.bf16.msra.mxu0 %v15962_v48  ;;  %v16012_v48 = vcombine.low %v10221_v37, %v10225_v15 }
 0x83a   :  { %13231 = vmatprep.mubr.bf16.mxu0 %v18002_v7  ;;  %13364 = vmatpush1.bf16.msra.mxu1 %v15964_v31  ;;  %v10236_v31 = vld [vmem:[#allocation18 + $0x600] sm:$0xff] }
 0x83b   :  { %13395 = vmatprep.mubr.bf16.mxu1 %v18002_v7  ;;  %13201 = vmatprep.subr.bf16.mxu0 %v15971_v55  ;;  %v10240_v55 = vld [vmem:[#allocation18 + $0x620] sm:$0xff] }
 0x83c   :  { %13365 = vmatprep.subr.bf16.mxu1 %v15973_v59  ;;  %v16018_v59 = vcombine.low %v10228_v24, %v10232_v21  ;;  %v16027_v25 = vcombine.high %v10236_v31, %v10240_v55  ;;  %v16026_v63 = vcombine.low %v10236_v31, %v10240_v55  ;;  %v10281_v24 = vld [vmem:[#allocation18 + $0x768] sm:$0xff] }
 0x83d   :  { %13202 = vmatpush1.bf16.msra.mxu0 %v15970_v6  ;;  %v16029_v6 = vcombine.high %v10237_v17, %v10241_v58  ;;  %v10289_v31 = vld [vmem:[#allocation18 + $0x7a8] sm:$0xff]  ;;  %v6783_v17 = vrot.slane %v17983_v45, %v17811_v54 }
 0x83e   :  { %13366 = vmatpush1.bf16.msra.mxu1 %v15972_v27  ;;  %13203 = vmatprep.subr.bf16.mxu0 %v15979_v57  ;;  %v10244_v27 = vld [vmem:[#allocation18 + $0x640] sm:$0xff] }
 0x83f   :  { %13367 = vmatprep.subr.bf16.mxu1 %v15981_v61  ;;  %v10248_v57 = vld [vmem:[#allocation18 + $0x660] sm:$0xff]  ;;  %v10245_v61 = vld [vmem:[#allocation18 + $0x648] sm:$0xff] }
 0x840   :  { %v16035_v32 = vcombine.high %v10244_v27, %v10248_v57  ;;  %v16034_v9 = vcombine.low %v10244_v27, %v10248_v57  ;;  %v16036_v10 = vcombine.low %v10245_v61, %v10249_v62  ;;  %v10293_v27 = vld [vmem:[#allocation18 + $0x7c8] sm:$0xff] }
 0x841   :  { %13204 = vmatpush1.bf16.msra.mxu0 %v15978_v14  ;;  %v16037_v14 = vcombine.high %v10245_v61, %v10249_v62  ;;  %v10297_v57 = vld [vmem:[#allocation18 + $0x7e8] sm:$0xff]  ;;  %v16517_v62 = vadd.f32 %v17977_v22, %v6783_v17  ;;  %v10308_v22 = vld [vmem:[#allocation18 + $0x840] sm:$0xff] }
 0x842   :  { %13368 = vmatpush1.bf16.msra.mxu1 %v15980_v4  ;;  %13205 = vmatprep.subr.bf16.mxu0 %v15987_v5  ;;  %v10252_v4 = vld [vmem:[#allocation18 + $0x680] sm:$0xff]  ;;  %v16085_v45 = vcombine.high %v10293_v27, %v10297_v57 }
 0x843   :  { %13369 = vmatprep.subr.bf16.mxu1 %v15989_v8  ;;  %v10256_v5 = vld [vmem:[#allocation18 + $0x6a0] sm:$0xff]  ;;  %v10253_v8 = vld [vmem:[#allocation18 + $0x688] sm:$0xff] }
 0x844   :  { %v16043_v0 = vcombine.high %v10252_v4, %v10256_v5  ;;  %v16042_v26 = vcombine.low %v10252_v4, %v10256_v5  ;;  %v16044_v29 = vcombine.low %v10253_v8, %v10257_v56  ;;  %v10301_v4 = vld [vmem:[#allocation18 + $0x808] sm:$0xff] }
 0x845   :  { %13206 = vmatpush1.bf16.msra.mxu0 %v15986_v12  ;;  %v16045_v12 = vcombine.high %v10253_v8, %v10257_v56  ;;  %v10305_v5 = vld [vmem:[#allocation18 + $0x828] sm:$0xff]  ;;  %v10030_v56 = vmax.f32 %v16517_v62, 0.0 }
 0x846   :  { %13370 = vmatpush1.bf16.msra.mxu1 %v15988_v50  ;;  %13207 = vmatprep.subr.bf16.mxu0 %v15995_v16  ;;  %v10260_v50 = vld [vmem:[#allocation18 + $0x6c0] sm:$0xff] }
 0x847   :  { %13371 = vmatprep.subr.bf16.mxu1 %v15997_v20  ;;  %v10264_v16 = vld [vmem:[#allocation18 + $0x6e0] sm:$0xff]  ;;  %v10261_v20 = vld [vmem:[#allocation18 + $0x6c8] sm:$0xff] }
 0x848   :  { %v16051_v34 = vcombine.high %v10260_v50, %v10264_v16  ;;  %v16050_v38 = vcombine.low %v10260_v50, %v10264_v16  ;;  %v16052_v37 = vcombine.low %v10261_v20, %v10265_v23  ;;  %v10309_v50 = vld [vmem:[#allocation18 + $0x848] sm:$0xff] }
 0x849   :  { %13208 = vmatpush1.bf16.msra.mxu0 %v15994_v3  ;;  %v16053_v3 = vcombine.high %v10261_v20, %v10265_v23  ;;  %v10313_v16 = vld [vmem:[#allocation18 + $0x868] sm:$0xff]  ;;  %v18011_v23 = vpack.c.bf16 %v10030_v56, %v10030_v56  ;;  %v10356_v56 = vld [vmem:[#allocation18 + $0x9c0] sm:$0xff] }
 0x84a   :  { %13372 = vmatpush1.bf16.msra.mxu1 %v15996_v33  ;;  %13209 = vmatprep.subr.bf16.mxu0 %v16003_v2  ;;  %v10268_v33 = vld [vmem:[#allocation18 + $0x700] sm:$0xff] }
 0x84b   :  { %13373 = vmatprep.subr.bf16.mxu1 %v16005_v36  ;;  %v10272_v2 = vld [vmem:[#allocation18 + $0x720] sm:$0xff]  ;;  %v10269_v36 = vld [vmem:[#allocation18 + $0x708] sm:$0xff] }
 0x84c   :  { %v16059_v15 = vcombine.high %v10268_v33, %v10272_v2  ;;  %v16058_v21 = vcombine.low %v10268_v33, %v10272_v2  ;;  %v16060_v13 = vcombine.low %v10269_v36, %v10273_v46  ;;  %v10320_v33 = vld [vmem:[#allocation18 + $0x8a0] sm:$0xff]  ;;  %v10317_v2 = vld [vmem:[#allocation18 + $0x888] sm:$0xff] }
 0x84d   :  { %13210 = vmatpush1.bf16.msra.mxu0 %v16002_v42  ;;  %v16061_v42 = vcombine.high %v10269_v36, %v10273_v46  ;;  %v10321_v36 = vld [vmem:[#allocation18 + $0x8a8] sm:$0xff] }
 0x84e   :  { %13374 = vmatpush1.bf16.msra.mxu1 %v16004_v43  ;;  %13211 = vmatprep.subr.bf16.mxu0 %v16011_v44  ;;  %v10276_v43 = vld [vmem:[#allocation18 + $0x740] sm:$0xff] }
 0x84f   :  { %13375 = vmatprep.subr.bf16.mxu1 %v16013_v49  ;;  %v10280_v44 = vld [vmem:[#allocation18 + $0x760] sm:$0xff]  ;;  %v10277_v49 = vld [vmem:[#allocation18 + $0x748] sm:$0xff] }
 0x850   :  { %v16067_v47 = vcombine.high %v10276_v43, %v10280_v44  ;;  %v16066_v55 = vcombine.low %v10276_v43, %v10280_v44  ;;  %v16068_v58 = vcombine.low %v10277_v49, %v10281_v24  ;;  %v10328_v43 = vld [vmem:[#allocation18 + $0x8e0] sm:$0xff]  ;;  %v10325_v44 = vld [vmem:[#allocation18 + $0x8c8] sm:$0xff] }
 0x851   :  { %13212 = vmatpush1.bf16.msra.mxu0 %v16010_v40  ;;  %v16069_v40 = vcombine.high %v10277_v49, %v10281_v24  ;;  %v10329_v49 = vld [vmem:[#allocation18 + $0x8e8] sm:$0xff] }
 0x852   :  { %13376 = vmatpush1.bf16.msra.mxu1 %v16012_v48  ;;  %13213 = vmatprep.subr.bf16.mxu0 %v16019_v51  ;;  %v10284_v48 = vld [vmem:[#allocation18 + $0x780] sm:$0xff] }
 0x853   :  { %13377 = vmatprep.subr.bf16.mxu1 %v16021_v53  ;;  %v10288_v51 = vld [vmem:[#allocation18 + $0x7a0] sm:$0xff]  ;;  %v10285_v53 = vld [vmem:[#allocation18 + $0x788] sm:$0xff] }
 0x854   :  { %v16074_v61 = vcombine.low %v10284_v48, %v10288_v51 }
 0x855   :  { %13214 = vmatpush1.bf16.msra.mxu0 %v16018_v59  ;;  %v16075_v59 = vcombine.high %v10284_v48, %v10288_v51  ;;  %v10336_v48 = vld [vmem:[#allocation18 + $0x920] sm:$0xff]  ;;  %v10333_v51 = vld [vmem:[#allocation18 + $0x908] sm:$0xff] }
 0x856   :  { %13378 = vmatpush1.bf16.msra.mxu1 %v16020_v60  ;;  %13215 = vmatprep.subr.bf16.mxu0 %v16027_v25  ;;  %v16077_v60 = vcombine.high %v10285_v53, %v10289_v31  ;;  %v10292_v25 = vld [vmem:[#allocation18 + $0x7c0] sm:$0xff] }
 0x857   :  { %13379 = vmatprep.subr.bf16.mxu1 %v16029_v6  ;;  %v10296_v6 = vld [vmem:[#allocation18 + $0x7e0] sm:$0xff] }
 0x858   :  { %v16082_v8 = vcombine.low %v10292_v25, %v10296_v6 }
 0x859   :  { %13216 = vmatpush1.bf16.msra.mxu0 %v16026_v63  ;;  %v16076_v63 = vcombine.low %v10285_v53, %v10289_v31  ;;  %v10337_v53 = vld [vmem:[#allocation18 + $0x928] sm:$0xff] }
 0x85a   :  { %13380 = vmatpush1.bf16.msra.mxu1 %v16028_v1  ;;  %13217 = vmatprep.subr.bf16.mxu0 %v16035_v32  ;;  %v16083_v1 = vcombine.high %v10292_v25, %v10296_v6  ;;  %v10300_v32 = vld [vmem:[#allocation18 + $0x800] sm:$0xff]  ;;  %v10341_v25 = vld [vmem:[#allocation18 + $0x948] sm:$0xff] }
 0x85b   :  { %13381 = vmatprep.subr.bf16.mxu1 %v16037_v14  ;;  %v10304_v14 = vld [vmem:[#allocation18 + $0x820] sm:$0xff]  ;;  %v10345_v6 = vld [vmem:[#allocation18 + $0x968] sm:$0xff] }
 0x85c   :  { %v16090_v20 = vcombine.low %v10300_v32, %v10304_v14  ;;  %v16133_v62 = vcombine.high %v10341_v25, %v10345_v6 }
 0x85d   :  { %13218 = vmatpush1.bf16.msra.mxu0 %v16034_v9  ;;  %v16084_v9 = vcombine.low %v10293_v27, %v10297_v57  ;;  %v16124_v57 = vcombine.low %v10333_v51, %v10337_v53 }
 0x85e   :  { %13382 = vmatpush1.bf16.msra.mxu1 %v16036_v10  ;;  %13219 = vmatprep.subr.bf16.mxu0 %v16043_v0  ;;  %v16091_v10 = vcombine.high %v10300_v32, %v10304_v14  ;;  %v16093_v0 = vcombine.high %v10301_v4, %v10305_v5  ;;  %v10353_v32 = vld [vmem:[#allocation18 + $0x9a8] sm:$0xff] }
 0x85f   :  { %13383 = vmatprep.subr.bf16.mxu1 %v16045_v12  ;;  %v10312_v12 = vld [vmem:[#allocation18 + $0x860] sm:$0xff] }
 0x860   :  { %v16098_v46 = vcombine.low %v10308_v22, %v10312_v12 }
 0x861   :  { %13220 = vmatpush1.bf16.msra.mxu0 %v16042_v26  ;;  %v16092_v26 = vcombine.low %v10301_v4, %v10305_v5  ;;  %v16132_v4 = vcombine.low %v10341_v25, %v10345_v6 }
 0x862   :  { %13384 = vmatpush1.bf16.msra.mxu1 %v16044_v29  ;;  %13221 = vmatprep.subr.bf16.mxu0 %v16051_v34  ;;  %v16099_v29 = vcombine.high %v10308_v22, %v10312_v12  ;;  %v16101_v34 = vcombine.high %v10309_v50, %v10313_v16 }
 0x863   :  { %13385 = vmatprep.subr.bf16.mxu1 %v16053_v3  ;;  %v10316_v3 = vld [vmem:[#allocation18 + $0x880] sm:$0xff] }
 0x864   :  { %v16106_v24 = vcombine.low %v10316_v3, %v10320_v33 }
 0x865   :  { %13222 = vmatpush1.bf16.msra.mxu0 %v16050_v38  ;;  %v16100_v38 = vcombine.low %v10309_v50, %v10313_v16 }
 0x866   :  { %13386 = vmatpush1.bf16.msra.mxu1 %v16052_v37  ;;  %13223 = vmatprep.subr.bf16.mxu0 %v16059_v15  ;;  %v16107_v37 = vcombine.high %v10316_v3, %v10320_v33  ;;  %v16109_v15 = vcombine.high %v10317_v2, %v10321_v36 }
 0x867   :  { %13387 = vmatprep.subr.bf16.mxu1 %v16061_v42  ;;  %v10324_v42 = vld [vmem:[#allocation18 + $0x8c0] sm:$0xff] }
 0x868   :  { %v16114_v31 = vcombine.low %v10324_v42, %v10328_v43 }
 0x869   :  { %13224 = vmatpush1.bf16.msra.mxu0 %v16058_v21  ;;  %v16108_v21 = vcombine.low %v10317_v2, %v10321_v36 }
 0x86a   :  { %13388 = vmatpush1.bf16.msra.mxu1 %v16060_v13  ;;  %13225 = vmatprep.subr.bf16.mxu0 %v16067_v47  ;;  %v16115_v13 = vcombine.high %v10324_v42, %v10328_v43  ;;  %v16117_v47 = vcombine.high %v10325_v44, %v10329_v49 }
 0x86b   :  { %13389 = vmatprep.subr.bf16.mxu1 %v16069_v40  ;;  %v10332_v40 = vld [vmem:[#allocation18 + $0x900] sm:$0xff] }
 0x86c   :  { %v16123_v17 = vcombine.high %v10332_v40, %v10336_v48  ;;  %v16122_v27 = vcombine.low %v10332_v40, %v10336_v48 }
 0x86d   :  { %13226 = vmatpush1.bf16.msra.mxu0 %v16066_v55  ;;  %v16116_v55 = vcombine.low %v10325_v44, %v10329_v49 }
 0x86e   :  { %13390 = vmatpush1.bf16.msra.mxu1 %v16068_v58  ;;  %13227 = vmatprep.subr.bf16.mxu0 %v16075_v59  ;;  %v16125_v58 = vcombine.high %v10333_v51, %v10337_v53  ;;  %v10340_v59 = vld [vmem:[#allocation18 + $0x940] sm:$0xff] }
 0x86f   :  { %13391 = vmatprep.subr.bf16.mxu1 %v16077_v60  ;;  %v10344_v60 = vld [vmem:[#allocation18 + $0x960] sm:$0xff] }
 0x870   :  { %v16130_v14 = vcombine.low %v10340_v59, %v10344_v60 }
 0x871   :  { %13228 = vmatpush1.bf16.msra.mxu0 %v16074_v61  ;;  %v16131_v61 = vcombine.high %v10340_v59, %v10344_v60 }
 0x872   :  { %13392 = vmatpush1.bf16.msra.mxu1 %v16076_v63  ;;  %13229 = vmatprep.subr.bf16.mxu0 %v16083_v1  ;;  %v10348_v63 = vld [vmem:[#allocation18 + $0x980] sm:$0xff] }
 0x873   :  { %13393 = vmatprep.subr.bf16.mxu1 %v16085_v45  ;;  %v10352_v1 = vld [vmem:[#allocation18 + $0x9a0] sm:$0xff]  ;;  %v10349_v45 = vld [vmem:[#allocation18 + $0x988] sm:$0xff] }
 0x874   :  { %v16139_v5 = vcombine.high %v10348_v63, %v10352_v1  ;;  %v16138_v22 = vcombine.low %v10348_v63, %v10352_v1  ;;  %v16140_v12 = vcombine.low %v10349_v45, %v10353_v32 }
 0x875   :  { %13230 = vmatpush1.bf16.msra.mxu0 %v16082_v8  ;;  %v16141_v8 = vcombine.high %v10349_v45, %v10353_v32 }
 0x876   :  { %13394 = vmatpush1.bf16.msra.mxu1 %v16084_v9  ;;  %13240 = vmatprep.subr.bf16.mxu0 %v16091_v10  ;;  %v10360_v9 = vld [vmem:[#allocation18 + $0x9e0] sm:$0xff]  ;;  %v10357_v10 = vld [vmem:[#allocation18 + $0x9c8] sm:$0xff] }
 0x877   :  { %13404 = vmatprep.subr.bf16.mxu1 %v16093_v0  ;;  %v10361_v0 = vld [vmem:[#allocation18 + $0x9e8] sm:$0xff]  ;;  %v16147_v50 = vcombine.high %v10356_v56, %v10360_v9  ;;  %v16146_v3 = vcombine.low %v10356_v56, %v10360_v9 }
 0x878   :  { %13232 = vmatmul.mubr.bf16.vlgmr.msra.gmra.mrb[28].mxu0 %v18011_v23  ;;  %v16149_v16 = vcombine.high %v10357_v10, %v10361_v0  ;;  %v16148_v33 = vcombine.low %v10357_v10, %v10361_v0 }
 0x879   :  { %13396 = vmatmul.mubr.bf16.vlgmr.msra.gmra.mrb[28].mxu1 %v18011_v23  ;;  %13241 = vmatpush1.bf16.msra.mxu0 %v16090_v20  ;;  %v10364_v20 = vld [vmem:[#allocation18 + $0xa00] sm:$0xff] }
 0x87a   :  { %13405 = vmatpush1.bf16.msra.mxu1 %v16092_v26  ;;  %13242 = vmatprep.subr.bf16.mxu0 %v16099_v29  ;;  %v10368_v26 = vld [vmem:[#allocation18 + $0xa20] sm:$0xff]  ;;  %v10365_v29 = vld [vmem:[#allocation18 + $0xa08] sm:$0xff] }
 0x87b   :  { %13406 = vmatprep.subr.bf16.mxu1 %v16101_v34  ;;  %v10369_v34 = vld [vmem:[#allocation18 + $0xa28] sm:$0xff]  ;;  %v16155_v2 = vcombine.high %v10364_v20, %v10368_v26  ;;  %v16154_v42 = vcombine.low %v10364_v20, %v10368_v26 }
 0x87c   :  { %v16157_v36 = vcombine.high %v10365_v29, %v10369_v34  ;;  %v16156_v43 = vcombine.low %v10365_v29, %v10369_v34 }
 0x87d   :  { %13243 = vmatpush1.bf16.msra.mxu0 %v16098_v46  ;;  %v10372_v46 = vld [vmem:[#allocation18 + $0xa40] sm:$0xff] }
 0x87e   :  { %13407 = vmatpush1.bf16.msra.mxu1 %v16100_v38  ;;  %13244 = vmatprep.subr.bf16.mxu0 %v16107_v37  ;;  %v10376_v38 = vld [vmem:[#allocation18 + $0xa60] sm:$0xff]  ;;  %v10373_v37 = vld [vmem:[#allocation18 + $0xa48] sm:$0xff] }
 0x87f   :  { %13408 = vmatprep.subr.bf16.mxu1 %v16109_v15  ;;  %v10377_v15 = vld [vmem:[#allocation18 + $0xa68] sm:$0xff]  ;;  %v16163_v44 = vcombine.high %v10372_v46, %v10376_v38  ;;  %v16162_v40 = vcombine.low %v10372_v46, %v10376_v38 }
 0x880   :  { %v16165_v49 = vcombine.high %v10373_v37, %v10377_v15  ;;  %v16164_v48 = vcombine.low %v10373_v37, %v10377_v15 }
 0x881   :  { %13245 = vmatpush1.bf16.msra.mxu0 %v16106_v24  ;;  %v10380_v24 = vld [vmem:[#allocation18 + $0xa80] sm:$0xff] }
 0x882   :  { %13409 = vmatpush1.bf16.msra.mxu1 %v16108_v21  ;;  %13246 = vmatprep.subr.bf16.mxu0 %v16115_v13  ;;  %v10384_v21 = vld [vmem:[#allocation18 + $0xaa0] sm:$0xff]  ;;  %v10381_v13 = vld [vmem:[#allocation18 + $0xa88] sm:$0xff] }
 0x883   :  { %13410 = vmatprep.subr.bf16.mxu1 %v16117_v47  ;;  %v10385_v47 = vld [vmem:[#allocation18 + $0xaa8] sm:$0xff]  ;;  %v16171_v51 = vcombine.high %v10380_v24, %v10384_v21  ;;  %v16170_v59 = vcombine.low %v10380_v24, %v10384_v21 }
 0x884   :  { %v16173_v53 = vcombine.high %v10381_v13, %v10385_v47  ;;  %v16172_v60 = vcombine.low %v10381_v13, %v10385_v47 }
 0x885   :  { %13247 = vmatpush1.bf16.msra.mxu0 %v16114_v31  ;;  %v10388_v31 = vld [vmem:[#allocation18 + $0xac0] sm:$0xff] }
 0x886   :  { %13411 = vmatpush1.bf16.msra.mxu1 %v16116_v55  ;;  %13248 = vmatprep.subr.bf16.mxu0 %v16123_v17  ;;  %v10392_v55 = vld [vmem:[#allocation18 + $0xae0] sm:$0xff]  ;;  %v10389_v17 = vld [vmem:[#allocation18 + $0xac8] sm:$0xff] }
 0x887   :  { %13412 = vmatprep.subr.bf16.mxu1 %v16125_v58  ;;  %v10393_v58 = vld [vmem:[#allocation18 + $0xae8] sm:$0xff]  ;;  %v16179_v25 = vcombine.high %v10388_v31, %v10392_v55  ;;  %v16178_v63 = vcombine.low %v10388_v31, %v10392_v55 }
 0x888   :  { %v16181_v6 = vcombine.high %v10389_v17, %v10393_v58  ;;  %v16180_v1 = vcombine.low %v10389_v17, %v10393_v58 }
 0x889   :  { %13249 = vmatpush1.bf16.msra.mxu0 %v16122_v27  ;;  %v10396_v27 = vld [vmem:[#allocation18 + $0xb00] sm:$0xff] }
 0x88a   :  { %13413 = vmatpush1.bf16.msra.mxu1 %v16124_v57  ;;  %13250 = vmatprep.subr.bf16.mxu0 %v16131_v61  ;;  %v10400_v57 = vld [vmem:[#allocation18 + $0xb20] sm:$0xff]  ;;  %v10397_v61 = vld [vmem:[#allocation18 + $0xb08] sm:$0xff] }
 0x88b   :  { %13414 = vmatprep.subr.bf16.mxu1 %v16133_v62  ;;  %v10401_v62 = vld [vmem:[#allocation18 + $0xb28] sm:$0xff]  ;;  %v16187_v45 = vcombine.high %v10396_v27, %v10400_v57  ;;  %v16186_v56 = vcombine.low %v10396_v27, %v10400_v57 }
 0x88c   :  { %v16189_v32 = vcombine.high %v10397_v61, %v10401_v62  ;;  %v16188_v9 = vcombine.low %v10397_v61, %v10401_v62 }
 0x88d   :  { %13251 = vmatpush1.bf16.msra.mxu0 %v16130_v14  ;;  %v10404_v14 = vld [vmem:[#allocation18 + $0xb40] sm:$0xff] }
 0x88e   :  { %13415 = vmatpush1.bf16.msra.mxu1 %v16132_v4  ;;  %13252 = vmatprep.subr.bf16.mxu0 %v16139_v5  ;;  %v10408_v4 = vld [vmem:[#allocation18 + $0xb60] sm:$0xff]  ;;  %v10405_v5 = vld [vmem:[#allocation18 + $0xb48] sm:$0xff] }
 0x88f   :  { %13416 = vmatprep.subr.bf16.mxu1 %v16141_v8  ;;  %v10409_v8 = vld [vmem:[#allocation18 + $0xb68] sm:$0xff]  ;;  %v16195_v10 = vcombine.high %v10404_v14, %v10408_v4  ;;  %v16194_v20 = vcombine.low %v10404_v14, %v10408_v4 }
 0x890   :  { %v16197_v0 = vcombine.high %v10405_v5, %v10409_v8  ;;  %v16196_v26 = vcombine.low %v10405_v5, %v10409_v8  ;;  %v10437_v14 = vld [vmem:[#allocation18 + $0xc48] sm:$0xff] }
 0x891   :  { %13253 = vmatpush1.bf16.msra.mxu0 %v16138_v22  ;;  %v10412_v22 = vld [vmem:[#allocation18 + $0xb80] sm:$0xff]  ;;  %v10441_v4 = vld [vmem:[#allocation18 + $0xc68] sm:$0xff] }
 0x892   :  { %13417 = vmatpush1.bf16.msra.mxu1 %v16140_v12  ;;  %13254 = vmatprep.subr.bf16.mxu0 %v16147_v50  ;;  %v10416_v12 = vld [vmem:[#allocation18 + $0xba0] sm:$0xff]  ;;  %v10413_v50 = vld [vmem:[#allocation18 + $0xb88] sm:$0xff] }
 0x893   :  { %13418 = vmatprep.subr.bf16.mxu1 %v16149_v16  ;;  %v10417_v16 = vld [vmem:[#allocation18 + $0xba8] sm:$0xff]  ;;  %v16203_v29 = vcombine.high %v10412_v22, %v10416_v12  ;;  %v16202_v46 = vcombine.low %v10412_v22, %v10416_v12  ;;  %v16229_v22 = vcombine.high %v10437_v14, %v10441_v4  ;;  %v10448_v12 = vld [vmem:[#allocation18 + $0xca0] sm:$0xff] }
 0x894   :  { %v16205_v34 = vcombine.high %v10413_v50, %v10417_v16  ;;  %v16204_v38 = vcombine.low %v10413_v50, %v10417_v16  ;;  %v10445_v50 = vld [vmem:[#allocation18 + $0xc88] sm:$0xff] }
 0x895   :  { %13255 = vmatpush1.bf16.msra.mxu0 %v16146_v3  ;;  %v10420_v3 = vld [vmem:[#allocation18 + $0xbc0] sm:$0xff]  ;;  %v10449_v16 = vld [vmem:[#allocation18 + $0xca8] sm:$0xff] }
 0x896   :  { %13419 = vmatpush1.bf16.msra.mxu1 %v16148_v33  ;;  %13256 = vmatprep.subr.bf16.mxu0 %v16155_v2  ;;  %v10424_v33 = vld [vmem:[#allocation18 + $0xbe0] sm:$0xff]  ;;  %v10421_v2 = vld [vmem:[#allocation18 + $0xbc8] sm:$0xff] }
 0x897   :  { %13420 = vmatprep.subr.bf16.mxu1 %v16157_v36  ;;  %v10425_v36 = vld [vmem:[#allocation18 + $0xbe8] sm:$0xff]  ;;  %v16211_v37 = vcombine.high %v10420_v3, %v10424_v33  ;;  %v16210_v24 = vcombine.low %v10420_v3, %v10424_v33  ;;  %v16237_v3 = vcombine.high %v10445_v50, %v10449_v16  ;;  %v10452_v33 = vld [vmem:[#allocation18 + $0xcc0] sm:$0xff] }
 0x898   :  { %v16213_v15 = vcombine.high %v10421_v2, %v10425_v36  ;;  %v16212_v21 = vcombine.low %v10421_v2, %v10425_v36  ;;  %v10456_v2 = vld [vmem:[#allocation18 + $0xce0] sm:$0xff]  ;;  %v10453_v36 = vld [vmem:[#allocation18 + $0xcc8] sm:$0xff] }
 0x899   :  { %13257 = vmatpush1.bf16.msra.mxu0 %v16154_v42  ;;  %v10428_v42 = vld [vmem:[#allocation18 + $0xc00] sm:$0xff] }
 0x89a   :  { %13421 = vmatpush1.bf16.msra.mxu1 %v16156_v43  ;;  %13258 = vmatprep.subr.bf16.mxu0 %v16163_v44  ;;  %v10432_v43 = vld [vmem:[#allocation18 + $0xc20] sm:$0xff]  ;;  %v10429_v44 = vld [vmem:[#allocation18 + $0xc08] sm:$0xff] }
 0x89b   :  { %13422 = vmatprep.subr.bf16.mxu1 %v16165_v49  ;;  %v10433_v49 = vld [vmem:[#allocation18 + $0xc28] sm:$0xff]  ;;  %v16219_v13 = vcombine.high %v10428_v42, %v10432_v43  ;;  %v16218_v8 = vcombine.low %v10428_v42, %v10432_v43  ;;  %v10460_v43 = vld [vmem:[#allocation18 + $0xd00] sm:$0xff] }
 0x89c   :  { %v16221_v47 = vcombine.high %v10429_v44, %v10433_v49 }
 0x89d   :  { %13259 = vmatpush1.bf16.msra.mxu0 %v16162_v40  ;;  %v18015_v40 = vld [vmem:[#allocation16] sm:$0xff] }
 0x89e   :  { %13423 = vmatpush1.bf16.msra.mxu1 %v16164_v48  ;;  %13260 = vmatprep.subr.bf16.mxu0 %v16171_v51  ;;  %v6791_v48 = vrot.slane %v18015_v40, %v17924_v28  ;;  %v6795_v51 = vrot.slane %v18015_v40, %v17927_v30 }
 0x89f   :  { %13424 = vmatprep.subr.bf16.mxu1 %v16173_v53  ;;  %v6803_v53 = vrot.slane %v18015_v40, %v17930_v35 }
 0x8a1   :  { %13261 = vmatpush1.bf16.msra.mxu0 %v16170_v59 }
 0x8a2   :  { %13425 = vmatpush1.bf16.msra.mxu1 %v16172_v60  ;;  %13262 = vmatprep.subr.bf16.mxu0 %v16179_v25 }
 0x8a3   :  { %13426 = vmatprep.subr.bf16.mxu1 %v16181_v6 }
 0x8a5   :  { %13263 = vmatpush1.bf16.msra.mxu0 %v16178_v63 }
 0x8a6   :  { %13427 = vmatpush1.bf16.msra.mxu1 %v16180_v1  ;;  %13264 = vmatprep.subr.bf16.mxu0 %v16187_v45  ;;  %v10436_v1 = vld [vmem:[#allocation18 + $0xc40] sm:$0xff] }
 0x8a7   :  { %13428 = vmatprep.subr.bf16.mxu1 %v16189_v32  ;;  %v10440_v32 = vld [vmem:[#allocation18 + $0xc60] sm:$0xff] }
 0x8a9   :  { %13265 = vmatpush1.bf16.msra.mxu0 %v16186_v56  ;;  %v16220_v56 = vcombine.low %v10429_v44, %v10433_v49  ;;  %v10464_v44 = vld [vmem:[#allocation18 + $0xd20] sm:$0xff]  ;;  %v10461_v49 = vld [vmem:[#allocation18 + $0xd08] sm:$0xff] }
 0x8aa   :  { %13429 = vmatpush1.bf16.msra.mxu1 %v16188_v9  ;;  %13266 = vmatprep.subr.bf16.mxu0 %v16195_v10  ;;  %v10444_v10 = vld [vmem:[#allocation18 + $0xc80] sm:$0xff] }
 0x8ab   :  { %13430 = vmatprep.subr.bf16.mxu1 %v16197_v0  ;;  %v16227_v0 = vcombine.high %v10436_v1, %v10440_v32 }
 0x8ad   :  { %13267 = vmatpush1.bf16.msra.mxu0 %v16194_v20 }
 0x8ae   :  { %13431 = vmatpush1.bf16.msra.mxu1 %v16196_v26  ;;  %13268 = vmatprep.subr.bf16.mxu0 %v16203_v29  ;;  %v16226_v26 = vcombine.low %v10436_v1, %v10440_v32  ;;  %v16228_v29 = vcombine.low %v10437_v14, %v10441_v4  ;;  %v10484_v32 = vld [vmem:[#allocation18 + $0xdc0] sm:$0xff]  ;;  %v10485_v4 = vld [vmem:[#allocation18 + $0xdc8] sm:$0xff] }
 0x8af   :  { %13432 = vmatprep.subr.bf16.mxu1 %v16205_v34  ;;  %v16235_v34 = vcombine.high %v10444_v10, %v10448_v12  ;;  %v10488_v14 = vld [vmem:[#allocation18 + $0xde0] sm:$0xff] }
 0x8b1   :  { %13269 = vmatpush1.bf16.msra.mxu0 %v16202_v46  ;;  %v10457_v46 = vld [vmem:[#allocation18 + $0xce8] sm:$0xff] }
 0x8b2   :  { %13433 = vmatpush1.bf16.msra.mxu1 %v16204_v38  ;;  %13270 = vmatprep.subr.bf16.mxu0 %v16211_v37  ;;  %v16234_v38 = vcombine.low %v10444_v10, %v10448_v12  ;;  %v16236_v37 = vcombine.low %v10445_v50, %v10449_v16  ;;  %v16245_v42 = vcombine.high %v10453_v36, %v10457_v46  ;;  %v10492_v12 = vld [vmem:[#allocation18 + $0xe00] sm:$0xff]  ;;  %v10493_v16 = vld [vmem:[#allocation18 + $0xe08] sm:$0xff] }
 0x8b3   :  { %13434 = vmatprep.subr.bf16.mxu1 %v16213_v15  ;;  %v16243_v15 = vcombine.high %v10452_v33, %v10456_v2  ;;  %v10496_v50 = vld [vmem:[#allocation18 + $0xe20] sm:$0xff] }
 0x8b5   :  { %13271 = vmatpush1.bf16.msra.mxu0 %v16210_v24  ;;  %v10465_v24 = vld [vmem:[#allocation18 + $0xd28] sm:$0xff] }
 0x8b6   :  { %13435 = vmatpush1.bf16.msra.mxu1 %v16212_v21  ;;  %13281 = vmatprep.subr.bf16.mxu0 %v16219_v13  ;;  %v16242_v21 = vcombine.low %v10452_v33, %v10456_v2  ;;  %v16244_v13 = vcombine.low %v10453_v36, %v10457_v46  ;;  %v10500_v2 = vld [vmem:[#allocation18 + $0xe40] sm:$0xff]  ;;  %v10501_v46 = vld [vmem:[#allocation18 + $0xe48] sm:$0xff] }
 0x8b7   :  { %13445 = vmatprep.subr.bf16.mxu1 %v16221_v47  ;;  %v16251_v47 = vcombine.high %v10460_v43, %v10464_v44  ;;  %v10504_v36 = vld [vmem:[#allocation18 + $0xe60] sm:$0xff] }
 0x8cb   :  { %v9857_v31 = vpop.f32.mrb[24].mxu0 }
 0x8cc   :  { %v16519_v55 = vadd.f32 %v9857_v31, %v6791_v48  ;;  %v18023_v17 = vpop.f32.mrb[24].mxu1  ;;  %v9859_v58 = vpop.f32.mrb[25].mxu0  ;;  %v16253_v48 = vcombine.high %v10461_v49, %v10465_v24  ;;  %v10469_v31 = vld [vmem:[#allocation18 + $0xd48] sm:$0xff] }
 0x8cd   :  { %v16520_v59 = vadd.f32 %v9859_v58, %v6795_v51  ;;  %v10023_v60 = vpop.f32.mrb[25].mxu1  ;;  %v9861_v25 = vpop.f32.mrb[26].mxu0  ;;  %v10468_v51 = vld [vmem:[#allocation18 + $0xd40] sm:$0xff]  ;;  %v16250_v58 = vcombine.low %v10460_v43, %v10464_v44 }
 0x8ce   :  { %v10032_v6 = vmax.f32 %v16519_v55, 0.0  ;;  %v16522_v27 = vadd.f32 %v10023_v60, %v6803_v53  ;;  %v10025_v57 = vpop.f32.mrb[26].mxu1  ;;  %v9862_v61 = vpop.f32.mrb[27].mxu0  ;;  %v10472_v53 = vld [vmem:[#allocation18 + $0xd60] sm:$0xff]  ;;  %v10473_v55 = vld [vmem:[#allocation18 + $0xd68] sm:$0xff] }
 0x8cf   :  { %v10033_v62 = vmax.f32 %v16520_v59, 0.0  ;;  %v10026_v63 = vpop.f32.mrb[27].mxu1  ;;  %v16252_v59 = vcombine.low %v10461_v49, %v10465_v24  ;;  %v16259_v60 = vcombine.high %v10468_v51, %v10472_v53  ;;  %v16261_v25 = vcombine.high %v10469_v31, %v10473_v55  ;;  %v10477_v57 = vld [vmem:[#allocation18 + $0xd88] sm:$0xff]  ;;  %v10508_v44 = vld [vmem:[#allocation18 + $0xe80] sm:$0xff] }
 0x8d0   :  { %v10035_v45 = vmax.f32 %v16522_v27, 0.0  ;;  %v18027_v9 = vpack.c.bf16 %v10032_v6, %v10032_v6  ;;  %v10476_v6 = vld [vmem:[#allocation18 + $0xd80] sm:$0xff]  ;;  %v10481_v61 = vld [vmem:[#allocation18 + $0xda8] sm:$0xff]  ;;  %v16260_v63 = vcombine.low %v10469_v31, %v10473_v55 }
 0x8d1   :  { %v18025_v5 = vpack.c.bf16 %v10033_v62, %v10033_v62  ;;  %v10480_v27 = vld [vmem:[#allocation18 + $0xda0] sm:$0xff]  ;;  %v16258_v62 = vcombine.low %v10468_v51, %v10472_v53  ;;  %v16268_v10 = vcombine.low %v10477_v57, %v10481_v61  ;;  %v10509_v24 = vld [vmem:[#allocation18 + $0xe88] sm:$0xff] }
 0x8d2   :  { %v18031_v20 = vpack.c.bf16 %v10035_v45, %v10035_v45  ;;  %v16267_v1 = vcombine.high %v10476_v6, %v10480_v27  ;;  %v16269_v45 = vcombine.high %v10477_v57, %v10481_v61  ;;  %v10512_v49 = vld [vmem:[#allocation18 + $0xea0] sm:$0xff]  ;;  %v10517_v55 = vld [vmem:[#allocation18 + $0xec8] sm:$0xff] }
 0x8d3   :  { %13272 = vmatprep.mubr.bf16.mxu0 %v18025_v5  ;;  %13436 = vmatprep.mubr.bf16.mxu1 %v18025_v5  ;;  %v10516_v53 = vld [vmem:[#allocation18 + $0xec0] sm:$0xff]  ;;  %v10525_v61 = vld [vmem:[#allocation18 + $0xf08] sm:$0xff] }
 0x8d4   :  { %13273 = vmatmul.mubr.bf16.vlgmr.msra.gmra.mrb[28].mxu0 %v18027_v9  ;;  %13437 = vmatmul.mubr.bf16.vlgmr.msra.gmra.mrb[28].mxu1 %v18027_v9  ;;  %v10520_v31 = vld [vmem:[#allocation18 + $0xee0] sm:$0xff] }
 0x8d5   :  { %13282 = vmatpush1.bf16.msra.mxu0 %v16218_v8  ;;  %13446 = vmatpush1.bf16.msra.mxu1 %v16220_v56  ;;  %v10489_v8 = vld [vmem:[#allocation18 + $0xde8] sm:$0xff]  ;;  %v16266_v56 = vcombine.low %v10476_v6, %v10480_v27  ;;  %v10524_v27 = vld [vmem:[#allocation18 + $0xf00] sm:$0xff] }
 0x8d6   :  { %13313 = vmatprep.mubr.bf16.mxu0 %v18031_v20  ;;  %13477 = vmatprep.mubr.bf16.mxu1 %v18031_v20  ;;  %v10528_v57 = vld [vmem:[#allocation18 + $0xf20] sm:$0xff] }
 0x8d7   :  { %13283 = vmatprep.subr.bf16.mxu0 %v16227_v0  ;;  %13447 = vmatprep.subr.bf16.mxu1 %v16229_v22  ;;  %v16275_v0 = vcombine.high %v10484_v32, %v10488_v14  ;;  %v16277_v22 = vcombine.high %v10485_v4, %v10489_v8 }
 0x8d9   :  { %13284 = vmatpush1.bf16.msra.mxu0 %v16226_v26  ;;  %13448 = vmatpush1.bf16.msra.mxu1 %v16228_v29  ;;  %v10497_v26 = vld [vmem:[#allocation18 + $0xe28] sm:$0xff]  ;;  %v16274_v29 = vcombine.low %v10484_v32, %v10488_v14  ;;  %v10532_v14 = vld [vmem:[#allocation18 + $0xf40] sm:$0xff] }
 0x8da   :  { %13285 = vmatprep.subr.bf16.mxu0 %v16235_v34  ;;  %13449 = vmatprep.subr.bf16.mxu1 %v16237_v3  ;;  %v16276_v34 = vcombine.low %v10485_v4, %v10489_v8  ;;  %v16283_v3 = vcombine.high %v10492_v12, %v10496_v50  ;;  %v16285_v33 = vcombine.high %v10493_v16, %v10497_v26  ;;  %v10536_v4 = vld [vmem:[#allocation18 + $0xf60] sm:$0xff]  ;;  %v10533_v8 = vld [vmem:[#allocation18 + $0xf48] sm:$0xff] }
 0x8dd   :  { %13286 = vmatpush1.bf16.msra.mxu0 %v16234_v38  ;;  %13450 = vmatpush1.bf16.msra.mxu1 %v16236_v37  ;;  %v10505_v38 = vld [vmem:[#allocation18 + $0xe68] sm:$0xff]  ;;  %v16282_v37 = vcombine.low %v10492_v12, %v10496_v50  ;;  %v10540_v50 = vld [vmem:[#allocation18 + $0xf80] sm:$0xff] }
 0x8de   :  { %13287 = vmatprep.subr.bf16.mxu0 %v16243_v15  ;;  %13451 = vmatprep.subr.bf16.mxu1 %v16245_v42  ;;  %v16284_v15 = vcombine.low %v10493_v16, %v10497_v26  ;;  %v16291_v42 = vcombine.high %v10500_v2, %v10504_v36  ;;  %v16293_v43 = vcombine.high %v10501_v46, %v10505_v38  ;;  %v10544_v16 = vld [vmem:[#allocation18 + $0xfa0] sm:$0xff]  ;;  %v10541_v26 = vld [vmem:[#allocation18 + $0xf88] sm:$0xff] }
 0x8e1   :  { %13288 = vmatpush1.bf16.msra.mxu0 %v16242_v21  ;;  %13452 = vmatpush1.bf16.msra.mxu1 %v16244_v13  ;;  %v10513_v21 = vld [vmem:[#allocation18 + $0xea8] sm:$0xff]  ;;  %v16290_v13 = vcombine.low %v10500_v2, %v10504_v36  ;;  %v16331_v2 = vcombine.high %v10540_v50, %v10544_v16 }
 0x8e2   :  { %13289 = vmatprep.subr.bf16.mxu0 %v16251_v47  ;;  %13453 = vmatprep.subr.bf16.mxu1 %v16253_v48  ;;  %v16292_v47 = vcombine.low %v10501_v46, %v10505_v38  ;;  %v16299_v48 = vcombine.high %v10508_v44, %v10512_v49  ;;  %v16301_v51 = vcombine.high %v10509_v24, %v10513_v21  ;;  %v10548_v46 = vld [vmem:[#allocation18 + $0xfc0] sm:$0xff] }
 0x8e3   :  { %v10552_v38 = vld [vmem:[#allocation18 + $0xfe0] sm:$0xff] }
 0x8e5   :  { %13290 = vmatpush1.bf16.msra.mxu0 %v16250_v58  ;;  %13454 = vmatpush1.bf16.msra.mxu1 %v16252_v59  ;;  %v10521_v58 = vld [vmem:[#allocation18 + $0xee8] sm:$0xff]  ;;  %v16298_v59 = vcombine.low %v10508_v44, %v10512_v49  ;;  %v16339_v49 = vcombine.high %v10548_v46, %v10552_v38 }
 0x8e6   :  { %13291 = vmatprep.subr.bf16.mxu0 %v16259_v60  ;;  %13455 = vmatprep.subr.bf16.mxu1 %v16261_v25  ;;  %v16300_v60 = vcombine.low %v10509_v24, %v10513_v21  ;;  %v16307_v25 = vcombine.high %v10516_v53, %v10520_v31  ;;  %v16309_v6 = vcombine.high %v10517_v55, %v10521_v58  ;;  %v10046_v21 = vld [vmem:[#allocation18 + $0x10] sm:$0xff] }
 0x8e9   :  { %13292 = vmatpush1.bf16.msra.mxu0 %v16258_v62  ;;  %13456 = vmatpush1.bf16.msra.mxu1 %v16260_v63  ;;  %v10529_v62 = vld [vmem:[#allocation18 + $0xf28] sm:$0xff]  ;;  %v16306_v63 = vcombine.low %v10516_v53, %v10520_v31 }
 0x8ea   :  { %13293 = vmatprep.subr.bf16.mxu0 %v16267_v1  ;;  %13457 = vmatprep.subr.bf16.mxu1 %v16269_v45  ;;  %v16308_v1 = vcombine.low %v10517_v55, %v10521_v58  ;;  %v16315_v45 = vcombine.high %v10524_v27, %v10528_v57  ;;  %v16317_v32 = vcombine.high %v10525_v61, %v10529_v62  ;;  %v10054_v58 = vld [vmem:[#allocation18 + $0x50] sm:$0xff] }
 0x8ed   :  { %13294 = vmatpush1.bf16.msra.mxu0 %v16266_v56  ;;  %13458 = vmatpush1.bf16.msra.mxu1 %v16268_v10  ;;  %v10537_v56 = vld [vmem:[#allocation18 + $0xf68] sm:$0xff]  ;;  %v16314_v10 = vcombine.low %v10524_v27, %v10528_v57 }
 0x8ee   :  { %13295 = vmatprep.subr.bf16.mxu0 %v16275_v0  ;;  %13459 = vmatprep.subr.bf16.mxu1 %v16277_v22  ;;  %v16316_v0 = vcombine.low %v10525_v61, %v10529_v62  ;;  %v16323_v22 = vcombine.high %v10532_v14, %v10536_v4  ;;  %v16325_v12 = vcombine.high %v10533_v8, %v10537_v56  ;;  %v10062_v62 = vld [vmem:[#allocation18 + $0x90] sm:$0xff] }
 0x8f1   :  { %13296 = vmatpush1.bf16.msra.mxu0 %v16274_v29  ;;  %13460 = vmatpush1.bf16.msra.mxu1 %v16276_v34  ;;  %v10545_v29 = vld [vmem:[#allocation18 + $0xfa8] sm:$0xff]  ;;  %v16322_v34 = vcombine.low %v10532_v14, %v10536_v4 }
 0x8f2   :  { %13297 = vmatprep.subr.bf16.mxu0 %v16283_v3  ;;  %13461 = vmatprep.subr.bf16.mxu1 %v16285_v33  ;;  %v16324_v3 = vcombine.low %v10533_v8, %v10537_v56  ;;  %v6799_v33 = vrot.slane %v18015_v40, %v17953_v19  ;;  %v16333_v36 = vcombine.high %v10541_v26, %v10545_v29  ;;  %v10050_v40 = vld [vmem:[#allocation18 + $0x30] sm:$0xff] }
 0x8f3   :  { %v15839_v31 = vcombine.high %v10046_v21, %v10050_v40  ;;  %v10070_v56 = vld [vmem:[#allocation18 + $0xd0] sm:$0xff] }
 0x8f4   :  { %v16521_v44 = vadd.f32 %v18023_v17, %v6799_v33  ;;  %v10055_v17 = vld [vmem:[#allocation18 + $0x58] sm:$0xff] }
 0x8f5   :  { %13298 = vmatpush1.bf16.msra.mxu0 %v16282_v37  ;;  %13462 = vmatpush1.bf16.msra.mxu1 %v16284_v15  ;;  %v10549_v37 = vld [vmem:[#allocation18 + $0xfc8] sm:$0xff] }
 0x8f6   :  { %13299 = vmatprep.subr.bf16.mxu0 %v16291_v42  ;;  %13463 = vmatprep.subr.bf16.mxu1 %v16293_v43  ;;  %v10553_v15 = vld [vmem:[#allocation18 + $0xfe8] sm:$0xff]  ;;  %v16330_v42 = vcombine.low %v10540_v50, %v10544_v16  ;;  %v16332_v43 = vcombine.low %v10541_v26, %v10545_v29  ;;  %v10034_v53 = vmax.f32 %v16521_v44, 0.0  ;;  %v10078_v29 = vld [vmem:[#allocation18 + $0x110] sm:$0xff] }
 0x8f7   :  { %v16341_v24 = vcombine.high %v10549_v37, %v10553_v15 }
 0x8f9   :  { %13300 = vmatpush1.bf16.msra.mxu0 %v16290_v13  ;;  %13464 = vmatpush1.bf16.msra.mxu1 %v16292_v47  ;;  %v10047_v13 = vld [vmem:[#allocation18 + $0x18] sm:$0xff] }
 0x8fa   :  { %13301 = vmatprep.subr.bf16.mxu0 %v16299_v48  ;;  %13465 = vmatprep.subr.bf16.mxu1 %v16301_v51  ;;  %v10051_v47 = vld [vmem:[#allocation18 + $0x38] sm:$0xff]  ;;  %v16338_v48 = vcombine.low %v10548_v46, %v10552_v38  ;;  %v16340_v51 = vcombine.low %v10549_v37, %v10553_v15  ;;  %v10086_v38 = vld [vmem:[#allocation18 + $0x150] sm:$0xff] }
 0x8fb   :  { %v15841_v55 = vcombine.high %v10047_v13, %v10051_v47  ;;  %v15840_v27 = vcombine.low %v10047_v13, %v10051_v47  ;;  %v10090_v37 = vld [vmem:[#allocation18 + $0x170] sm:$0xff]  ;;  %v10087_v15 = vld [vmem:[#allocation18 + $0x158] sm:$0xff] }
 0x8fc   :  { %v10095_v13 = vld [vmem:[#allocation18 + $0x198] sm:$0xff] }
 0x8fd   :  { %13302 = vmatpush1.bf16.msra.mxu0 %v16298_v59  ;;  %13466 = vmatpush1.bf16.msra.mxu1 %v16300_v60  ;;  %v10058_v59 = vld [vmem:[#allocation18 + $0x70] sm:$0xff]  ;;  %v10059_v60 = vld [vmem:[#allocation18 + $0x78] sm:$0xff] }
 0x8fe   :  { %13303 = vmatprep.subr.bf16.mxu0 %v16307_v25  ;;  %13467 = vmatprep.subr.bf16.mxu1 %v16309_v6  ;;  %v15838_v25 = vcombine.low %v10046_v21, %v10050_v40  ;;  %v18040_v6 = vpack.c.bf16 %v10034_v53, %v10034_v53  ;;  %v15847_v57 = vcombine.high %v10054_v58, %v10058_v59  ;;  %v10094_v21 = vld [vmem:[#allocation18 + $0x190] sm:$0xff]  ;;  %v10099_v47 = vld [vmem:[#allocation18 + $0x1b8] sm:$0xff] }
 0x8ff   :  { %v15849_v61 = vcombine.high %v10055_v17, %v10059_v60  ;;  %v15848_v14 = vcombine.low %v10055_v17, %v10059_v60  ;;  %v10098_v40 = vld [vmem:[#allocation18 + $0x1b0] sm:$0xff]  ;;  %v10107_v17 = vld [vmem:[#allocation18 + $0x1f8] sm:$0xff] }
 0x900   :  { %v15887_v53 = vcombine.high %v10094_v21, %v10098_v40  ;;  %v15886_v60 = vcombine.low %v10094_v21, %v10098_v40  ;;  %v10146_v21 = vld [vmem:[#allocation18 + $0x330] sm:$0xff]  ;;  %v10143_v40 = vld [vmem:[#allocation18 + $0x318] sm:$0xff] }
 0x901   :  { %13304 = vmatpush1.bf16.msra.mxu0 %v16306_v63  ;;  %13468 = vmatpush1.bf16.msra.mxu1 %v16308_v1  ;;  %v10066_v63 = vld [vmem:[#allocation18 + $0xb0] sm:$0xff]  ;;  %v10063_v1 = vld [vmem:[#allocation18 + $0x98] sm:$0xff] }
 0x902   :  { %13305 = vmatprep.subr.bf16.mxu0 %v16315_v45  ;;  %13469 = vmatprep.subr.bf16.mxu1 %v16317_v32  ;;  %v10067_v45 = vld [vmem:[#allocation18 + $0xb8] sm:$0xff]  ;;  %v15846_v32 = vcombine.low %v10054_v58, %v10058_v59  ;;  %v15855_v4 = vcombine.high %v10062_v62, %v10066_v63  ;;  %v10106_v58 = vld [vmem:[#allocation18 + $0x1f0] sm:$0xff] }
 0x903   :  { %v15857_v8 = vcombine.high %v10063_v1, %v10067_v45  ;;  %v15856_v50 = vcombine.low %v10063_v1, %v10067_v45  ;;  %v10103_v59 = vld [vmem:[#allocation18 + $0x1d8] sm:$0xff] }
 0x904   :  { %v10115_v1 = vld [vmem:[#allocation18 + $0x238] sm:$0xff] }
 0x905   :  { %13306 = vmatpush1.bf16.msra.mxu0 %v16314_v10  ;;  %13470 = vmatpush1.bf16.msra.mxu1 %v16316_v0  ;;  %v10074_v10 = vld [vmem:[#allocation18 + $0xf0] sm:$0xff]  ;;  %v10071_v0 = vld [vmem:[#allocation18 + $0xd8] sm:$0xff] }
 0x906   :  { %13307 = vmatprep.subr.bf16.mxu0 %v16323_v22  ;;  %13471 = vmatprep.subr.bf16.mxu1 %v16325_v12  ;;  %v10075_v22 = vld [vmem:[#allocation18 + $0xf8] sm:$0xff]  ;;  %v15854_v12 = vcombine.low %v10062_v62, %v10066_v63  ;;  %v15863_v16 = vcombine.high %v10070_v56, %v10074_v10  ;;  %v15862_v33 = vcombine.low %v10070_v56, %v10074_v10  ;;  %v10114_v62 = vld [vmem:[#allocation18 + $0x230] sm:$0xff] }
 0x907   :  { %v15865_v26 = vcombine.high %v10071_v0, %v10075_v22  ;;  %v10111_v63 = vld [vmem:[#allocation18 + $0x218] sm:$0xff]  ;;  %v10122_v56 = vld [vmem:[#allocation18 + $0x270] sm:$0xff] }
 0x908   :  { %v10119_v10 = vld [vmem:[#allocation18 + $0x258] sm:$0xff] }
 0x909   :  { %13308 = vmatpush1.bf16.msra.mxu0 %v16322_v34  ;;  %13472 = vmatpush1.bf16.msra.mxu1 %v16324_v3  ;;  %v10082_v34 = vld [vmem:[#allocation18 + $0x130] sm:$0xff]  ;;  %v10083_v3 = vld [vmem:[#allocation18 + $0x138] sm:$0xff] }
 0x90a   :  { %13309 = vmatprep.subr.bf16.mxu0 %v16331_v2  ;;  %13473 = vmatprep.subr.bf16.mxu1 %v16333_v36  ;;  %v15864_v2 = vcombine.low %v10071_v0, %v10075_v22  ;;  %v15871_v36 = vcombine.high %v10078_v29, %v10082_v34  ;;  %v10123_v0 = vld [vmem:[#allocation18 + $0x278] sm:$0xff] }
 0x90d   :  { %13310 = vmatpush1.bf16.msra.mxu0 %v16330_v42  ;;  %13474 = vmatpush1.bf16.msra.mxu1 %v16332_v43  ;;  %v10091_v42 = vld [vmem:[#allocation18 + $0x178] sm:$0xff]  ;;  %v15870_v43 = vcombine.low %v10078_v29, %v10082_v34  ;;  %v10130_v29 = vld [vmem:[#allocation18 + $0x2b0] sm:$0xff] }
 0x90e   :  { %13311 = vmatprep.subr.bf16.mxu0 %v16339_v49  ;;  %13475 = vmatprep.subr.bf16.mxu1 %v16341_v24  ;;  %v15879_v49 = vcombine.high %v10086_v38, %v10090_v37  ;;  %v15881_v24 = vcombine.high %v10087_v15, %v10091_v42  ;;  %v10127_v34 = vld [vmem:[#allocation18 + $0x298] sm:$0xff] }
 0x911   :  { %13312 = vmatpush1.bf16.msra.mxu0 %v16338_v48  ;;  %13476 = vmatpush1.bf16.msra.mxu1 %v16340_v51  ;;  %v15878_v48 = vcombine.low %v10086_v38, %v10090_v37  ;;  %v15880_v51 = vcombine.low %v10087_v15, %v10091_v42  ;;  %v10138_v38 = vld [vmem:[#allocation18 + $0x2f0] sm:$0xff]  ;;  %v10135_v37 = vld [vmem:[#allocation18 + $0x2d8] sm:$0xff] }
 0x912   :  { %13486 = vmatprep.subr.bf16.mxu0 %v15839_v31  ;;  %13650 = vmatprep.subr.bf16.mxu1 %v15841_v55  ;;  %v15889_v31 = vcombine.high %v10095_v13, %v10099_v47  ;;  %v10102_v55 = vld [vmem:[#allocation18 + $0x1d0] sm:$0xff]  ;;  %v10139_v15 = vld [vmem:[#allocation18 + $0x2f8] sm:$0xff] }
 0x913   :  { %v15894_v45 = vcombine.low %v10102_v55, %v10106_v58 }
 0x914   :  { %13314 = vmatmul.mubr.bf16.vlgmr.msra.gmra.mrb[28].mxu0 %v18040_v6  ;;  %13478 = vmatmul.mubr.bf16.vlgmr.msra.gmra.mrb[28].mxu1 %v18040_v6 }
 0x915   :  { %13487 = vmatpush1.bf16.msra.mxu0 %v15838_v25  ;;  %13518 = vmatprep.mubr.bf16.mxu0 %v17988_v11  ;;  %v15888_v25 = vcombine.low %v10095_v13, %v10099_v47  ;;  %v10147_v13 = vld [vmem:[#allocation18 + $0x338] sm:$0xff] }
 0x916   :  { %13651 = vmatpush1.bf16.msra.mxu1 %v15840_v27  ;;  %13682 = vmatprep.mubr.bf16.mxu1 %v17988_v11  ;;  %v10079_v11 = vld [vmem:[#allocation18 + $0x118] sm:$0xff]  ;;  %v15895_v27 = vcombine.high %v10102_v55, %v10106_v58  ;;  %v10154_v55 = vld [vmem:[#allocation18 + $0x370] sm:$0xff] }
 0x917   :  { %13488 = vmatprep.subr.bf16.mxu0 %v15847_v57  ;;  %13652 = vmatprep.subr.bf16.mxu1 %v15849_v61  ;;  %v15873_v46 = vcombine.high %v10079_v11, %v10083_v3  ;;  %v15872_v44 = vcombine.low %v10079_v11, %v10083_v3  ;;  %v15897_v57 = vcombine.high %v10103_v59, %v10107_v17  ;;  %v10110_v61 = vld [vmem:[#allocation18 + $0x210] sm:$0xff]  ;;  %v10131_v11 = vld [vmem:[#allocation18 + $0x2b8] sm:$0xff] }
 0x918   :  { %v15902_v22 = vcombine.low %v10110_v61, %v10114_v62  ;;  %v10151_v58 = vld [vmem:[#allocation18 + $0x358] sm:$0xff] }
 0x919   :  { %13489 = vmatpush1.bf16.msra.mxu0 %v15846_v32  ;;  %v15896_v32 = vcombine.low %v10103_v59, %v10107_v17  ;;  %v10155_v59 = vld [vmem:[#allocation18 + $0x378] sm:$0xff] }
 0x91a   :  { %13653 = vmatpush1.bf16.msra.mxu1 %v15848_v14  ;;  %13490 = vmatprep.subr.bf16.mxu0 %v15855_v4  ;;  %v15903_v14 = vcombine.high %v10110_v61, %v10114_v62  ;;  %v15905_v4 = vcombine.high %v10111_v63, %v10115_v1  ;;  %v10162_v61 = vld [vmem:[#allocation18 + $0x3b0] sm:$0xff]  ;;  %v10159_v62 = vld [vmem:[#allocation18 + $0x398] sm:$0xff] }
 0x91b   :  { %13654 = vmatprep.subr.bf16.mxu1 %v15857_v8  ;;  %v10118_v8 = vld [vmem:[#allocation18 + $0x250] sm:$0xff] }
 0x91c   :  { %v15910_v3 = vcombine.low %v10118_v8, %v10122_v56 }
 0x91d   :  { %13491 = vmatpush1.bf16.msra.mxu0 %v15854_v12  ;;  %v15904_v12 = vcombine.low %v10111_v63, %v10115_v1  ;;  %v10163_v63 = vld [vmem:[#allocation18 + $0x3b8] sm:$0xff] }
 0x91e   :  { %13655 = vmatpush1.bf16.msra.mxu1 %v15856_v50  ;;  %13492 = vmatprep.subr.bf16.mxu0 %v15863_v16  ;;  %v15911_v50 = vcombine.high %v10118_v8, %v10122_v56  ;;  %v15913_v16 = vcombine.high %v10119_v10, %v10123_v0  ;;  %v10170_v8 = vld [vmem:[#allocation18 + $0x3f0] sm:$0xff]  ;;  %v10167_v56 = vld [vmem:[#allocation18 + $0x3d8] sm:$0xff] }
 0x91f   :  { %13656 = vmatprep.subr.bf16.mxu1 %v15865_v26  ;;  %v10126_v26 = vld [vmem:[#allocation18 + $0x290] sm:$0xff] }
 0x920   :  { %v15918_v42 = vcombine.low %v10126_v26, %v10130_v29 }
 0x921   :  { %13493 = vmatpush1.bf16.msra.mxu0 %v15862_v33  ;;  %v15912_v33 = vcombine.low %v10119_v10, %v10123_v0  ;;  %v10171_v10 = vld [vmem:[#allocation18 + $0x3f8] sm:$0xff] }
 0x922   :  { %13657 = vmatpush1.bf16.msra.mxu1 %v15864_v2  ;;  %13494 = vmatprep.subr.bf16.mxu0 %v15871_v36  ;;  %v15919_v2 = vcombine.high %v10126_v26, %v10130_v29  ;;  %v15921_v36 = vcombine.high %v10127_v34, %v10131_v11  ;;  %v10178_v26 = vld [vmem:[#allocation18 + $0x430] sm:$0xff]  ;;  %v10175_v29 = vld [vmem:[#allocation18 + $0x418] sm:$0xff] }
 0x923   :  { %13658 = vmatprep.subr.bf16.mxu1 %v15873_v46  ;;  %v10134_v46 = vld [vmem:[#allocation18 + $0x2d0] sm:$0xff] }
 0x924   :  { %v15926_v47 = vcombine.low %v10134_v46, %v10138_v38 }
 0x925   :  { %13495 = vmatpush1.bf16.msra.mxu0 %v15870_v43  ;;  %v15920_v43 = vcombine.low %v10127_v34, %v10131_v11  ;;  %v10179_v34 = vld [vmem:[#allocation18 + $0x438] sm:$0xff] }
 0x926   :  { %13659 = vmatpush1.bf16.msra.mxu1 %v15872_v44  ;;  %13496 = vmatprep.subr.bf16.mxu0 %v15879_v49  ;;  %v15927_v44 = vcombine.high %v10134_v46, %v10138_v38  ;;  %v15929_v49 = vcombine.high %v10135_v37, %v10139_v15  ;;  %v10186_v46 = vld [vmem:[#allocation18 + $0x470] sm:$0xff] }
 0x927   :  { %13660 = vmatprep.subr.bf16.mxu1 %v15881_v24  ;;  %v10142_v24 = vld [vmem:[#allocation18 + $0x310] sm:$0xff] }
 0x928   :  { %v15934_v17 = vcombine.low %v10142_v24, %v10146_v21 }
 0x929   :  { %13497 = vmatpush1.bf16.msra.mxu0 %v15878_v48  ;;  %v15928_v48 = vcombine.low %v10135_v37, %v10139_v15  ;;  %v10183_v37 = vld [vmem:[#allocation18 + $0x458] sm:$0xff] }
 0x92a   :  { %13661 = vmatpush1.bf16.msra.mxu1 %v15880_v51  ;;  %13498 = vmatprep.subr.bf16.mxu0 %v15887_v53  ;;  %v15935_v51 = vcombine.high %v10142_v24, %v10146_v21  ;;  %v15937_v53 = vcombine.high %v10143_v40, %v10147_v13  ;;  %v10187_v15 = vld [vmem:[#allocation18 + $0x478] sm:$0xff] }
 0x92b   :  { %13662 = vmatprep.subr.bf16.mxu1 %v15889_v31  ;;  %v10150_v31 = vld [vmem:[#allocation18 + $0x350] sm:$0xff]  ;;  %v15977_v24 = vcombine.high %v10183_v37, %v10187_v15  ;;  %v10191_v21 = vld [vmem:[#allocation18 + $0x498] sm:$0xff] }
 0x92c   :  { %v15942_v1 = vcombine.low %v10150_v31, %v10154_v55 }
 0x92d   :  { %13499 = vmatpush1.bf16.msra.mxu0 %v15886_v60  ;;  %v15936_v60 = vcombine.low %v10143_v40, %v10147_v13  ;;  %v10195_v40 = vld [vmem:[#allocation18 + $0x4b8] sm:$0xff] }
 0x92e   :  { %13663 = vmatpush1.bf16.msra.mxu1 %v15888_v25  ;;  %13500 = vmatprep.subr.bf16.mxu0 %v15895_v27  ;;  %v15943_v25 = vcombine.high %v10150_v31, %v10154_v55  ;;  %v15945_v27 = vcombine.high %v10151_v58, %v10155_v59  ;;  %v10202_v31 = vld [vmem:[#allocation18 + $0x4f0] sm:$0xff]  ;;  %v10199_v55 = vld [vmem:[#allocation18 + $0x4d8] sm:$0xff] }
 0x92f   :  { %13664 = vmatprep.subr.bf16.mxu1 %v15897_v57  ;;  %v10158_v57 = vld [vmem:[#allocation18 + $0x390] sm:$0xff] }
 0x930   :  { %v15950_v0 = vcombine.low %v10158_v57, %v10162_v61 }
 0x931   :  { %13501 = vmatpush1.bf16.msra.mxu0 %v15894_v45  ;;  %v15944_v45 = vcombine.low %v10151_v58, %v10155_v59  ;;  %v10203_v58 = vld [vmem:[#allocation18 + $0x4f8] sm:$0xff] }
 0x932   :  { %13665 = vmatpush1.bf16.msra.mxu1 %v15896_v32  ;;  %13502 = vmatprep.subr.bf16.mxu0 %v15903_v14  ;;  %v15951_v32 = vcombine.high %v10158_v57, %v10162_v61  ;;  %v15953_v14 = vcombine.high %v10159_v62, %v10163_v63  ;;  %v10207_v57 = vld [vmem:[#allocation18 + $0x518] sm:$0xff] }
 0x933   :  { %13666 = vmatprep.subr.bf16.mxu1 %v15905_v4  ;;  %v10166_v4 = vld [vmem:[#allocation18 + $0x3d0] sm:$0xff]  ;;  %v10211_v61 = vld [vmem:[#allocation18 + $0x538] sm:$0xff] }
 0x934   :  { %v15958_v11 = vcombine.low %v10166_v4, %v10170_v8 }
 0x935   :  { %13503 = vmatpush1.bf16.msra.mxu0 %v15902_v22  ;;  %v15952_v22 = vcombine.low %v10159_v62, %v10163_v63  ;;  %v15992_v62 = vcombine.low %v10199_v55, %v10203_v58 }
 0x936   :  { %13667 = vmatpush1.bf16.msra.mxu1 %v15904_v12  ;;  %13504 = vmatprep.subr.bf16.mxu0 %v15911_v50  ;;  %v15959_v12 = vcombine.high %v10166_v4, %v10170_v8  ;;  %v15961_v50 = vcombine.high %v10167_v56, %v10171_v10  ;;  %v10219_v4 = vld [vmem:[#allocation18 + $0x578] sm:$0xff] }
 0x937   :  { %13668 = vmatprep.subr.bf16.mxu1 %v15913_v16  ;;  %v10174_v16 = vld [vmem:[#allocation18 + $0x410] sm:$0xff] }
 0x938   :  { %v15966_v38 = vcombine.low %v10174_v16, %v10178_v26 }
 0x939   :  { %13505 = vmatpush1.bf16.msra.mxu0 %v15910_v3  ;;  %v15960_v3 = vcombine.low %v10167_v56, %v10171_v10  ;;  %v16000_v56 = vcombine.low %v10207_v57, %v10211_v61 }
 0x93a   :  { %13669 = vmatpush1.bf16.msra.mxu1 %v15912_v33  ;;  %13506 = vmatprep.subr.bf16.mxu0 %v15919_v2  ;;  %v15967_v33 = vcombine.high %v10174_v16, %v10178_v26  ;;  %v15969_v2 = vcombine.high %v10175_v29, %v10179_v34  ;;  %v10227_v16 = vld [vmem:[#allocation18 + $0x5b8] sm:$0xff] }
 0x93b   :  { %13670 = vmatprep.subr.bf16.mxu1 %v15921_v36  ;;  %v10182_v36 = vld [vmem:[#allocation18 + $0x450] sm:$0xff] }
 0x93c   :  { %v15974_v13 = vcombine.low %v10182_v36, %v10186_v46 }
 0x93d   :  { %13507 = vmatpush1.bf16.msra.mxu0 %v15918_v42  ;;  %v15968_v42 = vcombine.low %v10175_v29, %v10179_v34 }
 0x93e   :  { %13671 = vmatpush1.bf16.msra.mxu1 %v15920_v43  ;;  %13508 = vmatprep.subr.bf16.mxu0 %v15927_v44  ;;  %v15975_v43 = vcombine.high %v10182_v36, %v10186_v46  ;;  %v10190_v44 = vld [vmem:[#allocation18 + $0x490] sm:$0xff]  ;;  %v10235_v36 = vld [vmem:[#allocation18 + $0x5f8] sm:$0xff] }
 0x93f   :  { %13672 = vmatprep.subr.bf16.mxu1 %v15929_v49  ;;  %v10194_v49 = vld [vmem:[#allocation18 + $0x4b0] sm:$0xff] }
 0x940   :  { %v15982_v59 = vcombine.low %v10190_v44, %v10194_v49 }
 0x941   :  { %13509 = vmatpush1.bf16.msra.mxu0 %v15926_v47  ;;  %v15976_v47 = vcombine.low %v10183_v37, %v10187_v15 }
 0x942   :  { %13673 = vmatpush1.bf16.msra.mxu1 %v15928_v48  ;;  %13510 = vmatprep.subr.bf16.mxu0 %v15935_v51  ;;  %v15983_v48 = vcombine.high %v10190_v44, %v10194_v49  ;;  %v15985_v51 = vcombine.high %v10191_v21, %v10195_v40  ;;  %v10239_v44 = vld [vmem:[#allocation18 + $0x618] sm:$0xff] }
 0x943   :  { %13674 = vmatprep.subr.bf16.mxu1 %v15937_v53  ;;  %v10198_v53 = vld [vmem:[#allocation18 + $0x4d0] sm:$0xff]  ;;  %v10243_v49 = vld [vmem:[#allocation18 + $0x638] sm:$0xff] }
 0x945   :  { %13511 = vmatpush1.bf16.msra.mxu0 %v15934_v17  ;;  %v15991_v17 = vcombine.high %v10198_v53, %v10202_v31 }
 0x946   :  { %13675 = vmatpush1.bf16.msra.mxu1 %v15936_v60  ;;  %13512 = vmatprep.subr.bf16.mxu0 %v15943_v25  ;;  %v15993_v60 = vcombine.high %v10199_v55, %v10203_v58  ;;  %v10206_v25 = vld [vmem:[#allocation18 + $0x510] sm:$0xff]  ;;  %v16032_v55 = vcombine.low %v10239_v44, %v10243_v49 }
 0x947   :  { %13676 = vmatprep.subr.bf16.mxu1 %v15945_v27  ;;  %v10210_v27 = vld [vmem:[#allocation18 + $0x530] sm:$0xff] }
 0x948   :  { %v15999_v63 = vcombine.high %v10206_v25, %v10210_v27  ;;  %v15998_v8 = vcombine.low %v10206_v25, %v10210_v27  ;;  %v10259_v25 = vld [vmem:[#allocation18 + $0x6b8] sm:$0xff] }
 0x949   :  { %13513 = vmatpush1.bf16.msra.mxu0 %v15942_v1  ;;  %v16001_v1 = vcombine.high %v10207_v57, %v10211_v61 }
 0x94a   :  { %13677 = vmatpush1.bf16.msra.mxu1 %v15944_v45  ;;  %13514 = vmatprep.subr.bf16.mxu0 %v15951_v32  ;;  %v10214_v45 = vld [vmem:[#allocation18 + $0x550] sm:$0xff] }
 0x94b   :  { %13678 = vmatprep.subr.bf16.mxu1 %v15953_v14  ;;  %v10218_v32 = vld [vmem:[#allocation18 + $0x570] sm:$0xff]  ;;  %v10215_v14 = vld [vmem:[#allocation18 + $0x558] sm:$0xff] }
 0x94c   :  { %v16007_v10 = vcombine.high %v10214_v45, %v10218_v32  ;;  %v16006_v26 = vcombine.low %v10214_v45, %v10218_v32  ;;  %v16008_v29 = vcombine.low %v10215_v14, %v10219_v4  ;;  %v10267_v45 = vld [vmem:[#allocation18 + $0x6f8] sm:$0xff] }
 0x94d   :  { %13515 = vmatpush1.bf16.msra.mxu0 %v15950_v0  ;;  %v16009_v0 = vcombine.high %v10215_v14, %v10219_v4 }
 0x94e   :  { %13679 = vmatpush1.bf16.msra.mxu1 %v15952_v22  ;;  %13516 = vmatprep.subr.bf16.mxu0 %v15959_v12  ;;  %v10222_v22 = vld [vmem:[#allocation18 + $0x590] sm:$0xff] }
 0x94f   :  { %13680 = vmatprep.subr.bf16.mxu1 %v15961_v50  ;;  %v10226_v12 = vld [vmem:[#allocation18 + $0x5b0] sm:$0xff]  ;;  %v10223_v50 = vld [vmem:[#allocation18 + $0x598] sm:$0xff] }
 0x950   :  { %v16015_v34 = vcombine.high %v10222_v22, %v10226_v12  ;;  %v16014_v46 = vcombine.low %v10222_v22, %v10226_v12  ;;  %v10275_v22 = vld [vmem:[#allocation18 + $0x738] sm:$0xff] }
 0x951   :  { %13517 = vmatpush1.bf16.msra.mxu0 %v15958_v11  ;;  %v16017_v11 = vcombine.high %v10223_v50, %v10227_v16 }
 0x952   :  { %13681 = vmatpush1.bf16.msra.mxu1 %v15960_v3  ;;  %13527 = vmatprep.subr.bf16.mxu0 %v15967_v33  ;;  %v10230_v3 = vld [vmem:[#allocation18 + $0x5d0] sm:$0xff] }
 0x953   :  { %13691 = vmatprep.subr.bf16.mxu1 %v15969_v2  ;;  %v10234_v33 = vld [vmem:[#allocation18 + $0x5f0] sm:$0xff]  ;;  %v10231_v2 = vld [vmem:[#allocation18 + $0x5d8] sm:$0xff] }
 0x954   :  { %13519 = vmatmul.mubr.bf16.vlgmr.msra.gmra.mrb[32].mxu0 %v18000_v18  ;;  %v16023_v37 = vcombine.high %v10230_v3, %v10234_v33  ;;  %v16025_v15 = vcombine.high %v10231_v2, %v10235_v36 }
 0x955   :  { %13683 = vmatmul.mubr.bf16.vlgmr.msra.gmra.mrb[32].mxu1 %v18000_v18  ;;  %13528 = vmatpush1.bf16.msra.mxu0 %v15966_v38  ;;  %v15984_v18 = vcombine.low %v10191_v21, %v10195_v40  ;;  %v16016_v38 = vcombine.low %v10223_v50, %v10227_v16  ;;  %v16024_v21 = vcombine.low %v10231_v2, %v10235_v36 }
 0x956   :  { %13559 = vmatprep.mubr.bf16.mxu0 %v18002_v7  ;;  %13692 = vmatpush1.bf16.msra.mxu1 %v15968_v42  ;;  %v10238_v42 = vld [vmem:[#allocation18 + $0x610] sm:$0xff] }
 0x957   :  { %13723 = vmatprep.mubr.bf16.mxu1 %v18002_v7  ;;  %13529 = vmatprep.subr.bf16.mxu0 %v15975_v43  ;;  %v15990_v7 = vcombine.low %v10198_v53, %v10202_v31  ;;  %v10242_v43 = vld [vmem:[#allocation18 + $0x630] sm:$0xff]  ;;  %v10251_v53 = vld [vmem:[#allocation18 + $0x678] sm:$0xff] }
 0x958   :  { %13693 = vmatprep.subr.bf16.mxu1 %v15977_v24  ;;  %v16022_v24 = vcombine.low %v10230_v3, %v10234_v33  ;;  %v16031_v40 = vcombine.high %v10238_v42, %v10242_v43  ;;  %v16030_v31 = vcombine.low %v10238_v42, %v10242_v43  ;;  %v10283_v3 = vld [vmem:[#allocation18 + $0x778] sm:$0xff] }
 0x959   :  { %13530 = vmatpush1.bf16.msra.mxu0 %v15974_v13  ;;  %v16033_v13 = vcombine.high %v10239_v44, %v10243_v49  ;;  %v10291_v42 = vld [vmem:[#allocation18 + $0x7b8] sm:$0xff] }
 0x95a   :  { %13694 = vmatpush1.bf16.msra.mxu1 %v15976_v47  ;;  %13531 = vmatprep.subr.bf16.mxu0 %v15983_v48  ;;  %v10246_v47 = vld [vmem:[#allocation18 + $0x650] sm:$0xff] }
 0x95b   :  { %13695 = vmatprep.subr.bf16.mxu1 %v15985_v51  ;;  %v10250_v48 = vld [vmem:[#allocation18 + $0x670] sm:$0xff]  ;;  %v10247_v51 = vld [vmem:[#allocation18 + $0x658] sm:$0xff] }
 0x95c   :  { %v16039_v58 = vcombine.high %v10246_v47, %v10250_v48  ;;  %v16038_v27 = vcombine.low %v10246_v47, %v10250_v48  ;;  %v16040_v57 = vcombine.low %v10247_v51, %v10251_v53  ;;  %v10299_v47 = vld [vmem:[#allocation18 + $0x7f8] sm:$0xff] }
 0x95d   :  { %13532 = vmatpush1.bf16.msra.mxu0 %v15982_v59  ;;  %v16041_v59 = vcombine.high %v10247_v51, %v10251_v53 }
 0x95e   :  { %13696 = vmatpush1.bf16.msra.mxu1 %v15984_v18  ;;  %13533 = vmatprep.subr.bf16.mxu0 %v15991_v17  ;;  %v10254_v18 = vld [vmem:[#allocation18 + $0x690] sm:$0xff] }
 0x95f   :  { %13697 = vmatprep.subr.bf16.mxu1 %v15993_v60  ;;  %v10258_v17 = vld [vmem:[#allocation18 + $0x6b0] sm:$0xff]  ;;  %v10255_v60 = vld [vmem:[#allocation18 + $0x698] sm:$0xff] }
 0x960   :  { %v16047_v61 = vcombine.high %v10254_v18, %v10258_v17  ;;  %v16046_v32 = vcombine.low %v10254_v18, %v10258_v17  ;;  %v16048_v14 = vcombine.low %v10255_v60, %v10259_v25  ;;  %v10307_v18 = vld [vmem:[#allocation18 + $0x838] sm:$0xff] }
 0x961   :  { %13534 = vmatpush1.bf16.msra.mxu0 %v15990_v7  ;;  %v16049_v7 = vcombine.high %v10255_v60, %v10259_v25 }
 0x962   :  { %13698 = vmatpush1.bf16.msra.mxu1 %v15992_v62  ;;  %13535 = vmatprep.subr.bf16.mxu0 %v15999_v63  ;;  %v10262_v62 = vld [vmem:[#allocation18 + $0x6d0] sm:$0xff] }
 0x963   :  { %13699 = vmatprep.subr.bf16.mxu1 %v16001_v1  ;;  %v10266_v63 = vld [vmem:[#allocation18 + $0x6f0] sm:$0xff]  ;;  %v10263_v1 = vld [vmem:[#allocation18 + $0x6d8] sm:$0xff] }
 0x964   :  { %v16055_v4 = vcombine.high %v10262_v62, %v10266_v63  ;;  %v16054_v12 = vcombine.low %v10262_v62, %v10266_v63  ;;  %v16056_v50 = vcombine.low %v10263_v1, %v10267_v45  ;;  %v10311_v62 = vld [vmem:[#allocation18 + $0x858] sm:$0xff] }
 0x965   :  { %13536 = vmatpush1.bf16.msra.mxu0 %v15998_v8  ;;  %v16057_v8 = vcombine.high %v10263_v1, %v10267_v45  ;;  %v10315_v63 = vld [vmem:[#allocation18 + $0x878] sm:$0xff] }
 0x966   :  { %13700 = vmatpush1.bf16.msra.mxu1 %v16000_v56  ;;  %13537 = vmatprep.subr.bf16.mxu0 %v16007_v10  ;;  %v10270_v56 = vld [vmem:[#allocation18 + $0x710] sm:$0xff] }
 0x967   :  { %13701 = vmatprep.subr.bf16.mxu1 %v16009_v0  ;;  %v10274_v10 = vld [vmem:[#allocation18 + $0x730] sm:$0xff]  ;;  %v10271_v0 = vld [vmem:[#allocation18 + $0x718] sm:$0xff] }
 0x968   :  { %v16063_v16 = vcombine.high %v10270_v56, %v10274_v10  ;;  %v16062_v33 = vcombine.low %v10270_v56, %v10274_v10  ;;  %v16064_v2 = vcombine.low %v10271_v0, %v10275_v22  ;;  %v10323_v56 = vld [vmem:[#allocation18 + $0x8b8] sm:$0xff] }
 0x969   :  { %13538 = vmatpush1.bf16.msra.mxu0 %v16006_v26  ;;  %v16065_v26 = vcombine.high %v10271_v0, %v10275_v22  ;;  %v16104_v0 = vcombine.low %v10311_v62, %v10315_v63 }
 0x96a   :  { %13702 = vmatpush1.bf16.msra.mxu1 %v16008_v29  ;;  %13539 = vmatprep.subr.bf16.mxu0 %v16015_v34  ;;  %v10278_v29 = vld [vmem:[#allocation18 + $0x750] sm:$0xff] }
 0x96b   :  { %13703 = vmatprep.subr.bf16.mxu1 %v16017_v11  ;;  %v10282_v34 = vld [vmem:[#allocation18 + $0x770] sm:$0xff]  ;;  %v10279_v11 = vld [vmem:[#allocation18 + $0x758] sm:$0xff] }
 0x96c   :  { %v16071_v36 = vcombine.high %v10278_v29, %v10282_v34  ;;  %v16070_v43 = vcombine.low %v10278_v29, %v10282_v34  ;;  %v16072_v44 = vcombine.low %v10279_v11, %v10283_v3  ;;  %v10331_v29 = vld [vmem:[#allocation18 + $0x8f8] sm:$0xff] }
 0x96d   :  { %13540 = vmatpush1.bf16.msra.mxu0 %v16014_v46  ;;  %v16073_v46 = vcombine.high %v10279_v11, %v10283_v3 }
 0x96e   :  { %13704 = vmatpush1.bf16.msra.mxu1 %v16016_v38  ;;  %13541 = vmatprep.subr.bf16.mxu0 %v16023_v37  ;;  %v10286_v38 = vld [vmem:[#allocation18 + $0x790] sm:$0xff] }
 0x96f   :  { %13705 = vmatprep.subr.bf16.mxu1 %v16025_v15  ;;  %v10290_v37 = vld [vmem:[#allocation18 + $0x7b0] sm:$0xff]  ;;  %v10287_v15 = vld [vmem:[#allocation18 + $0x798] sm:$0xff] }
 0x970   :  { %v16079_v49 = vcombine.high %v10286_v38, %v10290_v37  ;;  %v16078_v48 = vcombine.low %v10286_v38, %v10290_v37  ;;  %v16080_v51 = vcombine.low %v10287_v15, %v10291_v42 }
 0x971   :  { %13542 = vmatpush1.bf16.msra.mxu0 %v16022_v24  ;;  %v16081_v24 = vcombine.high %v10287_v15, %v10291_v42  ;;  %v10342_v42 = vld [vmem:[#allocation18 + $0x950] sm:$0xff] }
 0x972   :  { %13706 = vmatpush1.bf16.msra.mxu1 %v16024_v21  ;;  %13543 = vmatprep.subr.bf16.mxu0 %v16031_v40  ;;  %v10294_v21 = vld [vmem:[#allocation18 + $0x7d0] sm:$0xff] }
 0x973   :  { %13707 = vmatprep.subr.bf16.mxu1 %v16033_v13  ;;  %v10298_v40 = vld [vmem:[#allocation18 + $0x7f0] sm:$0xff]  ;;  %v10295_v13 = vld [vmem:[#allocation18 + $0x7d8] sm:$0xff] }
 0x974   :  { %v16087_v53 = vcombine.high %v10294_v21, %v10298_v40  ;;  %v16086_v17 = vcombine.low %v10294_v21, %v10298_v40  ;;  %v16088_v60 = vcombine.low %v10295_v13, %v10299_v47 }
 0x975   :  { %13544 = vmatpush1.bf16.msra.mxu0 %v16030_v31  ;;  %v16089_v31 = vcombine.high %v10295_v13, %v10299_v47  ;;  %v10350_v47 = vld [vmem:[#allocation18 + $0x990] sm:$0xff] }
 0x976   :  { %13708 = vmatpush1.bf16.msra.mxu1 %v16032_v55  ;;  %13545 = vmatprep.subr.bf16.mxu0 %v16039_v58  ;;  %v10302_v55 = vld [vmem:[#allocation18 + $0x810] sm:$0xff] }
 0x977   :  { %13709 = vmatprep.subr.bf16.mxu1 %v16041_v59  ;;  %v10306_v58 = vld [vmem:[#allocation18 + $0x830] sm:$0xff]  ;;  %v10303_v59 = vld [vmem:[#allocation18 + $0x818] sm:$0xff] }
 0x978   :  { %v16095_v25 = vcombine.high %v10302_v55, %v10306_v58  ;;  %v16096_v1 = vcombine.low %v10303_v59, %v10307_v18 }
 0x979   :  { %13546 = vmatpush1.bf16.msra.mxu0 %v16038_v27  ;;  %v16097_v27 = vcombine.high %v10303_v59, %v10307_v18  ;;  %v10358_v18 = vld [vmem:[#allocation18 + $0x9d0] sm:$0xff] }
 0x97a   :  { %13710 = vmatpush1.bf16.msra.mxu1 %v16040_v57  ;;  %13547 = vmatprep.subr.bf16.mxu0 %v16047_v61  ;;  %v10310_v57 = vld [vmem:[#allocation18 + $0x850] sm:$0xff] }
 0x97b   :  { %13711 = vmatprep.subr.bf16.mxu1 %v16049_v7  ;;  %v10314_v61 = vld [vmem:[#allocation18 + $0x870] sm:$0xff]  ;;  %v16094_v7 = vcombine.low %v10302_v55, %v10306_v58 }
 0x97c   :  { %v16103_v45 = vcombine.high %v10310_v57, %v10314_v61  ;;  %v16102_v10 = vcombine.low %v10310_v57, %v10314_v61 }
 0x97d   :  { %13548 = vmatpush1.bf16.msra.mxu0 %v16046_v32  ;;  %v10318_v32 = vld [vmem:[#allocation18 + $0x890] sm:$0xff] }
 0x97e   :  { %13712 = vmatpush1.bf16.msra.mxu1 %v16048_v14  ;;  %13549 = vmatprep.subr.bf16.mxu0 %v16055_v4  ;;  %v10322_v14 = vld [vmem:[#allocation18 + $0x8b0] sm:$0xff]  ;;  %v16105_v4 = vcombine.high %v10311_v62, %v10315_v63 }
 0x97f   :  { %13713 = vmatprep.subr.bf16.mxu1 %v16057_v8  ;;  %v10319_v8 = vld [vmem:[#allocation18 + $0x898] sm:$0xff]  ;;  %v16111_v22 = vcombine.high %v10318_v32, %v10322_v14  ;;  %v16110_v34 = vcombine.low %v10318_v32, %v10322_v14  ;;  %v10366_v62 = vld [vmem:[#allocation18 + $0xa10] sm:$0xff] }
 0x980   :  { %v10370_v63 = vld [vmem:[#allocation18 + $0xa30] sm:$0xff] }
 0x981   :  { %13550 = vmatpush1.bf16.msra.mxu0 %v16054_v12  ;;  %v16113_v12 = vcombine.high %v10319_v8, %v10323_v56 }
 0x982   :  { %13714 = vmatpush1.bf16.msra.mxu1 %v16056_v50  ;;  %13551 = vmatprep.subr.bf16.mxu0 %v16063_v16  ;;  %v10326_v50 = vld [vmem:[#allocation18 + $0x8d0] sm:$0xff] }
 0x983   :  { %13715 = vmatprep.subr.bf16.mxu1 %v16065_v26  ;;  %v10330_v16 = vld [vmem:[#allocation18 + $0x8f0] sm:$0xff]  ;;  %v10327_v26 = vld [vmem:[#allocation18 + $0x8d8] sm:$0xff] }
 0x984   :  { %v16119_v11 = vcombine.high %v10326_v50, %v10330_v16  ;;  %v16121_v3 = vcombine.high %v10327_v26, %v10331_v29  ;;  %v16120_v38 = vcombine.low %v10327_v26, %v10331_v29  ;;  %v10382_v29 = vld [vmem:[#allocation18 + $0xa90] sm:$0xff] }
 0x985   :  { %13552 = vmatpush1.bf16.msra.mxu0 %v16062_v33  ;;  %v10334_v33 = vld [vmem:[#allocation18 + $0x910] sm:$0xff] }
 0x986   :  { %13716 = vmatpush1.bf16.msra.mxu1 %v16064_v2  ;;  %13553 = vmatprep.subr.bf16.mxu0 %v16071_v36  ;;  %v10338_v2 = vld [vmem:[#allocation18 + $0x930] sm:$0xff]  ;;  %v10335_v36 = vld [vmem:[#allocation18 + $0x918] sm:$0xff] }
 0x987   :  { %13717 = vmatprep.subr.bf16.mxu1 %v16073_v46  ;;  %v10339_v46 = vld [vmem:[#allocation18 + $0x938] sm:$0xff]  ;;  %v16127_v37 = vcombine.high %v10334_v33, %v10338_v2 }
 0x988   :  { %v16129_v15 = vcombine.high %v10335_v36, %v10339_v46  ;;  %v16128_v21 = vcombine.low %v10335_v36, %v10339_v46  ;;  %v10390_v46 = vld [vmem:[#allocation18 + $0xad0] sm:$0xff] }
 0x989   :  { %13554 = vmatpush1.bf16.msra.mxu0 %v16070_v43  ;;  %v10346_v43 = vld [vmem:[#allocation18 + $0x970] sm:$0xff] }
 0x98a   :  { %13718 = vmatpush1.bf16.msra.mxu1 %v16072_v44  ;;  %13555 = vmatprep.subr.bf16.mxu0 %v16079_v49  ;;  %v10343_v44 = vld [vmem:[#allocation18 + $0x958] sm:$0xff]  ;;  %v16135_v40 = vcombine.high %v10342_v42, %v10346_v43 }
 0x98b   :  { %13719 = vmatprep.subr.bf16.mxu1 %v16081_v24  ;;  %v10347_v49 = vld [vmem:[#allocation18 + $0x978] sm:$0xff]  ;;  %v16126_v24 = vcombine.low %v10334_v33, %v10338_v2 }
 0x98c   :  { %v16137_v13 = vcombine.high %v10343_v44, %v10347_v49  ;;  %v16136_v55 = vcombine.low %v10343_v44, %v10347_v49  ;;  %v10398_v49 = vld [vmem:[#allocation18 + $0xb10] sm:$0xff] }
 0x98d   :  { %13556 = vmatpush1.bf16.msra.mxu0 %v16078_v48  ;;  %v10354_v48 = vld [vmem:[#allocation18 + $0x9b0] sm:$0xff] }
 0x98e   :  { %13720 = vmatpush1.bf16.msra.mxu1 %v16080_v51  ;;  %13557 = vmatprep.subr.bf16.mxu0 %v16087_v53  ;;  %v10351_v51 = vld [vmem:[#allocation18 + $0x998] sm:$0xff]  ;;  %v16143_v58 = vcombine.high %v10350_v47, %v10354_v48 }
 0x98f   :  { %13721 = vmatprep.subr.bf16.mxu1 %v16089_v31  ;;  %v10355_v53 = vld [vmem:[#allocation18 + $0x9b8] sm:$0xff]  ;;  %v16134_v31 = vcombine.low %v10342_v42, %v10346_v43 }
 0x990   :  { %v16145_v59 = vcombine.high %v10351_v51, %v10355_v53  ;;  %v16144_v57 = vcombine.low %v10351_v51, %v10355_v53  ;;  %v10406_v53 = vld [vmem:[#allocation18 + $0xb50] sm:$0xff] }
 0x991   :  { %13558 = vmatpush1.bf16.msra.mxu0 %v16086_v17  ;;  %v10362_v17 = vld [vmem:[#allocation18 + $0x9f0] sm:$0xff] }
 0x992   :  { %13722 = vmatpush1.bf16.msra.mxu1 %v16088_v60  ;;  %13568 = vmatprep.subr.bf16.mxu0 %v16095_v25  ;;  %v10359_v60 = vld [vmem:[#allocation18 + $0x9d8] sm:$0xff]  ;;  %v16151_v61 = vcombine.high %v10358_v18, %v10362_v17  ;;  %v16150_v32 = vcombine.low %v10358_v18, %v10362_v17 }
 0x993   :  { %13732 = vmatprep.subr.bf16.mxu1 %v16097_v27  ;;  %v10363_v25 = vld [vmem:[#allocation18 + $0x9f8] sm:$0xff]  ;;  %v16142_v27 = vcombine.low %v10350_v47, %v10354_v48 }
 0x994   :  { %13560 = vmatmul.mubr.bf16.vlgmr.msra.gmra.mrb[32].mxu0 %v18011_v23  ;;  %v16152_v14 = vcombine.low %v10359_v60, %v10363_v25 }
 0x995   :  { %13724 = vmatmul.mubr.bf16.vlgmr.msra.gmra.mrb[32].mxu1 %v18011_v23  ;;  %13569 = vmatpush1.bf16.msra.mxu0 %v16094_v7  ;;  %v16112_v23 = vcombine.low %v10319_v8, %v10323_v56  ;;  %v16153_v7 = vcombine.high %v10359_v60, %v10363_v25  ;;  %v10374_v56 = vld [vmem:[#allocation18 + $0xa50] sm:$0xff] }
 0x996   :  { %13600 = vmatprep.mubr.bf16.mxu0 %v18025_v5  ;;  %13733 = vmatpush1.bf16.msra.mxu1 %v16096_v1  ;;  %v10367_v1 = vld [vmem:[#allocation18 + $0xa18] sm:$0xff]  ;;  %v10414_v25 = vld [vmem:[#allocation18 + $0xb90] sm:$0xff] }
 0x997   :  { %13764 = vmatprep.mubr.bf16.mxu1 %v18025_v5  ;;  %13570 = vmatprep.subr.bf16.mxu0 %v16103_v45  ;;  %v16118_v5 = vcombine.low %v10326_v50, %v10330_v16  ;;  %v10371_v45 = vld [vmem:[#allocation18 + $0xa38] sm:$0xff] }
 0x998   :  { %13734 = vmatprep.subr.bf16.mxu1 %v16105_v4  ;;  %v16159_v4 = vcombine.high %v10366_v62, %v10370_v63  ;;  %v16161_v8 = vcombine.high %v10367_v1, %v10371_v45  ;;  %v16160_v50 = vcombine.low %v10367_v1, %v10371_v45  ;;  %v10422_v45 = vld [vmem:[#allocation18 + $0xbd0] sm:$0xff] }
 0x999   :  { %13571 = vmatpush1.bf16.msra.mxu0 %v16102_v10  ;;  %v10378_v10 = vld [vmem:[#allocation18 + $0xa70] sm:$0xff] }
 0x99a   :  { %13735 = vmatpush1.bf16.msra.mxu1 %v16104_v0  ;;  %13572 = vmatprep.subr.bf16.mxu0 %v16111_v22  ;;  %v10375_v0 = vld [vmem:[#allocation18 + $0xa58] sm:$0xff]  ;;  %v16167_v16 = vcombine.high %v10374_v56, %v10378_v10 }
 0x99b   :  { %13736 = vmatprep.subr.bf16.mxu1 %v16113_v12  ;;  %v10379_v22 = vld [vmem:[#allocation18 + $0xa78] sm:$0xff]  ;;  %v16158_v12 = vcombine.low %v10366_v62, %v10370_v63 }
 0x99c   :  { %v16169_v26 = vcombine.high %v10375_v0, %v10379_v22  ;;  %v16168_v33 = vcombine.low %v10375_v0, %v10379_v22  ;;  %v10430_v22 = vld [vmem:[#allocation18 + $0xc10] sm:$0xff] }
 0x99d   :  { %13573 = vmatpush1.bf16.msra.mxu0 %v16110_v34  ;;  %v10386_v34 = vld [vmem:[#allocation18 + $0xab0] sm:$0xff] }
 0x99e   :  { %13737 = vmatpush1.bf16.msra.mxu1 %v16112_v23  ;;  %13574 = vmatprep.subr.bf16.mxu0 %v16119_v11  ;;  %v10383_v23 = vld [vmem:[#allocation18 + $0xa98] sm:$0xff]  ;;  %v16175_v2 = vcombine.high %v10382_v29, %v10386_v34 }
 0x99f   :  { %13738 = vmatprep.subr.bf16.mxu1 %v16121_v3  ;;  %v10387_v11 = vld [vmem:[#allocation18 + $0xab8] sm:$0xff]  ;;  %v16166_v3 = vcombine.low %v10374_v56, %v10378_v10 }
 0x9a0   :  { %v16177_v36 = vcombine.high %v10383_v23, %v10387_v11  ;;  %v16176_v42 = vcombine.low %v10383_v23, %v10387_v11  ;;  %v10438_v11 = vld [vmem:[#allocation18 + $0xc50] sm:$0xff] }
 0x9a1   :  { %13575 = vmatpush1.bf16.msra.mxu0 %v16118_v5  ;;  %v10394_v5 = vld [vmem:[#allocation18 + $0xaf0] sm:$0xff] }
 0x9a2   :  { %13739 = vmatpush1.bf16.msra.mxu1 %v16120_v38  ;;  %13576 = vmatprep.subr.bf16.mxu0 %v16127_v37  ;;  %v10391_v38 = vld [vmem:[#allocation18 + $0xad8] sm:$0xff]  ;;  %v16183_v43 = vcombine.high %v10390_v46, %v10394_v5 }
 0x9a3   :  { %13740 = vmatprep.subr.bf16.mxu1 %v16129_v15  ;;  %v10395_v37 = vld [vmem:[#allocation18 + $0xaf8] sm:$0xff]  ;;  %v16174_v15 = vcombine.low %v10382_v29, %v10386_v34 }
 0x9a4   :  { %v16185_v44 = vcombine.high %v10391_v38, %v10395_v37  ;;  %v16184_v47 = vcombine.low %v10391_v38, %v10395_v37  ;;  %v10446_v38 = vld [vmem:[#allocation18 + $0xc90] sm:$0xff] }
 0x9a5   :  { %13577 = vmatpush1.bf16.msra.mxu0 %v16126_v24  ;;  %v10402_v24 = vld [vmem:[#allocation18 + $0xb30] sm:$0xff] }
 0x9a6   :  { %13741 = vmatpush1.bf16.msra.mxu1 %v16128_v21  ;;  %13578 = vmatprep.subr.bf16.mxu0 %v16135_v40  ;;  %v10399_v21 = vld [vmem:[#allocation18 + $0xb18] sm:$0xff]  ;;  %v16191_v48 = vcombine.high %v10398_v49, %v10402_v24  ;;  %v10450_v37 = vld [vmem:[#allocation18 + $0xcb0] sm:$0xff] }
 0x9a7   :  { %13742 = vmatprep.subr.bf16.mxu1 %v16137_v13  ;;  %v10403_v40 = vld [vmem:[#allocation18 + $0xb38] sm:$0xff]  ;;  %v16182_v13 = vcombine.low %v10390_v46, %v10394_v5 }
 0x9a8   :  { %v16193_v51 = vcombine.high %v10399_v21, %v10403_v40  ;;  %v16192_v18 = vcombine.low %v10399_v21, %v10403_v40  ;;  %v10454_v40 = vld [vmem:[#allocation18 + $0xcd0] sm:$0xff] }
 0x9a9   :  { %13579 = vmatpush1.bf16.msra.mxu0 %v16134_v31  ;;  %v10410_v31 = vld [vmem:[#allocation18 + $0xb70] sm:$0xff] }
 0x9aa   :  { %13743 = vmatpush1.bf16.msra.mxu1 %v16136_v55  ;;  %13580 = vmatprep.subr.bf16.mxu0 %v16143_v58  ;;  %v10407_v55 = vld [vmem:[#allocation18 + $0xb58] sm:$0xff]  ;;  %v16199_v17 = vcombine.high %v10406_v53, %v10410_v31 }
 0x9ab   :  { %13744 = vmatprep.subr.bf16.mxu1 %v16145_v59  ;;  %v10411_v58 = vld [vmem:[#allocation18 + $0xb78] sm:$0xff]  ;;  %v16190_v59 = vcombine.low %v10398_v49, %v10402_v24  ;;  %v16239_v24 = vcombine.high %v10446_v38, %v10450_v37 }
 0x9ac   :  { %v16201_v60 = vcombine.high %v10407_v55, %v10411_v58  ;;  %v16200_v62 = vcombine.low %v10407_v55, %v10411_v58  ;;  %v10462_v55 = vld [vmem:[#allocation18 + $0xd10] sm:$0xff] }
 0x9ad   :  { %13581 = vmatpush1.bf16.msra.mxu0 %v16142_v27  ;;  %v10418_v27 = vld [vmem:[#allocation18 + $0xbb0] sm:$0xff] }
 0x9ae   :  { %13745 = vmatpush1.bf16.msra.mxu1 %v16144_v57  ;;  %13582 = vmatprep.subr.bf16.mxu0 %v16151_v61  ;;  %v10415_v57 = vld [vmem:[#allocation18 + $0xb98] sm:$0xff]  ;;  %v16207_v63 = vcombine.high %v10414_v25, %v10418_v27  ;;  %v10466_v58 = vld [vmem:[#allocation18 + $0xd30] sm:$0xff] }
 0x9af   :  { %13746 = vmatprep.subr.bf16.mxu1 %v16153_v7  ;;  %v10419_v61 = vld [vmem:[#allocation18 + $0xbb8] sm:$0xff]  ;;  %v16198_v7 = vcombine.low %v10406_v53, %v10410_v31 }
 0x9b0   :  { %v16209_v1 = vcombine.high %v10415_v57, %v10419_v61  ;;  %v16208_v56 = vcombine.low %v10415_v57, %v10419_v61  ;;  %v10474_v57 = vld [vmem:[#allocation18 + $0xd70] sm:$0xff]  ;;  %v10471_v61 = vld [vmem:[#allocation18 + $0xd58] sm:$0xff] }
 0x9b1   :  { %13583 = vmatpush1.bf16.msra.mxu0 %v16150_v32  ;;  %v10426_v32 = vld [vmem:[#allocation18 + $0xbf0] sm:$0xff] }
 0x9b2   :  { %13747 = vmatpush1.bf16.msra.mxu1 %v16152_v14  ;;  %13584 = vmatprep.subr.bf16.mxu0 %v16159_v4  ;;  %v10423_v14 = vld [vmem:[#allocation18 + $0xbd8] sm:$0xff]  ;;  %v16215_v10 = vcombine.high %v10422_v45, %v10426_v32 }
 0x9b3   :  { %13748 = vmatprep.subr.bf16.mxu1 %v16161_v8  ;;  %v10427_v4 = vld [vmem:[#allocation18 + $0xbf8] sm:$0xff]  ;;  %v16206_v8 = vcombine.low %v10414_v25, %v10418_v27  ;;  %v10470_v27 = vld [vmem:[#allocation18 + $0xd50] sm:$0xff] }
 0x9b4   :  { %v16217_v0 = vcombine.high %v10423_v14, %v10427_v4  ;;  %v16216_v29 = vcombine.low %v10423_v14, %v10427_v4  ;;  %v10482_v14 = vld [vmem:[#allocation18 + $0xdb0] sm:$0xff]  ;;  %v10479_v4 = vld [vmem:[#allocation18 + $0xd98] sm:$0xff] }
 0x9b5   :  { %13585 = vmatpush1.bf16.msra.mxu0 %v16158_v12  ;;  %v10434_v12 = vld [vmem:[#allocation18 + $0xc30] sm:$0xff] }
 0x9b6   :  { %13749 = vmatpush1.bf16.msra.mxu1 %v16160_v50  ;;  %13586 = vmatprep.subr.bf16.mxu0 %v16167_v16  ;;  %v10431_v50 = vld [vmem:[#allocation18 + $0xc18] sm:$0xff]  ;;  %v16223_v34 = vcombine.high %v10430_v22, %v10434_v12 }
 0x9b7   :  { %13750 = vmatprep.subr.bf16.mxu1 %v16169_v26  ;;  %v10435_v16 = vld [vmem:[#allocation18 + $0xc38] sm:$0xff]  ;;  %v16214_v26 = vcombine.low %v10422_v45, %v10426_v32  ;;  %v10478_v32 = vld [vmem:[#allocation18 + $0xd90] sm:$0xff] }
 0x9b8   :  { %v16225_v23 = vcombine.high %v10431_v50, %v10435_v16  ;;  %v16224_v46 = vcombine.low %v10431_v50, %v10435_v16  ;;  %v10486_v16 = vld [vmem:[#allocation18 + $0xdd0] sm:$0xff] }
 0x9b9   :  { %13587 = vmatpush1.bf16.msra.mxu0 %v16166_v3  ;;  %v10442_v3 = vld [vmem:[#allocation18 + $0xc70] sm:$0xff] }
 0x9ba   :  { %13751 = vmatpush1.bf16.msra.mxu1 %v16168_v33  ;;  %13588 = vmatprep.subr.bf16.mxu0 %v16175_v2  ;;  %v16222_v33 = vcombine.low %v10430_v22, %v10434_v12  ;;  %v10439_v2 = vld [vmem:[#allocation18 + $0xc58] sm:$0xff]  ;;  %v16231_v5 = vcombine.high %v10438_v11, %v10442_v3 }
 0x9bb   :  { %13752 = vmatprep.subr.bf16.mxu1 %v16177_v36  ;;  %v10443_v36 = vld [vmem:[#allocation18 + $0xc78] sm:$0xff] }
 0x9bc   :  { %v16232_v49 = vcombine.low %v10439_v2, %v10443_v36 }
 0x9bd   :  { %13589 = vmatpush1.bf16.msra.mxu0 %v16174_v15  ;;  %v16233_v15 = vcombine.high %v10439_v2, %v10443_v36  ;;  %v16270_v2 = vcombine.low %v10478_v32, %v10482_v14 }
 0x9be   :  { %13753 = vmatpush1.bf16.msra.mxu1 %v16176_v42  ;;  %13590 = vmatprep.subr.bf16.mxu0 %v16183_v43  ;;  %v10447_v42 = vld [vmem:[#allocation18 + $0xc98] sm:$0xff] }
 0x9bf   :  { %13754 = vmatprep.subr.bf16.mxu1 %v16185_v44  ;;  %v10451_v43 = vld [vmem:[#allocation18 + $0xcb8] sm:$0xff]  ;;  %v16230_v44 = vcombine.low %v10438_v11, %v10442_v3 }
 0x9c0   :  { %v16241_v21 = vcombine.high %v10447_v42, %v10451_v43  ;;  %v10491_v11 = vld [vmem:[#allocation18 + $0xdf8] sm:$0xff] }
 0x9c1   :  { %13591 = vmatpush1.bf16.msra.mxu0 %v16182_v13  ;;  %v10458_v13 = vld [vmem:[#allocation18 + $0xcf0] sm:$0xff] }
 0x9c2   :  { %13755 = vmatpush1.bf16.msra.mxu1 %v16184_v47  ;;  %13592 = vmatprep.subr.bf16.mxu0 %v16191_v48  ;;  %v10455_v47 = vld [vmem:[#allocation18 + $0xcd8] sm:$0xff]  ;;  %v16247_v53 = vcombine.high %v10454_v40, %v10458_v13 }
 0x9c3   :  { %13756 = vmatprep.subr.bf16.mxu1 %v16193_v51  ;;  %v10459_v48 = vld [vmem:[#allocation18 + $0xcf8] sm:$0xff]  ;;  %v16238_v51 = vcombine.low %v10446_v38, %v10450_v37 }
 0x9c4   :  { %v16249_v31 = vcombine.high %v10455_v47, %v10459_v48 }
 0x9c5   :  { %13593 = vmatpush1.bf16.msra.mxu0 %v16190_v59  ;;  %v10463_v59 = vld [vmem:[#allocation18 + $0xd18] sm:$0xff] }
 0x9c6   :  { %13757 = vmatpush1.bf16.msra.mxu1 %v16192_v18  ;;  %13594 = vmatprep.subr.bf16.mxu0 %v16199_v17  ;;  %v10467_v18 = vld [vmem:[#allocation18 + $0xd38] sm:$0xff]  ;;  %v16248_v17 = vcombine.low %v10455_v47, %v10459_v48  ;;  %v10506_v47 = vld [vmem:[#allocation18 + $0xe70] sm:$0xff] }
 0x9c7   :  { %13758 = vmatprep.subr.bf16.mxu1 %v16201_v60  ;;  %v16255_v60 = vcombine.high %v10462_v55, %v10466_v58  ;;  %v16257_v25 = vcombine.high %v10463_v59, %v10467_v18  ;;  %v10503_v48 = vld [vmem:[#allocation18 + $0xe58] sm:$0xff] }
 0x9c9   :  { %13595 = vmatpush1.bf16.msra.mxu0 %v16198_v7  ;;  %v10475_v7 = vld [vmem:[#allocation18 + $0xd78] sm:$0xff] }
 0x9ca   :  { %13759 = vmatpush1.bf16.msra.mxu1 %v16200_v62  ;;  %13596 = vmatprep.subr.bf16.mxu0 %v16207_v63  ;;  %v16254_v62 = vcombine.low %v10462_v55, %v10466_v58  ;;  %v16256_v63 = vcombine.low %v10463_v59, %v10467_v18  ;;  %v16265_v45 = vcombine.high %v10471_v61, %v10475_v7  ;;  %v10510_v58 = vld [vmem:[#allocation18 + $0xe90] sm:$0xff]  ;;  %v10511_v18 = vld [vmem:[#allocation18 + $0xe98] sm:$0xff] }
 0x9cb   :  { %13760 = vmatprep.subr.bf16.mxu1 %v16209_v1  ;;  %v16263_v1 = vcombine.high %v10470_v27, %v10474_v57  ;;  %v10514_v59 = vld [vmem:[#allocation18 + $0xeb0] sm:$0xff] }
 0x9cd   :  { %13597 = vmatpush1.bf16.msra.mxu0 %v16206_v8  ;;  %v10483_v8 = vld [vmem:[#allocation18 + $0xdb8] sm:$0xff] }
 0x9ce   :  { %13761 = vmatpush1.bf16.msra.mxu1 %v16208_v56  ;;  %13598 = vmatprep.subr.bf16.mxu0 %v16215_v10  ;;  %v16262_v56 = vcombine.low %v10470_v27, %v10474_v57  ;;  %v16264_v10 = vcombine.low %v10471_v61, %v10475_v7  ;;  %v16273_v50 = vcombine.high %v10479_v4, %v10483_v8  ;;  %v10518_v57 = vld [vmem:[#allocation18 + $0xed0] sm:$0xff]  ;;  %v10519_v7 = vld [vmem:[#allocation18 + $0xed8] sm:$0xff] }
 0x9cf   :  { %13762 = vmatprep.subr.bf16.mxu1 %v16217_v0  ;;  %v16271_v0 = vcombine.high %v10478_v32, %v10482_v14  ;;  %v10522_v61 = vld [vmem:[#allocation18 + $0xef0] sm:$0xff] }
 0x9d0   :  { %v10526_v14 = vld [vmem:[#allocation18 + $0xf10] sm:$0xff] }
 0x9d1   :  { %13599 = vmatpush1.bf16.msra.mxu0 %v16214_v26  ;;  %v10490_v26 = vld [vmem:[#allocation18 + $0xdf0] sm:$0xff] }
 0x9d2   :  { %13763 = vmatpush1.bf16.msra.mxu1 %v16216_v29  ;;  %13609 = vmatprep.subr.bf16.mxu0 %v16223_v34  ;;  %v16279_v38 = vcombine.high %v10486_v16, %v10490_v26 }
 0x9d3   :  { %13773 = vmatprep.subr.bf16.mxu1 %v16225_v23  ;;  %v10487_v23 = vld [vmem:[#allocation18 + $0xdd8] sm:$0xff] }
 0x9d4   :  { %13601 = vmatmul.mubr.bf16.vlgmr.msra.gmra.mrb[32].mxu0 %v18027_v9  ;;  %v16281_v37 = vcombine.high %v10487_v23, %v10491_v11 }
 0x9d5   :  { %13765 = vmatmul.mubr.bf16.vlgmr.msra.gmra.mrb[32].mxu1 %v18027_v9  ;;  %13610 = vmatpush1.bf16.msra.mxu0 %v16222_v33  ;;  %v16240_v9 = vcombine.low %v10447_v42, %v10451_v43  ;;  %v10498_v42 = vld [vmem:[#allocation18 + $0xe30] sm:$0xff]  ;;  %v10495_v43 = vld [vmem:[#allocation18 + $0xe18] sm:$0xff] }
 0x9d6   :  { %13641 = vmatprep.mubr.bf16.mxu0 %v18031_v20  ;;  %13774 = vmatpush1.bf16.msra.mxu1 %v16224_v46 }
 0x9d7   :  { %13805 = vmatprep.mubr.bf16.mxu1 %v18031_v20  ;;  %13611 = vmatprep.subr.bf16.mxu0 %v16231_v5  ;;  %v16246_v20 = vcombine.low %v10454_v40, %v10458_v13  ;;  %v16272_v5 = vcombine.low %v10479_v4, %v10483_v8  ;;  %v10502_v13 = vld [vmem:[#allocation18 + $0xe50] sm:$0xff]  ;;  %v10527_v8 = vld [vmem:[#allocation18 + $0xf18] sm:$0xff] }
 0x9d8   :  { %13775 = vmatprep.subr.bf16.mxu1 %v16233_v15  ;;  %v10494_v15 = vld [vmem:[#allocation18 + $0xe10] sm:$0xff] }
 0x9d9   :  { %13612 = vmatpush1.bf16.msra.mxu0 %v16230_v44  ;;  %v10499_v44 = vld [vmem:[#allocation18 + $0xe38] sm:$0xff]  ;;  %v10530_v4 = vld [vmem:[#allocation18 + $0xf30] sm:$0xff] }
 0x9da   :  { %13776 = vmatpush1.bf16.msra.mxu1 %v16232_v49  ;;  %13613 = vmatprep.subr.bf16.mxu0 %v16239_v24  ;;  %v16278_v49 = vcombine.low %v10486_v16, %v10490_v26  ;;  %v16280_v24 = vcombine.low %v10487_v23, %v10491_v11  ;;  %v16289_v40 = vcombine.high %v10495_v43, %v10499_v44  ;;  %v10534_v26 = vld [vmem:[#allocation18 + $0xf50] sm:$0xff]  ;;  %v10535_v11 = vld [vmem:[#allocation18 + $0xf58] sm:$0xff] }
 0x9db   :  { %13777 = vmatprep.subr.bf16.mxu1 %v16241_v21  ;;  %v16287_v21 = vcombine.high %v10494_v15, %v10498_v42  ;;  %v10538_v23 = vld [vmem:[#allocation18 + $0xf70] sm:$0xff] }
 0x9dd   :  { %13614 = vmatpush1.bf16.msra.mxu0 %v16238_v51  ;;  %v10507_v51 = vld [vmem:[#allocation18 + $0xe78] sm:$0xff] }
 0x9de   :  { %13778 = vmatpush1.bf16.msra.mxu1 %v16240_v9  ;;  %13615 = vmatprep.subr.bf16.mxu0 %v16247_v53  ;;  %v16286_v9 = vcombine.low %v10494_v15, %v10498_v42  ;;  %v16288_v53 = vcombine.low %v10495_v43, %v10499_v44  ;;  %v16297_v55 = vcombine.high %v10503_v48, %v10507_v51  ;;  %v10547_v15 = vld [vmem:[#allocation18 + $0xfb8] sm:$0xff]  ;;  %v18066_v42 = vld [vmem:[#allocation19] sm:$0xff] }
 0x9df   :  { %13779 = vmatprep.subr.bf16.mxu1 %v16249_v31  ;;  %v16295_v31 = vcombine.high %v10502_v13, %v10506_v47  ;;  %v16326_v43 = vcombine.low %v10534_v26, %v10538_v23 }
 0x9e1   :  { %13616 = vmatpush1.bf16.msra.mxu0 %v16246_v20  ;;  %v10515_v20 = vld [vmem:[#allocation18 + $0xeb8] sm:$0xff] }
 0x9e2   :  { %13780 = vmatpush1.bf16.msra.mxu1 %v16248_v17  ;;  %13617 = vmatprep.subr.bf16.mxu0 %v16255_v60  ;;  %v16294_v17 = vcombine.low %v10502_v13, %v10506_v47  ;;  %v16296_v60 = vcombine.low %v10503_v48, %v10507_v51  ;;  %v16305_v27 = vcombine.high %v10511_v18, %v10515_v20  ;;  %v10551_v47 = vld [vmem:[#allocation18 + $0xfd8] sm:$0xff] }
 0x9e3   :  { %13781 = vmatprep.subr.bf16.mxu1 %v16257_v25  ;;  %v16303_v25 = vcombine.high %v10510_v58, %v10514_v59  ;;  %v10565_v13 = vrot.slane %v18066_v42, %v17797_v41  ;;  %v10555_v48 = vld [vmem:[#allocation18 + $0xff8] sm:$0xff]  ;;  %v10573_v51 = vrot.slane %v18066_v42, %v17804_v52  ;;  %v17141_v52 = vld [vmem:[%s18298_s13 + $0x40] sm:$0xff]  }
 0x9e4   :  { %v16344_v41 = vcombine.low %v10551_v47, %v10555_v48 }
 0x9e5   :  { %13618 = vmatpush1.bf16.msra.mxu0 %v16254_v62  ;;  %v10523_v62 = vld [vmem:[#allocation18 + $0xef8] sm:$0xff] }
 0x9e6   :  { %13782 = vmatpush1.bf16.msra.mxu1 %v16256_v63  ;;  %13619 = vmatprep.subr.bf16.mxu0 %v16263_v1  ;;  %v16302_v63 = vcombine.low %v10510_v58, %v10514_v59  ;;  %v16304_v1 = vcombine.low %v10511_v18, %v10515_v20  ;;  %v16313_v32 = vcombine.high %v10519_v7, %v10523_v62  ;;  %v17142_v20 = vld [vmem:[%s18298_s13 + $0xc0] sm:$0xff]  }
 0x9e7   :  { %v18058_v22 = vpop.f32.mrb[28].mxu0  ;;  %v18060_v12 = vpop.f32.mrb[28].mxu1  ;;  %13783 = vmatprep.subr.bf16.mxu1 %v16265_v45  ;;  %v16311_v45 = vcombine.high %v10518_v57, %v10522_v61 }
 0x9e8   :  { %v18062_v29 = vpop.f32.mrb[29].mxu0  ;;  %v18064_v34 = vpop.f32.mrb[29].mxu1 }
 0x9e9   :  { %v13319_v3 = vpop.f32.mrb[30].mxu0  ;;  %v13483_v33 = vpop.f32.mrb[30].mxu1  ;;  %13620 = vmatpush1.bf16.msra.mxu0 %v16262_v56  ;;  %v10531_v56 = vld [vmem:[#allocation18 + $0xf38] sm:$0xff]  ;;  %v16524_v58 = vadd.f32 %v18062_v29, %v10565_v13  ;;  %v16526_v59 = vadd.f32 %v18064_v34, %v10573_v51  ;;  %v17143_v29 = vld [vmem:[%s18298_s13] sm:$0xff]   ;;  %v17177_v13 = vld [vmem:[%s18298_s13 + $0x148] sm:$0xff]  }
 0x9ea   :  { %13784 = vmatpush1.bf16.msra.mxu1 %v16264_v10  ;;  %v13320_v36 = vpop.f32.mrb[31].mxu0  ;;  %v13484_v46 = vpop.f32.mrb[31].mxu1  ;;  %13621 = vmatprep.subr.bf16.mxu0 %v16271_v0  ;;  %v16310_v10 = vcombine.low %v10518_v57, %v10522_v61  ;;  %v16312_v0 = vcombine.low %v10519_v7, %v10523_v62  ;;  %v16321_v16 = vcombine.high %v10527_v8, %v10531_v56  ;;  %v10539_v3 = vld [vmem:[#allocation18 + $0xf78] sm:$0xff]  ;;  %v17144_v34 = vld [vmem:[%s18298_s13 + $0x80] sm:$0xff]   ;;  %v17146_v57 = vld [vmem:[%s18298_s13 + $0xc8] sm:$0xff]  }
 0x9eb   :  { %13785 = vmatprep.subr.bf16.mxu1 %v16273_v50  ;;  %v16319_v50 = vcombine.high %v10526_v14, %v10530_v4  ;;  %v16318_v33 = vcombine.low %v10526_v14, %v10530_v4  ;;  %v16327_v36 = vcombine.high %v10534_v26, %v10538_v23  ;;  %v16329_v46 = vcombine.high %v10535_v11, %v10539_v3  ;;  %v17147_v7 = vld [vmem:[%s18298_s13 + $0x8] sm:$0xff]   ;;  %v17154_v14 = vld [vmem:[%s18298_s13 + $0xd8] sm:$0xff]  }
 0x9ec   :  { %v16328_v44 = vcombine.low %v10535_v11, %v10539_v3  ;;  %v17148_v62 = vld [vmem:[%s18298_s13 + $0x88] sm:$0xff]   ;;  %v17155_v4 = vld [vmem:[%s18298_s13 + $0x18] sm:$0xff]   ;;  %v10561_v11 = vrot.slane %v18066_v42, %v17792_v39  ;;  %v17167_v39 = vld [vmem:[%s18298_s13 + $0x30] sm:$0xff]  }
 0x9ed   :  { %13622 = vmatpush1.bf16.msra.mxu0 %v16270_v2  ;;  %v16320_v2 = vcombine.low %v10527_v8, %v10531_v56  ;;  %v17156_v8 = vld [vmem:[%s18298_s13 + $0x98] sm:$0xff]   ;;  %v17157_v56 = vld [vmem:[%s18298_s13 + $0x60] sm:$0xff]   ;;  %v17162_v26 = vld [vmem:[%s18298_s13 + $0xe8] sm:$0xff]  }
 0x9ee   :  { %13786 = vmatpush1.bf16.msra.mxu1 %v16272_v5  ;;  %13623 = vmatprep.subr.bf16.mxu0 %v16279_v38  ;;  %v10542_v5 = vld [vmem:[#allocation18 + $0xf90] sm:$0xff] }
 0x9ef   :  { %13787 = vmatprep.subr.bf16.mxu1 %v16281_v37  ;;  %v10546_v38 = vld [vmem:[#allocation18 + $0xfb0] sm:$0xff]  ;;  %v10543_v37 = vld [vmem:[#allocation18 + $0xf98] sm:$0xff] }
 0x9f0   :  { %v17163_v23 = vld [vmem:[%s18298_s13 + $0x28] sm:$0xff]  }
 0x9f1   :  { %13624 = vmatpush1.bf16.msra.mxu0 %v16278_v49  ;;  %v16335_v49 = vcombine.high %v10542_v5, %v10546_v38  ;;  %v17164_v3 = vld [vmem:[%s18298_s13 + $0xa8] sm:$0xff]  }
 0x9f2   :  { %13788 = vmatpush1.bf16.msra.mxu1 %v16280_v24  ;;  %13625 = vmatprep.subr.bf16.mxu0 %v16287_v21  ;;  %v16337_v24 = vcombine.high %v10543_v37, %v10547_v15  ;;  %v10550_v21 = vld [vmem:[#allocation18 + $0xfd0] sm:$0xff] }
 0x9f3   :  { %13789 = vmatprep.subr.bf16.mxu1 %v16289_v40  ;;  %v10554_v40 = vld [vmem:[#allocation18 + $0xff0] sm:$0xff] }
 0x9f4   :  { %v16342_v18 = vcombine.low %v10550_v21, %v10554_v40  ;;  %v17179_v51 = vld [vmem:[%s18298_s13 + $0x108] sm:$0xff]  }
 0x9f5   :  { %13626 = vmatpush1.bf16.msra.mxu0 %v16286_v9  ;;  %v16334_v9 = vcombine.low %v10542_v5, %v10546_v38  ;;  %v17168_v5 = vld [vmem:[%s18298_s13 + $0xb0] sm:$0xff]  }
 0x9f6   :  { %13790 = vmatpush1.bf16.msra.mxu1 %v16288_v53  ;;  %13627 = vmatprep.subr.bf16.mxu0 %v16295_v31  ;;  %v16336_v53 = vcombine.low %v10543_v37, %v10547_v15  ;;  %v16343_v31 = vcombine.high %v10550_v21, %v10554_v40  ;;  %v17170_v37 = vld [vmem:[%s18298_s13 + $0xf8] sm:$0xff]   ;;  %v17176_v40 = vld [vmem:[%s18298_s13 + $0x180] sm:$0xff]  }
 0x9f7   :  { %13791 = vmatprep.subr.bf16.mxu1 %v16297_v55  ;;  %v16345_v55 = vcombine.high %v10551_v47, %v10555_v48  ;;  %v17178_v48 = vld [vmem:[%s18298_s13 + $0x1c8] sm:$0xff]  }
 0x9f9   :  { %13628 = vmatpush1.bf16.msra.mxu0 %v16294_v17  ;;  %v13815_v17 = vmax.f32 %v16524_v58, 0.0  ;;  %v17184_v58 = vld [vmem:[%s18298_s13 + $0x190] sm:$0xff]  }
 0x9fa   :  { %13792 = vmatpush1.bf16.msra.mxu1 %v16296_v60  ;;  %13629 = vmatprep.subr.bf16.mxu0 %v16303_v25  ;;  %v13817_v60 = vmax.f32 %v16526_v59, 0.0  ;;  %v17145_v25 = vld [vmem:[%s18298_s13 + $0x48] sm:$0xff]   ;;  %v17185_v59 = vld [vmem:[%s18298_s13 + $0x158] sm:$0xff]  }
 0x9fb   :  { %13793 = vmatprep.subr.bf16.mxu1 %v16305_v27  ;;  %v13823_v27 = vpack.c.bf16 %v13815_v17, %v13815_v17  ;;  %v17190_v17 = vld [vmem:[%s18298_s13 + $0x1e0] sm:$0xff]  }
 0x9fc   :  { %v13825_v61 = vpack.c.bf16 %v13817_v60, %v13817_v60  ;;  %v17191_v60 = vld [vmem:[%s18298_s13 + $0x120] sm:$0xff]  }
 0x9fd   :  { %13630 = vmatpush1.bf16.msra.mxu0 %v16302_v63  ;;  %v17149_v63 = vld [vmem:[%s18298_s13 + $0x50] sm:$0xff]  }
 0x9fe   :  { %13794 = vmatpush1.bf16.msra.mxu1 %v16304_v1  ;;  %13631 = vmatprep.subr.bf16.mxu0 %v16311_v45  ;;  %v17151_v1 = vld [vmem:[%s18298_s13 + $0x10] sm:$0xff]  }
 0x9ff   :  { %13795 = vmatprep.subr.bf16.mxu1 %v16313_v32  ;;  %v17152_v45 = vld [vmem:[%s18298_s13 + $0x90] sm:$0xff]   ;;  %v17153_v32 = vld [vmem:[%s18298_s13 + $0x58] sm:$0xff]  }
 0xa01   :  { %13632 = vmatpush1.bf16.msra.mxu0 %v16310_v10  ;;  %v17158_v10 = vld [vmem:[%s18298_s13 + $0xe0] sm:$0xff]  }
 0xa02   :  { %13796 = vmatpush1.bf16.msra.mxu1 %v16312_v0  ;;  %13633 = vmatprep.subr.bf16.mxu0 %v16319_v50  ;;  %v17159_v0 = vld [vmem:[%s18298_s13 + $0x20] sm:$0xff]  }
 0xa03   :  { %13797 = vmatprep.subr.bf16.mxu1 %v16321_v16  ;;  %v17160_v50 = vld [vmem:[%s18298_s13 + $0xa0] sm:$0xff]   ;;  %v17161_v16 = vld [vmem:[%s18298_s13 + $0x68] sm:$0xff]  }
 0xa05   :  { %13634 = vmatpush1.bf16.msra.mxu0 %v16318_v33  ;;  %v17165_v33 = vld [vmem:[%s18298_s13 + $0x70] sm:$0xff]  }
 0xa06   :  { %13798 = vmatpush1.bf16.msra.mxu1 %v16320_v2  ;;  %13635 = vmatprep.subr.bf16.mxu0 %v16327_v36  ;;  %v10569_v2 = vrot.slane %v18066_v42, %v17811_v54  ;;  %v17166_v36 = vld [vmem:[%s18298_s13 + $0xf0] sm:$0xff]   ;;  %v17169_v54 = vld [vmem:[%s18298_s13 + $0x78] sm:$0xff]  }
 0xa07   :  { %13799 = vmatprep.subr.bf16.mxu1 %v16329_v46  ;;  %v16523_v46 = vadd.f32 %v18058_v22, %v10561_v11  ;;  %v17171_v22 = vld [vmem:[%s18298_s13 + $0x38] sm:$0xff]  }
 0xa08   :  { %v16525_v38 = vadd.f32 %v18060_v12, %v10569_v2  ;;  %v17173_v12 = vld [vmem:[%s18298_s13 + $0x140] sm:$0xff]  }
 0xa09   :  { %13636 = vmatpush1.bf16.msra.mxu0 %v16326_v43  ;;  %v13814_v15 = vmax.f32 %v16523_v46, 0.0  ;;  %v17172_v43 = vld [vmem:[%s18298_s13 + $0xb8] sm:$0xff]  }
 0xa0a   :  { %13800 = vmatpush1.bf16.msra.mxu1 %v16328_v44  ;;  %13637 = vmatprep.subr.bf16.mxu0 %v16335_v49  ;;  %v13816_v44 = vmax.f32 %v16525_v38, 0.0  ;;  %v17174_v49 = vld [vmem:[%s18298_s13 + $0x1c0] sm:$0xff]  }
 0xa0b   :  { %13801 = vmatprep.subr.bf16.mxu1 %v16337_v24  ;;  %v17175_v24 = vld [vmem:[%s18298_s13 + $0x100] sm:$0xff]   ;;  %v13822_v21 = vpack.c.bf16 %v13814_v15, %v13814_v15 }
 0xa0c   :  { %v13824_v47 = vpack.c.bf16 %v13816_v44, %v13816_v44 }
 0xa0d   :  { %13638 = vmatpush1.bf16.msra.mxu0 %v16334_v9  ;;  %v17180_v9 = vld [vmem:[%s18298_s13 + $0x188] sm:$0xff]  }
 0xa0e   :  { %13802 = vmatpush1.bf16.msra.mxu1 %v16336_v53  ;;  %13639 = vmatprep.subr.bf16.mxu0 %v16343_v31  ;;  %v17181_v53 = vld [vmem:[%s18298_s13 + $0x150] sm:$0xff]  }
 0xa0f   :  { %13803 = vmatprep.subr.bf16.mxu1 %v16345_v55  ;;  %v17182_v31 = vld [vmem:[%s18298_s13 + $0x1d0] sm:$0xff]  }
 0xa10   :  { %v17183_v55 = vld [vmem:[%s18298_s13 + $0x110] sm:$0xff]  }
 0xa11   :  { %13640 = vmatpush1.bf16.msra.mxu0 %v16342_v18  ;;  %v17186_v18 = vld [vmem:[%s18298_s13 + $0x1d8] sm:$0xff]  }
 0xa12   :  { %13804 = vmatpush1.bf16.msra.mxu1 %v16344_v41  ;;  %16411 = vmatprep.subr.bf16.mxu0 %v17141_v52  ;;  %v17187_v41 = vld [vmem:[%s18298_s13 + $0x118] sm:$0xff]  }
 0xa13   :  { %16433 = vmatprep.subr.bf16.mxu1 %v17142_v20  ;;  %v17188_v52 = vld [vmem:[%s18298_s13 + $0x198] sm:$0xff]   ;;  %v17189_v20 = vld [vmem:[%s18298_s13 + $0x160] sm:$0xff]  }
 0xa14   :  { %13642 = vmatmul.mubr.bf16.vlgmr.msra.gmra.mrb[32].mxu0 %v18040_v6 }
 0xa15   :  { %13806 = vmatmul.mubr.bf16.vlgmr.msra.gmra.mrb[32].mxu1 %v18040_v6  ;;  %16412 = vmatpush3.bf16.msra.mxu0 %v17143_v29  ;;  %v17150_v6 = vld [vmem:[%s18298_s13 + $0xd0] sm:$0xff]   ;;  %v17192_v29 = vld [vmem:[%s18298_s13 + $0x1a0] sm:$0xff]  }
 0xa16   :  { %14381 = vmatprep.mubr.bf16.mxu0 %v13823_v27  ;;  %16434 = vmatpush3.bf16.msra.mxu1 %v17144_v34  ;;  %v17193_v34 = vld [vmem:[%s18298_s13 + $0x168] sm:$0xff]  }
 0xa17   :  { %14421 = vmatprep.mubr.bf16.mxu1 %v13825_v61  ;;  %16413 = vmatprep.subr.bf16.mxu0 %v17145_v25  ;;  %v17194_v25 = vld [vmem:[%s18298_s13 + $0x1e8] sm:$0xff]   ;;  %v17197_v61 = vld [vmem:[%s18298_s13 + $0x170] sm:$0xff]  }
 0xa18   :  { %16435 = vmatprep.subr.bf16.mxu1 %v17146_v57  ;;  %v17195_v27 = vld [vmem:[%s18298_s13 + $0x128] sm:$0xff]  }
 0xa19   :  { %16414 = vmatpush3.bf16.msra.mxu0 %v17147_v7  ;;  %v17196_v57 = vld [vmem:[%s18298_s13 + $0x1a8] sm:$0xff]   ;;  %v17198_v7 = vld [vmem:[%s18298_s13 + $0x1f0] sm:$0xff]  }
 0xa1a   :  { %16436 = vmatpush3.bf16.msra.mxu1 %v17148_v62  ;;  %16415 = vmatprep.subr.bf16.mxu0 %v17149_v63  ;;  %v17199_v62 = vld [vmem:[%s18298_s13 + $0x130] sm:$0xff]  }
 0xa1b   :  { %16437 = vmatprep.subr.bf16.mxu1 %v17150_v6  ;;  %v17200_v63 = vld [vmem:[%s18298_s13 + $0x1b0] sm:$0xff]   ;;  %v17201_v6 = vld [vmem:[%s18298_s13 + $0x178] sm:$0xff]  }
 0xa1d   :  { %16416 = vmatpush3.bf16.msra.mxu0 %v17151_v1  ;;  %v17202_v1 = vld [vmem:[%s18298_s13 + $0x1f8] sm:$0xff]  }
 0xa1e   :  { %16438 = vmatpush3.bf16.msra.mxu1 %v17152_v45  ;;  %16417 = vmatprep.subr.bf16.mxu0 %v17153_v32  ;;  %v17203_v45 = vld [vmem:[%s18298_s13 + $0x138] sm:$0xff]  }
 0xa1f   :  { %16439 = vmatprep.subr.bf16.mxu1 %v17154_v14  ;;  %v17204_v32 = vld [vmem:[%s18298_s13 + $0x1b8] sm:$0xff]   ;;  %v10577_v14 = vrot.slane %v18066_v42, %v17924_v28 }
 0xa21   :  { %16418 = vmatpush3.bf16.msra.mxu0 %v17155_v4  ;;  %v10585_v4 = vrot.slane %v18066_v42, %v17953_v19 }
 0xa22   :  { %16440 = vmatpush3.bf16.msra.mxu1 %v17156_v8  ;;  %16419 = vmatprep.subr.bf16.mxu0 %v17157_v56  ;;  %v10581_v8 = vrot.slane %v18066_v42, %v17927_v30  ;;  %v10589_v56 = vrot.slane %v18066_v42, %v17930_v35 }
 0xa23   :  { %16441 = vmatprep.subr.bf16.mxu1 %v17158_v10 }
 0xa25   :  { %16420 = vmatpush3.bf16.msra.mxu0 %v17159_v0 }
 0xa26   :  { %16442 = vmatpush3.bf16.msra.mxu1 %v17160_v50  ;;  %16421 = vmatprep.subr.bf16.mxu0 %v17161_v16 }
 0xa27   :  { %16443 = vmatprep.subr.bf16.mxu1 %v17162_v26 }
 0xa29   :  { %16422 = vmatpush3.bf16.msra.mxu0 %v17163_v23 }
 0xa2a   :  { %16444 = vmatpush3.bf16.msra.mxu1 %v17164_v3  ;;  %16423 = vmatprep.subr.bf16.mxu0 %v17165_v33 }
 0xa2b   :  { %16445 = vmatprep.subr.bf16.mxu1 %v17166_v36 }
 0xa2d   :  { %16424 = vmatpush3.bf16.msra.mxu0 %v17167_v39 }
 0xa2e   :  { %16446 = vmatpush3.bf16.msra.mxu1 %v17168_v5  ;;  %16425 = vmatprep.subr.bf16.mxu0 %v17169_v54 }
 0xa2f   :  { %16447 = vmatprep.subr.bf16.mxu1 %v17170_v37 }
 0xa31   :  { %16426 = vmatpush3.bf16.msra.mxu0 %v17171_v22  ;;  %v16346_v22 = vld [vmem:[#allocation21] ss:$0 sm:$0xff] }
 0xa32   :  { %16448 = vmatpush3.bf16.msra.mxu1 %v17172_v43  ;;  %16455 = vmatprep.subr.bf16.mxu0 %v17173_v12 }
 0xa33   :  { %16477 = vmatprep.subr.bf16.mxu1 %v17174_v49 }
 0xa34   :  { %14382 = vmatmul.mubr.bf16.vlgmr.msra.gmra.mrb[36].mxu0 %v13822_v21 }
 0xa35   :  { %14422 = vmatmul.mubr.bf16.vlgmr.msra.gmra.mrb[36].mxu1 %v13824_v47  ;;  %16456 = vmatpush3.bf16.msra.mxu0 %v17175_v24 }
 0xa36   :  { %16478 = vmatpush3.bf16.msra.mxu1 %v17176_v40  ;;  %16457 = vmatprep.subr.bf16.mxu0 %v17177_v13 }
 0xa37   :  { %16479 = vmatprep.subr.bf16.mxu1 %v17178_v48 }
 0xa39   :  { %16458 = vmatpush3.bf16.msra.mxu0 %v17179_v51 }
 0xa3a   :  { %16480 = vmatpush3.bf16.msra.mxu1 %v17180_v9  ;;  %16459 = vmatprep.subr.bf16.mxu0 %v17181_v53 }
 0xa3b   :  { %16481 = vmatprep.subr.bf16.mxu1 %v17182_v31 }
 0xa3d   :  { %16460 = vmatpush3.bf16.msra.mxu0 %v17183_v55 }
 0xa3e   :  { %16482 = vmatpush3.bf16.msra.mxu1 %v17184_v58  ;;  %16461 = vmatprep.subr.bf16.mxu0 %v17185_v59 }
 0xa3f   :  { %16483 = vmatprep.subr.bf16.mxu1 %v17186_v18 }
 0xa41   :  { %16462 = vmatpush3.bf16.msra.mxu0 %v17187_v41 }
 0xa42   :  { %16484 = vmatpush3.bf16.msra.mxu1 %v17188_v52  ;;  %16463 = vmatprep.subr.bf16.mxu0 %v17189_v20 }
 0xa43   :  { %16485 = vmatprep.subr.bf16.mxu1 %v17190_v17 }
 0xa45   :  { %16464 = vmatpush3.bf16.msra.mxu0 %v17191_v60 }
 0xa46   :  { %16486 = vmatpush3.bf16.msra.mxu1 %v17192_v29  ;;  %16465 = vmatprep.subr.bf16.mxu0 %v17193_v34 }
 0xa47   :  { %16487 = vmatprep.subr.bf16.mxu1 %v17194_v25 }
 0xa49   :  { %16466 = vmatpush3.bf16.msra.mxu0 %v17195_v27 }
 0xa4a   :  { %16488 = vmatpush3.bf16.msra.mxu1 %v17196_v57  ;;  %16467 = vmatprep.subr.bf16.mxu0 %v17197_v61 }
 0xa4b   :  { %16489 = vmatprep.subr.bf16.mxu1 %v17198_v7 }
 0xa4d   :  { %16468 = vmatpush3.bf16.msra.mxu0 %v17199_v62 }
 0xa4e   :  { %16490 = vmatpush3.bf16.msra.mxu1 %v17200_v63  ;;  %16469 = vmatprep.subr.bf16.mxu0 %v17201_v6 }
 0xa4f   :  { %16491 = vmatprep.subr.bf16.mxu1 %v17202_v1 }
 0xa51   :  { %16470 = vmatpush3.bf16.msra.mxu0 %v17203_v45 }
 0xa52   :  { %16492 = vmatpush3.bf16.msra.mxu1 %v17204_v32 }
 0xae7   :  { %v13643_v10 = vpop.f32.mrb[32].mxu0 }
 0xae8   :  { %v16527_v0 = vadd.f32 %v13643_v10, %v10577_v14  ;;  %v13807_v50 = vpop.f32.mrb[32].mxu1  ;;  %v13645_v16 = vpop.f32.mrb[33].mxu0 }
 0xae9   :  { %v16529_v26 = vadd.f32 %v13807_v50, %v10585_v4  ;;  %v16528_v23 = vadd.f32 %v13645_v16, %v10581_v8  ;;  %v13809_v11 = vpop.f32.mrb[33].mxu1  ;;  %v13647_v3 = vpop.f32.mrb[34].mxu0 }
 0xaea   :  { %v13818_v33 = vmax.f32 %v16527_v0, 0.0  ;;  %v16530_v2 = vadd.f32 %v13809_v11, %v10589_v56  ;;  %v13811_v28 = vpop.f32.mrb[34].mxu1  ;;  %v13648_v36 = vpop.f32.mrb[35].mxu0 }
 0xaeb   :  { %v13820_v39 = vmax.f32 %v16529_v26, 0.0  ;;  %v13819_v19 = vmax.f32 %v16528_v23, 0.0  ;;  %v13812_v46 = vpop.f32.mrb[35].mxu1 }
 0xaec   :  { %v13821_v5 = vmax.f32 %v16530_v2, 0.0  ;;  %v13826_v54 = vpack.c.bf16 %v13818_v33, %v13818_v33 }
 0xaed   :  { %v13827_v30 = vpack.c.bf16 %v13819_v19, %v13819_v19  ;;  %v13828_v35 = vpack.c.bf16 %v13820_v39, %v13820_v39 }
 0xaee   :  { %v13829_v38 = vpack.c.bf16 %v13821_v5, %v13821_v5 }
 0xaef   :  { %14461 = vmatprep.mubr.bf16.mxu0 %v13827_v30 }
 0xaf0   :  { %14501 = vmatprep.mubr.bf16.mxu1 %v13829_v38  ;;  %14462 = vmatmul.mubr.bf16.vlgmr.msra.gmra.mrb[40].mxu0 %v13826_v54 }
 0xaf1   :  { %14502 = vmatmul.mubr.bf16.vlgmr.msra.gmra.mrb[40].mxu1 %v13828_v35 }
 0xb07   :  { %v16427_v42 = vpop.f32.mrb[36].mxu0 }
 0xb08   :  { %v16449_v37 = vpop.f32.mrb[36].mxu1  ;;  %v16428_v15 = vpop.f32.mrb[37].mxu0 }
 0xb09   :  { %v16429_v43 = vadd.f32 %v16428_v15, %v16427_v42  ;;  %v16450_v12 = vpop.f32.mrb[37].mxu1  ;;  %v16430_v44 = vpop.f32.mrb[38].mxu0 }
 0xb0a   :  { %v16451_v49 = vadd.f32 %v16450_v12, %v16449_v37  ;;  %v16452_v24 = vpop.f32.mrb[38].mxu1  ;;  %v16431_v21 = vpop.f32.mrb[39].mxu0 }
 0xb0b   :  { %v14384_v40 = vadd.f32 %v16429_v43, %v16346_v22  ;;  %v16453_v13 = vpop.f32.mrb[39].mxu1 }
 0xb0d   :  { %v14424_v47 = vadd.f32 %v16451_v49, %v14384_v40 }
 0xbc3   :  { %v16471_v48 = vpop.f32.mrb[40].mxu0 }
 0xbc4   :  { %v16493_v51 = vpop.f32.mrb[40].mxu1  ;;  %v16472_v9 = vpop.f32.mrb[41].mxu0 }
 0xbc5   :  { %v16473_v53 = vadd.f32 %v16472_v9, %v16471_v48  ;;  %v16494_v31 = vpop.f32.mrb[41].mxu1  ;;  %v16474_v55 = vpop.f32.mrb[42].mxu0 }
 0xbc6   :  { %v16495_v58 = vadd.f32 %v16494_v31, %v16493_v51  ;;  %v16496_v59 = vpop.f32.mrb[42].mxu1  ;;  %v16475_v18 = vpop.f32.mrb[43].mxu0 }
 0xbc7   :  { %v14464_v41 = vadd.f32 %v16473_v53, %v14424_v47  ;;  %v16497_v52 = vpop.f32.mrb[43].mxu1 }
 0xbc9   :  { %v14504_v20 = vadd.f32 %v16495_v58, %v14464_v41 }
 0xbcb   :  { %14510 = vst.msk [vmem:[%s18300_s15] sm:$0xf] %vm14509_vm0, %v14504_v20 }
 0xbcc   :  { %14515 = vsyncpa [#allocation3], 1 }
 0xbcd   :  { %14516 = vsyncpa [#allocation5], 1 }
 0xbce   :  { %14517 = vsyncpa [#allocation8], 1 }
 0xbcf   :  { %14518 = vsyncpa [#allocation11], 1 }
 0xbd0   :  { %14519 = vsyncpa [#allocation14], 1 }
 0xbd1   :  { %14520 = vsyncpa [#allocation17], 1 }
 0xbd2   :  { %14521 = vsyncpa [#allocation20], 1 }

</bundles_post_ra>
